<compile_context>
chip_gen: v6e
topology: v6e:2x2x1
jax: 0.10.0
libtpu: 0.0.40
codegen_flags: <defaults>
</compile_context>

<pallas_src>
import functools
import math

import jax
import jax.numpy as jnp
from jax import lax
from jax.experimental import pallas as pl
from jax.experimental.pallas import tpu as pltpu

# ----------------------------- small demo config -----------------------------
BATCH = 2
TENSOR_LENGTH = 3      # T  (history length)
INPUT_SIZE = 4         # S
SCALARS_SIZE = 2
EMB_DIM = 32           # torso channel dim c
N_STEPS = 4            # action tokens per factorisation step
N_LOGITS = 8
N_SAMPLES = 4          # unused on the train path
POLICY_DIM = 32        # policy-head internal dim (2048 in the real model)
VALUE_HIDDEN = 64      # 512 in the real model
N_QUANTILES = 8
N_HEADS = 4
N_ATTENTIVE = 2        # 8 in the real model; reduced for the small demo
N_POLICY_LAYERS = 2
MLP_MULT = 4
LN_EPS = 1e-5
HUBER_DELTA = 1.0

F32 = jnp.float32
BF16 = jnp.bfloat16


# ================================ kernel helpers ================================
def _ln(v, g, b):
    mu = jnp.mean(v, axis=-1, keepdims=True)
    var = jnp.mean(jnp.square(v - mu), axis=-1, keepdims=True)
    return (v - mu) * lax.rsqrt(var + LN_EPS) * g + b


def _mha_ffn(x, y, gx, bx, gy, by, wq, bq, wk, bk, wv, bv, wo, bo,
             g2, b2, w1, b1, w2, b2m, *, n_heads, causal):
    """x <- x + Wo*MHA(LN(x), LN(y)); x <- x + W2*gelu(W1*LN(x)).  All heads batched."""
    xn = _ln(x, gx, bx)
    yn = _ln(y, gy, by)

    q = jnp.dot(xn.astype(BF16), wq, preferred_element_type=F32) + bq
    k = jnp.dot(yn.astype(BF16), wk, preferred_element_type=F32) + bk
    v = jnp.dot(yn.astype(BF16), wv, preferred_element_type=F32) + bv

    lx, d = q.shape
    lk = k.shape[0]
    dh = d // n_heads
    scale = 1.0 / math.sqrt(dh)

    # Head-major stacks (H, L, dh) built from lane slices (no in-kernel transpose).
    qh = jnp.stack([q[:, h * dh:(h + 1) * dh] for h in range(n_heads)], axis=0)
    kh = jnp.stack([k[:, h * dh:(h + 1) * dh] for h in range(n_heads)], axis=0)
    vh = jnp.stack([v[:, h * dh:(h + 1) * dh] for h in range(n_heads)], axis=0)

    # ONE batched score matmul for all heads (f32 scores from bf16 operands).
    s = jnp.einsum("hqd,hkd->hqk", qh.astype(BF16), kh.astype(BF16),
                   preferred_element_type=F32) * scale
    if causal:                                   # mask built once, broadcast over heads
        qi = lax.broadcasted_iota(jnp.int32, (lx, lk), 0)
        ki = lax.broadcasted_iota(jnp.int32, (lx, lk), 1)
        s = jnp.where((ki <= qi)[None, :, :], s, -1e30)

    s = s - jnp.max(s, axis=-1, keepdims=True)
    p = jnp.exp(s)
    p = p * pl.reciprocal(jnp.sum(p, axis=-1, keepdims=True), approx=True)

    # ONE batched attention-weighted value matmul.
    oh = jnp.einsum("hqk,hkd->hqd", p.astype(BF16), vh.astype(BF16),
                    preferred_element_type=F32)                      # (H, lx, dh)
    o = jnp.concatenate([oh[h] for h in range(n_heads)], axis=-1)    # (lx, d)

    # ONE out-projection for all heads.
    attn = jnp.dot(o.astype(BF16), wo, preferred_element_type=F32) + bo
    x = x + attn

    hmlp = _ln(x, g2, b2)
    hmlp = jnp.dot(hmlp.astype(BF16), w1, preferred_element_type=F32) + b1
    hmlp = jax.nn.gelu(hmlp, approximate=True)
    hmlp = jnp.dot(hmlp.astype(BF16), w2, preferred_element_type=F32) + b2m
    return x + hmlp


# ================================ Pallas kernels ================================
def _linear_kernel(x_ref, w_ref, b_ref, o_ref, acc_ref, *, activation, pre_activation):
    """Tiled o = act( pre_act(x) @ w + b ) with K-reduction accumulator."""
    @pl.when(pl.program_id(2) == 0)
    def _():
        acc_ref[...] = jnp.zeros_like(acc_ref)

    x = x_ref[...].astype(F32)
    if pre_activation == "relu":
        x = jnp.maximum(x, 0.0)
    acc_ref[...] += jnp.dot(x.astype(BF16), w_ref[...], preferred_element_type=F32)

    @pl.when(pl.program_id(2) == pl.num_programs(2) - 1)
    def _():
        y = acc_ref[...] + b_ref[...]
        if activation == "relu":
            y = jnp.maximum(y, 0.0)
        elif activation == "gelu":
            y = jax.nn.gelu(y, approximate=True)
        o_ref[...] = y.astype(o_ref.dtype)


def _attn_block_kernel(x_ref, y_ref,
                       gx, bx, gy, by, wq, bq, wk, bk, wv, bv, wo, bo,
                       g2, b2, w1, b1, w2, b2m,
                       o_ref, *, n_heads, causal):
    """Fused attention block; one batch row per grid step."""
    x = x_ref[0].astype(F32)
    y = y_ref[0].astype(F32)
    out = _mha_ffn(x, y, gx[...], bx[...], gy[...], by[...],
                   wq[...], bq[...], wk[...], bk[...], wv[...], bv[...],
                   wo[...], bo[...], g2[...], b2[...],
                   w1[...], b1[...], w2[...], b2m[...],
                   n_heads=n_heads, causal=causal)
    o_ref[0] = out.astype(o_ref.dtype)


def _attentive_kernel(a_ref, b_ref,
                      gx, bx, gy, by, wq, bq, wk, bk, wv, bv, wo, bo,
                      g2, b2, w1, b1, w2, b2m,
                      o1_ref, o2_ref, *, n_heads):
    """Attentive-modes block: concat the two mode rows in VMEM, self-attend, split."""
    s = a_ref.shape[1]
    x = jnp.concatenate([a_ref[0], b_ref[0]], axis=0).astype(F32)     # (2S, c)
    out = _mha_ffn(x, x, gx[...], bx[...], gy[...], by[...],
                   wq[...], bq[...], wk[...], bk[...], wv[...], bv[...],
                   wo[...], bo[...], g2[...], b2[...],
                   w1[...], b1[...], w2[...], b2m[...],
                   n_heads=n_heads, causal=False)
    o1_ref[0] = out[:s].astype(o1_ref.dtype)
    o2_ref[0] = out[s:].astype(o2_ref.dtype)


def _ce_sum_kernel(logits_ref, labels_ref, o_ref):
    """Cross-entropy, reduction='sum'; in-kernel one-hot via iota (int labels in)."""
    lg = logits_ref[...].astype(F32)                        # (M, L)
    lbl = labels_ref[...]                                   # (M, 1) int32
    m = jnp.max(lg, axis=-1, keepdims=True)
    lse = jnp.log(jnp.sum(jnp.exp(lg - m), axis=-1, keepdims=True)) + m
    col = lax.broadcasted_iota(jnp.int32, lg.shape, 1)
    tgt = jnp.sum(jnp.where(col == lbl, lg, 0.0), axis=-1, keepdims=True)
    o_ref[...] = jnp.sum(lse - tgt, axis=0, keepdims=True)


def _value_loss_kernel(z_ref, g_ref, w1, b1, w2, b2, w3, b3, w4, b4, o_ref, *, delta):
    """Fused ValueHead MLP (3x relu + out) + quantile-regression Huber loss."""
    def dense(h, w, b, relu):
        y = jnp.dot(h.astype(BF16), w[...], preferred_element_type=F32) + b[...]
        return jnp.maximum(y, 0.0) if relu else y

    h = z_ref[...].astype(F32)
    h = dense(h, w1, b1, True)
    h = dense(h, w2, b2, True)
    h = dense(h, w3, b3, True)
    q = dense(h, w4, b4, False)                             # (N, nq)

    g = g_ref[...].astype(F32)                              # (N, 1)
    n, nq = q.shape
    tau = (lax.broadcasted_iota(jnp.int32, (n, nq), 1).astype(F32) + 0.5) / nq
    d = g - q
    ad = jnp.abs(d)
    huber = jnp.where(ad <= delta, 0.5 * d * d, delta * (ad - 0.5 * delta))
    w = jnp.abs(tau - (d < 0.0).astype(F32))
    tot = jnp.sum(w * huber, axis=1, keepdims=True)
    o_ref[...] = jnp.sum(tot, axis=0, keepdims=True) / (n * nq)


# =============================== kernel wrappers ===============================
def _pick(dim, pref):
    return pref if dim % pref == 0 else dim


def linear(p, x, activation=None, pre_activation=None):
    """PyTorch nn.Linear equivalent (weights stored (in, out), bf16)."""
    lead = x.shape[:-1]
    x2 = x.reshape(-1, x.shape[-1])
    m, k = x2.shape
    n = p["w"].shape[1]
    tm, tn, tk = _pick(m, 256), _pick(n, 256), _pick(k, 512)
    out = pl.pallas_call(
        functools.partial(_linear_kernel, activation=activation,
                          pre_activation=pre_activation),
        grid=(m // tm, n // tn, k // tk),
        out_shape=jax.ShapeDtypeStruct((m, n), F32),
        in_specs=[pl.BlockSpec((tm, tk), lambda i, j, kk: (i, kk)),
                  pl.BlockSpec((tk, tn), lambda i, j, kk: (kk, j)),
                  pl.BlockSpec((1, tn), lambda i, j, kk: (0, j))],
        out_specs=pl.BlockSpec((tm, tn), lambda i, j, kk: (i, j)),
        scratch_shapes=[pltpu.VMEM((tm, tn), F32)],
        compiler_params=pltpu.CompilerParams(
            dimension_semantics=("parallel", "parallel", "arbitrary")),
    )(x2, p["w"], p["b"])
    return out.reshape(lead + (n,))


def _attn_param_args(p):
    return (p["ln_x"]["g"], p["ln_x"]["b"], p["ln_y"]["g"], p["ln_y"]["b"],
            p["wq"]["w"], p["wq"]["b"], p["wk"]["w"], p["wk"]["b"],
            p["wv"]["w"], p["wv"]["b"], p["wo"]["w"], p["wo"]["b"],
            p["ln_mlp"]["g"], p["ln_mlp"]["b"],
            p["w1"]["w"], p["w1"]["b"], p["w2"]["w"], p["w2"]["b"])


def _attn_param_specs(dx, dy):
    dm = dx * MLP_MULT

    def fixed(shape):
        return pl.BlockSpec(shape, lambda *_: (0,) * len(shape))

    return [fixed((1, dx)), fixed((1, dx)),          # ln_x
            fixed((1, dy)), fixed((1, dy)),          # ln_y
            fixed((dx, dx)), fixed((1, dx)),         # wq, bq
            fixed((dy, dx)), fixed((1, dx)),         # wk, bk
            fixed((dy, dx)), fixed((1, dx)),         # wv, bv
            fixed((dx, dx)), fixed((1, dx)),         # wo, bo
            fixed((1, dx)), fixed((1, dx)),          # ln_mlp
            fixed((dx, dm)), fixed((1, dm)),         # w1, b1
            fixed((dm, dx)), fixed((1, dx))]         # w2, b2


def attention_block(p, x, y, *, causal):
    """x:(B,Lx,Dx), y:(B,Ly,Dy) -> (B,Lx,Dx); batch grid ('parallel' for megacore)."""
    b_sz, lx, dx = x.shape
    ly, dy = y.shape[1], y.shape[2]
    in_specs = [pl.BlockSpec((1, lx, dx), lambda b: (b, 0, 0)),
                pl.BlockSpec((1, ly, dy), lambda b: (b, 0, 0))] + _attn_param_specs(dx, dy)
    return pl.pallas_call(
        functools.partial(_attn_block_kernel, n_heads=N_HEADS, causal=causal),
        grid=(b_sz,),
        out_shape=jax.ShapeDtypeStruct((b_sz, lx, dx), F32),
        in_specs=in_specs,
        out_specs=pl.BlockSpec((1, lx, dx), lambda b: (b, 0, 0)),
        compiler_params=pltpu.CompilerParams(dimension_semantics=("parallel",)),
    )(x, y, *_attn_param_args(p))


def attentive_block(p, a, b):
    """a, b: (M, S, c) -> two (M, S, c); in-kernel concat along the sequence."""
    m, s, c = a.shape
    in_specs = [pl.BlockSpec((1, s, c), lambda i: (i, 0, 0)),
                pl.BlockSpec((1, s, c), lambda i: (i, 0, 0))] + _attn_param_specs(c, c)
    out_specs = [pl.BlockSpec((1, s, c), lambda i: (i, 0, 0)),
                 pl.BlockSpec((1, s, c), lambda i: (i, 0, 0))]
    return pl.pallas_call(
        functools.partial(_attentive_kernel, n_heads=N_HEADS),
        grid=(m,),
        out_shape=(jax.ShapeDtypeStruct((m, s, c), F32),
                   jax.ShapeDtypeStruct((m, s, c), F32)),
        in_specs=in_specs,
        out_specs=out_specs,
        compiler_params=pltpu.CompilerParams(dimension_semantics=("parallel",)),
    )(a, b, *_attn_param_args(p))


def cross_entropy_sum(logits, labels):
    m = logits.shape[0] * logits.shape[1]
    logits2 = logits.reshape(m, N_LOGITS).astype(F32)
    lbl = labels.reshape(m, 1).astype(jnp.int32)
    out = pl.pallas_call(
        _ce_sum_kernel,
        out_shape=jax.ShapeDtypeStruct((1, 1), F32),
    )(logits2, lbl)
    return out[0, 0]


def value_head_quantile_loss(p, z1, g_value):
    n = z1.shape[0]
    g = g_value.reshape(n, 1).astype(F32)
    out = pl.pallas_call(
        functools.partial(_value_loss_kernel, delta=HUBER_DELTA),
        out_shape=jax.ShapeDtypeStruct((1, 1), F32),
    )(z1.astype(F32), g,
      p[0]["w"], p[0]["b"], p[1]["w"], p[1]["b"],
      p[2]["w"], p[2]["b"], p[3]["w"], p[3]["b"])
    return out[0, 0]


# ================================ model pieces =================================
def attentive_modes(p_list, x1, x2, x3):
    g = [x1, x2, x3]
    n, s, c = x1.shape[0], x1.shape[1], x1.shape[3]
    for idx, (m1, m2) in enumerate([(0, 1), (2, 0), (1, 2)]):
        a = g[m1].reshape(n * s, s, c)
        b = jnp.swapaxes(g[m2], 1, 2).reshape(n * s, s, c)
        o1, o2 = attentive_block(p_list[idx], a, b)
        g[m1] = o1.reshape(n, s, s, c)
        g[m2] = jnp.swapaxes(o2.reshape(n, s, s, c), 1, 2)
    return g


def torso_forward(p, x, s):
    n, t, sz = x.shape[0], x.shape[1], x.shape[2]
    x1 = jnp.transpose(x, (0, 2, 3, 4, 1)).reshape(n, sz, sz, sz * t)
    x2 = jnp.transpose(x, (0, 4, 2, 3, 1)).reshape(n, sz, sz, sz * t)
    x3 = jnp.transpose(x, (0, 3, 4, 2, 1)).reshape(n, sz, sz, sz * t)
    grids = [x1, x2, x3]
    for i in range(3):
        sc = linear(p["scalar"][i], s).reshape(n, sz, sz, 1)
        g = jnp.concatenate([grids[i], sc], axis=-1)
        g = linear(p["lin1"][i], g)
        g = linear(p["lin2"][i], g)
        grids[i] = g
    x1, x2, x3 = grids
    for layer_p in p["attentive"]:
        x1, x2, x3 = attentive_modes(layer_p, x1, x2, x3)
    e = jnp.stack([x1, x2, x3], axis=1).reshape(n, 3 * sz * sz, EMB_DIM)
    return e


def policy_head_train(p, e, g_action):
    onehot = jax.nn.one_hot(g_action, N_LOGITS, dtype=F32)                   # (N,T,L)
    shifted = jnp.concatenate([jnp.zeros_like(onehot[:, :1]), onehot[:, :-1]], axis=1)
    tok = linear(p["emb"], shifted)                                          # (N,T,P)
    xcur = tok + p["pos"][None]
    for lp in p["layers"]:
        xcur = attention_block(lp["self"], xcur, xcur, causal=True)
        xcur = attention_block(lp["cross"], xcur, e, causal=False)
    o = linear(p["out"], xcur, pre_activation="relu")                        # (N,T,L)
    z1 = xcur[:, 0]                                                          # (N,P)
    return o, z1


@jax.jit
def alpha_tensor_train_forward(params, x, s, g_action, g_value):
    e = torso_forward(params["torso"], x, s)
    o, z1 = policy_head_train(params["policy"], e, g_action)
    l_policy = cross_entropy_sum(o, g_action)
    l_value = value_head_quantile_loss(params["value"], z1, g_value.astype(F32))
    return l_policy, l_value


# ============================== parameter init =================================
def _dense_init(key, din, dout):
    w = (jax.random.normal(key, (din, dout), F32) / math.sqrt(din)).astype(BF16)
    return {"w": w, "b": jnp.zeros((1, dout), F32)}


def _ln_init(d):
    return {"g": jnp.ones((1, d), F32), "b": jnp.zeros((1, d), F32)}


def _attn_block_init(key, dx, dy):
    ks = jax.random.split(key, 6)
    return {
        "ln_x": _ln_init(dx), "ln_y": _ln_init(dy),
        "wq": _dense_init(ks[0], dx, dx),
        "wk": _dense_init(ks[1], dy, dx),
        "wv": _dense_init(ks[2], dy, dx),
        "wo": _dense_init(ks[3], dx, dx),
        "ln_mlp": _ln_init(dx),
        "w1": _dense_init(ks[4], dx, dx * MLP_MULT),
        "w2": _dense_init(ks[5], dx * MLP_MULT, dx),
    }


def init_params(key):
    keys = iter(jax.random.split(key, 128))
    nk = lambda: next(keys)
    s, t = INPUT_SIZE, TENSOR_LENGTH
    torso = {
        "scalar": [_dense_init(nk(), SCALARS_SIZE, s * s) for _ in range(3)],
        "lin1": [_dense_init(nk(), s * t + 1, EMB_DIM) for _ in range(3)],
        "lin2": [_dense_init(nk(), EMB_DIM, EMB_DIM) for _ in range(3)],
        "attentive": [[_attn_block_init(nk(), EMB_DIM, EMB_DIM) for _ in range(3)]
                      for _ in range(N_ATTENTIVE)],
    }
    policy = {
        "emb": _dense_init(nk(), N_LOGITS, POLICY_DIM),
        "pos": jax.random.normal(nk(), (N_STEPS, POLICY_DIM), F32) * 0.02,
        "layers": [{"self": _attn_block_init(nk(), POLICY_DIM, POLICY_DIM),
                    "cross": _attn_block_init(nk(), POLICY_DIM, EMB_DIM)}
                   for _ in range(N_POLICY_LAYERS)],
        "out": _dense_init(nk(), POLICY_DIM, N_LOGITS),
    }
    value = [_dense_init(nk(), POLICY_DIM, VALUE_HIDDEN),
             _dense_init(nk(), VALUE_HIDDEN, VALUE_HIDDEN),
             _dense_init(nk(), VALUE_HIDDEN, VALUE_HIDDEN),
             _dense_init(nk(), VALUE_HIDDEN, N_QUANTILES)]
    return {"torso": torso, "policy": policy, "value": value}


# ==================================== main =====================================
if __name__ == "__main__":
    root = jax.random.PRNGKey(0)
    kp, kx, ks, ka, kv = jax.random.split(root, 5)
    params = init_params(kp)

    x = jax.random.normal(
        kx, (BATCH, TENSOR_LENGTH, INPUT_SIZE, INPUT_SIZE, INPUT_SIZE), F32)
    s = jax.random.normal(ks, (BATCH, SCALARS_SIZE), F32)
    g_action = jax.random.randint(ka, (BATCH, N_STEPS), 0, N_LOGITS, dtype=jnp.int32)
    g_value = jax.random.normal(kv, (BATCH,), F32)

    l_policy, l_value = alpha_tensor_train_forward(params, x, s, g_action, g_value)
    jax.block_until_ready((l_policy, l_value))
    assert bool(jnp.isfinite(l_policy)) and bool(jnp.isfinite(l_value))
    print("KERNEL_OK")
</pallas_src>

<mosaic_0001>
module attributes {stable_mosaic.version = 11 : i64} {
  func.func @_linear_kernel(%arg0: i32, %arg1: i32, %arg2: i32, %arg3: memref<2x2xf32, #tpu.memory_space<vmem>>, %arg4: memref<2x16xbf16, #tpu.memory_space<vmem>>, %arg5: memref<1x16xf32, #tpu.memory_space<vmem>>, %arg6: memref<2x16xf32, #tpu.memory_space<vmem>>, %arg7: memref<2x16xf32, #tpu.memory_space<vmem>>) attributes {dimension_semantics = [#tpu.dimension_semantics<parallel>, #tpu.dimension_semantics<parallel>, #tpu.dimension_semantics<arbitrary>], iteration_bounds = array<i64: 1, 1, 1>, scalar_prefetch = 0 : i64, scratch_operands = 1 : i64, tpu.core_type = #tpu.core_type<tc>, window_params = [{transform_indices = @transform_0, window_bounds = array<i64: 2, 2>}, {transform_indices = @transform_1, window_bounds = array<i64: 2, 16>}, {transform_indices = @transform_2, window_bounds = array<i64: 1, 16>}, {transform_indices = @transform_3, window_bounds = array<i64: 2, 16>}]} {
    %c0_i32 = arith.constant 0 : i32
    %0 = arith.cmpi eq, %arg2, %c0_i32 : i32
    %1 = arith.extui %0 : i1 to i32
    %c0_i32_0 = arith.constant 0 : i32
    %2 = arith.cmpi ne, %1, %c0_i32_0 : i32
    scf.if %2 {
      %cst_10 = arith.constant 0.000000e+00 : f32
      %13 = vector.broadcast %cst_10 : f32 to vector<2x16xf32>
      %c0_11 = arith.constant 0 : index
      %c0_12 = arith.constant 0 : index
      %14 = vector.load %arg7[%c0_11, %c0_12] : memref<2x16xf32, #tpu.memory_space<vmem>>, vector<2x16xf32>
      tpu.vector_store %arg7[%c0_11, %c0_12], %13 {strides = array<i32>} : memref<2x16xf32, #tpu.memory_space<vmem>>, vector<2x16xf32>,
    } else {
    }
    %c0 = arith.constant 0 : index
    %c0_1 = arith.constant 0 : index
    %3 = vector.load %arg3[%c0, %c0_1] : memref<2x2xf32, #tpu.memory_space<vmem>>, vector<2x2xf32>
    %c0_2 = arith.constant 0 : index
    %c0_3 = arith.constant 0 : index
    %4 = vector.load %arg7[%c0_2, %c0_3] : memref<2x16xf32, #tpu.memory_space<vmem>>, vector<2x16xf32>
    %5 = arith.truncf %3 : vector<2x2xf32> to vector<2x2xbf16>
    %c0_4 = arith.constant 0 : index
    %c0_5 = arith.constant 0 : index
    %6 = vector.load %arg4[%c0_4, %c0_5] : memref<2x16xbf16, #tpu.memory_space<vmem>>, vector<2x16xbf16>
    %cst = arith.constant dense<0.000000e+00> : vector<2x16xf32>
    %7 = tpu.matmul %5, %6, %cst {dimension_numbers = #tpu.dot_dimension_numbers<[1], [0], [0], [1], [0, 0, 1, 1], [], []>} : vector<2x2xbf16>, vector<2x16xbf16>, vector<2x16xf32> -> vector<2x16xf32>
    %8 = arith.addf %4, %7 : vector<2x16xf32>
    %c0_6 = arith.constant 0 : index
    %c0_7 = arith.constant 0 : index
    %9 = vector.load %arg7[%c0_6, %c0_7] : memref<2x16xf32, #tpu.memory_space<vmem>>, vector<2x16xf32>
    tpu.vector_store %arg7[%c0_6, %c0_7], %8 {strides = array<i32>} : memref<2x16xf32, #tpu.memory_space<vmem>>, vector<2x16xf32>,
    %c0_i32_8 = arith.constant 0 : i32
    %10 = arith.cmpi eq, %arg2, %c0_i32_8 : i32
    %11 = arith.extui %10 : i1 to i32
    %c0_i32_9 = arith.constant 0 : i32
    %12 = arith.cmpi ne, %11, %c0_i32_9 : i32
    scf.if %12 {
      %c0_10 = arith.constant 0 : index
      %c0_11 = arith.constant 0 : index
      %13 = vector.load %arg7[%c0_10, %c0_11] : memref<2x16xf32, #tpu.memory_space<vmem>>, vector<2x16xf32>
      %c0_12 = arith.constant 0 : index
      %c0_13 = arith.constant 0 : index
      %14 = vector.load %arg5[%c0_12, %c0_13] : memref<1x16xf32, #tpu.memory_space<vmem>>, vector<1x16xf32>
      %15 = vector.broadcast %14 : vector<1x16xf32> to vector<2x16xf32>
      %16 = arith.addf %13, %15 : vector<2x16xf32>
      %c0_14 = arith.constant 0 : index
      %c0_15 = arith.constant 0 : index
      %17 = vector.load %arg6[%c0_14, %c0_15] : memref<2x16xf32, #tpu.memory_space<vmem>>, vector<2x16xf32>
      tpu.vector_store %arg6[%c0_14, %c0_15], %16 {strides = array<i32>} : memref<2x16xf32, #tpu.memory_space<vmem>>, vector<2x16xf32>,
    } else {
    }
    return
  }
  func.func @transform_0(%arg0: i32, %arg1: i32, %arg2: i32) -> (i32, i32) {
    %c0_i32 = arith.constant 0 : i32
    return %arg0, %arg2 : i32, i32
  }
  func.func @transform_1(%arg0: i32, %arg1: i32, %arg2: i32) -> (i32, i32) {
    %c0_i32 = arith.constant 0 : i32
    return %arg2, %arg1 : i32, i32
  }
  func.func @transform_2(%arg0: i32, %arg1: i32, %arg2: i32) -> (i32, i32) {
    %c0_i32 = arith.constant 0 : i32
    %c0_i32_0 = arith.constant 0 : i32
    return %c0_i32, %arg1 : i32, i32
  }
  func.func @transform_3(%arg0: i32, %arg1: i32, %arg2: i32) -> (i32, i32) {
    %c0_i32 = arith.constant 0 : i32
    return %arg0, %arg1 : i32, i32
  }
}

module attributes {stable_mosaic.version = 11 : i64} {
  func.func @_linear_kernel(%arg0: i32, %arg1: i32, %arg2: i32, %arg3: memref<32x13xf32, #tpu.memory_space<vmem>>, %arg4: memref<13x32xbf16, #tpu.memory_space<vmem>>, %arg5: memref<1x32xf32, #tpu.memory_space<vmem>>, %arg6: memref<32x32xf32, #tpu.memory_space<vmem>>, %arg7: memref<32x32xf32, #tpu.memory_space<vmem>>) attributes {dimension_semantics = [#tpu.dimension_semantics<parallel>, #tpu.dimension_semantics<parallel>, #tpu.dimension_semantics<arbitrary>], iteration_bounds = array<i64: 1, 1, 1>, scalar_prefetch = 0 : i64, scratch_operands = 1 : i64, tpu.core_type = #tpu.core_type<tc>, window_params = [{transform_indices = @transform_0, window_bounds = array<i64: 32, 13>}, {transform_indices = @transform_1, window_bounds = array<i64: 13, 32>}, {transform_indices = @transform_2, window_bounds = array<i64: 1, 32>}, {transform_indices = @transform_3, window_bounds = array<i64: 32, 32>}]} {
    %c0_i32 = arith.constant 0 : i32
    %0 = arith.cmpi eq, %arg2, %c0_i32 : i32
    %1 = arith.extui %0 : i1 to i32
    %c0_i32_0 = arith.constant 0 : i32
    %2 = arith.cmpi ne, %1, %c0_i32_0 : i32
    scf.if %2 {
      %cst_10 = arith.constant 0.000000e+00 : f32
      %13 = vector.broadcast %cst_10 : f32 to vector<32x32xf32>
      %c0_11 = arith.constant 0 : index
      %c0_12 = arith.constant 0 : index
      %14 = vector.load %arg7[%c0_11, %c0_12] : memref<32x32xf32, #tpu.memory_space<vmem>>, vector<32x32xf32>
      tpu.vector_store %arg7[%c0_11, %c0_12], %13 {strides = array<i32>} : memref<32x32xf32, #tpu.memory_space<vmem>>, vector<32x32xf32>,
    } else {
    }
    %c0 = arith.constant 0 : index
    %c0_1 = arith.constant 0 : index
    %3 = vector.load %arg3[%c0, %c0_1] : memref<32x13xf32, #tpu.memory_space<vmem>>, vector<32x13xf32>
    %c0_2 = arith.constant 0 : index
    %c0_3 = arith.constant 0 : index
    %4 = vector.load %arg7[%c0_2, %c0_3] : memref<32x32xf32, #tpu.memory_space<vmem>>, vector<32x32xf32>
    %5 = arith.truncf %3 : vector<32x13xf32> to vector<32x13xbf16>
    %c0_4 = arith.constant 0 : index
    %c0_5 = arith.constant 0 : index
    %6 = vector.load %arg4[%c0_4, %c0_5] : memref<13x32xbf16, #tpu.memory_space<vmem>>, vector<13x32xbf16>
    %cst = arith.constant dense<0.000000e+00> : vector<32x32xf32>
    %7 = tpu.matmul %5, %6, %cst {dimension_numbers = #tpu.dot_dimension_numbers<[1], [0], [0], [1], [0, 0, 1, 1], [], []>} : vector<32x13xbf16>, vector<13x32xbf16>, vector<32x32xf32> -> vector<32x32xf32>
    %8 = arith.addf %4, %7 : vector<32x32xf32>
    %c0_6 = arith.constant 0 : index
    %c0_7 = arith.constant 0 : index
    %9 = vector.load %arg7[%c0_6, %c0_7] : memref<32x32xf32, #tpu.memory_space<vmem>>, vector<32x32xf32>
    tpu.vector_store %arg7[%c0_6, %c0_7], %8 {strides = array<i32>} : memref<32x32xf32, #tpu.memory_space<vmem>>, vector<32x32xf32>,
    %c0_i32_8 = arith.constant 0 : i32
    %10 = arith.cmpi eq, %arg2, %c0_i32_8 : i32
    %11 = arith.extui %10 : i1 to i32
    %c0_i32_9 = arith.constant 0 : i32
    %12 = arith.cmpi ne, %11, %c0_i32_9 : i32
    scf.if %12 {
      %c0_10 = arith.constant 0 : index
      %c0_11 = arith.constant 0 : index
      %13 = vector.load %arg7[%c0_10, %c0_11] : memref<32x32xf32, #tpu.memory_space<vmem>>, vector<32x32xf32>
      %c0_12 = arith.constant 0 : index
      %c0_13 = arith.constant 0 : index
      %14 = vector.load %arg5[%c0_12, %c0_13] : memref<1x32xf32, #tpu.memory_space<vmem>>, vector<1x32xf32>
      %15 = vector.broadcast %14 : vector<1x32xf32> to vector<32x32xf32>
      %16 = arith.addf %13, %15 : vector<32x32xf32>
      %c0_14 = arith.constant 0 : index
      %c0_15 = arith.constant 0 : index
      %17 = vector.load %arg6[%c0_14, %c0_15] : memref<32x32xf32, #tpu.memory_space<vmem>>, vector<32x32xf32>
      tpu.vector_store %arg6[%c0_14, %c0_15], %16 {strides = array<i32>} : memref<32x32xf32, #tpu.memory_space<vmem>>, vector<32x32xf32>,
    } else {
    }
    return
  }
  func.func @transform_0(%arg0: i32, %arg1: i32, %arg2: i32) -> (i32, i32) {
    %c0_i32 = arith.constant 0 : i32
    return %arg0, %arg2 : i32, i32
  }
  func.func @transform_1(%arg0: i32, %arg1: i32, %arg2: i32) -> (i32, i32) {
    %c0_i32 = arith.constant 0 : i32
    return %arg2, %arg1 : i32, i32
  }
  func.func @transform_2(%arg0: i32, %arg1: i32, %arg2: i32) -> (i32, i32) {
    %c0_i32 = arith.constant 0 : i32
    %c0_i32_0 = arith.constant 0 : i32
    return %c0_i32, %arg1 : i32, i32
  }
  func.func @transform_3(%arg0: i32, %arg1: i32, %arg2: i32) -> (i32, i32) {
    %c0_i32 = arith.constant 0 : i32
    return %arg0, %arg1 : i32, i32
  }
}

module attributes {stable_mosaic.version = 11 : i64} {
  func.func @_linear_kernel(%arg0: i32, %arg1: i32, %arg2: i32, %arg3: memref<32x32xf32, #tpu.memory_space<vmem>>, %arg4: memref<32x32xbf16, #tpu.memory_space<vmem>>, %arg5: memref<1x32xf32, #tpu.memory_space<vmem>>, %arg6: memref<32x32xf32, #tpu.memory_space<vmem>>, %arg7: memref<32x32xf32, #tpu.memory_space<vmem>>) attributes {dimension_semantics = [#tpu.dimension_semantics<parallel>, #tpu.dimension_semantics<parallel>, #tpu.dimension_semantics<arbitrary>], iteration_bounds = array<i64: 1, 1, 1>, scalar_prefetch = 0 : i64, scratch_operands = 1 : i64, tpu.core_type = #tpu.core_type<tc>, window_params = [{transform_indices = @transform_0, window_bounds = array<i64: 32, 32>}, {transform_indices = @transform_1, window_bounds = array<i64: 32, 32>}, {transform_indices = @transform_2, window_bounds = array<i64: 1, 32>}, {transform_indices = @transform_3, window_bounds = array<i64: 32, 32>}]} {
    %c0_i32 = arith.constant 0 : i32
    %0 = arith.cmpi eq, %arg2, %c0_i32 : i32
    %1 = arith.extui %0 : i1 to i32
    %c0_i32_0 = arith.constant 0 : i32
    %2 = arith.cmpi ne, %1, %c0_i32_0 : i32
    scf.if %2 {
      %cst_10 = arith.constant 0.000000e+00 : f32
      %13 = vector.broadcast %cst_10 : f32 to vector<32x32xf32>
      %c0_11 = arith.constant 0 : index
      %c0_12 = arith.constant 0 : index
      %14 = vector.load %arg7[%c0_11, %c0_12] : memref<32x32xf32, #tpu.memory_space<vmem>>, vector<32x32xf32>
      tpu.vector_store %arg7[%c0_11, %c0_12], %13 {strides = array<i32>} : memref<32x32xf32, #tpu.memory_space<vmem>>, vector<32x32xf32>,
    } else {
    }
    %c0 = arith.constant 0 : index
    %c0_1 = arith.constant 0 : index
    %3 = vector.load %arg3[%c0, %c0_1] : memref<32x32xf32, #tpu.memory_space<vmem>>, vector<32x32xf32>
    %c0_2 = arith.constant 0 : index
    %c0_3 = arith.constant 0 : index
    %4 = vector.load %arg7[%c0_2, %c0_3] : memref<32x32xf32, #tpu.memory_space<vmem>>, vector<32x32xf32>
    %5 = arith.truncf %3 : vector<32x32xf32> to vector<32x32xbf16>
    %c0_4 = arith.constant 0 : index
    %c0_5 = arith.constant 0 : index
    %6 = vector.load %arg4[%c0_4, %c0_5] : memref<32x32xbf16, #tpu.memory_space<vmem>>, vector<32x32xbf16>
    %cst = arith.constant dense<0.000000e+00> : vector<32x32xf32>
    %7 = tpu.matmul %5, %6, %cst {dimension_numbers = #tpu.dot_dimension_numbers<[1], [0], [0], [1], [0, 0, 1, 1], [], []>} : vector<32x32xbf16>, vector<32x32xbf16>, vector<32x32xf32> -> vector<32x32xf32>
    %8 = arith.addf %4, %7 : vector<32x32xf32>
    %c0_6 = arith.constant 0 : index
    %c0_7 = arith.constant 0 : index
    %9 = vector.load %arg7[%c0_6, %c0_7] : memref<32x32xf32, #tpu.memory_space<vmem>>, vector<32x32xf32>
    tpu.vector_store %arg7[%c0_6, %c0_7], %8 {strides = array<i32>} : memref<32x32xf32, #tpu.memory_space<vmem>>, vector<32x32xf32>,
    %c0_i32_8 = arith.constant 0 : i32
    %10 = arith.cmpi eq, %arg2, %c0_i32_8 : i32
    %11 = arith.extui %10 : i1 to i32
    %c0_i32_9 = arith.constant 0 : i32
    %12 = arith.cmpi ne, %11, %c0_i32_9 : i32
    scf.if %12 {
      %c0_10 = arith.constant 0 : index
      %c0_11 = arith.constant 0 : index
      %13 = vector.load %arg7[%c0_10, %c0_11] : memref<32x32xf32, #tpu.memory_space<vmem>>, vector<32x32xf32>
      %c0_12 = arith.constant 0 : index
      %c0_13 = arith.constant 0 : index
      %14 = vector.load %arg5[%c0_12, %c0_13] : memref<1x32xf32, #tpu.memory_space<vmem>>, vector<1x32xf32>
      %15 = vector.broadcast %14 : vector<1x32xf32> to vector<32x32xf32>
      %16 = arith.addf %13, %15 : vector<32x32xf32>
      %c0_14 = arith.constant 0 : index
      %c0_15 = arith.constant 0 : index
      %17 = vector.load %arg6[%c0_14, %c0_15] : memref<32x32xf32, #tpu.memory_space<vmem>>, vector<32x32xf32>
      tpu.vector_store %arg6[%c0_14, %c0_15], %16 {strides = array<i32>} : memref<32x32xf32, #tpu.memory_space<vmem>>, vector<32x32xf32>,
    } else {
    }
    return
  }
  func.func @transform_0(%arg0: i32, %arg1: i32, %arg2: i32) -> (i32, i32) {
    %c0_i32 = arith.constant 0 : i32
    return %arg0, %arg2 : i32, i32
  }
  func.func @transform_1(%arg0: i32, %arg1: i32, %arg2: i32) -> (i32, i32) {
    %c0_i32 = arith.constant 0 : i32
    return %arg2, %arg1 : i32, i32
  }
  func.func @transform_2(%arg0: i32, %arg1: i32, %arg2: i32) -> (i32, i32) {
    %c0_i32 = arith.constant 0 : i32
    %c0_i32_0 = arith.constant 0 : i32
    return %c0_i32, %arg1 : i32, i32
  }
  func.func @transform_3(%arg0: i32, %arg1: i32, %arg2: i32) -> (i32, i32) {
    %c0_i32 = arith.constant 0 : i32
    return %arg0, %arg1 : i32, i32
  }
}

module attributes {stable_mosaic.version = 11 : i64} {
  func.func @_attentive_kernel(%arg0: i32, %arg1: memref<1x4x32xf32, #tpu.memory_space<vmem>>, %arg2: memref<1x4x32xf32, #tpu.memory_space<vmem>>, %arg3: memref<1x32xf32, #tpu.memory_space<vmem>>, %arg4: memref<1x32xf32, #tpu.memory_space<vmem>>, %arg5: memref<1x32xf32, #tpu.memory_space<vmem>>, %arg6: memref<1x32xf32, #tpu.memory_space<vmem>>, %arg7: memref<32x32xbf16, #tpu.memory_space<vmem>>, %arg8: memref<1x32xf32, #tpu.memory_space<vmem>>, %arg9: memref<32x32xbf16, #tpu.memory_space<vmem>>, %arg10: memref<1x32xf32, #tpu.memory_space<vmem>>, %arg11: memref<32x32xbf16, #tpu.memory_space<vmem>>, %arg12: memref<1x32xf32, #tpu.memory_space<vmem>>, %arg13: memref<32x32xbf16, #tpu.memory_space<vmem>>, %arg14: memref<1x32xf32, #tpu.memory_space<vmem>>, %arg15: memref<1x32xf32, #tpu.memory_space<vmem>>, %arg16: memref<1x32xf32, #tpu.memory_space<vmem>>, %arg17: memref<32x128xbf16, #tpu.memory_space<vmem>>, %arg18: memref<1x128xf32, #tpu.memory_space<vmem>>, %arg19: memref<128x32xbf16, #tpu.memory_space<vmem>>, %arg20: memref<1x32xf32, #tpu.memory_space<vmem>>, %arg21: memref<1x4x32xf32, #tpu.memory_space<vmem>>, %arg22: memref<1x4x32xf32, #tpu.memory_space<vmem>>) attributes {dimension_semantics = [#tpu.dimension_semantics<parallel>], iteration_bounds = array<i64: 8>, scalar_prefetch = 0 : i64, scratch_operands = 0 : i64, tpu.core_type = #tpu.core_type<tc>, window_params = [{transform_indices = @transform_0, window_bounds = array<i64: 1, 4, 32>}, {transform_indices = @transform_1, window_bounds = array<i64: 1, 4, 32>}, {pipeline_mode = #tpu.pipeline_mode<synchronous>, transform_indices = @transform_2, window_bounds = array<i64: 1, 32>}, {pipeline_mode = #tpu.pipeline_mode<synchronous>, transform_indices = @transform_3, window_bounds = array<i64: 1, 32>}, {pipeline_mode = #tpu.pipeline_mode<synchronous>, transform_indices = @transform_4, window_bounds = array<i64: 1, 32>}, {pipeline_mode = #tpu.pipeline_mode<synchronous>, transform_indices = @transform_5, window_bounds = array<i64: 1, 32>}, {pipeline_mode = #tpu.pipeline_mode<synchronous>, transform_indices = @transform_6, window_bounds = array<i64: 32, 32>}, {pipeline_mode = #tpu.pipeline_mode<synchronous>, transform_indices = @transform_7, window_bounds = array<i64: 1, 32>}, {pipeline_mode = #tpu.pipeline_mode<synchronous>, transform_indices = @transform_8, window_bounds = array<i64: 32, 32>}, {pipeline_mode = #tpu.pipeline_mode<synchronous>, transform_indices = @transform_9, window_bounds = array<i64: 1, 32>}, {pipeline_mode = #tpu.pipeline_mode<synchronous>, transform_indices = @transform_10, window_bounds = array<i64: 32, 32>}, {pipeline_mode = #tpu.pipeline_mode<synchronous>, transform_indices = @transform_11, window_bounds = array<i64: 1, 32>}, {pipeline_mode = #tpu.pipeline_mode<synchronous>, transform_indices = @transform_12, window_bounds = array<i64: 32, 32>}, {pipeline_mode = #tpu.pipeline_mode<synchronous>, transform_indices = @transform_13, window_bounds = array<i64: 1, 32>}, {pipeline_mode = #tpu.pipeline_mode<synchronous>, transform_indices = @transform_14, window_bounds = array<i64: 1, 32>}, {pipeline_mode = #tpu.pipeline_mode<synchronous>, transform_indices = @transform_15, window_bounds = array<i64: 1, 32>}, {pipeline_mode = #tpu.pipeline_mode<synchronous>, transform_indices = @transform_16, window_bounds = array<i64: 32, 128>}, {pipeline_mode = #tpu.pipeline_mode<synchronous>, transform_indices = @transform_17, window_bounds = array<i64: 1, 128>}, {pipeline_mode = #tpu.pipeline_mode<synchronous>, transform_indices = @transform_18, window_bounds = array<i64: 128, 32>}, {pipeline_mode = #tpu.pipeline_mode<synchronous>, transform_indices = @transform_19, window_bounds = array<i64: 1, 32>}, {transform_indices = @transform_20, window_bounds = array<i64: 1, 4, 32>}, {transform_indices = @transform_21, window_bounds = array<i64: 1, 4, 32>}]} {
    %c0 = arith.constant 0 : index
    %c0_0 = arith.constant 0 : index
    %c0_1 = arith.constant 0 : index
    %0 = vector.load %arg1[%c0, %c0_0, %c0_1] : memref<1x4x32xf32, #tpu.memory_space<vmem>>, vector<1x4x32xf32>
    %1 = vector.shape_cast %0 : vector<1x4x32xf32> to vector<4x32xf32>
    %c0_2 = arith.constant 0 : index
    %c0_3 = arith.constant 0 : index
    %c0_4 = arith.constant 0 : index
    %2 = vector.load %arg2[%c0_2, %c0_3, %c0_4] : memref<1x4x32xf32, #tpu.memory_space<vmem>>, vector<1x4x32xf32>
    %3 = vector.shape_cast %2 : vector<1x4x32xf32> to vector<4x32xf32>
    %4 = tpu.concatenate %1, %3 in 0 : vector<4x32xf32>, vector<4x32xf32> -> vector<8x32xf32>
    %c0_5 = arith.constant 0 : index
    %c0_6 = arith.constant 0 : index
    %5 = vector.load %arg3[%c0_5, %c0_6] : memref<1x32xf32, #tpu.memory_space<vmem>>, vector<1x32xf32>
    %c0_7 = arith.constant 0 : index
    %c0_8 = arith.constant 0 : index
    %6 = vector.load %arg4[%c0_7, %c0_8] : memref<1x32xf32, #tpu.memory_space<vmem>>, vector<1x32xf32>
    %c0_9 = arith.constant 0 : index
    %c0_10 = arith.constant 0 : index
    %7 = vector.load %arg5[%c0_9, %c0_10] : memref<1x32xf32, #tpu.memory_space<vmem>>, vector<1x32xf32>
    %c0_11 = arith.constant 0 : index
    %c0_12 = arith.constant 0 : index
    %8 = vector.load %arg6[%c0_11, %c0_12] : memref<1x32xf32, #tpu.memory_space<vmem>>, vector<1x32xf32>
    %c0_13 = arith.constant 0 : index
    %c0_14 = arith.constant 0 : index
    %9 = vector.load %arg7[%c0_13, %c0_14] : memref<32x32xbf16, #tpu.memory_space<vmem>>, vector<32x32xbf16>
    %c0_15 = arith.constant 0 : index
    %c0_16 = arith.constant 0 : index
    %10 = vector.load %arg8[%c0_15, %c0_16] : memref<1x32xf32, #tpu.memory_space<vmem>>, vector<1x32xf32>
    %c0_17 = arith.constant 0 : index
    %c0_18 = arith.constant 0 : index
    %11 = vector.load %arg9[%c0_17, %c0_18] : memref<32x32xbf16, #tpu.memory_space<vmem>>, vector<32x32xbf16>
    %c0_19 = arith.constant 0 : index
    %c0_20 = arith.constant 0 : index
    %12 = vector.load %arg10[%c0_19, %c0_20] : memref<1x32xf32, #tpu.memory_space<vmem>>, vector<1x32xf32>
    %c0_21 = arith.constant 0 : index
    %c0_22 = arith.constant 0 : index
    %13 = vector.load %arg11[%c0_21, %c0_22] : memref<32x32xbf16, #tpu.memory_space<vmem>>, vector<32x32xbf16>
    %c0_23 = arith.constant 0 : index
    %c0_24 = arith.constant 0 : index
    %14 = vector.load %arg12[%c0_23, %c0_24] : memref<1x32xf32, #tpu.memory_space<vmem>>, vector<1x32xf32>
    %c0_25 = arith.constant 0 : index
    %c0_26 = arith.constant 0 : index
    %15 = vector.load %arg13[%c0_25, %c0_26] : memref<32x32xbf16, #tpu.memory_space<vmem>>, vector<32x32xbf16>
    %c0_27 = arith.constant 0 : index
    %c0_28 = arith.constant 0 : index
    %16 = vector.load %arg14[%c0_27, %c0_28] : memref<1x32xf32, #tpu.memory_space<vmem>>, vector<1x32xf32>
    %c0_29 = arith.constant 0 : index
    %c0_30 = arith.constant 0 : index
    %17 = vector.load %arg15[%c0_29, %c0_30] : memref<1x32xf32, #tpu.memory_space<vmem>>, vector<1x32xf32>
    %c0_31 = arith.constant 0 : index
    %c0_32 = arith.constant 0 : index
    %18 = vector.load %arg16[%c0_31, %c0_32] : memref<1x32xf32, #tpu.memory_space<vmem>>, vector<1x32xf32>
    %c0_33 = arith.constant 0 : index
    %c0_34 = arith.constant 0 : index
    %19 = vector.load %arg17[%c0_33, %c0_34] : memref<32x128xbf16, #tpu.memory_space<vmem>>, vector<32x128xbf16>
    %c0_35 = arith.constant 0 : index
    %c0_36 = arith.constant 0 : index
    %20 = vector.load %arg18[%c0_35, %c0_36] : memref<1x128xf32, #tpu.memory_space<vmem>>, vector<1x128xf32>
    %c0_37 = arith.constant 0 : index
    %c0_38 = arith.constant 0 : index
    %21 = vector.load %arg19[%c0_37, %c0_38] : memref<128x32xbf16, #tpu.memory_space<vmem>>, vector<128x32xbf16>
    %c0_39 = arith.constant 0 : index
    %c0_40 = arith.constant 0 : index
    %22 = vector.load %arg20[%c0_39, %c0_40] : memref<1x32xf32, #tpu.memory_space<vmem>>, vector<1x32xf32>
    %cst = arith.constant dense<0.000000e+00> : vector<8xf32>
    %23 = vector.multi_reduction <add>, %4, %cst [1] : vector<8x32xf32> to vector<8xf32>
    %24 = vector.shape_cast %23 : vector<8xf32> to vector<8x1xf32>
    %cst_41 = arith.constant 3.200000e+01 : f32
    %25 = vector.broadcast %cst_41 : f32 to vector<8x1xf32>
    %26 = arith.divf %24, %25 : vector<8x1xf32>
    %27 = vector.broadcast %26 : vector<8x1xf32> to vector<8x32xf32>
    %28 = arith.subf %4, %27 : vector<8x32xf32>
    %29 = arith.mulf %28, %28 : vector<8x32xf32>
    %cst_42 = arith.constant dense<0.000000e+00> : vector<8xf32>
    %30 = vector.multi_reduction <add>, %29, %cst_42 [1] : vector<8x32xf32> to vector<8xf32>
    %31 = vector.shape_cast %30 : vector<8xf32> to vector<8x1xf32>
    %cst_43 = arith.constant 3.200000e+01 : f32
    %32 = vector.broadcast %cst_43 : f32 to vector<8x1xf32>
    %33 = arith.divf %31, %32 : vector<8x1xf32>
    %34 = vector.broadcast %26 : vector<8x1xf32> to vector<8x32xf32>
    %35 = arith.subf %4, %34 : vector<8x32xf32>
    %cst_44 = arith.constant 9.99999974E-6 : f32
    %36 = vector.broadcast %cst_44 : f32 to vector<8x1xf32>
    %37 = arith.addf %33, %36 : vector<8x1xf32>
    %38 = math.rsqrt %37 : vector<8x1xf32>
    %39 = vector.broadcast %38 : vector<8x1xf32> to vector<8x32xf32>
    %40 = arith.mulf %35, %39 : vector<8x32xf32>
    %41 = vector.broadcast %5 : vector<1x32xf32> to vector<8x32xf32>
    %42 = arith.mulf %40, %41 : vector<8x32xf32>
    %43 = vector.broadcast %6 : vector<1x32xf32> to vector<8x32xf32>
    %44 = arith.addf %42, %43 : vector<8x32xf32>
    %cst_45 = arith.constant dense<0.000000e+00> : vector<8xf32>
    %45 = vector.multi_reduction <add>, %4, %cst_45 [1] : vector<8x32xf32> to vector<8xf32>
    %46 = vector.shape_cast %45 : vector<8xf32> to vector<8x1xf32>
    %cst_46 = arith.constant 3.200000e+01 : f32
    %47 = vector.broadcast %cst_46 : f32 to vector<8x1xf32>
    %48 = arith.divf %46, %47 : vector<8x1xf32>
    %49 = vector.broadcast %48 : vector<8x1xf32> to vector<8x32xf32>
    %50 = arith.subf %4, %49 : vector<8x32xf32>
    %51 = arith.mulf %50, %50 : vector<8x32xf32>
    %cst_47 = arith.constant dense<0.000000e+00> : vector<8xf32>
    %52 = vector.multi_reduction <add>, %51, %cst_47 [1] : vector<8x32xf32> to vector<8xf32>
    %53 = vector.shape_cast %52 : vector<8xf32> to vector<8x1xf32>
    %cst_48 = arith.constant 3.200000e+01 : f32
    %54 = vector.broadcast %cst_48 : f32 to vector<8x1xf32>
    %55 = arith.divf %53, %54 : vector<8x1xf32>
    %56 = vector.broadcast %48 : vector<8x1xf32> to vector<8x32xf32>
    %57 = arith.subf %4, %56 : vector<8x32xf32>
    %cst_49 = arith.constant 9.99999974E-6 : f32
    %58 = vector.broadcast %cst_49 : f32 to vector<8x1xf32>
    %59 = arith.addf %55, %58 : vector<8x1xf32>
    %60 = math.rsqrt %59 : vector<8x1xf32>
    %61 = vector.broadcast %60 : vector<8x1xf32> to vector<8x32xf32>
    %62 = arith.mulf %57, %61 : vector<8x32xf32>
    %63 = vector.broadcast %7 : vector<1x32xf32> to vector<8x32xf32>
    %64 = arith.mulf %62, %63 : vector<8x32xf32>
    %65 = vector.broadcast %8 : vector<1x32xf32> to vector<8x32xf32>
    %66 = arith.addf %64, %65 : vector<8x32xf32>
    %67 = arith.truncf %44 : vector<8x32xf32> to vector<8x32xbf16>
    %cst_50 = arith.constant dense<0.000000e+00> : vector<8x32xf32>
    %68 = tpu.matmul %67, %9, %cst_50 {dimension_numbers = #tpu.dot_dimension_numbers<[1], [0], [0], [1], [0, 0, 1, 1], [], []>} : vector<8x32xbf16>, vector<32x32xbf16>, vector<8x32xf32> -> vector<8x32xf32>
    %69 = vector.broadcast %10 : vector<1x32xf32> to vector<8x32xf32>
    %70 = arith.addf %68, %69 : vector<8x32xf32>
    %71 = arith.truncf %66 : vector<8x32xf32> to vector<8x32xbf16>
    %cst_51 = arith.constant dense<0.000000e+00> : vector<8x32xf32>
    %72 = tpu.matmul %71, %11, %cst_51 {dimension_numbers = #tpu.dot_dimension_numbers<[1], [0], [0], [1], [0, 0, 1, 1], [], []>} : vector<8x32xbf16>, vector<32x32xbf16>, vector<8x32xf32> -> vector<8x32xf32>
    %73 = vector.broadcast %12 : vector<1x32xf32> to vector<8x32xf32>
    %74 = arith.addf %72, %73 : vector<8x32xf32>
    %75 = arith.truncf %66 : vector<8x32xf32> to vector<8x32xbf16>
    %cst_52 = arith.constant dense<0.000000e+00> : vector<8x32xf32>
    %76 = tpu.matmul %75, %13, %cst_52 {dimension_numbers = #tpu.dot_dimension_numbers<[1], [0], [0], [1], [0, 0, 1, 1], [], []>} : vector<8x32xbf16>, vector<32x32xbf16>, vector<8x32xf32> -> vector<8x32xf32>
    %77 = vector.broadcast %14 : vector<1x32xf32> to vector<8x32xf32>
    %78 = arith.addf %76, %77 : vector<8x32xf32>
    %79 = vector.extract_strided_slice %70 {offsets = [0, 0], sizes = [8, 8], strides = [1, 1]} : vector<8x32xf32> to vector<8x8xf32>
    %80 = vector.extract_strided_slice %70 {offsets = [0, 8], sizes = [8, 8], strides = [1, 1]} : vector<8x32xf32> to vector<8x8xf32>
    %81 = vector.extract_strided_slice %70 {offsets = [0, 16], sizes = [8, 8], strides = [1, 1]} : vector<8x32xf32> to vector<8x8xf32>
    %82 = vector.extract_strided_slice %70 {offsets = [0, 24], sizes = [8, 8], strides = [1, 1]} : vector<8x32xf32> to vector<8x8xf32>
    %83 = vector.shape_cast %79 : vector<8x8xf32> to vector<1x8x8xf32>
    %84 = vector.shape_cast %80 : vector<8x8xf32> to vector<1x8x8xf32>
    %85 = vector.shape_cast %81 : vector<8x8xf32> to vector<1x8x8xf32>
    %86 = vector.shape_cast %82 : vector<8x8xf32> to vector<1x8x8xf32>
    %87 = tpu.concatenate %83, %84, %85, %86 in 0 : vector<1x8x8xf32>, vector<1x8x8xf32>, vector<1x8x8xf32>, vector<1x8x8xf32> -> vector<4x8x8xf32>
    %88 = vector.extract_strided_slice %74 {offsets = [0, 0], sizes = [8, 8], strides = [1, 1]} : vector<8x32xf32> to vector<8x8xf32>
    %89 = vector.extract_strided_slice %74 {offsets = [0, 8], sizes = [8, 8], strides = [1, 1]} : vector<8x32xf32> to vector<8x8xf32>
    %90 = vector.extract_strided_slice %74 {offsets = [0, 16], sizes = [8, 8], strides = [1, 1]} : vector<8x32xf32> to vector<8x8xf32>
    %91 = vector.extract_strided_slice %74 {offsets = [0, 24], sizes = [8, 8], strides = [1, 1]} : vector<8x32xf32> to vector<8x8xf32>
    %92 = vector.shape_cast %88 : vector<8x8xf32> to vector<1x8x8xf32>
    %93 = vector.shape_cast %89 : vector<8x8xf32> to vector<1x8x8xf32>
    %94 = vector.shape_cast %90 : vector<8x8xf32> to vector<1x8x8xf32>
    %95 = vector.shape_cast %91 : vector<8x8xf32> to vector<1x8x8xf32>
    %96 = tpu.concatenate %92, %93, %94, %95 in 0 : vector<1x8x8xf32>, vector<1x8x8xf32>, vector<1x8x8xf32>, vector<1x8x8xf32> -> vector<4x8x8xf32>
    %97 = vector.extract_strided_slice %78 {offsets = [0, 0], sizes = [8, 8], strides = [1, 1]} : vector<8x32xf32> to vector<8x8xf32>
    %98 = vector.extract_strided_slice %78 {offsets = [0, 8], sizes = [8, 8], strides = [1, 1]} : vector<8x32xf32> to vector<8x8xf32>
    %99 = vector.extract_strided_slice %78 {offsets = [0, 16], sizes = [8, 8], strides = [1, 1]} : vector<8x32xf32> to vector<8x8xf32>
    %100 = vector.extract_strided_slice %78 {offsets = [0, 24], sizes = [8, 8], strides = [1, 1]} : vector<8x32xf32> to vector<8x8xf32>
    %101 = vector.shape_cast %97 : vector<8x8xf32> to vector<1x8x8xf32>
    %102 = vector.shape_cast %98 : vector<8x8xf32> to vector<1x8x8xf32>
    %103 = vector.shape_cast %99 : vector<8x8xf32> to vector<1x8x8xf32>
    %104 = vector.shape_cast %100 : vector<8x8xf32> to vector<1x8x8xf32>
    %105 = tpu.concatenate %101, %102, %103, %104 in 0 : vector<1x8x8xf32>, vector<1x8x8xf32>, vector<1x8x8xf32>, vector<1x8x8xf32> -> vector<4x8x8xf32>
    %106 = arith.truncf %87 : vector<4x8x8xf32> to vector<4x8x8xbf16>
    %107 = arith.truncf %96 : vector<4x8x8xf32> to vector<4x8x8xbf16>
    "tpu.trace_start"() <{level = 10 : i32, message = "hqd,hkd->hqk"}> : () -> ()
    %cst_53 = arith.constant dense<0.000000e+00> : vector<4x8x8xf32>
    %108 = tpu.matmul %106, %107, %cst_53 {dimension_numbers = #tpu.dot_dimension_numbers<[2], [2], [1], [1], [0, 0, 0, 1, 1, 1], [0], [0]>} : vector<4x8x8xbf16>, vector<4x8x8xbf16>, vector<4x8x8xf32> -> vector<4x8x8xf32>
    "tpu.trace_stop"() : () -> ()
    %cst_54 = arith.constant 0.353553385 : f32
    %109 = vector.broadcast %cst_54 : f32 to vector<4x8x8xf32>
    %110 = arith.mulf %108, %109 : vector<4x8x8xf32>
    %cst_55 = arith.constant dense<0xFF800000> : vector<4x8xf32>
    %111 = vector.multi_reduction <maximumf>, %110, %cst_55 [2] : vector<4x8x8xf32> to vector<4x8xf32>
    %112 = vector.shape_cast %111 : vector<4x8xf32> to vector<4x8x1xf32>
    %113 = vector.broadcast %112 : vector<4x8x1xf32> to vector<4x8x8xf32>
    %114 = arith.subf %110, %113 : vector<4x8x8xf32>
    %115 = math.exp %114 : vector<4x8x8xf32>
    %cst_56 = arith.constant dense<0.000000e+00> : vector<4x8xf32>
    %116 = vector.multi_reduction <add>, %115, %cst_56 [2] : vector<4x8x8xf32> to vector<4x8xf32>
    %117 = vector.shape_cast %116 : vector<4x8xf32> to vector<4x8x1xf32>
    %118 = tpu.reciprocal %117 {approx = true} : vector<4x8x1xf32> -> vector<4x8x1xf32>
    %119 = vector.broadcast %118 : vector<4x8x1xf32> to vector<4x8x8xf32>
    %120 = arith.mulf %115, %119 : vector<4x8x8xf32>
    %121 = arith.truncf %120 : vector<4x8x8xf32> to vector<4x8x8xbf16>
    %122 = arith.truncf %105 : vector<4x8x8xf32> to vector<4x8x8xbf16>
    "tpu.trace_start"() <{level = 10 : i32, message = "hqk,hkd->hqd"}> : () -> ()
    %cst_57 = arith.constant dense<0.000000e+00> : vector<4x8x8xf32>
    %123 = tpu.matmul %121, %122, %cst_57 {dimension_numbers = #tpu.dot_dimension_numbers<[2], [1], [1], [2], [0, 0, 0, 1, 1, 2], [0], [0]>} : vector<4x8x8xbf16>, vector<4x8x8xbf16>, vector<4x8x8xf32> -> vector<4x8x8xf32>
    "tpu.trace_stop"() : () -> ()
    %124 = vector.extract_strided_slice %123 {offsets = [0, 0, 0], sizes = [1, 8, 8], strides = [1, 1, 1]} : vector<4x8x8xf32> to vector<1x8x8xf32>
    %125 = vector.shape_cast %124 : vector<1x8x8xf32> to vector<8x8xf32>
    %126 = vector.extract_strided_slice %123 {offsets = [1, 0, 0], sizes = [1, 8, 8], strides = [1, 1, 1]} : vector<4x8x8xf32> to vector<1x8x8xf32>
    %127 = vector.shape_cast %126 : vector<1x8x8xf32> to vector<8x8xf32>
    %128 = vector.extract_strided_slice %123 {offsets = [2, 0, 0], sizes = [1, 8, 8], strides = [1, 1, 1]} : vector<4x8x8xf32> to vector<1x8x8xf32>
    %129 = vector.shape_cast %128 : vector<1x8x8xf32> to vector<8x8xf32>
    %130 = vector.extract_strided_slice %123 {offsets = [3, 0, 0], sizes = [1, 8, 8], strides = [1, 1, 1]} : vector<4x8x8xf32> to vector<1x8x8xf32>
    %131 = vector.shape_cast %130 : vector<1x8x8xf32> to vector<8x8xf32>
    %132 = tpu.concatenate %125, %127, %129, %131 in 1 : vector<8x8xf32>, vector<8x8xf32>, vector<8x8xf32>, vector<8x8xf32> -> vector<8x32xf32>
    %133 = arith.truncf %132 : vector<8x32xf32> to vector<8x32xbf16>
    %cst_58 = arith.constant dense<0.000000e+00> : vector<8x32xf32>
    %134 = tpu.matmul %133, %15, %cst_58 {dimension_numbers = #tpu.dot_dimension_numbers<[1], [0], [0], [1], [0, 0, 1, 1], [], []>} : vector<8x32xbf16>, vector<32x32xbf16>, vector<8x32xf32> -> vector<8x32xf32>
    %135 = vector.broadcast %16 : vector<1x32xf32> to vector<8x32xf32>
    %136 = arith.addf %134, %135 : vector<8x32xf32>
    %137 = arith.addf %4, %136 : vector<8x32xf32>
    %cst_59 = arith.constant dense<0.000000e+00> : vector<8xf32>
    %138 = vector.multi_reduction <add>, %137, %cst_59 [1] : vector<8x32xf32> to vector<8xf32>
    %139 = vector.shape_cast %138 : vector<8xf32> to vector<8x1xf32>
    %cst_60 = arith.constant 3.200000e+01 : f32
    %140 = vector.broadcast %cst_60 : f32 to vector<8x1xf32>
    %141 = arith.divf %139, %140 : vector<8x1xf32>
    %142 = vector.broadcast %141 : vector<8x1xf32> to vector<8x32xf32>
    %143 = arith.subf %137, %142 : vector<8x32xf32>
    %144 = arith.mulf %143, %143 : vector<8x32xf32>
    %cst_61 = arith.constant dense<0.000000e+00> : vector<8xf32>
    %145 = vector.multi_reduction <add>, %144, %cst_61 [1] : vector<8x32xf32> to vector<8xf32>
    %146 = vector.shape_cast %145 : vector<8xf32> to vector<8x1xf32>
    %cst_62 = arith.constant 3.200000e+01 : f32
    %147 = vector.broadcast %cst_62 : f32 to vector<8x1xf32>
    %148 = arith.divf %146, %147 : vector<8x1xf32>
    %149 = vector.broadcast %141 : vector<8x1xf32> to vector<8x32xf32>
    %150 = arith.subf %137, %149 : vector<8x32xf32>
    %cst_63 = arith.constant 9.99999974E-6 : f32
    %151 = vector.broadcast %cst_63 : f32 to vector<8x1xf32>
    %152 = arith.addf %148, %151 : vector<8x1xf32>
    %153 = math.rsqrt %152 : vector<8x1xf32>
    %154 = vector.broadcast %153 : vector<8x1xf32> to vector<8x32xf32>
    %155 = arith.mulf %150, %154 : vector<8x32xf32>
    %156 = vector.broadcast %17 : vector<1x32xf32> to vector<8x32xf32>
    %157 = arith.mulf %155, %156 : vector<8x32xf32>
    %158 = vector.broadcast %18 : vector<1x32xf32> to vector<8x32xf32>
    %159 = arith.addf %157, %158 : vector<8x32xf32>
    %160 = arith.truncf %159 : vector<8x32xf32> to vector<8x32xbf16>
    %cst_64 = arith.constant dense<0.000000e+00> : vector<8x128xf32>
    %161 = tpu.matmul %160, %19, %cst_64 {dimension_numbers = #tpu.dot_dimension_numbers<[1], [0], [0], [1], [0, 0, 1, 1], [], []>} : vector<8x32xbf16>, vector<32x128xbf16>, vector<8x128xf32> -> vector<8x128xf32>
    %162 = vector.broadcast %20 : vector<1x128xf32> to vector<8x128xf32>
    %163 = arith.addf %161, %162 : vector<8x128xf32>
    %164 = arith.mulf %163, %163 : vector<8x128xf32>
    %165 = arith.mulf %163, %164 : vector<8x128xf32>
    %cst_65 = arith.constant 4.471500e-02 : f32
    %166 = vector.broadcast %cst_65 : f32 to vector<8x128xf32>
    %167 = arith.mulf %166, %165 : vector<8x128xf32>
    %168 = arith.addf %163, %167 : vector<8x128xf32>
    %cst_66 = arith.constant 0.797884583 : f32
    %169 = vector.broadcast %cst_66 : f32 to vector<8x128xf32>
    %170 = arith.mulf %169, %168 : vector<8x128xf32>
    %171 = math.tanh %170 : vector<8x128xf32>
    %cst_67 = arith.constant 1.000000e+00 : f32
    %172 = vector.broadcast %cst_67 : f32 to vector<8x128xf32>
    %173 = arith.addf %172, %171 : vector<8x128xf32>
    %cst_68 = arith.constant 5.000000e-01 : f32
    %174 = vector.broadcast %cst_68 : f32 to vector<8x128xf32>
    %175 = arith.mulf %174, %173 : vector<8x128xf32>
    %176 = arith.mulf %163, %175 : vector<8x128xf32>
    %177 = arith.truncf %176 : vector<8x128xf32> to vector<8x128xbf16>
    %cst_69 = arith.constant dense<0.000000e+00> : vector<8x32xf32>
    %178 = tpu.matmul %177, %21, %cst_69 {dimension_numbers = #tpu.dot_dimension_numbers<[1], [0], [0], [1], [0, 0, 1, 1], [], []>} : vector<8x128xbf16>, vector<128x32xbf16>, vector<8x32xf32> -> vector<8x32xf32>
    %179 = vector.broadcast %22 : vector<1x32xf32> to vector<8x32xf32>
    %180 = arith.addf %178, %179 : vector<8x32xf32>
    %181 = arith.addf %137, %180 : vector<8x32xf32>
    %182 = vector.extract_strided_slice %181 {offsets = [0, 0], sizes = [4, 32], strides = [1, 1]} : vector<8x32xf32> to vector<4x32xf32>
    %c0_70 = arith.constant 0 : index
    %c0_71 = arith.constant 0 : index
    %c0_72 = arith.constant 0 : index
    %183 = vector.load %arg21[%c0_70, %c0_71, %c0_72] : memref<1x4x32xf32, #tpu.memory_space<vmem>>, vector<1x4x32xf32>
    %184 = vector.shape_cast %183 : vector<1x4x32xf32> to vector<4x32xf32>
    %185 = vector.shape_cast %182 : vector<4x32xf32> to vector<1x4x32xf32>
    tpu.vector_store %arg21[%c0_70, %c0_71, %c0_72], %185 {strides = array<i32>} : memref<1x4x32xf32, #tpu.memory_space<vmem>>, vector<1x4x32xf32>,
    %186 = vector.extract_strided_slice %181 {offsets = [4, 0], sizes = [4, 32], strides = [1, 1]} : vector<8x32xf32> to vector<4x32xf32>
    %c0_73 = arith.constant 0 : index
    %c0_74 = arith.constant 0 : index
    %c0_75 = arith.constant 0 : index
    %187 = vector.load %arg22[%c0_73, %c0_74, %c0_75] : memref<1x4x32xf32, #tpu.memory_space<vmem>>, vector<1x4x32xf32>
    %188 = vector.shape_cast %187 : vector<1x4x32xf32> to vector<4x32xf32>
    %189 = vector.shape_cast %186 : vector<4x32xf32> to vector<1x4x32xf32>
    tpu.vector_store %arg22[%c0_73, %c0_74, %c0_75], %189 {strides = array<i32>} : memref<1x4x32xf32, #tpu.memory_space<vmem>>, vector<1x4x32xf32>,
    return
  }
  func.func @transform_0(%arg0: i32) -> (i32, i32, i32) {
    %c0_i32 = arith.constant 0 : i32
    %c0_i32_0 = arith.constant 0 : i32
    %c0_i32_1 = arith.constant 0 : i32
    return %arg0, %c0_i32, %c0_i32_0 : i32, i32, i32
  }
  func.func @transform_1(%arg0: i32) -> (i32, i32, i32) {
    %c0_i32 = arith.constant 0 : i32
    %c0_i32_0 = arith.constant 0 : i32
    %c0_i32_1 = arith.constant 0 : i32
    return %arg0, %c0_i32, %c0_i32_0 : i32, i32, i32
  }
  func.func @transform_2(%arg0: i32) -> (i32, i32) {
    %c0_i32 = arith.constant 0 : i32
    %c0_i32_0 = arith.constant 0 : i32
    %c0_i32_1 = arith.constant 0 : i32
    return %c0_i32, %c0_i32_0 : i32, i32
  }
  func.func @transform_3(%arg0: i32) -> (i32, i32) {
    %c0_i32 = arith.constant 0 : i32
    %c0_i32_0 = arith.constant 0 : i32
    %c0_i32_1 = arith.constant 0 : i32
    return %c0_i32, %c0_i32_0 : i32, i32
  }
  func.func @transform_4(%arg0: i32) -> (i32, i32) {
    %c0_i32 = arith.constant 0 : i32
    %c0_i32_0 = arith.constant 0 : i32
    %c0_i32_1 = arith.constant 0 : i32
    return %c0_i32, %c0_i32_0 : i32, i32
  }
  func.func @transform_5(%arg0: i32) -> (i32, i32) {
    %c0_i32 = arith.constant 0 : i32
    %c0_i32_0 = arith.constant 0 : i32
    %c0_i32_1 = arith.constant 0 : i32
    return %c0_i32, %c0_i32_0 : i32, i32
  }
  func.func @transform_6(%arg0: i32) -> (i32, i32) {
    %c0_i32 = arith.constant 0 : i32
    %c0_i32_0 = arith.constant 0 : i32
    %c0_i32_1 = arith.constant 0 : i32
    return %c0_i32, %c0_i32_0 : i32, i32
  }
  func.func @transform_7(%arg0: i32) -> (i32, i32) {
    %c0_i32 = arith.constant 0 : i32
    %c0_i32_0 = arith.constant 0 : i32
    %c0_i32_1 = arith.constant 0 : i32
    return %c0_i32, %c0_i32_0 : i32, i32
  }
  func.func @transform_8(%arg0: i32) -> (i32, i32) {
    %c0_i32 = arith.constant 0 : i32
    %c0_i32_0 = arith.constant 0 : i32
    %c0_i32_1 = arith.constant 0 : i32
    return %c0_i32, %c0_i32_0 : i32, i32
  }
  func.func @transform_9(%arg0: i32) -> (i32, i32) {
    %c0_i32 = arith.constant 0 : i32
    %c0_i32_0 = arith.constant 0 : i32
    %c0_i32_1 = arith.constant 0 : i32
    return %c0_i32, %c0_i32_0 : i32, i32
  }
  func.func @transform_10(%arg0: i32) -> (i32, i32) {
    %c0_i32 = arith.constant 0 : i32
    %c0_i32_0 = arith.constant 0 : i32
    %c0_i32_1 = arith.constant 0 : i32
    return %c0_i32, %c0_i32_0 : i32, i32
  }
  func.func @transform_11(%arg0: i32) -> (i32, i32) {
    %c0_i32 = arith.constant 0 : i32
    %c0_i32_0 = arith.constant 0 : i32
    %c0_i32_1 = arith.constant 0 : i32
    return %c0_i32, %c0_i32_0 : i32, i32
  }
  func.func @transform_12(%arg0: i32) -> (i32, i32) {
    %c0_i32 = arith.constant 0 : i32
    %c0_i32_0 = arith.constant 0 : i32
    %c0_i32_1 = arith.constant 0 : i32
    return %c0_i32, %c0_i32_0 : i32, i32
  }
  func.func @transform_13(%arg0: i32) -> (i32, i32) {
    %c0_i32 = arith.constant 0 : i32
    %c0_i32_0 = arith.constant 0 : i32
    %c0_i32_1 = arith.constant 0 : i32
    return %c0_i32, %c0_i32_0 : i32, i32
  }
  func.func @transform_14(%arg0: i32) -> (i32, i32) {
    %c0_i32 = arith.constant 0 : i32
    %c0_i32_0 = arith.constant 0 : i32
    %c0_i32_1 = arith.constant 0 : i32
    return %c0_i32, %c0_i32_0 : i32, i32
  }
  func.func @transform_15(%arg0: i32) -> (i32, i32) {
    %c0_i32 = arith.constant 0 : i32
    %c0_i32_0 = arith.constant 0 : i32
    %c0_i32_1 = arith.constant 0 : i32
    return %c0_i32, %c0_i32_0 : i32, i32
  }
  func.func @transform_16(%arg0: i32) -> (i32, i32) {
    %c0_i32 = arith.constant 0 : i32
    %c0_i32_0 = arith.constant 0 : i32
    %c0_i32_1 = arith.constant 0 : i32
    return %c0_i32, %c0_i32_0 : i32, i32
  }
  func.func @transform_17(%arg0: i32) -> (i32, i32) {
    %c0_i32 = arith.constant 0 : i32
    %c0_i32_0 = arith.constant 0 : i32
    %c0_i32_1 = arith.constant 0 : i32
    return %c0_i32, %c0_i32_0 : i32, i32
  }
  func.func @transform_18(%arg0: i32) -> (i32, i32) {
    %c0_i32 = arith.constant 0 : i32
    %c0_i32_0 = arith.constant 0 : i32
    %c0_i32_1 = arith.constant 0 : i32
    return %c0_i32, %c0_i32_0 : i32, i32
  }
  func.func @transform_19(%arg0: i32) -> (i32, i32) {
    %c0_i32 = arith.constant 0 : i32
    %c0_i32_0 = arith.constant 0 : i32
    %c0_i32_1 = arith.constant 0 : i32
    return %c0_i32, %c0_i32_0 : i32, i32
  }
  func.func @transform_20(%arg0: i32) -> (i32, i32, i32) {
    %c0_i32 = arith.constant 0 : i32
    %c0_i32_0 = arith.constant 0 : i32
    %c0_i32_1 = arith.constant 0 : i32
    return %arg0, %c0_i32, %c0_i32_0 : i32, i32, i32
  }
  func.func @transform_21(%arg0: i32) -> (i32, i32, i32) {
    %c0_i32 = arith.constant 0 : i32
    %c0_i32_0 = arith.constant 0 : i32
    %c0_i32_1 = arith.constant 0 : i32
    return %arg0, %c0_i32, %c0_i32_0 : i32, i32, i32
  }
}

module attributes {stable_mosaic.version = 11 : i64} {
  func.func @_linear_kernel(%arg0: i32, %arg1: i32, %arg2: i32, %arg3: memref<8x8xf32, #tpu.memory_space<vmem>>, %arg4: memref<8x32xbf16, #tpu.memory_space<vmem>>, %arg5: memref<1x32xf32, #tpu.memory_space<vmem>>, %arg6: memref<8x32xf32, #tpu.memory_space<vmem>>, %arg7: memref<8x32xf32, #tpu.memory_space<vmem>>) attributes {dimension_semantics = [#tpu.dimension_semantics<parallel>, #tpu.dimension_semantics<parallel>, #tpu.dimension_semantics<arbitrary>], iteration_bounds = array<i64: 1, 1, 1>, scalar_prefetch = 0 : i64, scratch_operands = 1 : i64, tpu.core_type = #tpu.core_type<tc>, window_params = [{transform_indices = @transform_0, window_bounds = array<i64: 8, 8>}, {transform_indices = @transform_1, window_bounds = array<i64: 8, 32>}, {transform_indices = @transform_2, window_bounds = array<i64: 1, 32>}, {transform_indices = @transform_3, window_bounds = array<i64: 8, 32>}]} {
    %c0_i32 = arith.constant 0 : i32
    %0 = arith.cmpi eq, %arg2, %c0_i32 : i32
    %1 = arith.extui %0 : i1 to i32
    %c0_i32_0 = arith.constant 0 : i32
    %2 = arith.cmpi ne, %1, %c0_i32_0 : i32
    scf.if %2 {
      %cst_10 = arith.constant 0.000000e+00 : f32
      %13 = vector.broadcast %cst_10 : f32 to vector<8x32xf32>
      %c0_11 = arith.constant 0 : index
      %c0_12 = arith.constant 0 : index
      %14 = vector.load %arg7[%c0_11, %c0_12] : memref<8x32xf32, #tpu.memory_space<vmem>>, vector<8x32xf32>
      tpu.vector_store %arg7[%c0_11, %c0_12], %13 {strides = array<i32>} : memref<8x32xf32, #tpu.memory_space<vmem>>, vector<8x32xf32>,
    } else {
    }
    %c0 = arith.constant 0 : index
    %c0_1 = arith.constant 0 : index
    %3 = vector.load %arg3[%c0, %c0_1] : memref<8x8xf32, #tpu.memory_space<vmem>>, vector<8x8xf32>
    %c0_2 = arith.constant 0 : index
    %c0_3 = arith.constant 0 : index
    %4 = vector.load %arg7[%c0_2, %c0_3] : memref<8x32xf32, #tpu.memory_space<vmem>>, vector<8x32xf32>
    %5 = arith.truncf %3 : vector<8x8xf32> to vector<8x8xbf16>
    %c0_4 = arith.constant 0 : index
    %c0_5 = arith.constant 0 : index
    %6 = vector.load %arg4[%c0_4, %c0_5] : memref<8x32xbf16, #tpu.memory_space<vmem>>, vector<8x32xbf16>
    %cst = arith.constant dense<0.000000e+00> : vector<8x32xf32>
    %7 = tpu.matmul %5, %6, %cst {dimension_numbers = #tpu.dot_dimension_numbers<[1], [0], [0], [1], [0, 0, 1, 1], [], []>} : vector<8x8xbf16>, vector<8x32xbf16>, vector<8x32xf32> -> vector<8x32xf32>
    %8 = arith.addf %4, %7 : vector<8x32xf32>
    %c0_6 = arith.constant 0 : index
    %c0_7 = arith.constant 0 : index
    %9 = vector.load %arg7[%c0_6, %c0_7] : memref<8x32xf32, #tpu.memory_space<vmem>>, vector<8x32xf32>
    tpu.vector_store %arg7[%c0_6, %c0_7], %8 {strides = array<i32>} : memref<8x32xf32, #tpu.memory_space<vmem>>, vector<8x32xf32>,
    %c0_i32_8 = arith.constant 0 : i32
    %10 = arith.cmpi eq, %arg2, %c0_i32_8 : i32
    %11 = arith.extui %10 : i1 to i32
    %c0_i32_9 = arith.constant 0 : i32
    %12 = arith.cmpi ne, %11, %c0_i32_9 : i32
    scf.if %12 {
      %c0_10 = arith.constant 0 : index
      %c0_11 = arith.constant 0 : index
      %13 = vector.load %arg7[%c0_10, %c0_11] : memref<8x32xf32, #tpu.memory_space<vmem>>, vector<8x32xf32>
      %c0_12 = arith.constant 0 : index
      %c0_13 = arith.constant 0 : index
      %14 = vector.load %arg5[%c0_12, %c0_13] : memref<1x32xf32, #tpu.memory_space<vmem>>, vector<1x32xf32>
      %15 = vector.broadcast %14 : vector<1x32xf32> to vector<8x32xf32>
      %16 = arith.addf %13, %15 : vector<8x32xf32>
      %c0_14 = arith.constant 0 : index
      %c0_15 = arith.constant 0 : index
      %17 = vector.load %arg6[%c0_14, %c0_15] : memref<8x32xf32, #tpu.memory_space<vmem>>, vector<8x32xf32>
      tpu.vector_store %arg6[%c0_14, %c0_15], %16 {strides = array<i32>} : memref<8x32xf32, #tpu.memory_space<vmem>>, vector<8x32xf32>,
    } else {
    }
    return
  }
  func.func @transform_0(%arg0: i32, %arg1: i32, %arg2: i32) -> (i32, i32) {
    %c0_i32 = arith.constant 0 : i32
    return %arg0, %arg2 : i32, i32
  }
  func.func @transform_1(%arg0: i32, %arg1: i32, %arg2: i32) -> (i32, i32) {
    %c0_i32 = arith.constant 0 : i32
    return %arg2, %arg1 : i32, i32
  }
  func.func @transform_2(%arg0: i32, %arg1: i32, %arg2: i32) -> (i32, i32) {
    %c0_i32 = arith.constant 0 : i32
    %c0_i32_0 = arith.constant 0 : i32
    return %c0_i32, %arg1 : i32, i32
  }
  func.func @transform_3(%arg0: i32, %arg1: i32, %arg2: i32) -> (i32, i32) {
    %c0_i32 = arith.constant 0 : i32
    return %arg0, %arg1 : i32, i32
  }
}

module attributes {stable_mosaic.version = 11 : i64} {
  func.func @_attn_block_kernel(%arg0: i32, %arg1: memref<1x4x32xf32, #tpu.memory_space<vmem>>, %arg2: memref<1x4x32xf32, #tpu.memory_space<vmem>>, %arg3: memref<1x32xf32, #tpu.memory_space<vmem>>, %arg4: memref<1x32xf32, #tpu.memory_space<vmem>>, %arg5: memref<1x32xf32, #tpu.memory_space<vmem>>, %arg6: memref<1x32xf32, #tpu.memory_space<vmem>>, %arg7: memref<32x32xbf16, #tpu.memory_space<vmem>>, %arg8: memref<1x32xf32, #tpu.memory_space<vmem>>, %arg9: memref<32x32xbf16, #tpu.memory_space<vmem>>, %arg10: memref<1x32xf32, #tpu.memory_space<vmem>>, %arg11: memref<32x32xbf16, #tpu.memory_space<vmem>>, %arg12: memref<1x32xf32, #tpu.memory_space<vmem>>, %arg13: memref<32x32xbf16, #tpu.memory_space<vmem>>, %arg14: memref<1x32xf32, #tpu.memory_space<vmem>>, %arg15: memref<1x32xf32, #tpu.memory_space<vmem>>, %arg16: memref<1x32xf32, #tpu.memory_space<vmem>>, %arg17: memref<32x128xbf16, #tpu.memory_space<vmem>>, %arg18: memref<1x128xf32, #tpu.memory_space<vmem>>, %arg19: memref<128x32xbf16, #tpu.memory_space<vmem>>, %arg20: memref<1x32xf32, #tpu.memory_space<vmem>>, %arg21: memref<1x4x32xf32, #tpu.memory_space<vmem>>) attributes {dimension_semantics = [#tpu.dimension_semantics<parallel>], iteration_bounds = array<i64: 2>, scalar_prefetch = 0 : i64, scratch_operands = 0 : i64, tpu.core_type = #tpu.core_type<tc>, window_params = [{transform_indices = @transform_0, window_bounds = array<i64: 1, 4, 32>}, {transform_indices = @transform_1, window_bounds = array<i64: 1, 4, 32>}, {pipeline_mode = #tpu.pipeline_mode<synchronous>, transform_indices = @transform_2, window_bounds = array<i64: 1, 32>}, {pipeline_mode = #tpu.pipeline_mode<synchronous>, transform_indices = @transform_3, window_bounds = array<i64: 1, 32>}, {pipeline_mode = #tpu.pipeline_mode<synchronous>, transform_indices = @transform_4, window_bounds = array<i64: 1, 32>}, {pipeline_mode = #tpu.pipeline_mode<synchronous>, transform_indices = @transform_5, window_bounds = array<i64: 1, 32>}, {pipeline_mode = #tpu.pipeline_mode<synchronous>, transform_indices = @transform_6, window_bounds = array<i64: 32, 32>}, {pipeline_mode = #tpu.pipeline_mode<synchronous>, transform_indices = @transform_7, window_bounds = array<i64: 1, 32>}, {pipeline_mode = #tpu.pipeline_mode<synchronous>, transform_indices = @transform_8, window_bounds = array<i64: 32, 32>}, {pipeline_mode = #tpu.pipeline_mode<synchronous>, transform_indices = @transform_9, window_bounds = array<i64: 1, 32>}, {pipeline_mode = #tpu.pipeline_mode<synchronous>, transform_indices = @transform_10, window_bounds = array<i64: 32, 32>}, {pipeline_mode = #tpu.pipeline_mode<synchronous>, transform_indices = @transform_11, window_bounds = array<i64: 1, 32>}, {pipeline_mode = #tpu.pipeline_mode<synchronous>, transform_indices = @transform_12, window_bounds = array<i64: 32, 32>}, {pipeline_mode = #tpu.pipeline_mode<synchronous>, transform_indices = @transform_13, window_bounds = array<i64: 1, 32>}, {pipeline_mode = #tpu.pipeline_mode<synchronous>, transform_indices = @transform_14, window_bounds = array<i64: 1, 32>}, {pipeline_mode = #tpu.pipeline_mode<synchronous>, transform_indices = @transform_15, window_bounds = array<i64: 1, 32>}, {pipeline_mode = #tpu.pipeline_mode<synchronous>, transform_indices = @transform_16, window_bounds = array<i64: 32, 128>}, {pipeline_mode = #tpu.pipeline_mode<synchronous>, transform_indices = @transform_17, window_bounds = array<i64: 1, 128>}, {pipeline_mode = #tpu.pipeline_mode<synchronous>, transform_indices = @transform_18, window_bounds = array<i64: 128, 32>}, {pipeline_mode = #tpu.pipeline_mode<synchronous>, transform_indices = @transform_19, window_bounds = array<i64: 1, 32>}, {transform_indices = @transform_20, window_bounds = array<i64: 1, 4, 32>}]} {
    %c0 = arith.constant 0 : index
    %c0_0 = arith.constant 0 : index
    %c0_1 = arith.constant 0 : index
    %0 = vector.load %arg1[%c0, %c0_0, %c0_1] : memref<1x4x32xf32, #tpu.memory_space<vmem>>, vector<1x4x32xf32>
    %1 = vector.shape_cast %0 : vector<1x4x32xf32> to vector<4x32xf32>
    %c0_2 = arith.constant 0 : index
    %c0_3 = arith.constant 0 : index
    %c0_4 = arith.constant 0 : index
    %2 = vector.load %arg2[%c0_2, %c0_3, %c0_4] : memref<1x4x32xf32, #tpu.memory_space<vmem>>, vector<1x4x32xf32>
    %3 = vector.shape_cast %2 : vector<1x4x32xf32> to vector<4x32xf32>
    %c0_5 = arith.constant 0 : index
    %c0_6 = arith.constant 0 : index
    %4 = vector.load %arg3[%c0_5, %c0_6] : memref<1x32xf32, #tpu.memory_space<vmem>>, vector<1x32xf32>
    %c0_7 = arith.constant 0 : index
    %c0_8 = arith.constant 0 : index
    %5 = vector.load %arg4[%c0_7, %c0_8] : memref<1x32xf32, #tpu.memory_space<vmem>>, vector<1x32xf32>
    %c0_9 = arith.constant 0 : index
    %c0_10 = arith.constant 0 : index
    %6 = vector.load %arg5[%c0_9, %c0_10] : memref<1x32xf32, #tpu.memory_space<vmem>>, vector<1x32xf32>
    %c0_11 = arith.constant 0 : index
    %c0_12 = arith.constant 0 : index
    %7 = vector.load %arg6[%c0_11, %c0_12] : memref<1x32xf32, #tpu.memory_space<vmem>>, vector<1x32xf32>
    %c0_13 = arith.constant 0 : index
    %c0_14 = arith.constant 0 : index
    %8 = vector.load %arg7[%c0_13, %c0_14] : memref<32x32xbf16, #tpu.memory_space<vmem>>, vector<32x32xbf16>
    %c0_15 = arith.constant 0 : index
    %c0_16 = arith.constant 0 : index
    %9 = vector.load %arg8[%c0_15, %c0_16] : memref<1x32xf32, #tpu.memory_space<vmem>>, vector<1x32xf32>
    %c0_17 = arith.constant 0 : index
    %c0_18 = arith.constant 0 : index
    %10 = vector.load %arg9[%c0_17, %c0_18] : memref<32x32xbf16, #tpu.memory_space<vmem>>, vector<32x32xbf16>
    %c0_19 = arith.constant 0 : index
    %c0_20 = arith.constant 0 : index
    %11 = vector.load %arg10[%c0_19, %c0_20] : memref<1x32xf32, #tpu.memory_space<vmem>>, vector<1x32xf32>
    %c0_21 = arith.constant 0 : index
    %c0_22 = arith.constant 0 : index
    %12 = vector.load %arg11[%c0_21, %c0_22] : memref<32x32xbf16, #tpu.memory_space<vmem>>, vector<32x32xbf16>
    %c0_23 = arith.constant 0 : index
    %c0_24 = arith.constant 0 : index
    %13 = vector.load %arg12[%c0_23, %c0_24] : memref<1x32xf32, #tpu.memory_space<vmem>>, vector<1x32xf32>
    %c0_25 = arith.constant 0 : index
    %c0_26 = arith.constant 0 : index
    %14 = vector.load %arg13[%c0_25, %c0_26] : memref<32x32xbf16, #tpu.memory_space<vmem>>, vector<32x32xbf16>
    %c0_27 = arith.constant 0 : index
    %c0_28 = arith.constant 0 : index
    %15 = vector.load %arg14[%c0_27, %c0_28] : memref<1x32xf32, #tpu.memory_space<vmem>>, vector<1x32xf32>
    %c0_29 = arith.constant 0 : index
    %c0_30 = arith.constant 0 : index
    %16 = vector.load %arg15[%c0_29, %c0_30] : memref<1x32xf32, #tpu.memory_space<vmem>>, vector<1x32xf32>
    %c0_31 = arith.constant 0 : index
    %c0_32 = arith.constant 0 : index
    %17 = vector.load %arg16[%c0_31, %c0_32] : memref<1x32xf32, #tpu.memory_space<vmem>>, vector<1x32xf32>
    %c0_33 = arith.constant 0 : index
    %c0_34 = arith.constant 0 : index
    %18 = vector.load %arg17[%c0_33, %c0_34] : memref<32x128xbf16, #tpu.memory_space<vmem>>, vector<32x128xbf16>
    %c0_35 = arith.constant 0 : index
    %c0_36 = arith.constant 0 : index
    %19 = vector.load %arg18[%c0_35, %c0_36] : memref<1x128xf32, #tpu.memory_space<vmem>>, vector<1x128xf32>
    %c0_37 = arith.constant 0 : index
    %c0_38 = arith.constant 0 : index
    %20 = vector.load %arg19[%c0_37, %c0_38] : memref<128x32xbf16, #tpu.memory_space<vmem>>, vector<128x32xbf16>
    %c0_39 = arith.constant 0 : index
    %c0_40 = arith.constant 0 : index
    %21 = vector.load %arg20[%c0_39, %c0_40] : memref<1x32xf32, #tpu.memory_space<vmem>>, vector<1x32xf32>
    %cst = arith.constant dense<0.000000e+00> : vector<4xf32>
    %22 = vector.multi_reduction <add>, %1, %cst [1] : vector<4x32xf32> to vector<4xf32>
    %23 = vector.shape_cast %22 : vector<4xf32> to vector<4x1xf32>
    %cst_41 = arith.constant 3.200000e+01 : f32
    %24 = vector.broadcast %cst_41 : f32 to vector<4x1xf32>
    %25 = arith.divf %23, %24 : vector<4x1xf32>
    %26 = vector.broadcast %25 : vector<4x1xf32> to vector<4x32xf32>
    %27 = arith.subf %1, %26 : vector<4x32xf32>
    %28 = arith.mulf %27, %27 : vector<4x32xf32>
    %cst_42 = arith.constant dense<0.000000e+00> : vector<4xf32>
    %29 = vector.multi_reduction <add>, %28, %cst_42 [1] : vector<4x32xf32> to vector<4xf32>
    %30 = vector.shape_cast %29 : vector<4xf32> to vector<4x1xf32>
    %cst_43 = arith.constant 3.200000e+01 : f32
    %31 = vector.broadcast %cst_43 : f32 to vector<4x1xf32>
    %32 = arith.divf %30, %31 : vector<4x1xf32>
    %33 = vector.broadcast %25 : vector<4x1xf32> to vector<4x32xf32>
    %34 = arith.subf %1, %33 : vector<4x32xf32>
    %cst_44 = arith.constant 9.99999974E-6 : f32
    %35 = vector.broadcast %cst_44 : f32 to vector<4x1xf32>
    %36 = arith.addf %32, %35 : vector<4x1xf32>
    %37 = math.rsqrt %36 : vector<4x1xf32>
    %38 = vector.broadcast %37 : vector<4x1xf32> to vector<4x32xf32>
    %39 = arith.mulf %34, %38 : vector<4x32xf32>
    %40 = vector.broadcast %4 : vector<1x32xf32> to vector<4x32xf32>
    %41 = arith.mulf %39, %40 : vector<4x32xf32>
    %42 = vector.broadcast %5 : vector<1x32xf32> to vector<4x32xf32>
    %43 = arith.addf %41, %42 : vector<4x32xf32>
    %cst_45 = arith.constant dense<0.000000e+00> : vector<4xf32>
    %44 = vector.multi_reduction <add>, %3, %cst_45 [1] : vector<4x32xf32> to vector<4xf32>
    %45 = vector.shape_cast %44 : vector<4xf32> to vector<4x1xf32>
    %cst_46 = arith.constant 3.200000e+01 : f32
    %46 = vector.broadcast %cst_46 : f32 to vector<4x1xf32>
    %47 = arith.divf %45, %46 : vector<4x1xf32>
    %48 = vector.broadcast %47 : vector<4x1xf32> to vector<4x32xf32>
    %49 = arith.subf %3, %48 : vector<4x32xf32>
    %50 = arith.mulf %49, %49 : vector<4x32xf32>
    %cst_47 = arith.constant dense<0.000000e+00> : vector<4xf32>
    %51 = vector.multi_reduction <add>, %50, %cst_47 [1] : vector<4x32xf32> to vector<4xf32>
    %52 = vector.shape_cast %51 : vector<4xf32> to vector<4x1xf32>
    %cst_48 = arith.constant 3.200000e+01 : f32
    %53 = vector.broadcast %cst_48 : f32 to vector<4x1xf32>
    %54 = arith.divf %52, %53 : vector<4x1xf32>
    %55 = vector.broadcast %47 : vector<4x1xf32> to vector<4x32xf32>
    %56 = arith.subf %3, %55 : vector<4x32xf32>
    %cst_49 = arith.constant 9.99999974E-6 : f32
    %57 = vector.broadcast %cst_49 : f32 to vector<4x1xf32>
    %58 = arith.addf %54, %57 : vector<4x1xf32>
    %59 = math.rsqrt %58 : vector<4x1xf32>
    %60 = vector.broadcast %59 : vector<4x1xf32> to vector<4x32xf32>
    %61 = arith.mulf %56, %60 : vector<4x32xf32>
    %62 = vector.broadcast %6 : vector<1x32xf32> to vector<4x32xf32>
    %63 = arith.mulf %61, %62 : vector<4x32xf32>
    %64 = vector.broadcast %7 : vector<1x32xf32> to vector<4x32xf32>
    %65 = arith.addf %63, %64 : vector<4x32xf32>
    %66 = arith.truncf %43 : vector<4x32xf32> to vector<4x32xbf16>
    %cst_50 = arith.constant dense<0.000000e+00> : vector<4x32xf32>
    %67 = tpu.matmul %66, %8, %cst_50 {dimension_numbers = #tpu.dot_dimension_numbers<[1], [0], [0], [1], [0, 0, 1, 1], [], []>} : vector<4x32xbf16>, vector<32x32xbf16>, vector<4x32xf32> -> vector<4x32xf32>
    %68 = vector.broadcast %9 : vector<1x32xf32> to vector<4x32xf32>
    %69 = arith.addf %67, %68 : vector<4x32xf32>
    %70 = arith.truncf %65 : vector<4x32xf32> to vector<4x32xbf16>
    %cst_51 = arith.constant dense<0.000000e+00> : vector<4x32xf32>
    %71 = tpu.matmul %70, %10, %cst_51 {dimension_numbers = #tpu.dot_dimension_numbers<[1], [0], [0], [1], [0, 0, 1, 1], [], []>} : vector<4x32xbf16>, vector<32x32xbf16>, vector<4x32xf32> -> vector<4x32xf32>
    %72 = vector.broadcast %11 : vector<1x32xf32> to vector<4x32xf32>
    %73 = arith.addf %71, %72 : vector<4x32xf32>
    %74 = arith.truncf %65 : vector<4x32xf32> to vector<4x32xbf16>
    %cst_52 = arith.constant dense<0.000000e+00> : vector<4x32xf32>
    %75 = tpu.matmul %74, %12, %cst_52 {dimension_numbers = #tpu.dot_dimension_numbers<[1], [0], [0], [1], [0, 0, 1, 1], [], []>} : vector<4x32xbf16>, vector<32x32xbf16>, vector<4x32xf32> -> vector<4x32xf32>
    %76 = vector.broadcast %13 : vector<1x32xf32> to vector<4x32xf32>
    %77 = arith.addf %75, %76 : vector<4x32xf32>
    %78 = vector.extract_strided_slice %69 {offsets = [0, 0], sizes = [4, 8], strides = [1, 1]} : vector<4x32xf32> to vector<4x8xf32>
    %79 = vector.extract_strided_slice %69 {offsets = [0, 8], sizes = [4, 8], strides = [1, 1]} : vector<4x32xf32> to vector<4x8xf32>
    %80 = vector.extract_strided_slice %69 {offsets = [0, 16], sizes = [4, 8], strides = [1, 1]} : vector<4x32xf32> to vector<4x8xf32>
    %81 = vector.extract_strided_slice %69 {offsets = [0, 24], sizes = [4, 8], strides = [1, 1]} : vector<4x32xf32> to vector<4x8xf32>
    %82 = vector.shape_cast %78 : vector<4x8xf32> to vector<1x4x8xf32>
    %83 = vector.shape_cast %79 : vector<4x8xf32> to vector<1x4x8xf32>
    %84 = vector.shape_cast %80 : vector<4x8xf32> to vector<1x4x8xf32>
    %85 = vector.shape_cast %81 : vector<4x8xf32> to vector<1x4x8xf32>
    %86 = tpu.concatenate %82, %83, %84, %85 in 0 : vector<1x4x8xf32>, vector<1x4x8xf32>, vector<1x4x8xf32>, vector<1x4x8xf32> -> vector<4x4x8xf32>
    %87 = vector.extract_strided_slice %73 {offsets = [0, 0], sizes = [4, 8], strides = [1, 1]} : vector<4x32xf32> to vector<4x8xf32>
    %88 = vector.extract_strided_slice %73 {offsets = [0, 8], sizes = [4, 8], strides = [1, 1]} : vector<4x32xf32> to vector<4x8xf32>
    %89 = vector.extract_strided_slice %73 {offsets = [0, 16], sizes = [4, 8], strides = [1, 1]} : vector<4x32xf32> to vector<4x8xf32>
    %90 = vector.extract_strided_slice %73 {offsets = [0, 24], sizes = [4, 8], strides = [1, 1]} : vector<4x32xf32> to vector<4x8xf32>
    %91 = vector.shape_cast %87 : vector<4x8xf32> to vector<1x4x8xf32>
    %92 = vector.shape_cast %88 : vector<4x8xf32> to vector<1x4x8xf32>
    %93 = vector.shape_cast %89 : vector<4x8xf32> to vector<1x4x8xf32>
    %94 = vector.shape_cast %90 : vector<4x8xf32> to vector<1x4x8xf32>
    %95 = tpu.concatenate %91, %92, %93, %94 in 0 : vector<1x4x8xf32>, vector<1x4x8xf32>, vector<1x4x8xf32>, vector<1x4x8xf32> -> vector<4x4x8xf32>
    %96 = vector.extract_strided_slice %77 {offsets = [0, 0], sizes = [4, 8], strides = [1, 1]} : vector<4x32xf32> to vector<4x8xf32>
    %97 = vector.extract_strided_slice %77 {offsets = [0, 8], sizes = [4, 8], strides = [1, 1]} : vector<4x32xf32> to vector<4x8xf32>
    %98 = vector.extract_strided_slice %77 {offsets = [0, 16], sizes = [4, 8], strides = [1, 1]} : vector<4x32xf32> to vector<4x8xf32>
    %99 = vector.extract_strided_slice %77 {offsets = [0, 24], sizes = [4, 8], strides = [1, 1]} : vector<4x32xf32> to vector<4x8xf32>
    %100 = vector.shape_cast %96 : vector<4x8xf32> to vector<1x4x8xf32>
    %101 = vector.shape_cast %97 : vector<4x8xf32> to vector<1x4x8xf32>
    %102 = vector.shape_cast %98 : vector<4x8xf32> to vector<1x4x8xf32>
    %103 = vector.shape_cast %99 : vector<4x8xf32> to vector<1x4x8xf32>
    %104 = tpu.concatenate %100, %101, %102, %103 in 0 : vector<1x4x8xf32>, vector<1x4x8xf32>, vector<1x4x8xf32>, vector<1x4x8xf32> -> vector<4x4x8xf32>
    %105 = arith.truncf %86 : vector<4x4x8xf32> to vector<4x4x8xbf16>
    %106 = arith.truncf %95 : vector<4x4x8xf32> to vector<4x4x8xbf16>
    "tpu.trace_start"() <{level = 10 : i32, message = "hqd,hkd->hqk"}> : () -> ()
    %cst_53 = arith.constant dense<0.000000e+00> : vector<4x4x4xf32>
    %107 = tpu.matmul %105, %106, %cst_53 {dimension_numbers = #tpu.dot_dimension_numbers<[2], [2], [1], [1], [0, 0, 0, 1, 1, 1], [0], [0]>} : vector<4x4x8xbf16>, vector<4x4x8xbf16>, vector<4x4x4xf32> -> vector<4x4x4xf32>
    "tpu.trace_stop"() : () -> ()
    %cst_54 = arith.constant 0.353553385 : f32
    %108 = vector.broadcast %cst_54 : f32 to vector<4x4x4xf32>
    %109 = arith.mulf %107, %108 : vector<4x4x4xf32>
    %110 = tpu.iota {dimensions = array<i32: 0>} : vector<4x4xi32>
    %111 = tpu.iota {dimensions = array<i32: 1>} : vector<4x4xi32>
    %112 = arith.cmpi sle, %111, %110 : vector<4x4xi32>
    %113 = vector.shape_cast %112 : vector<4x4xi1> to vector<1x4x4xi1>
    %cst_55 = arith.constant -1.000000e+30 : f32
    %114 = vector.shape_cast %113 : vector<1x4x4xi1> to vector<1x4x4xi1>
    %115 = vector.broadcast %114 : vector<1x4x4xi1> to vector<4x4x4xi1>
    %116 = vector.broadcast %cst_55 : f32 to vector<4x4x4xf32>
    %117 = arith.select %115, %109, %116 : vector<4x4x4xi1>, vector<4x4x4xf32>
    %cst_56 = arith.constant dense<0xFF800000> : vector<4x4xf32>
    %118 = vector.multi_reduction <maximumf>, %117, %cst_56 [2] : vector<4x4x4xf32> to vector<4x4xf32>
    %119 = vector.shape_cast %118 : vector<4x4xf32> to vector<4x4x1xf32>
    %120 = vector.broadcast %119 : vector<4x4x1xf32> to vector<4x4x4xf32>
    %121 = arith.subf %117, %120 : vector<4x4x4xf32>
    %122 = math.exp %121 : vector<4x4x4xf32>
    %cst_57 = arith.constant dense<0.000000e+00> : vector<4x4xf32>
    %123 = vector.multi_reduction <add>, %122, %cst_57 [2] : vector<4x4x4xf32> to vector<4x4xf32>
    %124 = vector.shape_cast %123 : vector<4x4xf32> to vector<4x4x1xf32>
    %125 = tpu.reciprocal %124 {approx = true} : vector<4x4x1xf32> -> vector<4x4x1xf32>
    %126 = vector.broadcast %125 : vector<4x4x1xf32> to vector<4x4x4xf32>
    %127 = arith.mulf %122, %126 : vector<4x4x4xf32>
    %128 = arith.truncf %127 : vector<4x4x4xf32> to vector<4x4x4xbf16>
    %129 = arith.truncf %104 : vector<4x4x8xf32> to vector<4x4x8xbf16>
    "tpu.trace_start"() <{level = 10 : i32, message = "hqk,hkd->hqd"}> : () -> ()
    %cst_58 = arith.constant dense<0.000000e+00> : vector<4x4x8xf32>
    %130 = tpu.matmul %128, %129, %cst_58 {dimension_numbers = #tpu.dot_dimension_numbers<[2], [1], [1], [2], [0, 0, 0, 1, 1, 2], [0], [0]>} : vector<4x4x4xbf16>, vector<4x4x8xbf16>, vector<4x4x8xf32> -> vector<4x4x8xf32>
    "tpu.trace_stop"() : () -> ()
    %131 = vector.extract_strided_slice %130 {offsets = [0, 0, 0], sizes = [1, 4, 8], strides = [1, 1, 1]} : vector<4x4x8xf32> to vector<1x4x8xf32>
    %132 = vector.shape_cast %131 : vector<1x4x8xf32> to vector<4x8xf32>
    %133 = vector.extract_strided_slice %130 {offsets = [1, 0, 0], sizes = [1, 4, 8], strides = [1, 1, 1]} : vector<4x4x8xf32> to vector<1x4x8xf32>
    %134 = vector.shape_cast %133 : vector<1x4x8xf32> to vector<4x8xf32>
    %135 = vector.extract_strided_slice %130 {offsets = [2, 0, 0], sizes = [1, 4, 8], strides = [1, 1, 1]} : vector<4x4x8xf32> to vector<1x4x8xf32>
    %136 = vector.shape_cast %135 : vector<1x4x8xf32> to vector<4x8xf32>
    %137 = vector.extract_strided_slice %130 {offsets = [3, 0, 0], sizes = [1, 4, 8], strides = [1, 1, 1]} : vector<4x4x8xf32> to vector<1x4x8xf32>
    %138 = vector.shape_cast %137 : vector<1x4x8xf32> to vector<4x8xf32>
    %139 = tpu.concatenate %132, %134, %136, %138 in 1 : vector<4x8xf32>, vector<4x8xf32>, vector<4x8xf32>, vector<4x8xf32> -> vector<4x32xf32>
    %140 = arith.truncf %139 : vector<4x32xf32> to vector<4x32xbf16>
    %cst_59 = arith.constant dense<0.000000e+00> : vector<4x32xf32>
    %141 = tpu.matmul %140, %14, %cst_59 {dimension_numbers = #tpu.dot_dimension_numbers<[1], [0], [0], [1], [0, 0, 1, 1], [], []>} : vector<4x32xbf16>, vector<32x32xbf16>, vector<4x32xf32> -> vector<4x32xf32>
    %142 = vector.broadcast %15 : vector<1x32xf32> to vector<4x32xf32>
    %143 = arith.addf %141, %142 : vector<4x32xf32>
    %144 = arith.addf %1, %143 : vector<4x32xf32>
    %cst_60 = arith.constant dense<0.000000e+00> : vector<4xf32>
    %145 = vector.multi_reduction <add>, %144, %cst_60 [1] : vector<4x32xf32> to vector<4xf32>
    %146 = vector.shape_cast %145 : vector<4xf32> to vector<4x1xf32>
    %cst_61 = arith.constant 3.200000e+01 : f32
    %147 = vector.broadcast %cst_61 : f32 to vector<4x1xf32>
    %148 = arith.divf %146, %147 : vector<4x1xf32>
    %149 = vector.broadcast %148 : vector<4x1xf32> to vector<4x32xf32>
    %150 = arith.subf %144, %149 : vector<4x32xf32>
    %151 = arith.mulf %150, %150 : vector<4x32xf32>
    %cst_62 = arith.constant dense<0.000000e+00> : vector<4xf32>
    %152 = vector.multi_reduction <add>, %151, %cst_62 [1] : vector<4x32xf32> to vector<4xf32>
    %153 = vector.shape_cast %152 : vector<4xf32> to vector<4x1xf32>
    %cst_63 = arith.constant 3.200000e+01 : f32
    %154 = vector.broadcast %cst_63 : f32 to vector<4x1xf32>
    %155 = arith.divf %153, %154 : vector<4x1xf32>
    %156 = vector.broadcast %148 : vector<4x1xf32> to vector<4x32xf32>
    %157 = arith.subf %144, %156 : vector<4x32xf32>
    %cst_64 = arith.constant 9.99999974E-6 : f32
    %158 = vector.broadcast %cst_64 : f32 to vector<4x1xf32>
    %159 = arith.addf %155, %158 : vector<4x1xf32>
    %160 = math.rsqrt %159 : vector<4x1xf32>
    %161 = vector.broadcast %160 : vector<4x1xf32> to vector<4x32xf32>
    %162 = arith.mulf %157, %161 : vector<4x32xf32>
    %163 = vector.broadcast %16 : vector<1x32xf32> to vector<4x32xf32>
    %164 = arith.mulf %162, %163 : vector<4x32xf32>
    %165 = vector.broadcast %17 : vector<1x32xf32> to vector<4x32xf32>
    %166 = arith.addf %164, %165 : vector<4x32xf32>
    %167 = arith.truncf %166 : vector<4x32xf32> to vector<4x32xbf16>
    %cst_65 = arith.constant dense<0.000000e+00> : vector<4x128xf32>
    %168 = tpu.matmul %167, %18, %cst_65 {dimension_numbers = #tpu.dot_dimension_numbers<[1], [0], [0], [1], [0, 0, 1, 1], [], []>} : vector<4x32xbf16>, vector<32x128xbf16>, vector<4x128xf32> -> vector<4x128xf32>
    %169 = vector.broadcast %19 : vector<1x128xf32> to vector<4x128xf32>
    %170 = arith.addf %168, %169 : vector<4x128xf32>
    %171 = arith.mulf %170, %170 : vector<4x128xf32>
    %172 = arith.mulf %170, %171 : vector<4x128xf32>
    %cst_66 = arith.constant 4.471500e-02 : f32
    %173 = vector.broadcast %cst_66 : f32 to vector<4x128xf32>
    %174 = arith.mulf %173, %172 : vector<4x128xf32>
    %175 = arith.addf %170, %174 : vector<4x128xf32>
    %cst_67 = arith.constant 0.797884583 : f32
    %176 = vector.broadcast %cst_67 : f32 to vector<4x128xf32>
    %177 = arith.mulf %176, %175 : vector<4x128xf32>
    %178 = math.tanh %177 : vector<4x128xf32>
    %cst_68 = arith.constant 1.000000e+00 : f32
    %179 = vector.broadcast %cst_68 : f32 to vector<4x128xf32>
    %180 = arith.addf %179, %178 : vector<4x128xf32>
    %cst_69 = arith.constant 5.000000e-01 : f32
    %181 = vector.broadcast %cst_69 : f32 to vector<4x128xf32>
    %182 = arith.mulf %181, %180 : vector<4x128xf32>
    %183 = arith.mulf %170, %182 : vector<4x128xf32>
    %184 = arith.truncf %183 : vector<4x128xf32> to vector<4x128xbf16>
    %cst_70 = arith.constant dense<0.000000e+00> : vector<4x32xf32>
    %185 = tpu.matmul %184, %20, %cst_70 {dimension_numbers = #tpu.dot_dimension_numbers<[1], [0], [0], [1], [0, 0, 1, 1], [], []>} : vector<4x128xbf16>, vector<128x32xbf16>, vector<4x32xf32> -> vector<4x32xf32>
    %186 = vector.broadcast %21 : vector<1x32xf32> to vector<4x32xf32>
    %187 = arith.addf %185, %186 : vector<4x32xf32>
    %188 = arith.addf %144, %187 : vector<4x32xf32>
    %c0_71 = arith.constant 0 : index
    %c0_72 = arith.constant 0 : index
    %c0_73 = arith.constant 0 : index
    %189 = vector.load %arg21[%c0_71, %c0_72, %c0_73] : memref<1x4x32xf32, #tpu.memory_space<vmem>>, vector<1x4x32xf32>
    %190 = vector.shape_cast %189 : vector<1x4x32xf32> to vector<4x32xf32>
    %191 = vector.shape_cast %188 : vector<4x32xf32> to vector<1x4x32xf32>
    tpu.vector_store %arg21[%c0_71, %c0_72, %c0_73], %191 {strides = array<i32>} : memref<1x4x32xf32, #tpu.memory_space<vmem>>, vector<1x4x32xf32>,
    return
  }
  func.func @transform_0(%arg0: i32) -> (i32, i32, i32) {
    %c0_i32 = arith.constant 0 : i32
    %c0_i32_0 = arith.constant 0 : i32
    %c0_i32_1 = arith.constant 0 : i32
    return %arg0, %c0_i32, %c0_i32_0 : i32, i32, i32
  }
  func.func @transform_1(%arg0: i32) -> (i32, i32, i32) {
    %c0_i32 = arith.constant 0 : i32
    %c0_i32_0 = arith.constant 0 : i32
    %c0_i32_1 = arith.constant 0 : i32
    return %arg0, %c0_i32, %c0_i32_0 : i32, i32, i32
  }
  func.func @transform_2(%arg0: i32) -> (i32, i32) {
    %c0_i32 = arith.constant 0 : i32
    %c0_i32_0 = arith.constant 0 : i32
    %c0_i32_1 = arith.constant 0 : i32
    return %c0_i32, %c0_i32_0 : i32, i32
  }
  func.func @transform_3(%arg0: i32) -> (i32, i32) {
    %c0_i32 = arith.constant 0 : i32
    %c0_i32_0 = arith.constant 0 : i32
    %c0_i32_1 = arith.constant 0 : i32
    return %c0_i32, %c0_i32_0 : i32, i32
  }
  func.func @transform_4(%arg0: i32) -> (i32, i32) {
    %c0_i32 = arith.constant 0 : i32
    %c0_i32_0 = arith.constant 0 : i32
    %c0_i32_1 = arith.constant 0 : i32
    return %c0_i32, %c0_i32_0 : i32, i32
  }
  func.func @transform_5(%arg0: i32) -> (i32, i32) {
    %c0_i32 = arith.constant 0 : i32
    %c0_i32_0 = arith.constant 0 : i32
    %c0_i32_1 = arith.constant 0 : i32
    return %c0_i32, %c0_i32_0 : i32, i32
  }
  func.func @transform_6(%arg0: i32) -> (i32, i32) {
    %c0_i32 = arith.constant 0 : i32
    %c0_i32_0 = arith.constant 0 : i32
    %c0_i32_1 = arith.constant 0 : i32
    return %c0_i32, %c0_i32_0 : i32, i32
  }
  func.func @transform_7(%arg0: i32) -> (i32, i32) {
    %c0_i32 = arith.constant 0 : i32
    %c0_i32_0 = arith.constant 0 : i32
    %c0_i32_1 = arith.constant 0 : i32
    return %c0_i32, %c0_i32_0 : i32, i32
  }
  func.func @transform_8(%arg0: i32) -> (i32, i32) {
    %c0_i32 = arith.constant 0 : i32
    %c0_i32_0 = arith.constant 0 : i32
    %c0_i32_1 = arith.constant 0 : i32
    return %c0_i32, %c0_i32_0 : i32, i32
  }
  func.func @transform_9(%arg0: i32) -> (i32, i32) {
    %c0_i32 = arith.constant 0 : i32
    %c0_i32_0 = arith.constant 0 : i32
    %c0_i32_1 = arith.constant 0 : i32
    return %c0_i32, %c0_i32_0 : i32, i32
  }
  func.func @transform_10(%arg0: i32) -> (i32, i32) {
    %c0_i32 = arith.constant 0 : i32
    %c0_i32_0 = arith.constant 0 : i32
    %c0_i32_1 = arith.constant 0 : i32
    return %c0_i32, %c0_i32_0 : i32, i32
  }
  func.func @transform_11(%arg0: i32) -> (i32, i32) {
    %c0_i32 = arith.constant 0 : i32
    %c0_i32_0 = arith.constant 0 : i32
    %c0_i32_1 = arith.constant 0 : i32
    return %c0_i32, %c0_i32_0 : i32, i32
  }
  func.func @transform_12(%arg0: i32) -> (i32, i32) {
    %c0_i32 = arith.constant 0 : i32
    %c0_i32_0 = arith.constant 0 : i32
    %c0_i32_1 = arith.constant 0 : i32
    return %c0_i32, %c0_i32_0 : i32, i32
  }
  func.func @transform_13(%arg0: i32) -> (i32, i32) {
    %c0_i32 = arith.constant 0 : i32
    %c0_i32_0 = arith.constant 0 : i32
    %c0_i32_1 = arith.constant 0 : i32
    return %c0_i32, %c0_i32_0 : i32, i32
  }
  func.func @transform_14(%arg0: i32) -> (i32, i32) {
    %c0_i32 = arith.constant 0 : i32
    %c0_i32_0 = arith.constant 0 : i32
    %c0_i32_1 = arith.constant 0 : i32
    return %c0_i32, %c0_i32_0 : i32, i32
  }
  func.func @transform_15(%arg0: i32) -> (i32, i32) {
    %c0_i32 = arith.constant 0 : i32
    %c0_i32_0 = arith.constant 0 : i32
    %c0_i32_1 = arith.constant 0 : i32
    return %c0_i32, %c0_i32_0 : i32, i32
  }
  func.func @transform_16(%arg0: i32) -> (i32, i32) {
    %c0_i32 = arith.constant 0 : i32
    %c0_i32_0 = arith.constant 0 : i32
    %c0_i32_1 = arith.constant 0 : i32
    return %c0_i32, %c0_i32_0 : i32, i32
  }
  func.func @transform_17(%arg0: i32) -> (i32, i32) {
    %c0_i32 = arith.constant 0 : i32
    %c0_i32_0 = arith.constant 0 : i32
    %c0_i32_1 = arith.constant 0 : i32
    return %c0_i32, %c0_i32_0 : i32, i32
  }
  func.func @transform_18(%arg0: i32) -> (i32, i32) {
    %c0_i32 = arith.constant 0 : i32
    %c0_i32_0 = arith.constant 0 : i32
    %c0_i32_1 = arith.constant 0 : i32
    return %c0_i32, %c0_i32_0 : i32, i32
  }
  func.func @transform_19(%arg0: i32) -> (i32, i32) {
    %c0_i32 = arith.constant 0 : i32
    %c0_i32_0 = arith.constant 0 : i32
    %c0_i32_1 = arith.constant 0 : i32
    return %c0_i32, %c0_i32_0 : i32, i32
  }
  func.func @transform_20(%arg0: i32) -> (i32, i32, i32) {
    %c0_i32 = arith.constant 0 : i32
    %c0_i32_0 = arith.constant 0 : i32
    %c0_i32_1 = arith.constant 0 : i32
    return %arg0, %c0_i32, %c0_i32_0 : i32, i32, i32
  }
}

module attributes {stable_mosaic.version = 11 : i64} {
  func.func @_attn_block_kernel(%arg0: i32, %arg1: memref<1x4x32xf32, #tpu.memory_space<vmem>>, %arg2: memref<1x48x32xf32, #tpu.memory_space<vmem>>, %arg3: memref<1x32xf32, #tpu.memory_space<vmem>>, %arg4: memref<1x32xf32, #tpu.memory_space<vmem>>, %arg5: memref<1x32xf32, #tpu.memory_space<vmem>>, %arg6: memref<1x32xf32, #tpu.memory_space<vmem>>, %arg7: memref<32x32xbf16, #tpu.memory_space<vmem>>, %arg8: memref<1x32xf32, #tpu.memory_space<vmem>>, %arg9: memref<32x32xbf16, #tpu.memory_space<vmem>>, %arg10: memref<1x32xf32, #tpu.memory_space<vmem>>, %arg11: memref<32x32xbf16, #tpu.memory_space<vmem>>, %arg12: memref<1x32xf32, #tpu.memory_space<vmem>>, %arg13: memref<32x32xbf16, #tpu.memory_space<vmem>>, %arg14: memref<1x32xf32, #tpu.memory_space<vmem>>, %arg15: memref<1x32xf32, #tpu.memory_space<vmem>>, %arg16: memref<1x32xf32, #tpu.memory_space<vmem>>, %arg17: memref<32x128xbf16, #tpu.memory_space<vmem>>, %arg18: memref<1x128xf32, #tpu.memory_space<vmem>>, %arg19: memref<128x32xbf16, #tpu.memory_space<vmem>>, %arg20: memref<1x32xf32, #tpu.memory_space<vmem>>, %arg21: memref<1x4x32xf32, #tpu.memory_space<vmem>>) attributes {dimension_semantics = [#tpu.dimension_semantics<parallel>], iteration_bounds = array<i64: 2>, scalar_prefetch = 0 : i64, scratch_operands = 0 : i64, tpu.core_type = #tpu.core_type<tc>, window_params = [{transform_indices = @transform_0, window_bounds = array<i64: 1, 4, 32>}, {transform_indices = @transform_1, window_bounds = array<i64: 1, 48, 32>}, {pipeline_mode = #tpu.pipeline_mode<synchronous>, transform_indices = @transform_2, window_bounds = array<i64: 1, 32>}, {pipeline_mode = #tpu.pipeline_mode<synchronous>, transform_indices = @transform_3, window_bounds = array<i64: 1, 32>}, {pipeline_mode = #tpu.pipeline_mode<synchronous>, transform_indices = @transform_4, window_bounds = array<i64: 1, 32>}, {pipeline_mode = #tpu.pipeline_mode<synchronous>, transform_indices = @transform_5, window_bounds = array<i64: 1, 32>}, {pipeline_mode = #tpu.pipeline_mode<synchronous>, transform_indices = @transform_6, window_bounds = array<i64: 32, 32>}, {pipeline_mode = #tpu.pipeline_mode<synchronous>, transform_indices = @transform_7, window_bounds = array<i64: 1, 32>}, {pipeline_mode = #tpu.pipeline_mode<synchronous>, transform_indices = @transform_8, window_bounds = array<i64: 32, 32>}, {pipeline_mode = #tpu.pipeline_mode<synchronous>, transform_indices = @transform_9, window_bounds = array<i64: 1, 32>}, {pipeline_mode = #tpu.pipeline_mode<synchronous>, transform_indices = @transform_10, window_bounds = array<i64: 32, 32>}, {pipeline_mode = #tpu.pipeline_mode<synchronous>, transform_indices = @transform_11, window_bounds = array<i64: 1, 32>}, {pipeline_mode = #tpu.pipeline_mode<synchronous>, transform_indices = @transform_12, window_bounds = array<i64: 32, 32>}, {pipeline_mode = #tpu.pipeline_mode<synchronous>, transform_indices = @transform_13, window_bounds = array<i64: 1, 32>}, {pipeline_mode = #tpu.pipeline_mode<synchronous>, transform_indices = @transform_14, window_bounds = array<i64: 1, 32>}, {pipeline_mode = #tpu.pipeline_mode<synchronous>, transform_indices = @transform_15, window_bounds = array<i64: 1, 32>}, {pipeline_mode = #tpu.pipeline_mode<synchronous>, transform_indices = @transform_16, window_bounds = array<i64: 32, 128>}, {pipeline_mode = #tpu.pipeline_mode<synchronous>, transform_indices = @transform_17, window_bounds = array<i64: 1, 128>}, {pipeline_mode = #tpu.pipeline_mode<synchronous>, transform_indices = @transform_18, window_bounds = array<i64: 128, 32>}, {pipeline_mode = #tpu.pipeline_mode<synchronous>, transform_indices = @transform_19, window_bounds = array<i64: 1, 32>}, {transform_indices = @transform_20, window_bounds = array<i64: 1, 4, 32>}]} {
    %c0 = arith.constant 0 : index
    %c0_0 = arith.constant 0 : index
    %c0_1 = arith.constant 0 : index
    %0 = vector.load %arg1[%c0, %c0_0, %c0_1] : memref<1x4x32xf32, #tpu.memory_space<vmem>>, vector<1x4x32xf32>
    %1 = vector.shape_cast %0 : vector<1x4x32xf32> to vector<4x32xf32>
    %c0_2 = arith.constant 0 : index
    %c0_3 = arith.constant 0 : index
    %c0_4 = arith.constant 0 : index
    %2 = vector.load %arg2[%c0_2, %c0_3, %c0_4] : memref<1x48x32xf32, #tpu.memory_space<vmem>>, vector<1x48x32xf32>
    %3 = vector.shape_cast %2 : vector<1x48x32xf32> to vector<48x32xf32>
    %c0_5 = arith.constant 0 : index
    %c0_6 = arith.constant 0 : index
    %4 = vector.load %arg3[%c0_5, %c0_6] : memref<1x32xf32, #tpu.memory_space<vmem>>, vector<1x32xf32>
    %c0_7 = arith.constant 0 : index
    %c0_8 = arith.constant 0 : index
    %5 = vector.load %arg4[%c0_7, %c0_8] : memref<1x32xf32, #tpu.memory_space<vmem>>, vector<1x32xf32>
    %c0_9 = arith.constant 0 : index
    %c0_10 = arith.constant 0 : index
    %6 = vector.load %arg5[%c0_9, %c0_10] : memref<1x32xf32, #tpu.memory_space<vmem>>, vector<1x32xf32>
    %c0_11 = arith.constant 0 : index
    %c0_12 = arith.constant 0 : index
    %7 = vector.load %arg6[%c0_11, %c0_12] : memref<1x32xf32, #tpu.memory_space<vmem>>, vector<1x32xf32>
    %c0_13 = arith.constant 0 : index
    %c0_14 = arith.constant 0 : index
    %8 = vector.load %arg7[%c0_13, %c0_14] : memref<32x32xbf16, #tpu.memory_space<vmem>>, vector<32x32xbf16>
    %c0_15 = arith.constant 0 : index
    %c0_16 = arith.constant 0 : index
    %9 = vector.load %arg8[%c0_15, %c0_16] : memref<1x32xf32, #tpu.memory_space<vmem>>, vector<1x32xf32>
    %c0_17 = arith.constant 0 : index
    %c0_18 = arith.constant 0 : index
    %10 = vector.load %arg9[%c0_17, %c0_18] : memref<32x32xbf16, #tpu.memory_space<vmem>>, vector<32x32xbf16>
    %c0_19 = arith.constant 0 : index
    %c0_20 = arith.constant 0 : index
    %11 = vector.load %arg10[%c0_19, %c0_20] : memref<1x32xf32, #tpu.memory_space<vmem>>, vector<1x32xf32>
    %c0_21 = arith.constant 0 : index
    %c0_22 = arith.constant 0 : index
    %12 = vector.load %arg11[%c0_21, %c0_22] : memref<32x32xbf16, #tpu.memory_space<vmem>>, vector<32x32xbf16>
    %c0_23 = arith.constant 0 : index
    %c0_24 = arith.constant 0 : index
    %13 = vector.load %arg12[%c0_23, %c0_24] : memref<1x32xf32, #tpu.memory_space<vmem>>, vector<1x32xf32>
    %c0_25 = arith.constant 0 : index
    %c0_26 = arith.constant 0 : index
    %14 = vector.load %arg13[%c0_25, %c0_26] : memref<32x32xbf16, #tpu.memory_space<vmem>>, vector<32x32xbf16>
    %c0_27 = arith.constant 0 : index
    %c0_28 = arith.constant 0 : index
    %15 = vector.load %arg14[%c0_27, %c0_28] : memref<1x32xf32, #tpu.memory_space<vmem>>, vector<1x32xf32>
    %c0_29 = arith.constant 0 : index
    %c0_30 = arith.constant 0 : index
    %16 = vector.load %arg15[%c0_29, %c0_30] : memref<1x32xf32, #tpu.memory_space<vmem>>, vector<1x32xf32>
    %c0_31 = arith.constant 0 : index
    %c0_32 = arith.constant 0 : index
    %17 = vector.load %arg16[%c0_31, %c0_32] : memref<1x32xf32, #tpu.memory_space<vmem>>, vector<1x32xf32>
    %c0_33 = arith.constant 0 : index
    %c0_34 = arith.constant 0 : index
    %18 = vector.load %arg17[%c0_33, %c0_34] : memref<32x128xbf16, #tpu.memory_space<vmem>>, vector<32x128xbf16>
    %c0_35 = arith.constant 0 : index
    %c0_36 = arith.constant 0 : index
    %19 = vector.load %arg18[%c0_35, %c0_36] : memref<1x128xf32, #tpu.memory_space<vmem>>, vector<1x128xf32>
    %c0_37 = arith.constant 0 : index
    %c0_38 = arith.constant 0 : index
    %20 = vector.load %arg19[%c0_37, %c0_38] : memref<128x32xbf16, #tpu.memory_space<vmem>>, vector<128x32xbf16>
    %c0_39 = arith.constant 0 : index
    %c0_40 = arith.constant 0 : index
    %21 = vector.load %arg20[%c0_39, %c0_40] : memref<1x32xf32, #tpu.memory_space<vmem>>, vector<1x32xf32>
    %cst = arith.constant dense<0.000000e+00> : vector<4xf32>
    %22 = vector.multi_reduction <add>, %1, %cst [1] : vector<4x32xf32> to vector<4xf32>
    %23 = vector.shape_cast %22 : vector<4xf32> to vector<4x1xf32>
    %cst_41 = arith.constant 3.200000e+01 : f32
    %24 = vector.broadcast %cst_41 : f32 to vector<4x1xf32>
    %25 = arith.divf %23, %24 : vector<4x1xf32>
    %26 = vector.broadcast %25 : vector<4x1xf32> to vector<4x32xf32>
    %27 = arith.subf %1, %26 : vector<4x32xf32>
    %28 = arith.mulf %27, %27 : vector<4x32xf32>
    %cst_42 = arith.constant dense<0.000000e+00> : vector<4xf32>
    %29 = vector.multi_reduction <add>, %28, %cst_42 [1] : vector<4x32xf32> to vector<4xf32>
    %30 = vector.shape_cast %29 : vector<4xf32> to vector<4x1xf32>
    %cst_43 = arith.constant 3.200000e+01 : f32
    %31 = vector.broadcast %cst_43 : f32 to vector<4x1xf32>
    %32 = arith.divf %30, %31 : vector<4x1xf32>
    %33 = vector.broadcast %25 : vector<4x1xf32> to vector<4x32xf32>
    %34 = arith.subf %1, %33 : vector<4x32xf32>
    %cst_44 = arith.constant 9.99999974E-6 : f32
    %35 = vector.broadcast %cst_44 : f32 to vector<4x1xf32>
    %36 = arith.addf %32, %35 : vector<4x1xf32>
    %37 = math.rsqrt %36 : vector<4x1xf32>
    %38 = vector.broadcast %37 : vector<4x1xf32> to vector<4x32xf32>
    %39 = arith.mulf %34, %38 : vector<4x32xf32>
    %40 = vector.broadcast %4 : vector<1x32xf32> to vector<4x32xf32>
    %41 = arith.mulf %39, %40 : vector<4x32xf32>
    %42 = vector.broadcast %5 : vector<1x32xf32> to vector<4x32xf32>
    %43 = arith.addf %41, %42 : vector<4x32xf32>
    %cst_45 = arith.constant dense<0.000000e+00> : vector<48xf32>
    %44 = vector.multi_reduction <add>, %3, %cst_45 [1] : vector<48x32xf32> to vector<48xf32>
    %45 = vector.shape_cast %44 : vector<48xf32> to vector<48x1xf32>
    %cst_46 = arith.constant 3.200000e+01 : f32
    %46 = vector.broadcast %cst_46 : f32 to vector<48x1xf32>
    %47 = arith.divf %45, %46 : vector<48x1xf32>
    %48 = vector.broadcast %47 : vector<48x1xf32> to vector<48x32xf32>
    %49 = arith.subf %3, %48 : vector<48x32xf32>
    %50 = arith.mulf %49, %49 : vector<48x32xf32>
    %cst_47 = arith.constant dense<0.000000e+00> : vector<48xf32>
    %51 = vector.multi_reduction <add>, %50, %cst_47 [1] : vector<48x32xf32> to vector<48xf32>
    %52 = vector.shape_cast %51 : vector<48xf32> to vector<48x1xf32>
    %cst_48 = arith.constant 3.200000e+01 : f32
    %53 = vector.broadcast %cst_48 : f32 to vector<48x1xf32>
    %54 = arith.divf %52, %53 : vector<48x1xf32>
    %55 = vector.broadcast %47 : vector<48x1xf32> to vector<48x32xf32>
    %56 = arith.subf %3, %55 : vector<48x32xf32>
    %cst_49 = arith.constant 9.99999974E-6 : f32
    %57 = vector.broadcast %cst_49 : f32 to vector<48x1xf32>
    %58 = arith.addf %54, %57 : vector<48x1xf32>
    %59 = math.rsqrt %58 : vector<48x1xf32>
    %60 = vector.broadcast %59 : vector<48x1xf32> to vector<48x32xf32>
    %61 = arith.mulf %56, %60 : vector<48x32xf32>
    %62 = vector.broadcast %6 : vector<1x32xf32> to vector<48x32xf32>
    %63 = arith.mulf %61, %62 : vector<48x32xf32>
    %64 = vector.broadcast %7 : vector<1x32xf32> to vector<48x32xf32>
    %65 = arith.addf %63, %64 : vector<48x32xf32>
    %66 = arith.truncf %43 : vector<4x32xf32> to vector<4x32xbf16>
    %cst_50 = arith.constant dense<0.000000e+00> : vector<4x32xf32>
    %67 = tpu.matmul %66, %8, %cst_50 {dimension_numbers = #tpu.dot_dimension_numbers<[1], [0], [0], [1], [0, 0, 1, 1], [], []>} : vector<4x32xbf16>, vector<32x32xbf16>, vector<4x32xf32> -> vector<4x32xf32>
    %68 = vector.broadcast %9 : vector<1x32xf32> to vector<4x32xf32>
    %69 = arith.addf %67, %68 : vector<4x32xf32>
    %70 = arith.truncf %65 : vector<48x32xf32> to vector<48x32xbf16>
    %cst_51 = arith.constant dense<0.000000e+00> : vector<48x32xf32>
    %71 = tpu.matmul %70, %10, %cst_51 {dimension_numbers = #tpu.dot_dimension_numbers<[1], [0], [0], [1], [0, 0, 1, 1], [], []>} : vector<48x32xbf16>, vector<32x32xbf16>, vector<48x32xf32> -> vector<48x32xf32>
    %72 = vector.broadcast %11 : vector<1x32xf32> to vector<48x32xf32>
    %73 = arith.addf %71, %72 : vector<48x32xf32>
    %74 = arith.truncf %65 : vector<48x32xf32> to vector<48x32xbf16>
    %cst_52 = arith.constant dense<0.000000e+00> : vector<48x32xf32>
    %75 = tpu.matmul %74, %12, %cst_52 {dimension_numbers = #tpu.dot_dimension_numbers<[1], [0], [0], [1], [0, 0, 1, 1], [], []>} : vector<48x32xbf16>, vector<32x32xbf16>, vector<48x32xf32> -> vector<48x32xf32>
    %76 = vector.broadcast %13 : vector<1x32xf32> to vector<48x32xf32>
    %77 = arith.addf %75, %76 : vector<48x32xf32>
    %78 = vector.extract_strided_slice %69 {offsets = [0, 0], sizes = [4, 8], strides = [1, 1]} : vector<4x32xf32> to vector<4x8xf32>
    %79 = vector.extract_strided_slice %69 {offsets = [0, 8], sizes = [4, 8], strides = [1, 1]} : vector<4x32xf32> to vector<4x8xf32>
    %80 = vector.extract_strided_slice %69 {offsets = [0, 16], sizes = [4, 8], strides = [1, 1]} : vector<4x32xf32> to vector<4x8xf32>
    %81 = vector.extract_strided_slice %69 {offsets = [0, 24], sizes = [4, 8], strides = [1, 1]} : vector<4x32xf32> to vector<4x8xf32>
    %82 = vector.shape_cast %78 : vector<4x8xf32> to vector<1x4x8xf32>
    %83 = vector.shape_cast %79 : vector<4x8xf32> to vector<1x4x8xf32>
    %84 = vector.shape_cast %80 : vector<4x8xf32> to vector<1x4x8xf32>
    %85 = vector.shape_cast %81 : vector<4x8xf32> to vector<1x4x8xf32>
    %86 = tpu.concatenate %82, %83, %84, %85 in 0 : vector<1x4x8xf32>, vector<1x4x8xf32>, vector<1x4x8xf32>, vector<1x4x8xf32> -> vector<4x4x8xf32>
    %87 = vector.extract_strided_slice %73 {offsets = [0, 0], sizes = [48, 8], strides = [1, 1]} : vector<48x32xf32> to vector<48x8xf32>
    %88 = vector.extract_strided_slice %73 {offsets = [0, 8], sizes = [48, 8], strides = [1, 1]} : vector<48x32xf32> to vector<48x8xf32>
    %89 = vector.extract_strided_slice %73 {offsets = [0, 16], sizes = [48, 8], strides = [1, 1]} : vector<48x32xf32> to vector<48x8xf32>
    %90 = vector.extract_strided_slice %73 {offsets = [0, 24], sizes = [48, 8], strides = [1, 1]} : vector<48x32xf32> to vector<48x8xf32>
    %91 = vector.shape_cast %87 : vector<48x8xf32> to vector<1x48x8xf32>
    %92 = vector.shape_cast %88 : vector<48x8xf32> to vector<1x48x8xf32>
    %93 = vector.shape_cast %89 : vector<48x8xf32> to vector<1x48x8xf32>
    %94 = vector.shape_cast %90 : vector<48x8xf32> to vector<1x48x8xf32>
    %95 = tpu.concatenate %91, %92, %93, %94 in 0 : vector<1x48x8xf32>, vector<1x48x8xf32>, vector<1x48x8xf32>, vector<1x48x8xf32> -> vector<4x48x8xf32>
    %96 = vector.extract_strided_slice %77 {offsets = [0, 0], sizes = [48, 8], strides = [1, 1]} : vector<48x32xf32> to vector<48x8xf32>
    %97 = vector.extract_strided_slice %77 {offsets = [0, 8], sizes = [48, 8], strides = [1, 1]} : vector<48x32xf32> to vector<48x8xf32>
    %98 = vector.extract_strided_slice %77 {offsets = [0, 16], sizes = [48, 8], strides = [1, 1]} : vector<48x32xf32> to vector<48x8xf32>
    %99 = vector.extract_strided_slice %77 {offsets = [0, 24], sizes = [48, 8], strides = [1, 1]} : vector<48x32xf32> to vector<48x8xf32>
    %100 = vector.shape_cast %96 : vector<48x8xf32> to vector<1x48x8xf32>
    %101 = vector.shape_cast %97 : vector<48x8xf32> to vector<1x48x8xf32>
    %102 = vector.shape_cast %98 : vector<48x8xf32> to vector<1x48x8xf32>
    %103 = vector.shape_cast %99 : vector<48x8xf32> to vector<1x48x8xf32>
    %104 = tpu.concatenate %100, %101, %102, %103 in 0 : vector<1x48x8xf32>, vector<1x48x8xf32>, vector<1x48x8xf32>, vector<1x48x8xf32> -> vector<4x48x8xf32>
    %105 = arith.truncf %86 : vector<4x4x8xf32> to vector<4x4x8xbf16>
    %106 = arith.truncf %95 : vector<4x48x8xf32> to vector<4x48x8xbf16>
    "tpu.trace_start"() <{level = 10 : i32, message = "hqd,hkd->hqk"}> : () -> ()
    %cst_53 = arith.constant dense<0.000000e+00> : vector<4x4x48xf32>
    %107 = tpu.matmul %105, %106, %cst_53 {dimension_numbers = #tpu.dot_dimension_numbers<[2], [2], [1], [1], [0, 0, 0, 1, 1, 1], [0], [0]>} : vector<4x4x8xbf16>, vector<4x48x8xbf16>, vector<4x4x48xf32> -> vector<4x4x48xf32>
    "tpu.trace_stop"() : () -> ()
    %cst_54 = arith.constant 0.353553385 : f32
    %108 = vector.broadcast %cst_54 : f32 to vector<4x4x48xf32>
    %109 = arith.mulf %107, %108 : vector<4x4x48xf32>
    %cst_55 = arith.constant dense<0xFF800000> : vector<4x4xf32>
    %110 = vector.multi_reduction <maximumf>, %109, %cst_55 [2] : vector<4x4x48xf32> to vector<4x4xf32>
    %111 = vector.shape_cast %110 : vector<4x4xf32> to vector<4x4x1xf32>
    %112 = vector.broadcast %111 : vector<4x4x1xf32> to vector<4x4x48xf32>
    %113 = arith.subf %109, %112 : vector<4x4x48xf32>
    %114 = math.exp %113 : vector<4x4x48xf32>
    %cst_56 = arith.constant dense<0.000000e+00> : vector<4x4xf32>
    %115 = vector.multi_reduction <add>, %114, %cst_56 [2] : vector<4x4x48xf32> to vector<4x4xf32>
    %116 = vector.shape_cast %115 : vector<4x4xf32> to vector<4x4x1xf32>
    %117 = tpu.reciprocal %116 {approx = true} : vector<4x4x1xf32> -> vector<4x4x1xf32>
    %118 = vector.broadcast %117 : vector<4x4x1xf32> to vector<4x4x48xf32>
    %119 = arith.mulf %114, %118 : vector<4x4x48xf32>
    %120 = arith.truncf %119 : vector<4x4x48xf32> to vector<4x4x48xbf16>
    %121 = arith.truncf %104 : vector<4x48x8xf32> to vector<4x48x8xbf16>
    "tpu.trace_start"() <{level = 10 : i32, message = "hqk,hkd->hqd"}> : () -> ()
    %cst_57 = arith.constant dense<0.000000e+00> : vector<4x4x8xf32>
    %122 = tpu.matmul %120, %121, %cst_57 {dimension_numbers = #tpu.dot_dimension_numbers<[2], [1], [1], [2], [0, 0, 0, 1, 1, 2], [0], [0]>} : vector<4x4x48xbf16>, vector<4x48x8xbf16>, vector<4x4x8xf32> -> vector<4x4x8xf32>
    "tpu.trace_stop"() : () -> ()
    %123 = vector.extract_strided_slice %122 {offsets = [0, 0, 0], sizes = [1, 4, 8], strides = [1, 1, 1]} : vector<4x4x8xf32> to vector<1x4x8xf32>
    %124 = vector.shape_cast %123 : vector<1x4x8xf32> to vector<4x8xf32>
    %125 = vector.extract_strided_slice %122 {offsets = [1, 0, 0], sizes = [1, 4, 8], strides = [1, 1, 1]} : vector<4x4x8xf32> to vector<1x4x8xf32>
    %126 = vector.shape_cast %125 : vector<1x4x8xf32> to vector<4x8xf32>
    %127 = vector.extract_strided_slice %122 {offsets = [2, 0, 0], sizes = [1, 4, 8], strides = [1, 1, 1]} : vector<4x4x8xf32> to vector<1x4x8xf32>
    %128 = vector.shape_cast %127 : vector<1x4x8xf32> to vector<4x8xf32>
    %129 = vector.extract_strided_slice %122 {offsets = [3, 0, 0], sizes = [1, 4, 8], strides = [1, 1, 1]} : vector<4x4x8xf32> to vector<1x4x8xf32>
    %130 = vector.shape_cast %129 : vector<1x4x8xf32> to vector<4x8xf32>
    %131 = tpu.concatenate %124, %126, %128, %130 in 1 : vector<4x8xf32>, vector<4x8xf32>, vector<4x8xf32>, vector<4x8xf32> -> vector<4x32xf32>
    %132 = arith.truncf %131 : vector<4x32xf32> to vector<4x32xbf16>
    %cst_58 = arith.constant dense<0.000000e+00> : vector<4x32xf32>
    %133 = tpu.matmul %132, %14, %cst_58 {dimension_numbers = #tpu.dot_dimension_numbers<[1], [0], [0], [1], [0, 0, 1, 1], [], []>} : vector<4x32xbf16>, vector<32x32xbf16>, vector<4x32xf32> -> vector<4x32xf32>
    %134 = vector.broadcast %15 : vector<1x32xf32> to vector<4x32xf32>
    %135 = arith.addf %133, %134 : vector<4x32xf32>
    %136 = arith.addf %1, %135 : vector<4x32xf32>
    %cst_59 = arith.constant dense<0.000000e+00> : vector<4xf32>
    %137 = vector.multi_reduction <add>, %136, %cst_59 [1] : vector<4x32xf32> to vector<4xf32>
    %138 = vector.shape_cast %137 : vector<4xf32> to vector<4x1xf32>
    %cst_60 = arith.constant 3.200000e+01 : f32
    %139 = vector.broadcast %cst_60 : f32 to vector<4x1xf32>
    %140 = arith.divf %138, %139 : vector<4x1xf32>
    %141 = vector.broadcast %140 : vector<4x1xf32> to vector<4x32xf32>
    %142 = arith.subf %136, %141 : vector<4x32xf32>
    %143 = arith.mulf %142, %142 : vector<4x32xf32>
    %cst_61 = arith.constant dense<0.000000e+00> : vector<4xf32>
    %144 = vector.multi_reduction <add>, %143, %cst_61 [1] : vector<4x32xf32> to vector<4xf32>
    %145 = vector.shape_cast %144 : vector<4xf32> to vector<4x1xf32>
    %cst_62 = arith.constant 3.200000e+01 : f32
    %146 = vector.broadcast %cst_62 : f32 to vector<4x1xf32>
    %147 = arith.divf %145, %146 : vector<4x1xf32>
    %148 = vector.broadcast %140 : vector<4x1xf32> to vector<4x32xf32>
    %149 = arith.subf %136, %148 : vector<4x32xf32>
    %cst_63 = arith.constant 9.99999974E-6 : f32
    %150 = vector.broadcast %cst_63 : f32 to vector<4x1xf32>
    %151 = arith.addf %147, %150 : vector<4x1xf32>
    %152 = math.rsqrt %151 : vector<4x1xf32>
    %153 = vector.broadcast %152 : vector<4x1xf32> to vector<4x32xf32>
    %154 = arith.mulf %149, %153 : vector<4x32xf32>
    %155 = vector.broadcast %16 : vector<1x32xf32> to vector<4x32xf32>
    %156 = arith.mulf %154, %155 : vector<4x32xf32>
    %157 = vector.broadcast %17 : vector<1x32xf32> to vector<4x32xf32>
    %158 = arith.addf %156, %157 : vector<4x32xf32>
    %159 = arith.truncf %158 : vector<4x32xf32> to vector<4x32xbf16>
    %cst_64 = arith.constant dense<0.000000e+00> : vector<4x128xf32>
    %160 = tpu.matmul %159, %18, %cst_64 {dimension_numbers = #tpu.dot_dimension_numbers<[1], [0], [0], [1], [0, 0, 1, 1], [], []>} : vector<4x32xbf16>, vector<32x128xbf16>, vector<4x128xf32> -> vector<4x128xf32>
    %161 = vector.broadcast %19 : vector<1x128xf32> to vector<4x128xf32>
    %162 = arith.addf %160, %161 : vector<4x128xf32>
    %163 = arith.mulf %162, %162 : vector<4x128xf32>
    %164 = arith.mulf %162, %163 : vector<4x128xf32>
    %cst_65 = arith.constant 4.471500e-02 : f32
    %165 = vector.broadcast %cst_65 : f32 to vector<4x128xf32>
    %166 = arith.mulf %165, %164 : vector<4x128xf32>
    %167 = arith.addf %162, %166 : vector<4x128xf32>
    %cst_66 = arith.constant 0.797884583 : f32
    %168 = vector.broadcast %cst_66 : f32 to vector<4x128xf32>
    %169 = arith.mulf %168, %167 : vector<4x128xf32>
    %170 = math.tanh %169 : vector<4x128xf32>
    %cst_67 = arith.constant 1.000000e+00 : f32
    %171 = vector.broadcast %cst_67 : f32 to vector<4x128xf32>
    %172 = arith.addf %171, %170 : vector<4x128xf32>
    %cst_68 = arith.constant 5.000000e-01 : f32
    %173 = vector.broadcast %cst_68 : f32 to vector<4x128xf32>
    %174 = arith.mulf %173, %172 : vector<4x128xf32>
    %175 = arith.mulf %162, %174 : vector<4x128xf32>
    %176 = arith.truncf %175 : vector<4x128xf32> to vector<4x128xbf16>
    %cst_69 = arith.constant dense<0.000000e+00> : vector<4x32xf32>
    %177 = tpu.matmul %176, %20, %cst_69 {dimension_numbers = #tpu.dot_dimension_numbers<[1], [0], [0], [1], [0, 0, 1, 1], [], []>} : vector<4x128xbf16>, vector<128x32xbf16>, vector<4x32xf32> -> vector<4x32xf32>
    %178 = vector.broadcast %21 : vector<1x32xf32> to vector<4x32xf32>
    %179 = arith.addf %177, %178 : vector<4x32xf32>
    %180 = arith.addf %136, %179 : vector<4x32xf32>
    %c0_70 = arith.constant 0 : index
    %c0_71 = arith.constant 0 : index
    %c0_72 = arith.constant 0 : index
    %181 = vector.load %arg21[%c0_70, %c0_71, %c0_72] : memref<1x4x32xf32, #tpu.memory_space<vmem>>, vector<1x4x32xf32>
    %182 = vector.shape_cast %181 : vector<1x4x32xf32> to vector<4x32xf32>
    %183 = vector.shape_cast %180 : vector<4x32xf32> to vector<1x4x32xf32>
    tpu.vector_store %arg21[%c0_70, %c0_71, %c0_72], %183 {strides = array<i32>} : memref<1x4x32xf32, #tpu.memory_space<vmem>>, vector<1x4x32xf32>,
    return
  }
  func.func @transform_0(%arg0: i32) -> (i32, i32, i32) {
    %c0_i32 = arith.constant 0 : i32
    %c0_i32_0 = arith.constant 0 : i32
    %c0_i32_1 = arith.constant 0 : i32
    return %arg0, %c0_i32, %c0_i32_0 : i32, i32, i32
  }
  func.func @transform_1(%arg0: i32) -> (i32, i32, i32) {
    %c0_i32 = arith.constant 0 : i32
    %c0_i32_0 = arith.constant 0 : i32
    %c0_i32_1 = arith.constant 0 : i32
    return %arg0, %c0_i32, %c0_i32_0 : i32, i32, i32
  }
  func.func @transform_2(%arg0: i32) -> (i32, i32) {
    %c0_i32 = arith.constant 0 : i32
    %c0_i32_0 = arith.constant 0 : i32
    %c0_i32_1 = arith.constant 0 : i32
    return %c0_i32, %c0_i32_0 : i32, i32
  }
  func.func @transform_3(%arg0: i32) -> (i32, i32) {
    %c0_i32 = arith.constant 0 : i32
    %c0_i32_0 = arith.constant 0 : i32
    %c0_i32_1 = arith.constant 0 : i32
    return %c0_i32, %c0_i32_0 : i32, i32
  }
  func.func @transform_4(%arg0: i32) -> (i32, i32) {
    %c0_i32 = arith.constant 0 : i32
    %c0_i32_0 = arith.constant 0 : i32
    %c0_i32_1 = arith.constant 0 : i32
    return %c0_i32, %c0_i32_0 : i32, i32
  }
  func.func @transform_5(%arg0: i32) -> (i32, i32) {
    %c0_i32 = arith.constant 0 : i32
    %c0_i32_0 = arith.constant 0 : i32
    %c0_i32_1 = arith.constant 0 : i32
    return %c0_i32, %c0_i32_0 : i32, i32
  }
  func.func @transform_6(%arg0: i32) -> (i32, i32) {
    %c0_i32 = arith.constant 0 : i32
    %c0_i32_0 = arith.constant 0 : i32
    %c0_i32_1 = arith.constant 0 : i32
    return %c0_i32, %c0_i32_0 : i32, i32
  }
  func.func @transform_7(%arg0: i32) -> (i32, i32) {
    %c0_i32 = arith.constant 0 : i32
    %c0_i32_0 = arith.constant 0 : i32
    %c0_i32_1 = arith.constant 0 : i32
    return %c0_i32, %c0_i32_0 : i32, i32
  }
  func.func @transform_8(%arg0: i32) -> (i32, i32) {
    %c0_i32 = arith.constant 0 : i32
    %c0_i32_0 = arith.constant 0 : i32
    %c0_i32_1 = arith.constant 0 : i32
    return %c0_i32, %c0_i32_0 : i32, i32
  }
  func.func @transform_9(%arg0: i32) -> (i32, i32) {
    %c0_i32 = arith.constant 0 : i32
    %c0_i32_0 = arith.constant 0 : i32
    %c0_i32_1 = arith.constant 0 : i32
    return %c0_i32, %c0_i32_0 : i32, i32
  }
  func.func @transform_10(%arg0: i32) -> (i32, i32) {
    %c0_i32 = arith.constant 0 : i32
    %c0_i32_0 = arith.constant 0 : i32
    %c0_i32_1 = arith.constant 0 : i32
    return %c0_i32, %c0_i32_0 : i32, i32
  }
  func.func @transform_11(%arg0: i32) -> (i32, i32) {
    %c0_i32 = arith.constant 0 : i32
    %c0_i32_0 = arith.constant 0 : i32
    %c0_i32_1 = arith.constant 0 : i32
    return %c0_i32, %c0_i32_0 : i32, i32
  }
  func.func @transform_12(%arg0: i32) -> (i32, i32) {
    %c0_i32 = arith.constant 0 : i32
    %c0_i32_0 = arith.constant 0 : i32
    %c0_i32_1 = arith.constant 0 : i32
    return %c0_i32, %c0_i32_0 : i32, i32
  }
  func.func @transform_13(%arg0: i32) -> (i32, i32) {
    %c0_i32 = arith.constant 0 : i32
    %c0_i32_0 = arith.constant 0 : i32
    %c0_i32_1 = arith.constant 0 : i32
    return %c0_i32, %c0_i32_0 : i32, i32
  }
  func.func @transform_14(%arg0: i32) -> (i32, i32) {
    %c0_i32 = arith.constant 0 : i32
    %c0_i32_0 = arith.constant 0 : i32
    %c0_i32_1 = arith.constant 0 : i32
    return %c0_i32, %c0_i32_0 : i32, i32
  }
  func.func @transform_15(%arg0: i32) -> (i32, i32) {
    %c0_i32 = arith.constant 0 : i32
    %c0_i32_0 = arith.constant 0 : i32
    %c0_i32_1 = arith.constant 0 : i32
    return %c0_i32, %c0_i32_0 : i32, i32
  }
  func.func @transform_16(%arg0: i32) -> (i32, i32) {
    %c0_i32 = arith.constant 0 : i32
    %c0_i32_0 = arith.constant 0 : i32
    %c0_i32_1 = arith.constant 0 : i32
    return %c0_i32, %c0_i32_0 : i32, i32
  }
  func.func @transform_17(%arg0: i32) -> (i32, i32) {
    %c0_i32 = arith.constant 0 : i32
    %c0_i32_0 = arith.constant 0 : i32
    %c0_i32_1 = arith.constant 0 : i32
    return %c0_i32, %c0_i32_0 : i32, i32
  }
  func.func @transform_18(%arg0: i32) -> (i32, i32) {
    %c0_i32 = arith.constant 0 : i32
    %c0_i32_0 = arith.constant 0 : i32
    %c0_i32_1 = arith.constant 0 : i32
    return %c0_i32, %c0_i32_0 : i32, i32
  }
  func.func @transform_19(%arg0: i32) -> (i32, i32) {
    %c0_i32 = arith.constant 0 : i32
    %c0_i32_0 = arith.constant 0 : i32
    %c0_i32_1 = arith.constant 0 : i32
    return %c0_i32, %c0_i32_0 : i32, i32
  }
  func.func @transform_20(%arg0: i32) -> (i32, i32, i32) {
    %c0_i32 = arith.constant 0 : i32
    %c0_i32_0 = arith.constant 0 : i32
    %c0_i32_1 = arith.constant 0 : i32
    return %arg0, %c0_i32, %c0_i32_0 : i32, i32, i32
  }
}

module attributes {stable_mosaic.version = 11 : i64} {
  func.func @_attn_block_kernel(%arg0: i32, %arg1: memref<1x4x32xf32, #tpu.memory_space<vmem>>, %arg2: memref<1x48x32xf32, #tpu.memory_space<vmem>>, %arg3: memref<1x32xf32, #tpu.memory_space<vmem>>, %arg4: memref<1x32xf32, #tpu.memory_space<vmem>>, %arg5: memref<1x32xf32, #tpu.memory_space<vmem>>, %arg6: memref<1x32xf32, #tpu.memory_space<vmem>>, %arg7: memref<32x32xbf16, #tpu.memory_space<vmem>>, %arg8: memref<1x32xf32, #tpu.memory_space<vmem>>, %arg9: memref<32x32xbf16, #tpu.memory_space<vmem>>, %arg10: memref<1x32xf32, #tpu.memory_space<vmem>>, %arg11: memref<32x32xbf16, #tpu.memory_space<vmem>>, %arg12: memref<1x32xf32, #tpu.memory_space<vmem>>, %arg13: memref<32x32xbf16, #tpu.memory_space<vmem>>, %arg14: memref<1x32xf32, #tpu.memory_space<vmem>>, %arg15: memref<1x32xf32, #tpu.memory_space<vmem>>, %arg16: memref<1x32xf32, #tpu.memory_space<vmem>>, %arg17: memref<32x128xbf16, #tpu.memory_space<vmem>>, %arg18: memref<1x128xf32, #tpu.memory_space<vmem>>, %arg19: memref<128x32xbf16, #tpu.memory_space<vmem>>, %arg20: memref<1x32xf32, #tpu.memory_space<vmem>>, %arg21: memref<1x4x32xf32, #tpu.memory_space<vmem>>) attributes {dimension_semantics = [#tpu.dimension_semantics<parallel>], iteration_bounds = array<i64: 2>, scalar_prefetch = 0 : i64, scratch_operands = 0 : i64, tpu.core_type = #tpu.core_type<tc>, window_params = [{transform_indices = @transform_0, window_bounds = array<i64: 1, 4, 32>}, {transform_indices = @transform_1, window_bounds = array<i64: 1, 48, 32>}, {pipeline_mode = #tpu.pipeline_mode<synchronous>, transform_indices = @transform_2, window_bounds = array<i64: 1, 32>}, {pipeline_mode = #tpu.pipeline_mode<synchronous>, transform_indices = @transform_3, window_bounds = array<i64: 1, 32>}, {pipeline_mode = #tpu.pipeline_mode<synchronous>, transform_indices = @transform_4, window_bounds = array<i64: 1, 32>}, {pipeline_mode = #tpu.pipeline_mode<synchronous>, transform_indices = @transform_5, window_bounds = array<i64: 1, 32>}, {pipeline_mode = #tpu.pipeline_mode<synchronous>, transform_indices = @transform_6, window_bounds = array<i64: 32, 32>}, {pipeline_mode = #tpu.pipeline_mode<synchronous>, transform_indices = @transform_7, window_bounds = array<i64: 1, 32>}, {pipeline_mode = #tpu.pipeline_mode<synchronous>, transform_indices = @transform_8, window_bounds = array<i64: 32, 32>}, {pipeline_mode = #tpu.pipeline_mode<synchronous>, transform_indices = @transform_9, window_bounds = array<i64: 1, 32>}, {pipeline_mode = #tpu.pipeline_mode<synchronous>, transform_indices = @transform_10, window_bounds = array<i64: 32, 32>}, {pipeline_mode = #tpu.pipeline_mode<synchronous>, transform_indices = @transform_11, window_bounds = array<i64: 1, 32>}, {pipeline_mode = #tpu.pipeline_mode<synchronous>, transform_indices = @transform_12, window_bounds = array<i64: 32, 32>}, {pipeline_mode = #tpu.pipeline_mode<synchronous>, transform_indices = @transform_13, window_bounds = array<i64: 1, 32>}, {pipeline_mode = #tpu.pipeline_mode<synchronous>, transform_indices = @transform_14, window_bounds = array<i64: 1, 32>}, {pipeline_mode = #tpu.pipeline_mode<synchronous>, transform_indices = @transform_15, window_bounds = array<i64: 1, 32>}, {pipeline_mode = #tpu.pipeline_mode<synchronous>, transform_indices = @transform_16, window_bounds = array<i64: 32, 128>}, {pipeline_mode = #tpu.pipeline_mode<synchronous>, transform_indices = @transform_17, window_bounds = array<i64: 1, 128>}, {pipeline_mode = #tpu.pipeline_mode<synchronous>, transform_indices = @transform_18, window_bounds = array<i64: 128, 32>}, {pipeline_mode = #tpu.pipeline_mode<synchronous>, transform_indices = @transform_19, window_bounds = array<i64: 1, 32>}, {transform_indices = @transform_20, window_bounds = array<i64: 1, 4, 32>}]} {
    %c0 = arith.constant 0 : index
    %c0_0 = arith.constant 0 : index
    %c0_1 = arith.constant 0 : index
    %0 = vector.load %arg1[%c0, %c0_0, %c0_1] : memref<1x4x32xf32, #tpu.memory_space<vmem>>, vector<1x4x32xf32>
    %1 = vector.shape_cast %0 : vector<1x4x32xf32> to vector<4x32xf32>
    %c0_2 = arith.constant 0 : index
    %c0_3 = arith.constant 0 : index
    %c0_4 = arith.constant 0 : index
    %2 = vector.load %arg2[%c0_2, %c0_3, %c0_4] : memref<1x48x32xf32, #tpu.memory_space<vmem>>, vector<1x48x32xf32>
    %3 = vector.shape_cast %2 : vector<1x48x32xf32> to vector<48x32xf32>
    %c0_5 = arith.constant 0 : index
    %c0_6 = arith.constant 0 : index
    %4 = vector.load %arg3[%c0_5, %c0_6] : memref<1x32xf32, #tpu.memory_space<vmem>>, vector<1x32xf32>
    %c0_7 = arith.constant 0 : index
    %c0_8 = arith.constant 0 : index
    %5 = vector.load %arg4[%c0_7, %c0_8] : memref<1x32xf32, #tpu.memory_space<vmem>>, vector<1x32xf32>
    %c0_9 = arith.constant 0 : index
    %c0_10 = arith.constant 0 : index
    %6 = vector.load %arg5[%c0_9, %c0_10] : memref<1x32xf32, #tpu.memory_space<vmem>>, vector<1x32xf32>
    %c0_11 = arith.constant 0 : index
    %c0_12 = arith.constant 0 : index
    %7 = vector.load %arg6[%c0_11, %c0_12] : memref<1x32xf32, #tpu.memory_space<vmem>>, vector<1x32xf32>
    %c0_13 = arith.constant 0 : index
    %c0_14 = arith.constant 0 : index
    %8 = vector.load %arg7[%c0_13, %c0_14] : memref<32x32xbf16, #tpu.memory_space<vmem>>, vector<32x32xbf16>
    %c0_15 = arith.constant 0 : index
    %c0_16 = arith.constant 0 : index
    %9 = vector.load %arg8[%c0_15, %c0_16] : memref<1x32xf32, #tpu.memory_space<vmem>>, vector<1x32xf32>
    %c0_17 = arith.constant 0 : index
    %c0_18 = arith.constant 0 : index
    %10 = vector.load %arg9[%c0_17, %c0_18] : memref<32x32xbf16, #tpu.memory_space<vmem>>, vector<32x32xbf16>
    %c0_19 = arith.constant 0 : index
    %c0_20 = arith.constant 0 : index
    %11 = vector.load %arg10[%c0_19, %c0_20] : memref<1x32xf32, #tpu.memory_space<vmem>>, vector<1x32xf32>
    %c0_21 = arith.constant 0 : index
    %c0_22 = arith.constant 0 : index
    %12 = vector.load %arg11[%c0_21, %c0_22] : memref<32x32xbf16, #tpu.memory_space<vmem>>, vector<32x32xbf16>
    %c0_23 = arith.constant 0 : index
    %c0_24 = arith.constant 0 : index
    %13 = vector.load %arg12[%c0_23, %c0_24] : memref<1x32xf32, #tpu.memory_space<vmem>>, vector<1x32xf32>
    %c0_25 = arith.constant 0 : index
    %c0_26 = arith.constant 0 : index
    %14 = vector.load %arg13[%c0_25, %c0_26] : memref<32x32xbf16, #tpu.memory_space<vmem>>, vector<32x32xbf16>
    %c0_27 = arith.constant 0 : index
    %c0_28 = arith.constant 0 : index
    %15 = vector.load %arg14[%c0_27, %c0_28] : memref<1x32xf32, #tpu.memory_space<vmem>>, vector<1x32xf32>
    %c0_29 = arith.constant 0 : index
    %c0_30 = arith.constant 0 : index
    %16 = vector.load %arg15[%c0_29, %c0_30] : memref<1x32xf32, #tpu.memory_space<vmem>>, vector<1x32xf32>
    %c0_31 = arith.constant 0 : index
    %c0_32 = arith.constant 0 : index
    %17 = vector.load %arg16[%c0_31, %c0_32] : memref<1x32xf32, #tpu.memory_space<vmem>>, vector<1x32xf32>
    %c0_33 = arith.constant 0 : index
    %c0_34 = arith.constant 0 : index
    %18 = vector.load %arg17[%c0_33, %c0_34] : memref<32x128xbf16, #tpu.memory_space<vmem>>, vector<32x128xbf16>
    %c0_35 = arith.constant 0 : index
    %c0_36 = arith.constant 0 : index
    %19 = vector.load %arg18[%c0_35, %c0_36] : memref<1x128xf32, #tpu.memory_space<vmem>>, vector<1x128xf32>
    %c0_37 = arith.constant 0 : index
    %c0_38 = arith.constant 0 : index
    %20 = vector.load %arg19[%c0_37, %c0_38] : memref<128x32xbf16, #tpu.memory_space<vmem>>, vector<128x32xbf16>
    %c0_39 = arith.constant 0 : index
    %c0_40 = arith.constant 0 : index
    %21 = vector.load %arg20[%c0_39, %c0_40] : memref<1x32xf32, #tpu.memory_space<vmem>>, vector<1x32xf32>
    %cst = arith.constant dense<0.000000e+00> : vector<4xf32>
    %22 = vector.multi_reduction <add>, %1, %cst [1] : vector<4x32xf32> to vector<4xf32>
    %23 = vector.shape_cast %22 : vector<4xf32> to vector<4x1xf32>
    %cst_41 = arith.constant 3.200000e+01 : f32
    %24 = vector.broadcast %cst_41 : f32 to vector<4x1xf32>
    %25 = arith.divf %23, %24 : vector<4x1xf32>
    %26 = vector.broadcast %25 : vector<4x1xf32> to vector<4x32xf32>
    %27 = arith.subf %1, %26 : vector<4x32xf32>
    %28 = arith.mulf %27, %27 : vector<4x32xf32>
    %cst_42 = arith.constant dense<0.000000e+00> : vector<4xf32>
    %29 = vector.multi_reduction <add>, %28, %cst_42 [1] : vector<4x32xf32> to vector<4xf32>
    %30 = vector.shape_cast %29 : vector<4xf32> to vector<4x1xf32>
    %cst_43 = arith.constant 3.200000e+01 : f32
    %31 = vector.broadcast %cst_43 : f32 to vector<4x1xf32>
    %32 = arith.divf %30, %31 : vector<4x1xf32>
    %33 = vector.broadcast %25 : vector<4x1xf32> to vector<4x32xf32>
    %34 = arith.subf %1, %33 : vector<4x32xf32>
    %cst_44 = arith.constant 9.99999974E-6 : f32
    %35 = vector.broadcast %cst_44 : f32 to vector<4x1xf32>
    %36 = arith.addf %32, %35 : vector<4x1xf32>
    %37 = math.rsqrt %36 : vector<4x1xf32>
    %38 = vector.broadcast %37 : vector<4x1xf32> to vector<4x32xf32>
    %39 = arith.mulf %34, %38 : vector<4x32xf32>
    %40 = vector.broadcast %4 : vector<1x32xf32> to vector<4x32xf32>
    %41 = arith.mulf %39, %40 : vector<4x32xf32>
    %42 = vector.broadcast %5 : vector<1x32xf32> to vector<4x32xf32>
    %43 = arith.addf %41, %42 : vector<4x32xf32>
    %cst_45 = arith.constant dense<0.000000e+00> : vector<48xf32>
    %44 = vector.multi_reduction <add>, %3, %cst_45 [1] : vector<48x32xf32> to vector<48xf32>
    %45 = vector.shape_cast %44 : vector<48xf32> to vector<48x1xf32>
    %cst_46 = arith.constant 3.200000e+01 : f32
    %46 = vector.broadcast %cst_46 : f32 to vector<48x1xf32>
    %47 = arith.divf %45, %46 : vector<48x1xf32>
    %48 = vector.broadcast %47 : vector<48x1xf32> to vector<48x32xf32>
    %49 = arith.subf %3, %48 : vector<48x32xf32>
    %50 = arith.mulf %49, %49 : vector<48x32xf32>
    %cst_47 = arith.constant dense<0.000000e+00> : vector<48xf32>
    %51 = vector.multi_reduction <add>, %50, %cst_47 [1] : vector<48x32xf32> to vector<48xf32>
    %52 = vector.shape_cast %51 : vector<48xf32> to vector<48x1xf32>
    %cst_48 = arith.constant 3.200000e+01 : f32
    %53 = vector.broadcast %cst_48 : f32 to vector<48x1xf32>
    %54 = arith.divf %52, %53 : vector<48x1xf32>
    %55 = vector.broadcast %47 : vector<48x1xf32> to vector<48x32xf32>
    %56 = arith.subf %3, %55 : vector<48x32xf32>
    %cst_49 = arith.constant 9.99999974E-6 : f32
    %57 = vector.broadcast %cst_49 : f32 to vector<48x1xf32>
    %58 = arith.addf %54, %57 : vector<48x1xf32>
    %59 = math.rsqrt %58 : vector<48x1xf32>
    %60 = vector.broadcast %59 : vector<48x1xf32> to vector<48x32xf32>
    %61 = arith.mulf %56, %60 : vector<48x32xf32>
    %62 = vector.broadcast %6 : vector<1x32xf32> to vector<48x32xf32>
    %63 = arith.mulf %61, %62 : vector<48x32xf32>
    %64 = vector.broadcast %7 : vector<1x32xf32> to vector<48x32xf32>
    %65 = arith.addf %63, %64 : vector<48x32xf32>
    %66 = arith.truncf %43 : vector<4x32xf32> to vector<4x32xbf16>
    %cst_50 = arith.constant dense<0.000000e+00> : vector<4x32xf32>
    %67 = tpu.matmul %66, %8, %cst_50 {dimension_numbers = #tpu.dot_dimension_numbers<[1], [0], [0], [1], [0, 0, 1, 1], [], []>} : vector<4x32xbf16>, vector<32x32xbf16>, vector<4x32xf32> -> vector<4x32xf32>
    %68 = vector.broadcast %9 : vector<1x32xf32> to vector<4x32xf32>
    %69 = arith.addf %67, %68 : vector<4x32xf32>
    %70 = arith.truncf %65 : vector<48x32xf32> to vector<48x32xbf16>
    %cst_51 = arith.constant dense<0.000000e+00> : vector<48x32xf32>
    %71 = tpu.matmul %70, %10, %cst_51 {dimension_numbers = #tpu.dot_dimension_numbers<[1], [0], [0], [1], [0, 0, 1, 1], [], []>} : vector<48x32xbf16>, vector<32x32xbf16>, vector<48x32xf32> -> vector<48x32xf32>
    %72 = vector.broadcast %11 : vector<1x32xf32> to vector<48x32xf32>
    %73 = arith.addf %71, %72 : vector<48x32xf32>
    %74 = arith.truncf %65 : vector<48x32xf32> to vector<48x32xbf16>
    %cst_52 = arith.constant dense<0.000000e+00> : vector<48x32xf32>
    %75 = tpu.matmul %74, %12, %cst_52 {dimension_numbers = #tpu.dot_dimension_numbers<[1], [0], [0], [1], [0, 0, 1, 1], [], []>} : vector<48x32xbf16>, vector<32x32xbf16>, vector<48x32xf32> -> vector<48x32xf32>
    %76 = vector.broadcast %13 : vector<1x32xf32> to vector<48x32xf32>
    %77 = arith.addf %75, %76 : vector<48x32xf32>
    %78 = vector.extract_strided_slice %69 {offsets = [0, 0], sizes = [4, 8], strides = [1, 1]} : vector<4x32xf32> to vector<4x8xf32>
    %79 = vector.extract_strided_slice %69 {offsets = [0, 8], sizes = [4, 8], strides = [1, 1]} : vector<4x32xf32> to vector<4x8xf32>
    %80 = vector.extract_strided_slice %69 {offsets = [0, 16], sizes = [4, 8], strides = [1, 1]} : vector<4x32xf32> to vector<4x8xf32>
    %81 = vector.extract_strided_slice %69 {offsets = [0, 24], sizes = [4, 8], strides = [1, 1]} : vector<4x32xf32> to vector<4x8xf32>
    %82 = vector.shape_cast %78 : vector<4x8xf32> to vector<1x4x8xf32>
    %83 = vector.shape_cast %79 : vector<4x8xf32> to vector<1x4x8xf32>
    %84 = vector.shape_cast %80 : vector<4x8xf32> to vector<1x4x8xf32>
    %85 = vector.shape_cast %81 : vector<4x8xf32> to vector<1x4x8xf32>
    %86 = tpu.concatenate %82, %83, %84, %85 in 0 : vector<1x4x8xf32>, vector<1x4x8xf32>, vector<1x4x8xf32>, vector<1x4x8xf32> -> vector<4x4x8xf32>
    %87 = vector.extract_strided_slice %73 {offsets = [0, 0], sizes = [48, 8], strides = [1, 1]} : vector<48x32xf32> to vector<48x8xf32>
    %88 = vector.extract_strided_slice %73 {offsets = [0, 8], sizes = [48, 8], strides = [1, 1]} : vector<48x32xf32> to vector<48x8xf32>
    %89 = vector.extract_strided_slice %73 {offsets = [0, 16], sizes = [48, 8], strides = [1, 1]} : vector<48x32xf32> to vector<48x8xf32>
    %90 = vector.extract_strided_slice %73 {offsets = [0, 24], sizes = [48, 8], strides = [1, 1]} : vector<48x32xf32> to vector<48x8xf32>
    %91 = vector.shape_cast %87 : vector<48x8xf32> to vector<1x48x8xf32>
    %92 = vector.shape_cast %88 : vector<48x8xf32> to vector<1x48x8xf32>
    %93 = vector.shape_cast %89 : vector<48x8xf32> to vector<1x48x8xf32>
    %94 = vector.shape_cast %90 : vector<48x8xf32> to vector<1x48x8xf32>
    %95 = tpu.concatenate %91, %92, %93, %94 in 0 : vector<1x48x8xf32>, vector<1x48x8xf32>, vector<1x48x8xf32>, vector<1x48x8xf32> -> vector<4x48x8xf32>
    %96 = vector.extract_strided_slice %77 {offsets = [0, 0], sizes = [48, 8], strides = [1, 1]} : vector<48x32xf32> to vector<48x8xf32>
    %97 = vector.extract_strided_slice %77 {offsets = [0, 8], sizes = [48, 8], strides = [1, 1]} : vector<48x32xf32> to vector<48x8xf32>
    %98 = vector.extract_strided_slice %77 {offsets = [0, 16], sizes = [48, 8], strides = [1, 1]} : vector<48x32xf32> to vector<48x8xf32>
    %99 = vector.extract_strided_slice %77 {offsets = [0, 24], sizes = [48, 8], strides = [1, 1]} : vector<48x32xf32> to vector<48x8xf32>
    %100 = vector.shape_cast %96 : vector<48x8xf32> to vector<1x48x8xf32>
    %101 = vector.shape_cast %97 : vector<48x8xf32> to vector<1x48x8xf32>
    %102 = vector.shape_cast %98 : vector<48x8xf32> to vector<1x48x8xf32>
    %103 = vector.shape_cast %99 : vector<48x8xf32> to vector<1x48x8xf32>
    %104 = tpu.concatenate %100, %101, %102, %103 in 0 : vector<1x48x8xf32>, vector<1x48x8xf32>, vector<1x48x8xf32>, vector<1x48x8xf32> -> vector<4x48x8xf32>
    %105 = arith.truncf %86 : vector<4x4x8xf32> to vector<4x4x8xbf16>
    %106 = arith.truncf %95 : vector<4x48x8xf32> to vector<4x48x8xbf16>
    "tpu.trace_start"() <{level = 10 : i32, message = "hqd,hkd->hqk"}> : () -> ()
    %cst_53 = arith.constant dense<0.000000e+00> : vector<4x4x48xf32>
    %107 = tpu.matmul %105, %106, %cst_53 {dimension_numbers = #tpu.dot_dimension_numbers<[2], [2], [1], [1], [0, 0, 0, 1, 1, 1], [0], [0]>} : vector<4x4x8xbf16>, vector<4x48x8xbf16>, vector<4x4x48xf32> -> vector<4x4x48xf32>
    "tpu.trace_stop"() : () -> ()
    %cst_54 = arith.constant 0.353553385 : f32
    %108 = vector.broadcast %cst_54 : f32 to vector<4x4x48xf32>
    %109 = arith.mulf %107, %108 : vector<4x4x48xf32>
    %cst_55 = arith.constant dense<0xFF800000> : vector<4x4xf32>
    %110 = vector.multi_reduction <maximumf>, %109, %cst_55 [2] : vector<4x4x48xf32> to vector<4x4xf32>
    %111 = vector.shape_cast %110 : vector<4x4xf32> to vector<4x4x1xf32>
    %112 = vector.broadcast %111 : vector<4x4x1xf32> to vector<4x4x48xf32>
    %113 = arith.subf %109, %112 : vector<4x4x48xf32>
    %114 = math.exp %113 : vector<4x4x48xf32>
    %cst_56 = arith.constant dense<0.000000e+00> : vector<4x4xf32>
    %115 = vector.multi_reduction <add>, %114, %cst_56 [2] : vector<4x4x48xf32> to vector<4x4xf32>
    %116 = vector.shape_cast %115 : vector<4x4xf32> to vector<4x4x1xf32>
    %117 = tpu.reciprocal %116 {approx = true} : vector<4x4x1xf32> -> vector<4x4x1xf32>
    %118 = vector.broadcast %117 : vector<4x4x1xf32> to vector<4x4x48xf32>
    %119 = arith.mulf %114, %118 : vector<4x4x48xf32>
    %120 = arith.truncf %119 : vector<4x4x48xf32> to vector<4x4x48xbf16>
    %121 = arith.truncf %104 : vector<4x48x8xf32> to vector<4x48x8xbf16>
    "tpu.trace_start"() <{level = 10 : i32, message = "hqk,hkd->hqd"}> : () -> ()
    %cst_57 = arith.constant dense<0.000000e+00> : vector<4x4x8xf32>
    %122 = tpu.matmul %120, %121, %cst_57 {dimension_numbers = #tpu.dot_dimension_numbers<[2], [1], [1], [2], [0, 0, 0, 1, 1, 2], [0], [0]>} : vector<4x4x48xbf16>, vector<4x48x8xbf16>, vector<4x4x8xf32> -> vector<4x4x8xf32>
    "tpu.trace_stop"() : () -> ()
    %123 = vector.extract_strided_slice %122 {offsets = [0, 0, 0], sizes = [1, 4, 8], strides = [1, 1, 1]} : vector<4x4x8xf32> to vector<1x4x8xf32>
    %124 = vector.shape_cast %123 : vector<1x4x8xf32> to vector<4x8xf32>
    %125 = vector.extract_strided_slice %122 {offsets = [1, 0, 0], sizes = [1, 4, 8], strides = [1, 1, 1]} : vector<4x4x8xf32> to vector<1x4x8xf32>
    %126 = vector.shape_cast %125 : vector<1x4x8xf32> to vector<4x8xf32>
    %127 = vector.extract_strided_slice %122 {offsets = [2, 0, 0], sizes = [1, 4, 8], strides = [1, 1, 1]} : vector<4x4x8xf32> to vector<1x4x8xf32>
    %128 = vector.shape_cast %127 : vector<1x4x8xf32> to vector<4x8xf32>
    %129 = vector.extract_strided_slice %122 {offsets = [3, 0, 0], sizes = [1, 4, 8], strides = [1, 1, 1]} : vector<4x4x8xf32> to vector<1x4x8xf32>
    %130 = vector.shape_cast %129 : vector<1x4x8xf32> to vector<4x8xf32>
    %131 = tpu.concatenate %124, %126, %128, %130 in 1 : vector<4x8xf32>, vector<4x8xf32>, vector<4x8xf32>, vector<4x8xf32> -> vector<4x32xf32>
    %132 = arith.truncf %131 : vector<4x32xf32> to vector<4x32xbf16>
    %cst_58 = arith.constant dense<0.000000e+00> : vector<4x32xf32>
    %133 = tpu.matmul %132, %14, %cst_58 {dimension_numbers = #tpu.dot_dimension_numbers<[1], [0], [0], [1], [0, 0, 1, 1], [], []>} : vector<4x32xbf16>, vector<32x32xbf16>, vector<4x32xf32> -> vector<4x32xf32>
    %134 = vector.broadcast %15 : vector<1x32xf32> to vector<4x32xf32>
    %135 = arith.addf %133, %134 : vector<4x32xf32>
    %136 = arith.addf %1, %135 : vector<4x32xf32>
    %cst_59 = arith.constant dense<0.000000e+00> : vector<4xf32>
    %137 = vector.multi_reduction <add>, %136, %cst_59 [1] : vector<4x32xf32> to vector<4xf32>
    %138 = vector.shape_cast %137 : vector<4xf32> to vector<4x1xf32>
    %cst_60 = arith.constant 3.200000e+01 : f32
    %139 = vector.broadcast %cst_60 : f32 to vector<4x1xf32>
    %140 = arith.divf %138, %139 : vector<4x1xf32>
    %141 = vector.broadcast %140 : vector<4x1xf32> to vector<4x32xf32>
    %142 = arith.subf %136, %141 : vector<4x32xf32>
    %143 = arith.mulf %142, %142 : vector<4x32xf32>
    %cst_61 = arith.constant dense<0.000000e+00> : vector<4xf32>
    %144 = vector.multi_reduction <add>, %143, %cst_61 [1] : vector<4x32xf32> to vector<4xf32>
    %145 = vector.shape_cast %144 : vector<4xf32> to vector<4x1xf32>
    %cst_62 = arith.constant 3.200000e+01 : f32
    %146 = vector.broadcast %cst_62 : f32 to vector<4x1xf32>
    %147 = arith.divf %145, %146 : vector<4x1xf32>
    %148 = vector.broadcast %140 : vector<4x1xf32> to vector<4x32xf32>
    %149 = arith.subf %136, %148 : vector<4x32xf32>
    %cst_63 = arith.constant 9.99999974E-6 : f32
    %150 = vector.broadcast %cst_63 : f32 to vector<4x1xf32>
    %151 = arith.addf %147, %150 : vector<4x1xf32>
    %152 = math.rsqrt %151 : vector<4x1xf32>
    %153 = vector.broadcast %152 : vector<4x1xf32> to vector<4x32xf32>
    %154 = arith.mulf %149, %153 : vector<4x32xf32>
    %155 = vector.broadcast %16 : vector<1x32xf32> to vector<4x32xf32>
    %156 = arith.mulf %154, %155 : vector<4x32xf32>
    %157 = vector.broadcast %17 : vector<1x32xf32> to vector<4x32xf32>
    %158 = arith.addf %156, %157 : vector<4x32xf32>
    %159 = arith.truncf %158 : vector<4x32xf32> to vector<4x32xbf16>
    %cst_64 = arith.constant dense<0.000000e+00> : vector<4x128xf32>
    %160 = tpu.matmul %159, %18, %cst_64 {dimension_numbers = #tpu.dot_dimension_numbers<[1], [0], [0], [1], [0, 0, 1, 1], [], []>} : vector<4x32xbf16>, vector<32x128xbf16>, vector<4x128xf32> -> vector<4x128xf32>
    %161 = vector.broadcast %19 : vector<1x128xf32> to vector<4x128xf32>
    %162 = arith.addf %160, %161 : vector<4x128xf32>
    %163 = arith.mulf %162, %162 : vector<4x128xf32>
    %164 = arith.mulf %162, %163 : vector<4x128xf32>
    %cst_65 = arith.constant 4.471500e-02 : f32
    %165 = vector.broadcast %cst_65 : f32 to vector<4x128xf32>
    %166 = arith.mulf %165, %164 : vector<4x128xf32>
    %167 = arith.addf %162, %166 : vector<4x128xf32>
    %cst_66 = arith.constant 0.797884583 : f32
    %168 = vector.broadcast %cst_66 : f32 to vector<4x128xf32>
    %169 = arith.mulf %168, %167 : vector<4x128xf32>
    %170 = math.tanh %169 : vector<4x128xf32>
    %cst_67 = arith.constant 1.000000e+00 : f32
    %171 = vector.broadcast %cst_67 : f32 to vector<4x128xf32>
    %172 = arith.addf %171, %170 : vector<4x128xf32>
    %cst_68 = arith.constant 5.000000e-01 : f32
    %173 = vector.broadcast %cst_68 : f32 to vector<4x128xf32>
    %174 = arith.mulf %173, %172 : vector<4x128xf32>
    %175 = arith.mulf %162, %174 : vector<4x128xf32>
    %176 = arith.truncf %175 : vector<4x128xf32> to vector<4x128xbf16>
    %cst_69 = arith.constant dense<0.000000e+00> : vector<4x32xf32>
    %177 = tpu.matmul %176, %20, %cst_69 {dimension_numbers = #tpu.dot_dimension_numbers<[1], [0], [0], [1], [0, 0, 1, 1], [], []>} : vector<4x128xbf16>, vector<128x32xbf16>, vector<4x32xf32> -> vector<4x32xf32>
    %178 = vector.broadcast %21 : vector<1x32xf32> to vector<4x32xf32>
    %179 = arith.addf %177, %178 : vector<4x32xf32>
    %180 = arith.addf %136, %179 : vector<4x32xf32>
    %c0_70 = arith.constant 0 : index
    %c0_71 = arith.constant 0 : index
    %c0_72 = arith.constant 0 : index
    %181 = vector.load %arg21[%c0_70, %c0_71, %c0_72] : memref<1x4x32xf32, #tpu.memory_space<vmem>>, vector<1x4x32xf32>
    %182 = vector.shape_cast %181 : vector<1x4x32xf32> to vector<4x32xf32>
    %183 = vector.shape_cast %180 : vector<4x32xf32> to vector<1x4x32xf32>
    tpu.vector_store %arg21[%c0_70, %c0_71, %c0_72], %183 {strides = array<i32>} : memref<1x4x32xf32, #tpu.memory_space<vmem>>, vector<1x4x32xf32>,
    return
  }
  func.func @transform_0(%arg0: i32) -> (i32, i32, i32) {
    %c0_i32 = arith.constant 0 : i32
    %c0_i32_0 = arith.constant 0 : i32
    %c0_i32_1 = arith.constant 0 : i32
    return %arg0, %c0_i32, %c0_i32_0 : i32, i32, i32
  }
  func.func @transform_1(%arg0: i32) -> (i32, i32, i32) {
    %c0_i32 = arith.constant 0 : i32
    %c0_i32_0 = arith.constant 0 : i32
    %c0_i32_1 = arith.constant 0 : i32
    return %arg0, %c0_i32, %c0_i32_0 : i32, i32, i32
  }
  func.func @transform_2(%arg0: i32) -> (i32, i32) {
    %c0_i32 = arith.constant 0 : i32
    %c0_i32_0 = arith.constant 0 : i32
    %c0_i32_1 = arith.constant 0 : i32
    return %c0_i32, %c0_i32_0 : i32, i32
  }
  func.func @transform_3(%arg0: i32) -> (i32, i32) {
    %c0_i32 = arith.constant 0 : i32
    %c0_i32_0 = arith.constant 0 : i32
    %c0_i32_1 = arith.constant 0 : i32
    return %c0_i32, %c0_i32_0 : i32, i32
  }
  func.func @transform_4(%arg0: i32) -> (i32, i32) {
    %c0_i32 = arith.constant 0 : i32
    %c0_i32_0 = arith.constant 0 : i32
    %c0_i32_1 = arith.constant 0 : i32
    return %c0_i32, %c0_i32_0 : i32, i32
  }
  func.func @transform_5(%arg0: i32) -> (i32, i32) {
    %c0_i32 = arith.constant 0 : i32
    %c0_i32_0 = arith.constant 0 : i32
    %c0_i32_1 = arith.constant 0 : i32
    return %c0_i32, %c0_i32_0 : i32, i32
  }
  func.func @transform_6(%arg0: i32) -> (i32, i32) {
    %c0_i32 = arith.constant 0 : i32
    %c0_i32_0 = arith.constant 0 : i32
    %c0_i32_1 = arith.constant 0 : i32
    return %c0_i32, %c0_i32_0 : i32, i32
  }
  func.func @transform_7(%arg0: i32) -> (i32, i32) {
    %c0_i32 = arith.constant 0 : i32
    %c0_i32_0 = arith.constant 0 : i32
    %c0_i32_1 = arith.constant 0 : i32
    return %c0_i32, %c0_i32_0 : i32, i32
  }
  func.func @transform_8(%arg0: i32) -> (i32, i32) {
    %c0_i32 = arith.constant 0 : i32
    %c0_i32_0 = arith.constant 0 : i32
    %c0_i32_1 = arith.constant 0 : i32
    return %c0_i32, %c0_i32_0 : i32, i32
  }
  func.func @transform_9(%arg0: i32) -> (i32, i32) {
    %c0_i32 = arith.constant 0 : i32
    %c0_i32_0 = arith.constant 0 : i32
    %c0_i32_1 = arith.constant 0 : i32
    return %c0_i32, %c0_i32_0 : i32, i32
  }
  func.func @transform_10(%arg0: i32) -> (i32, i32) {
    %c0_i32 = arith.constant 0 : i32
    %c0_i32_0 = arith.constant 0 : i32
    %c0_i32_1 = arith.constant 0 : i32
    return %c0_i32, %c0_i32_0 : i32, i32
  }
  func.func @transform_11(%arg0: i32) -> (i32, i32) {
    %c0_i32 = arith.constant 0 : i32
    %c0_i32_0 = arith.constant 0 : i32
    %c0_i32_1 = arith.constant 0 : i32
    return %c0_i32, %c0_i32_0 : i32, i32
  }
  func.func @transform_12(%arg0: i32) -> (i32, i32) {
    %c0_i32 = arith.constant 0 : i32
    %c0_i32_0 = arith.constant 0 : i32
    %c0_i32_1 = arith.constant 0 : i32
    return %c0_i32, %c0_i32_0 : i32, i32
  }
  func.func @transform_13(%arg0: i32) -> (i32, i32) {
    %c0_i32 = arith.constant 0 : i32
    %c0_i32_0 = arith.constant 0 : i32
    %c0_i32_1 = arith.constant 0 : i32
    return %c0_i32, %c0_i32_0 : i32, i32
  }
  func.func @transform_14(%arg0: i32) -> (i32, i32) {
    %c0_i32 = arith.constant 0 : i32
    %c0_i32_0 = arith.constant 0 : i32
    %c0_i32_1 = arith.constant 0 : i32
    return %c0_i32, %c0_i32_0 : i32, i32
  }
  func.func @transform_15(%arg0: i32) -> (i32, i32) {
    %c0_i32 = arith.constant 0 : i32
    %c0_i32_0 = arith.constant 0 : i32
    %c0_i32_1 = arith.constant 0 : i32
    return %c0_i32, %c0_i32_0 : i32, i32
  }
  func.func @transform_16(%arg0: i32) -> (i32, i32) {
    %c0_i32 = arith.constant 0 : i32
    %c0_i32_0 = arith.constant 0 : i32
    %c0_i32_1 = arith.constant 0 : i32
    return %c0_i32, %c0_i32_0 : i32, i32
  }
  func.func @transform_17(%arg0: i32) -> (i32, i32) {
    %c0_i32 = arith.constant 0 : i32
    %c0_i32_0 = arith.constant 0 : i32
    %c0_i32_1 = arith.constant 0 : i32
    return %c0_i32, %c0_i32_0 : i32, i32
  }
  func.func @transform_18(%arg0: i32) -> (i32, i32) {
    %c0_i32 = arith.constant 0 : i32
    %c0_i32_0 = arith.constant 0 : i32
    %c0_i32_1 = arith.constant 0 : i32
    return %c0_i32, %c0_i32_0 : i32, i32
  }
  func.func @transform_19(%arg0: i32) -> (i32, i32) {
    %c0_i32 = arith.constant 0 : i32
    %c0_i32_0 = arith.constant 0 : i32
    %c0_i32_1 = arith.constant 0 : i32
    return %c0_i32, %c0_i32_0 : i32, i32
  }
  func.func @transform_20(%arg0: i32) -> (i32, i32, i32) {
    %c0_i32 = arith.constant 0 : i32
    %c0_i32_0 = arith.constant 0 : i32
    %c0_i32_1 = arith.constant 0 : i32
    return %arg0, %c0_i32, %c0_i32_0 : i32, i32, i32
  }
}

module attributes {stable_mosaic.version = 11 : i64} {
  func.func @_value_loss_kernel(%arg0: memref<2x32xf32, #tpu.memory_space<vmem>>, %arg1: memref<2x1xf32, #tpu.memory_space<vmem>>, %arg2: memref<32x64xbf16, #tpu.memory_space<vmem>>, %arg3: memref<1x64xf32, #tpu.memory_space<vmem>>, %arg4: memref<64x64xbf16, #tpu.memory_space<vmem>>, %arg5: memref<1x64xf32, #tpu.memory_space<vmem>>, %arg6: memref<64x64xbf16, #tpu.memory_space<vmem>>, %arg7: memref<1x64xf32, #tpu.memory_space<vmem>>, %arg8: memref<64x8xbf16, #tpu.memory_space<vmem>>, %arg9: memref<1x8xf32, #tpu.memory_space<vmem>>, %arg10: memref<1x1xf32, #tpu.memory_space<vmem>>) attributes {dimension_semantics = [], scalar_prefetch = 0 : i64, scratch_operands = 0 : i64, tpu.core_type = #tpu.core_type<tc>} {
    %c0 = arith.constant 0 : index
    %c0_0 = arith.constant 0 : index
    %0 = vector.load %arg0[%c0, %c0_0] : memref<2x32xf32, #tpu.memory_space<vmem>>, vector<2x32xf32>
    %1 = arith.truncf %0 : vector<2x32xf32> to vector<2x32xbf16>
    %c0_1 = arith.constant 0 : index
    %c0_2 = arith.constant 0 : index
    %2 = vector.load %arg2[%c0_1, %c0_2] : memref<32x64xbf16, #tpu.memory_space<vmem>>, vector<32x64xbf16>
    %cst = arith.constant dense<0.000000e+00> : vector<2x64xf32>
    %3 = tpu.matmul %1, %2, %cst {dimension_numbers = #tpu.dot_dimension_numbers<[1], [0], [0], [1], [0, 0, 1, 1], [], []>} : vector<2x32xbf16>, vector<32x64xbf16>, vector<2x64xf32> -> vector<2x64xf32>
    %c0_3 = arith.constant 0 : index
    %c0_4 = arith.constant 0 : index
    %4 = vector.load %arg3[%c0_3, %c0_4] : memref<1x64xf32, #tpu.memory_space<vmem>>, vector<1x64xf32>
    %5 = vector.broadcast %4 : vector<1x64xf32> to vector<2x64xf32>
    %6 = arith.addf %3, %5 : vector<2x64xf32>
    %cst_5 = arith.constant 0.000000e+00 : f32
    %7 = vector.broadcast %cst_5 : f32 to vector<2x64xf32>
    %8 = arith.maximumf %6, %7 : vector<2x64xf32>
    %9 = arith.truncf %8 : vector<2x64xf32> to vector<2x64xbf16>
    %c0_6 = arith.constant 0 : index
    %c0_7 = arith.constant 0 : index
    %10 = vector.load %arg4[%c0_6, %c0_7] : memref<64x64xbf16, #tpu.memory_space<vmem>>, vector<64x64xbf16>
    %cst_8 = arith.constant dense<0.000000e+00> : vector<2x64xf32>
    %11 = tpu.matmul %9, %10, %cst_8 {dimension_numbers = #tpu.dot_dimension_numbers<[1], [0], [0], [1], [0, 0, 1, 1], [], []>} : vector<2x64xbf16>, vector<64x64xbf16>, vector<2x64xf32> -> vector<2x64xf32>
    %c0_9 = arith.constant 0 : index
    %c0_10 = arith.constant 0 : index
    %12 = vector.load %arg5[%c0_9, %c0_10] : memref<1x64xf32, #tpu.memory_space<vmem>>, vector<1x64xf32>
    %13 = vector.broadcast %12 : vector<1x64xf32> to vector<2x64xf32>
    %14 = arith.addf %11, %13 : vector<2x64xf32>
    %cst_11 = arith.constant 0.000000e+00 : f32
    %15 = vector.broadcast %cst_11 : f32 to vector<2x64xf32>
    %16 = arith.maximumf %14, %15 : vector<2x64xf32>
    %17 = arith.truncf %16 : vector<2x64xf32> to vector<2x64xbf16>
    %c0_12 = arith.constant 0 : index
    %c0_13 = arith.constant 0 : index
    %18 = vector.load %arg6[%c0_12, %c0_13] : memref<64x64xbf16, #tpu.memory_space<vmem>>, vector<64x64xbf16>
    %cst_14 = arith.constant dense<0.000000e+00> : vector<2x64xf32>
    %19 = tpu.matmul %17, %18, %cst_14 {dimension_numbers = #tpu.dot_dimension_numbers<[1], [0], [0], [1], [0, 0, 1, 1], [], []>} : vector<2x64xbf16>, vector<64x64xbf16>, vector<2x64xf32> -> vector<2x64xf32>
    %c0_15 = arith.constant 0 : index
    %c0_16 = arith.constant 0 : index
    %20 = vector.load %arg7[%c0_15, %c0_16] : memref<1x64xf32, #tpu.memory_space<vmem>>, vector<1x64xf32>
    %21 = vector.broadcast %20 : vector<1x64xf32> to vector<2x64xf32>
    %22 = arith.addf %19, %21 : vector<2x64xf32>
    %cst_17 = arith.constant 0.000000e+00 : f32
    %23 = vector.broadcast %cst_17 : f32 to vector<2x64xf32>
    %24 = arith.maximumf %22, %23 : vector<2x64xf32>
    %25 = arith.truncf %24 : vector<2x64xf32> to vector<2x64xbf16>
    %c0_18 = arith.constant 0 : index
    %c0_19 = arith.constant 0 : index
    %26 = vector.load %arg8[%c0_18, %c0_19] : memref<64x8xbf16, #tpu.memory_space<vmem>>, vector<64x8xbf16>
    %cst_20 = arith.constant dense<0.000000e+00> : vector<2x8xf32>
    %27 = tpu.matmul %25, %26, %cst_20 {dimension_numbers = #tpu.dot_dimension_numbers<[1], [0], [0], [1], [0, 0, 1, 1], [], []>} : vector<2x64xbf16>, vector<64x8xbf16>, vector<2x8xf32> -> vector<2x8xf32>
    %c0_21 = arith.constant 0 : index
    %c0_22 = arith.constant 0 : index
    %28 = vector.load %arg9[%c0_21, %c0_22] : memref<1x8xf32, #tpu.memory_space<vmem>>, vector<1x8xf32>
    %29 = vector.broadcast %28 : vector<1x8xf32> to vector<2x8xf32>
    %30 = arith.addf %27, %29 : vector<2x8xf32>
    %c0_23 = arith.constant 0 : index
    %c0_24 = arith.constant 0 : index
    %31 = vector.load %arg1[%c0_23, %c0_24] : memref<2x1xf32, #tpu.memory_space<vmem>>, vector<2x1xf32>
    %32 = tpu.iota {dimensions = array<i32: 1>} : vector<2x8xi32>
    %33 = arith.sitofp %32 : vector<2x8xi32> to vector<2x8xf32>
    %cst_25 = arith.constant 5.000000e-01 : f32
    %34 = vector.broadcast %cst_25 : f32 to vector<2x8xf32>
    %35 = arith.addf %33, %34 : vector<2x8xf32>
    %cst_26 = arith.constant 8.000000e+00 : f32
    %36 = vector.broadcast %cst_26 : f32 to vector<2x8xf32>
    %37 = arith.divf %35, %36 : vector<2x8xf32>
    %38 = vector.broadcast %31 : vector<2x1xf32> to vector<2x8xf32>
    %39 = arith.subf %38, %30 : vector<2x8xf32>
    %40 = math.absf %39 : vector<2x8xf32>
    %cst_27 = arith.constant 1.000000e+00 : f32
    %41 = vector.broadcast %cst_27 : f32 to vector<2x8xf32>
    %42 = arith.cmpf ole, %40, %41 : vector<2x8xf32>
    %cst_28 = arith.constant 5.000000e-01 : f32
    %43 = vector.broadcast %cst_28 : f32 to vector<2x8xf32>
    %44 = arith.mulf %43, %39 : vector<2x8xf32>
    %45 = arith.mulf %44, %39 : vector<2x8xf32>
    %cst_29 = arith.constant 5.000000e-01 : f32
    %46 = vector.broadcast %cst_29 : f32 to vector<2x8xf32>
    %47 = arith.subf %40, %46 : vector<2x8xf32>
    %cst_30 = arith.constant 1.000000e+00 : f32
    %48 = vector.broadcast %cst_30 : f32 to vector<2x8xf32>
    %49 = arith.mulf %48, %47 : vector<2x8xf32>
    %50 = arith.select %42, %45, %49 : vector<2x8xi1>, vector<2x8xf32>
    %cst_31 = arith.constant 0.000000e+00 : f32
    %51 = vector.broadcast %cst_31 : f32 to vector<2x8xf32>
    %52 = arith.cmpf olt, %39, %51 : vector<2x8xf32>
    %53 = arith.extui %52 : vector<2x8xi1> to vector<2x8xi32>
    %54 = arith.sitofp %53 : vector<2x8xi32> to vector<2x8xf32>
    %55 = arith.subf %37, %54 : vector<2x8xf32>
    %56 = math.absf %55 : vector<2x8xf32>
    %57 = arith.mulf %56, %50 : vector<2x8xf32>
    %cst_32 = arith.constant dense<0.000000e+00> : vector<2xf32>
    %58 = vector.multi_reduction <add>, %57, %cst_32 [1] : vector<2x8xf32> to vector<2xf32>
    %59 = vector.shape_cast %58 : vector<2xf32> to vector<2x1xf32>
    %cst_33 = arith.constant dense<0.000000e+00> : vector<1xf32>
    %60 = vector.multi_reduction <add>, %59, %cst_33 [0] : vector<2x1xf32> to vector<1xf32>
    %61 = vector.shape_cast %60 : vector<1xf32> to vector<1x1xf32>
    %cst_34 = arith.constant 1.600000e+01 : f32
    %62 = vector.broadcast %cst_34 : f32 to vector<1x1xf32>
    %63 = arith.divf %61, %62 : vector<1x1xf32>
    %c0_35 = arith.constant 0 : index
    %c0_36 = arith.constant 0 : index
    %64 = vector.load %arg10[%c0_35, %c0_36] : memref<1x1xf32, #tpu.memory_space<vmem>>, vector<1x1xf32>
    tpu.vector_store %arg10[%c0_35, %c0_36], %63 {strides = array<i32>} : memref<1x1xf32, #tpu.memory_space<vmem>>, vector<1x1xf32>,
    return
  }
}

module attributes {stable_mosaic.version = 11 : i64} {
  func.func @_linear_kernel(%arg0: i32, %arg1: i32, %arg2: i32, %arg3: memref<8x32xf32, #tpu.memory_space<vmem>>, %arg4: memref<32x8xbf16, #tpu.memory_space<vmem>>, %arg5: memref<1x8xf32, #tpu.memory_space<vmem>>, %arg6: memref<8x8xf32, #tpu.memory_space<vmem>>, %arg7: memref<8x8xf32, #tpu.memory_space<vmem>>) attributes {dimension_semantics = [#tpu.dimension_semantics<parallel>, #tpu.dimension_semantics<parallel>, #tpu.dimension_semantics<arbitrary>], iteration_bounds = array<i64: 1, 1, 1>, scalar_prefetch = 0 : i64, scratch_operands = 1 : i64, tpu.core_type = #tpu.core_type<tc>, window_params = [{transform_indices = @transform_0, window_bounds = array<i64: 8, 32>}, {transform_indices = @transform_1, window_bounds = array<i64: 32, 8>}, {transform_indices = @transform_2, window_bounds = array<i64: 1, 8>}, {transform_indices = @transform_3, window_bounds = array<i64: 8, 8>}]} {
    %c0_i32 = arith.constant 0 : i32
    %0 = arith.cmpi eq, %arg2, %c0_i32 : i32
    %1 = arith.extui %0 : i1 to i32
    %c0_i32_0 = arith.constant 0 : i32
    %2 = arith.cmpi ne, %1, %c0_i32_0 : i32
    scf.if %2 {
      %cst_11 = arith.constant 0.000000e+00 : f32
      %15 = vector.broadcast %cst_11 : f32 to vector<8x8xf32>
      %c0_12 = arith.constant 0 : index
      %c0_13 = arith.constant 0 : index
      %16 = vector.load %arg7[%c0_12, %c0_13] : memref<8x8xf32, #tpu.memory_space<vmem>>, vector<8x8xf32>
      tpu.vector_store %arg7[%c0_12, %c0_13], %15 {strides = array<i32>} : memref<8x8xf32, #tpu.memory_space<vmem>>, vector<8x8xf32>,
    } else {
    }
    %c0 = arith.constant 0 : index
    %c0_1 = arith.constant 0 : index
    %3 = vector.load %arg3[%c0, %c0_1] : memref<8x32xf32, #tpu.memory_space<vmem>>, vector<8x32xf32>
    %cst = arith.constant 0.000000e+00 : f32
    %4 = vector.broadcast %cst : f32 to vector<8x32xf32>
    %5 = arith.maximumf %3, %4 : vector<8x32xf32>
    %c0_2 = arith.constant 0 : index
    %c0_3 = arith.constant 0 : index
    %6 = vector.load %arg7[%c0_2, %c0_3] : memref<8x8xf32, #tpu.memory_space<vmem>>, vector<8x8xf32>
    %7 = arith.truncf %5 : vector<8x32xf32> to vector<8x32xbf16>
    %c0_4 = arith.constant 0 : index
    %c0_5 = arith.constant 0 : index
    %8 = vector.load %arg4[%c0_4, %c0_5] : memref<32x8xbf16, #tpu.memory_space<vmem>>, vector<32x8xbf16>
    %cst_6 = arith.constant dense<0.000000e+00> : vector<8x8xf32>
    %9 = tpu.matmul %7, %8, %cst_6 {dimension_numbers = #tpu.dot_dimension_numbers<[1], [0], [0], [1], [0, 0, 1, 1], [], []>} : vector<8x32xbf16>, vector<32x8xbf16>, vector<8x8xf32> -> vector<8x8xf32>
    %10 = arith.addf %6, %9 : vector<8x8xf32>
    %c0_7 = arith.constant 0 : index
    %c0_8 = arith.constant 0 : index
    %11 = vector.load %arg7[%c0_7, %c0_8] : memref<8x8xf32, #tpu.memory_space<vmem>>, vector<8x8xf32>
    tpu.vector_store %arg7[%c0_7, %c0_8], %10 {strides = array<i32>} : memref<8x8xf32, #tpu.memory_space<vmem>>, vector<8x8xf32>,
    %c0_i32_9 = arith.constant 0 : i32
    %12 = arith.cmpi eq, %arg2, %c0_i32_9 : i32
    %13 = arith.extui %12 : i1 to i32
    %c0_i32_10 = arith.constant 0 : i32
    %14 = arith.cmpi ne, %13, %c0_i32_10 : i32
    scf.if %14 {
      %c0_11 = arith.constant 0 : index
      %c0_12 = arith.constant 0 : index
      %15 = vector.load %arg7[%c0_11, %c0_12] : memref<8x8xf32, #tpu.memory_space<vmem>>, vector<8x8xf32>
      %c0_13 = arith.constant 0 : index
      %c0_14 = arith.constant 0 : index
      %16 = vector.load %arg5[%c0_13, %c0_14] : memref<1x8xf32, #tpu.memory_space<vmem>>, vector<1x8xf32>
      %17 = vector.broadcast %16 : vector<1x8xf32> to vector<8x8xf32>
      %18 = arith.addf %15, %17 : vector<8x8xf32>
      %c0_15 = arith.constant 0 : index
      %c0_16 = arith.constant 0 : index
      %19 = vector.load %arg6[%c0_15, %c0_16] : memref<8x8xf32, #tpu.memory_space<vmem>>, vector<8x8xf32>
      tpu.vector_store %arg6[%c0_15, %c0_16], %18 {strides = array<i32>} : memref<8x8xf32, #tpu.memory_space<vmem>>, vector<8x8xf32>,
    } else {
    }
    return
  }
  func.func @transform_0(%arg0: i32, %arg1: i32, %arg2: i32) -> (i32, i32) {
    %c0_i32 = arith.constant 0 : i32
    return %arg0, %arg2 : i32, i32
  }
  func.func @transform_1(%arg0: i32, %arg1: i32, %arg2: i32) -> (i32, i32) {
    %c0_i32 = arith.constant 0 : i32
    return %arg2, %arg1 : i32, i32
  }
  func.func @transform_2(%arg0: i32, %arg1: i32, %arg2: i32) -> (i32, i32) {
    %c0_i32 = arith.constant 0 : i32
    %c0_i32_0 = arith.constant 0 : i32
    return %c0_i32, %arg1 : i32, i32
  }
  func.func @transform_3(%arg0: i32, %arg1: i32, %arg2: i32) -> (i32, i32) {
    %c0_i32 = arith.constant 0 : i32
    return %arg0, %arg1 : i32, i32
  }
}

module attributes {stable_mosaic.version = 11 : i64} {
  func.func @_ce_sum_kernel(%arg0: memref<8x8xf32, #tpu.memory_space<vmem>>, %arg1: memref<8x1xi32, #tpu.memory_space<vmem>>, %arg2: memref<1x1xf32, #tpu.memory_space<vmem>>) attributes {dimension_semantics = [], scalar_prefetch = 0 : i64, scratch_operands = 0 : i64, tpu.core_type = #tpu.core_type<tc>} {
    %c0 = arith.constant 0 : index
    %c0_0 = arith.constant 0 : index
    %0 = vector.load %arg0[%c0, %c0_0] : memref<8x8xf32, #tpu.memory_space<vmem>>, vector<8x8xf32>
    %c0_1 = arith.constant 0 : index
    %c0_2 = arith.constant 0 : index
    %1 = vector.load %arg1[%c0_1, %c0_2] : memref<8x1xi32, #tpu.memory_space<vmem>>, vector<8x1xi32>
    %cst = arith.constant dense<0xFF800000> : vector<8xf32>
    %2 = vector.multi_reduction <maximumf>, %0, %cst [1] : vector<8x8xf32> to vector<8xf32>
    %3 = vector.shape_cast %2 : vector<8xf32> to vector<8x1xf32>
    %4 = vector.broadcast %3 : vector<8x1xf32> to vector<8x8xf32>
    %5 = arith.subf %0, %4 : vector<8x8xf32>
    %6 = math.exp %5 : vector<8x8xf32>
    %cst_3 = arith.constant dense<0.000000e+00> : vector<8xf32>
    %7 = vector.multi_reduction <add>, %6, %cst_3 [1] : vector<8x8xf32> to vector<8xf32>
    %8 = vector.shape_cast %7 : vector<8xf32> to vector<8x1xf32>
    %9 = math.log %8 : vector<8x1xf32>
    %10 = arith.addf %9, %3 : vector<8x1xf32>
    %11 = tpu.iota {dimensions = array<i32: 1>} : vector<8x8xi32>
    %12 = vector.broadcast %1 : vector<8x1xi32> to vector<8x8xi32>
    %13 = arith.cmpi eq, %11, %12 : vector<8x8xi32>
    %cst_4 = arith.constant 0.000000e+00 : f32
    %14 = vector.broadcast %cst_4 : f32 to vector<8x8xf32>
    %15 = arith.select %13, %0, %14 : vector<8x8xi1>, vector<8x8xf32>
    %cst_5 = arith.constant dense<0.000000e+00> : vector<8xf32>
    %16 = vector.multi_reduction <add>, %15, %cst_5 [1] : vector<8x8xf32> to vector<8xf32>
    %17 = vector.shape_cast %16 : vector<8xf32> to vector<8x1xf32>
    %18 = arith.subf %10, %17 : vector<8x1xf32>
    %cst_6 = arith.constant dense<0.000000e+00> : vector<1xf32>
    %19 = vector.multi_reduction <add>, %18, %cst_6 [0] : vector<8x1xf32> to vector<1xf32>
    %20 = vector.shape_cast %19 : vector<1xf32> to vector<1x1xf32>
    %c0_7 = arith.constant 0 : index
    %c0_8 = arith.constant 0 : index
    %21 = vector.load %arg2[%c0_7, %c0_8] : memref<1x1xf32, #tpu.memory_space<vmem>>, vector<1x1xf32>
    tpu.vector_store %arg2[%c0_7, %c0_8], %20 {strides = array<i32>} : memref<1x1xf32, #tpu.memory_space<vmem>>, vector<1x1xf32>,
    return
  }
}

</mosaic_0001>

<bundles_post_ra>
// kernel: alpha_tensor_train_forward.26
= control target key start
LH: loop header
LB: loop body
LE: loop exit
PB: predicated region body
PF: predicated region fallthrough
CT: control target
= control target key end

     0   :  { %vm19_vm0 = vcmask 123904   ;;  %vm29_vm1 = vcmask 1040384   ;;  %v105_v0 = vmov 0.0   ;;  %vm106_vm2 = vmmov 0   ;;  %s142_s1 = inlined_call_operand.vmem [shape: bf16[2,16], index: 1, kind: input, shape index: {}]   ;;  %s143_s0 = inlined_call_operand.vmem [shape: f32[2,2], index: 0, kind: input, shape index: {}]   ;;  %s144_s2 = inlined_call_operand.vmem [shape: f32[1,16], index: 2, kind: input, shape index: {}]   ;;  %s145_s3 = inlined_call_operand.vmem [shape: f32[2,16], index: 3, kind: output, shape index: {}]  }
   0x1   :  { %20 = vst.msk [vmem:[#allocation2] sm:$0x3] %vm19_vm0, %v105_v0  ;;  %97 = vmatprep.subr.bf16.mxu0 %v105_v0  ;;  %v24_v1 = vld [vmem:[%s142_s1] sm:$0x1]  ;;  %99 = vmatprep.mubr.msk.bf16.mxu0 %vm106_vm2, %v105_v0  ;;  %vm25_vm3 = vcmask 15360  }
   0x2   :  { %v21_v2 = vld [vmem:[%s143_s0] sm:$0x3]  ;;  %v31_v3 = vsel %vm29_vm1, %v24_v1, 0 }
   0x3   :  { %v23_v4 = vpack.c.bf16 %v21_v2, %v21_v2  ;;  %98 = vmatpush3.bf16.msra.mxu0 %v31_v3  ;;  %v94_v11 = vld [vmem:[%s144_s2] ss:$0 sm:$0xff] }
   0x6   :  { %100 = vmatmul.mubr.msk.bf16.vlgmr.msra.gmra.mxu0 %vm25_vm3, %v23_v4 }
   0x8   :  { %v22_v5 = vld [vmem:[#allocation2] sm:$0x3] }
  0xc6   :  { %v67_v6 = vpop.f32.mrf.mxu0 }
  0xc7   :  { %v73_v7 = vadd.f32 %v67_v6, %v22_v5 }
  0xc8   :  { %v101_v8 = vpop.f32.mrf.mxu0 }
  0xc9   :  { %75 = vst.msk [vmem:[#allocation2] sm:$0x3] %vm19_vm0, %v73_v7 }
  0xca   :  { %v70_v9 = vpop.f32.mrf.mxu0 }
  0xcc   :  { %v102_v10 = vpop.f32.mrf.mxu0 }
  0xd0   :  { %v79_v12 = vld [vmem:[#allocation2] sm:$0x3] }
  0xd1   :  { %v87_v13 = vadd.f32 %v94_v11, %v79_v12 }
  0xd3   :  { %88 = vst.msk [vmem:[%s145_s3] sm:$0x3] %vm19_vm0, %v87_v13 }

// kernel: alpha_tensor_train_forward.28
= control target key start
LH: loop header
LB: loop body
LE: loop exit
PB: predicated region body
PF: predicated region fallthrough
CT: control target
= control target key end

     0   :  { %vm19_vm0 = vcmask 261120   ;;  %v160_v1 = vmov 0.0   ;;  %s228_s1 = inlined_call_operand.vmem [shape: bf16[32,32], index: 1, kind: input, shape index: {}]   ;;  %s229_s0 = inlined_call_operand.vmem [shape: f32[32,32], index: 0, kind: input, shape index: {}]   ;;  %s230_s2 = inlined_call_operand.vmem [shape: f32[1,32], index: 2, kind: input, shape index: {}]   ;;  %s231_s3 = inlined_call_operand.vmem [shape: f32[32,32], index: 3, kind: output, shape index: {}]  }
   0x1   :  { %v158_v0 = vld [vmem:[%s228_s1 + $0x8] sm:$0xff]   ;;  %22 = vst.msk [vmem:[#allocation2 + $0x10] sm:$0xff] %vm19_vm0, %v160_v1  ;;  %20 = vst.msk [vmem:[#allocation2] sm:$0xff] %vm19_vm0, %v160_v1  ;;  %v159_v2 = vld [vmem:[%s228_s1] sm:$0xff]  }
   0x2   :  { %21 = vst.msk [vmem:[#allocation2 + $0x8] sm:$0xff] %vm19_vm0, %v160_v1  ;;  %23 = vst.msk [vmem:[#allocation2 + $0x18] sm:$0xff] %vm19_vm0, %v160_v1  ;;  %149 = vmatprep.subr.bf16.mxu0 %v158_v0  ;;  %v24_v3 = vld [vmem:[%s229_s0] sm:$0xff]  ;;  %v25_v4 = vld [vmem:[%s229_s0 + $0x8] sm:$0xff] }
   0x3   :  { %150 = vmatpush3.bf16.msra.mxu0 %v158_v0  ;;  %v32_v5 = vpack.c.bf16 %v25_v4, %v24_v3  ;;  %v26_v6 = vld [vmem:[%s229_s0 + $0x10] sm:$0xff]  ;;  %v27_v7 = vld [vmem:[%s229_s0 + $0x18] sm:$0xff]  ;;  %v144_v21 = vld [vmem:[%s230_s2] ss:$0 sm:$0xff] }
   0x4   :  { %151 = vmatprep.subr.bf16.mxu0 %v159_v2  ;;  %v33_v8 = vpack.c.bf16 %v27_v7, %v26_v6 }
   0x5   :  { %153 = vmatprep.mubr.msk.bf16.mxu0 %vm19_vm0, %v32_v5 }
   0x7   :  { %152 = vmatpush3.bf16.msra.mxu0 %v159_v2 }
   0x8   :  { %v30_v9 = vld [vmem:[#allocation2 + $0x10] sm:$0xff]  ;;  %v28_v11 = vld [vmem:[#allocation2] sm:$0xff] }
   0x9   :  { %v31_v14 = vld [vmem:[#allocation2 + $0x18] sm:$0xff]  ;;  %v29_v17 = vld [vmem:[#allocation2 + $0x8] sm:$0xff] }
   0xa   :  { %154 = vmatmul.mubr.msk.bf16.vlgmr.msra.gmra.mxu0 %vm19_vm0, %v33_v8 }
  0xca   :  { %v155_v10 = vpop.f32.mrf.mxu0 }
  0xcb   :  { %v108_v12 = vadd.f32 %v155_v10, %v30_v9 }
  0xcc   :  { %v91_v13 = vpop.f32.mrf.mxu0 }
  0xcd   :  { %112 = vst.msk [vmem:[#allocation2 + $0x10] sm:$0xff] %vm19_vm0, %v108_v12  ;;  %v106_v15 = vadd.f32 %v91_v13, %v28_v11 }
  0xce   :  { %v156_v16 = vpop.f32.mrf.mxu0 }
  0xcf   :  { %110 = vst.msk [vmem:[#allocation2] sm:$0xff] %vm19_vm0, %v106_v15  ;;  %v109_v18 = vadd.f32 %v156_v16, %v31_v14 }
  0xd0   :  { %v94_v19 = vpop.f32.mrf.mxu0 }
  0xd1   :  { %113 = vst.msk [vmem:[#allocation2 + $0x18] sm:$0xff] %vm19_vm0, %v109_v18  ;;  %v107_v20 = vadd.f32 %v94_v19, %v29_v17 }
  0xd3   :  { %111 = vst.msk [vmem:[#allocation2 + $0x8] sm:$0xff] %vm19_vm0, %v107_v20 }
  0xd4   :  { %v119_v22 = vld [vmem:[#allocation2 + $0x10] sm:$0xff] }
  0xd5   :  { %v130_v23 = vadd.f32 %v144_v21, %v119_v22 }
  0xd6   :  { %v117_v24 = vld [vmem:[#allocation2] sm:$0xff] }
  0xd7   :  { %134 = vst.msk [vmem:[%s231_s3 + $0x10] sm:$0xff] %vm19_vm0, %v130_v23  ;;  %v128_v25 = vadd.f32 %v144_v21, %v117_v24 }
  0xd8   :  { %v120_v26 = vld [vmem:[#allocation2 + $0x18] sm:$0xff] }
  0xd9   :  { %132 = vst.msk [vmem:[%s231_s3] sm:$0xff] %vm19_vm0, %v128_v25  ;;  %v131_v27 = vadd.f32 %v144_v21, %v120_v26 }
  0xda   :  { %v118_v28 = vld [vmem:[#allocation2 + $0x8] sm:$0xff] }
  0xdb   :  { %135 = vst.msk [vmem:[%s231_s3 + $0x18] sm:$0xff] %vm19_vm0, %v131_v27  ;;  %v129_v29 = vadd.f32 %v144_v21, %v118_v28 }
  0xdd   :  { %133 = vst.msk [vmem:[%s231_s3 + $0x8] sm:$0xff] %vm19_vm0, %v129_v29 }

// kernel: alpha_tensor_train_forward.27
= control target key start
LH: loop header
LB: loop body
LE: loop exit
PB: predicated region body
PF: predicated region fallthrough
CT: control target
= control target key end

     0   :  { %vm48_vm0 = vcmask 1045504   ;;  %vm49_vm1 = vcmask 1046528   ;;  %v155_v1 = vmov 65535   ;;  %vm41_vm2 = vcmask 105472   ;;  %s221_s1 = inlined_call_operand.vmem [shape: bf16[13,32], index: 1, kind: input, shape index: {}]   ;;  %s222_s0 = inlined_call_operand.vmem [shape: f32[32,13], index: 0, kind: input, shape index: {}]   ;;  %s223_s2 = inlined_call_operand.vmem [shape: f32[1,32], index: 2, kind: input, shape index: {}]   ;;  %s224_s3 = inlined_call_operand.vmem [shape: f32[32,32], index: 3, kind: output, shape index: {}]  }
   0x1   :  { %v154_v0 = vld [vmem:[%s221_s1] sm:$0x7f]   ;;  %v50_v2 = vsel %vm48_vm0, 4294967295, %v155_v1  ;;  %v25_v4 = vld [vmem:[%s222_s0 + $0x8] sm:$0xff]  ;;  %vm19_vm3 = vcmask 261120   ;;  %v26_v7 = vld [vmem:[%s222_s0 + $0x10] sm:$0xff] }
   0x2   :  { %v24_v3 = vld [vmem:[%s222_s0] sm:$0xff]  ;;  %v51_v5 = vsel %vm49_vm1, %v50_v2, 0  ;;  %v27_v8 = vld [vmem:[%s222_s0 + $0x18] sm:$0xff]  ;;  %v156_v9 = vmov 0.0  }
   0x3   :  { %v32_v6 = vpack.c.bf16 %v25_v4, %v24_v3  ;;  %22 = vst.msk [vmem:[#allocation2 + $0x10] sm:$0xff] %vm19_vm3, %v156_v9  ;;  %20 = vst.msk [vmem:[#allocation2] sm:$0xff] %vm19_vm3, %v156_v9  ;;  %v53_v10 = vand.u32 %v154_v0, %v51_v5  ;;  %v33_v11 = vpack.c.bf16 %v27_v8, %v26_v7  ;;  %v142_v24 = vld [vmem:[%s223_s2] ss:$0 sm:$0xff] }
   0x4   :  { %21 = vst.msk [vmem:[#allocation2 + $0x8] sm:$0xff] %vm19_vm3, %v156_v9  ;;  %23 = vst.msk [vmem:[#allocation2 + $0x18] sm:$0xff] %vm19_vm3, %v156_v9 }
   0x5   :  { %148 = vmatprep.mubr.msk.bf16.mxu0 %vm41_vm2, %v32_v6  ;;  %146 = vmatprep.subr.bf16.mxu0 %v53_v10 }
   0x6   :  { %147 = vmatpush3.bf16.msra.mxu0 %v53_v10 }
   0x9   :  { %149 = vmatmul.mubr.msk.bf16.vlgmr.msra.gmra.mxu0 %vm41_vm2, %v33_v11 }
   0xa   :  { %v30_v12 = vld [vmem:[#allocation2 + $0x10] sm:$0xff]  ;;  %v28_v14 = vld [vmem:[#allocation2] sm:$0xff] }
   0xb   :  { %v31_v17 = vld [vmem:[#allocation2 + $0x18] sm:$0xff]  ;;  %v29_v20 = vld [vmem:[#allocation2 + $0x8] sm:$0xff] }
  0xc9   :  { %v150_v13 = vpop.f32.mrf.mxu0 }
  0xca   :  { %v106_v15 = vadd.f32 %v150_v13, %v30_v12 }
  0xcb   :  { %v89_v16 = vpop.f32.mrf.mxu0 }
  0xcc   :  { %111 = vst.msk [vmem:[#allocation2 + $0x10] sm:$0xff] %vm19_vm3, %v106_v15  ;;  %v104_v18 = vadd.f32 %v89_v16, %v28_v14 }
  0xcd   :  { %v151_v19 = vpop.f32.mrf.mxu0 }
  0xce   :  { %109 = vst.msk [vmem:[#allocation2] sm:$0xff] %vm19_vm3, %v104_v18  ;;  %v107_v21 = vadd.f32 %v151_v19, %v31_v17 }
  0xcf   :  { %v92_v22 = vpop.f32.mrf.mxu0 }
  0xd0   :  { %112 = vst.msk [vmem:[#allocation2 + $0x18] sm:$0xff] %vm19_vm3, %v107_v21  ;;  %v105_v23 = vadd.f32 %v92_v22, %v29_v20 }
  0xd2   :  { %110 = vst.msk [vmem:[#allocation2 + $0x8] sm:$0xff] %vm19_vm3, %v105_v23 }
  0xd3   :  { %v118_v25 = vld [vmem:[#allocation2 + $0x10] sm:$0xff] }
  0xd4   :  { %v129_v26 = vadd.f32 %v142_v24, %v118_v25 }
  0xd5   :  { %v116_v27 = vld [vmem:[#allocation2] sm:$0xff] }
  0xd6   :  { %133 = vst.msk [vmem:[%s224_s3 + $0x10] sm:$0xff] %vm19_vm3, %v129_v26  ;;  %v127_v28 = vadd.f32 %v142_v24, %v116_v27 }
  0xd7   :  { %v119_v29 = vld [vmem:[#allocation2 + $0x18] sm:$0xff] }
  0xd8   :  { %131 = vst.msk [vmem:[%s224_s3] sm:$0xff] %vm19_vm3, %v127_v28  ;;  %v130_v30 = vadd.f32 %v142_v24, %v119_v29 }
  0xd9   :  { %v117_v31 = vld [vmem:[#allocation2 + $0x8] sm:$0xff] }
  0xda   :  { %134 = vst.msk [vmem:[%s224_s3 + $0x18] sm:$0xff] %vm19_vm3, %v130_v30  ;;  %v128_v32 = vadd.f32 %v142_v24, %v117_v31 }
  0xdc   :  { %132 = vst.msk [vmem:[%s224_s3 + $0x8] sm:$0xff] %vm19_vm3, %v128_v32 }

// kernel: alpha_tensor_train_forward.38
= control target key start
LH: loop header
LB: loop body
LE: loop exit
PB: predicated region body
PF: predicated region fallthrough
CT: control target
= control target key end

     0   :  { %vm19_vm0 = vcmask 261120   ;;  %vm29_vm1 = vcmask 1043456   ;;  %v105_v0 = vmov 0.0   ;;  %vm106_vm2 = vmmov 0   ;;  %s142_s1 = inlined_call_operand.vmem [shape: bf16[8,32], index: 1, kind: input, shape index: {}]   ;;  %s143_s0 = inlined_call_operand.vmem [shape: f32[8,8], index: 0, kind: input, shape index: {}]   ;;  %s144_s2 = inlined_call_operand.vmem [shape: f32[1,32], index: 2, kind: input, shape index: {}]   ;;  %s145_s3 = inlined_call_operand.vmem [shape: f32[8,32], index: 3, kind: output, shape index: {}]  }
   0x1   :  { %20 = vst.msk [vmem:[#allocation2] sm:$0xff] %vm19_vm0, %v105_v0  ;;  %97 = vmatprep.subr.bf16.mxu0 %v105_v0  ;;  %v24_v1 = vld [vmem:[%s142_s1] sm:$0xf]  ;;  %99 = vmatprep.mubr.msk.bf16.mxu0 %vm106_vm2, %v105_v0  ;;  %vm25_vm3 = vcmask 64512  }
   0x2   :  { %v21_v2 = vld [vmem:[%s143_s0] sm:$0xff]  ;;  %v31_v3 = vsel %vm29_vm1, %v24_v1, 0 }
   0x3   :  { %v23_v4 = vpack.c.bf16 %v21_v2, %v21_v2  ;;  %98 = vmatpush3.bf16.msra.mxu0 %v31_v3  ;;  %v94_v11 = vld [vmem:[%s144_s2] ss:$0 sm:$0xff] }
   0x6   :  { %100 = vmatmul.mubr.msk.bf16.vlgmr.msra.gmra.mxu0 %vm25_vm3, %v23_v4 }
   0x8   :  { %v22_v5 = vld [vmem:[#allocation2] sm:$0xff] }
  0xc6   :  { %v67_v6 = vpop.f32.mrf.mxu0 }
  0xc7   :  { %v73_v7 = vadd.f32 %v67_v6, %v22_v5 }
  0xc8   :  { %v101_v8 = vpop.f32.mrf.mxu0 }
  0xc9   :  { %75 = vst.msk [vmem:[#allocation2] sm:$0xff] %vm19_vm0, %v73_v7 }
  0xca   :  { %v70_v9 = vpop.f32.mrf.mxu0 }
  0xcc   :  { %v102_v10 = vpop.f32.mrf.mxu0 }
  0xd0   :  { %v79_v12 = vld [vmem:[#allocation2] sm:$0xff] }
  0xd1   :  { %v87_v13 = vadd.f32 %v94_v11, %v79_v12 }
  0xd3   :  { %88 = vst.msk [vmem:[%s145_s3] sm:$0xff] %vm19_vm0, %v87_v13 }

// kernel: alpha_tensor_train_forward.32
= control target key start
LH: loop header
LB: loop body
LE: loop exit
PB: predicated region body
PF: predicated region fallthrough
CT: control target
= control target key end

     0   :  { %s2416_s0 = inlined_call_operand.vmem [shape: f32[8,4,32], index: 0, kind: input, shape index: {}]   ;;  %s2417_s1 = inlined_call_operand.vmem [shape: f32[8,4,32], index: 1, kind: input, shape index: {}]   ;;  %s2418_s2 = inlined_call_operand.vmem [shape: f32[1,32], index: 2, kind: input, shape index: {}]   ;;  %s2419_s3 = inlined_call_operand.vmem [shape: f32[1,32], index: 3, kind: input, shape index: {}]   ;;  %s2420_s4 = inlined_call_operand.vmem [shape: f32[1,32], index: 4, kind: input, shape index: {}]   ;;  %s2421_s5 = inlined_call_operand.vmem [shape: f32[1,32], index: 5, kind: input, shape index: {}]   ;;  %s2422_s6 = inlined_call_operand.vmem [shape: bf16[32,32], index: 6, kind: input, shape index: {}]   ;;  %s2423_s7 = inlined_call_operand.vmem [shape: f32[1,32], index: 7, kind: input, shape index: {}]   ;;  %s2424_s8 = inlined_call_operand.vmem [shape: bf16[32,32], index: 8, kind: input, shape index: {}]   ;;  %s2425_s9 = inlined_call_operand.vmem [shape: f32[1,32], index: 9, kind: input, shape index: {}]   ;;  %s2426_s10 = inlined_call_operand.vmem [shape: bf16[32,32], index: 10, kind: input, shape index: {}]   ;;  %s2427_s11 = inlined_call_operand.vmem [shape: f32[1,32], index: 11, kind: input, shape index: {}]   ;;  %s2428_s12 = inlined_call_operand.vmem [shape: bf16[32,32], index: 12, kind: input, shape index: {}]   ;;  %s2429_s13 = inlined_call_operand.vmem [shape: f32[1,32], index: 13, kind: input, shape index: {}]   ;;  %s2430_s14 = inlined_call_operand.vmem [shape: f32[1,32], index: 14, kind: input, shape index: {}]   ;;  %s2431_s15 = inlined_call_operand.vmem [shape: f32[1,32], index: 15, kind: input, shape index: {}]   ;;  %s2432_s16 = inlined_call_operand.vmem [shape: bf16[32,128], index: 16, kind: input, shape index: {}]   ;;  %s2433_s17 = inlined_call_operand.vmem [shape: f32[1,128], index: 17, kind: input, shape index: {}]   ;;  %s2434_s18 = inlined_call_operand.vmem [shape: bf16[128,32], index: 18, kind: input, shape index: {}]   ;;  %s2435_s19 = inlined_call_operand.vmem [shape: f32[1,32], index: 19, kind: input, shape index: {}]   ;;  %s2436_s20 = inlined_call_operand.vmem [shape: f32[8,4,32], index: 20, kind: output, shape index: {0}]   ;;  %s2437_s21 = inlined_call_operand.vmem [shape: f32[8,4,32], index: 21, kind: output, shape index: {1}]  }
   0x1   :  { %2438 = sst [smem:[#allocation2_spill]] %s2416_s0 }
   0x2   :  { %2439 = sst [smem:[#allocation3_spill]] %s2417_s1 }
   0x3   :  { %2440 = sst [smem:[#allocation4_spill]] %s2418_s2  ;;  %s2182_s2 = smov 0  }
   0x4   :  { %2441 = sst [smem:[#allocation5_spill]] %s2419_s3 }
   0x5   :  { %2442 = sst [smem:[#allocation6_spill]] %s2420_s4 }
   0x6   :  { %2443 = sst [smem:[#allocation7_spill]] %s2421_s5 }
   0x7 LB: > { %s1798_s25 = sadd.s32 4294967295, %s2062_s2   ;;  %p1802_p0 = scmp.ge.s32.totalorder %s2062_s2, 1  ;;  %s2062_s2 = sphi %s2182_s2, %s32_s2  }
   0x8   : > { %p598_p1 = scmp.lt.s32.totalorder %s2062_s2, 9 }
   0xa   : > { %p599_p2 = pnand %p1802_p0, %p598_p1 }
   0xb   : > { %p664_p3 = scmp.lt.s32.totalorder (!%p599_p2), %s1798_s25, 7  ;;  %s2444_s28 = sld [smem:[#allocation2_spill]] (!%p599_p2) }
   0xc   : > { %602 = sbr.rel (%p599_p2) target bundleno = 2469 (0x9a5), region = 100  ;;  %s2445_s30 = sld [smem:[#allocation3_spill]] (!%p599_p2) }
   0xd   : > { %s2446_s3 = sld [smem:[#allocation4_spill]] (!%p599_p2)  ;;  %s2066_s22 = smov (!%p599_p2), 120  }
   0xe   : > { %s2447_s0 = sld [smem:[#allocation5_spill]] (!%p599_p2)  ;;  %s2067_s24 = smov (!%p599_p2), 112  }
   0xf   : > { %s2070_s4 = smov (!%p599_p2), 16  }
  0x11   : > { %s2451_s25 = smov (!%p664_p3, %s1798_s25), 7  ;;  %vm686_vm0 = vcmask 1043456   ;;  %vm736_vm1 = vcmask 261120   ;;  %v2016_v10 = vld [vmem:[%s2422_s6 + $0x8] sm:$0xff]   ;;  %v2064_v11 = vmov 0.0   ;;  %vm2065_vm2 = vmmov 0  }
  0x12   : > { %s2190_s26 = sshll.u32 %s2451_s25, 2  ;;  %1892 = vmatprep.subr.bf16.mxu0 %v2064_v11  ;;  %1896 = vmatprep.mubr.msk.bf16.mxu0 %vm2065_vm2, %v2064_v11  ;;  %v2017_v12 = vld [vmem:[%s2422_s6] sm:$0xff]   ;;  %v2018_v23 = vld [vmem:[%s2424_s8 + $0x8] sm:$0xff]   ;;  %s2449_s25 = sld [smem:[#allocation7_spill]]  ;;  %vm999_vm3 = vcmask 64512   ;;  %vm1437_vm4 = vcmask 130048  }
  0x13   : > { %s667_s29 = scalar_lea.vmem %s2444_s28, %s2190_s26  ;;  %s671_s5 = scalar_lea.vmem %s2445_s30, %s2190_s26  ;;  %1893 = vmatpush3.bf16.msra.mxu0 %v2016_v10  ;;  %1916 = vmatprep.subr.bf16.mxu1 %v2064_v11  ;;  %v1807_v17 = vld [vmem:[%s2446_s3] ss:$0 sm:$0xff]  ;;  %v2020_v29 = vld [vmem:[%s2426_s10 + $0x8] sm:$0xff]   ;;  %vm1439_vm5 = vcmask 195584   ;;  %vm1698_vm6 = vcmask 257024   ;;  %vm1700_vm7 = vcmask 261124  }
  0x14   : > { %v681_v0 = vld [vmem:[%s667_s29] sm:$0xf]  ;;  %1894 = vmatprep.subr.bf16.mxu0 %v2064_v11  ;;  %1918 = vmatprep.mubr.msk.bf16.mxu1 %vm2065_vm2, %v2064_v11  ;;  %s675_s28 = scalar_lea.vmem %s2436_s20, %s2190_s26 }
  0x15   : > { %v682_v1 = vld [vmem:[%s671_s5] sm:$0xf]  ;;  %s2448_s5 = sld [smem:[#allocation6_spill]] }
  0x16   : > { %v684_v2 = vrot.slane %v682_v1, 4  ;;  %v1808_v19 = vld [vmem:[%s2447_s0] ss:$0 sm:$0xff]  ;;  %s2069_s0 = smov 8  }
  0x17   : > { %1895 = vmatpush3.bf16.msra.mxu0 %v2017_v12  ;;  %v2019_v27 = vld [vmem:[%s2424_s8] sm:$0xff]  }
  0x18   : > { %v2201_v3 = vsel %vm686_vm0, %v681_v0, %v684_v2  ;;  %1900 = vmatprep.subr.bf16.mxu0 %v2064_v11  ;;  %v1810_v26 = vld [vmem:[%s2449_s25] ss:$0 sm:$0xff]  ;;  %s2068_s25 = smov 104  }
  0x19   : > { %v737_v4 = vsel %vm736_vm1, %v2201_v3, 0.0  ;;  %v2021_v31 = vld [vmem:[%s2426_s10] sm:$0xff]  }
  0x1a   : > { %738 = vadd.xlane.f32.xlu0 %v737_v4  ;;  %v1811_v32 = vld [vmem:[%s2423_s7] ss:$0 sm:$0xff] }
  0x1b   : > { %v1809_v21 = vld [vmem:[%s2448_s5] ss:$0 sm:$0xff] }
  0x1c   : > { %v1815_v38 = vld [vmem:[%s2425_s9] ss:$0 sm:$0xff] }
  0x1d   : > { %v1819_v54 = vld [vmem:[%s2427_s11] ss:$0 sm:$0xff] }
  0xa3   : > { %v739_v5 = vpop.xlane.xlu0 %738 }
  0xa4   : > { %v741_v6 = vmul.f32 0.03125, %v739_v5 }
  0xa6   : > { %v742_v7 = vsub.f32 %v2201_v3, %v741_v6 }
  0xa8   : > { %v743_v8 = vmul.f32 %v742_v7, %v742_v7 }
  0xaa   : > { %v744_v9 = vsel %vm736_vm1, %v743_v8, 0.0 }
  0xab   : > { %745 = vadd.xlane.f32.xlu0 %v744_v9 }
 0x134   : > { %v746_v13 = vpop.xlane.xlu0 %745 }
 0x135   : > { %v747_v14 = vmul.f32 0.03125, %v746_v13 }
 0x137   : > { %v748_v15 = vadd.f32 1e-05, %v747_v14 }
 0x139   : > { %2034 = vrsqrt.f32 %v748_v15 }
 0x146   : > { %v2035_v16 = vpop.eup %2034 }
 0x147   : > { %v750_v18 = vmul.f32 %v2035_v16, %v742_v7 }
 0x149   : > { %v757_v20 = vmul.f32 %v1807_v17, %v750_v18  ;;  %v771_v24 = vmul.f32 %v1809_v21, %v750_v18 }
 0x14b   : > { %v764_v22 = vadd.f32 %v1808_v19, %v757_v20  ;;  %v778_v28 = vadd.f32 %v1810_v26, %v771_v24 }
 0x14d   : > { %v779_v25 = vpack.c.bf16 %v764_v22, %v764_v22  ;;  %v841_v30 = vpack.c.bf16 %v778_v28, %v778_v28 }
 0x14f   : > { %1897 = vmatmul.mubr.msk.bf16.vlgmr.msra.gmra.mxu0 %vm736_vm1, %v779_v25 }
 0x150   : > { %1901 = vmatpush3.bf16.msra.mxu0 %v2018_v23  ;;  %1904 = vmatprep.mubr.msk.bf16.mxu0 %vm2065_vm2, %v2064_v11 }
 0x151   : > { %1902 = vmatprep.subr.bf16.mxu0 %v2064_v11 }
 0x154   : > { %1903 = vmatpush3.bf16.msra.mxu0 %v2019_v27 }
 0x155   : > { %1908 = vmatprep.subr.bf16.mxu0 %v2064_v11 }
 0x157   : > { %1905 = vmatmul.mubr.msk.bf16.vlgmr.msra.gmra.mxu0 %vm736_vm1, %v841_v30 }
 0x158   : > { %1909 = vmatpush3.bf16.msra.mxu0 %v2020_v29  ;;  %1912 = vmatprep.mubr.msk.bf16.mxu0 %vm2065_vm2, %v2064_v11 }
 0x159   : > { %1910 = vmatprep.subr.bf16.mxu0 %v2064_v11 }
 0x15c   : > { %1911 = vmatpush3.bf16.msra.mxu0 %v2021_v31 }
 0x15d   : > { %1922 = vmatprep.subr.bf16.mxu0 %v2064_v11 }
 0x15f   : > { %1913 = vmatmul.mubr.msk.bf16.vlgmr.msra.gmra.mxu0 %vm736_vm1, %v841_v30 }
 0x160   : > { %1924 = vmatprep.mubr.msk.bf16.mxu0 %vm2065_vm2, %v2064_v11 }
 0x20f   : > { %v835_v33 = vpop.f32.mrf.mxu0 }
 0x210   : > { %v836_v34 = vadd.f32 %v1811_v32, %v835_v33 }
 0x211   : > { %v1898_v35 = vpop.f32.mrf.mxu0 }
 0x212   : > { %962 = vrot.lane.b32.xlu0 %v836_v34, %s2066_s22  ;;  %v991_v48 = vpack.c.bf16 %v836_v34, %v836_v34 }
 0x213   : > { %v838_v36 = vpop.f32.mrf.mxu0 }
 0x215   : > { %v1899_v37 = vpop.f32.mrf.mxu0 }
 0x217   : > { %v897_v39 = vpop.f32.mrf.mxu0 }
 0x218   : > { %v898_v40 = vadd.f32 %v1815_v38, %v897_v39 }
 0x219   : > { %v1906_v41 = vpop.f32.mrf.mxu0 }
 0x21a   : > { %972 = vrot.lane.b32.xlu1 %v898_v40, %s2066_s22  ;;  %v995_v42 = vpack.c.bf16 %v898_v40, %v898_v40 }
 0x21b   : > { %v900_v43 = vpop.f32.mrf.mxu0 }
 0x21c   : > { %v1004_v44 = vsel %vm999_vm3, %v995_v42, 0 }
 0x21d   : > { %v1907_v45 = vpop.f32.mrf.mxu0  ;;  %1917 = vmatpush3.bf16.xpose.msra.mxu1 %v1004_v44 }
 0x21e   : > { %975 = vrot.lane.b32.xlu1 %v898_v40, %s2067_s24  ;;  %1928 = vmatprep.subr.bf16.mxu1 %v2064_v11 }
 0x21f   : > { %v955_v46 = vpop.f32.mrf.mxu0 }
 0x220   : > { %v2280_v58 = vadd.f32 %v1819_v54, %v955_v46 }
 0x221   : > { %v1914_v47 = vpop.f32.mrf.mxu0 }
 0x222   : > { %978 = vrot.lane.b32.xlu1 %v898_v40, %s2068_s25  ;;  %v1236_v0 = vpack.c.bf16 %v2280_v58, %v2280_v58 }
 0x223   : > { %v958_v49 = vpop.f32.mrf.mxu0 }
 0x224   : > { %1919 = vmatmul.mubr.msk.bf16.vlgmr.msra.gmra.mxu1 %vm999_vm3, %v991_v48  ;;  %v1244_v4 = vsel %vm686_vm0, %v1236_v0, 0 }
 0x225   : > { %v1915_v50 = vpop.f32.mrf.mxu0  ;;  %1930 = vmatprep.mubr.msk.bf16.mxu1 %vm2065_vm2, %v2064_v11 }
 0x226   : > { %965 = vrot.lane.b32.xlu1 %v836_v34, %s2067_s24 }
 0x22a   : > { %968 = vrot.lane.b32.xlu1 %v836_v34, %s2068_s25 }
 0x284   : > { %v963_v57 = vpop.permute.xlu0 %962 }
 0x285   : > { %v992_v61 = vpack.c.bf16 %v963_v57, %v963_v57 }
 0x28c   : > { %v973_v51 = vpop.permute.xlu1 %972 }
 0x28d   : > { %v996_v52 = vpack.c.bf16 %v973_v51, %v973_v51 }
 0x28f   : > { %v1050_v53 = vsel %vm999_vm3, %v996_v52, 0 }
 0x290   : > { %1923 = vmatpush3.bf16.xpose.msra.mxu0 %v1050_v53  ;;  %v976_v55 = vpop.permute.xlu1 %975 }
 0x291   : > { %v997_v56 = vpack.c.bf16 %v976_v55, %v976_v55  ;;  %1934 = vmatprep.subr.bf16.mxu0 %v2064_v11 }
 0x293   : > { %v1096_v59 = vsel %vm999_vm3, %v997_v56, 0 }
 0x294   : > { %v979_v60 = vpop.permute.xlu1 %978  ;;  %1929 = vmatpush3.bf16.xpose.msra.mxu1 %v1096_v59 }
 0x295   : > { %v998_v62 = vpack.c.bf16 %v979_v60, %v979_v60  ;;  %1940 = vmatprep.subr.bf16.mxu1 %v2064_v11 }
 0x297   : > { %v1142_v63 = vsel %vm999_vm3, %v998_v62, 0  ;;  %1925 = vmatmul.mubr.msk.bf16.vlgmr.msra.gmra.mxu0 %vm999_vm3, %v992_v61 }
 0x298   : > { %1935 = vmatpush3.bf16.xpose.msra.mxu0 %v1142_v63  ;;  %v966_v1 = vpop.permute.xlu1 %965  ;;  %1936 = vmatprep.mubr.msk.bf16.mxu0 %vm2065_vm2, %v2064_v11 }
 0x299   : > { %v993_v2 = vpack.c.bf16 %v966_v1, %v966_v1  ;;  %1946 = vmatprep.subr.bf16.mxu0 %v2064_v11 }
 0x29b   : > { %1931 = vmatmul.mubr.msk.bf16.vlgmr.msra.gmra.mxu1 %vm999_vm3, %v993_v2 }
 0x29c   : > { %v969_v5 = vpop.permute.xlu1 %968  ;;  %1941 = vmatpush3.bf16.msra.mxu1 %v1244_v4  ;;  %1942 = vmatprep.mubr.msk.bf16.mxu1 %vm2065_vm2, %v2064_v11 }
 0x29d   : > { %v994_v6 = vpack.c.bf16 %v969_v5, %v969_v5  ;;  %1952 = vmatprep.subr.bf16.mxu1 %v2064_v11 }
 0x29f   : > { %1937 = vmatmul.mubr.msk.bf16.vlgmr.msra.gmra.mxu0 %vm999_vm3, %v994_v6 }
 0x2a0   : > { %1948 = vmatprep.mubr.msk.bf16.mxu0 %vm2065_vm2, %v2064_v11 }
 0x2e4   : > { %v1040_v7 = vpop.f32.mrf.mxu1 }
 0x2e5   : > { %v1184_v8 = vmul.f32 0.35355338, %v1040_v7 }
 0x2e6   : > { %v1920_v9 = vpop.f32.mrf.mxu1 }
 0x2e7   : > { %v1188_v10 = vsel %vm999_vm3, %v1184_v8, -inf }
 0x2e8   : > { %1189 = vmax.xlane.f32.xlu1 %v1188_v10  ;;  %v1043_v12 = vpop.f32.mrf.mxu1 }
 0x2ea   : > { %v1921_v13 = vpop.f32.mrf.mxu1 }
 0x357   : > { %v1086_v14 = vpop.f32.mrf.mxu0 }
 0x358   : > { %v1185_v15 = vmul.f32 0.35355338, %v1086_v14 }
 0x359   : > { %v1926_v16 = vpop.f32.mrf.mxu0 }
 0x35a   : > { %v1191_v17 = vsel %vm999_vm3, %v1185_v15, -inf }
 0x35b   : > { %v1132_v18 = vpop.f32.mrf.mxu1  ;;  %1192 = vmax.xlane.f32.xlu0 %v1191_v17  ;;  %v1089_v19 = vpop.f32.mrf.mxu0 }
 0x35c   : > { %v1186_v20 = vmul.f32 0.35355338, %v1132_v18  ;;  %v2022_v19 = vld [vmem:[%s2428_s12 + $0x8] sm:$0xff]  }
 0x35d   : > { %v1927_v21 = vpop.f32.mrf.mxu0  ;;  %v1932_v22 = vpop.f32.mrf.mxu1 }
 0x35e   : > { %v1194_v23 = vsel %vm999_vm3, %v1186_v20, -inf }
 0x35f   : > { %1195 = vmax.xlane.f32.xlu1 %v1194_v23  ;;  %v1135_v24 = vpop.f32.mrf.mxu1  ;;  %v1178_v25 = vpop.f32.mrf.mxu0 }
 0x360   : > { %v1187_v26 = vmul.f32 0.35355338, %v1178_v25 }
 0x361   : > { %v1933_v27 = vpop.f32.mrf.mxu1  ;;  %v1938_v28 = vpop.f32.mrf.mxu0 }
 0x362   : > { %v1197_v29 = vsel %vm999_vm3, %v1187_v26, -inf  ;;  %v2023_v28 = vld [vmem:[%s2428_s12] sm:$0xff]  }
 0x363   : > { %1198 = vmax.xlane.f32.xlu1 %v1197_v29  ;;  %v1181_v30 = vpop.f32.mrf.mxu0 }
 0x365   : > { %v1939_v31 = vpop.f32.mrf.mxu0 }
 0x371   : > { %v1190_v32 = vpop.xlane.xlu1 %1189 }
 0x372   : > { %v1200_v33 = vsub.f32 %v1184_v8, %v1190_v32 }
 0x374   : > { %v1204_v34 = vmul.f32 1.442695, %v1200_v33 }
 0x376   : > { %2036 = vpow2.f32 %v1204_v34 }
 0x383   : > { %v2037_v35 = vpop.eup %2036 }
 0x384   : > { %v1212_v36 = vsel %vm999_vm3, %v2037_v35, 0.0 }
 0x385   : > { %1213 = vadd.xlane.f32.xlu0 %v1212_v36 }
 0x3e4   : > { %v1193_v37 = vpop.xlane.xlu0 %1192 }
 0x3e5   : > { %v1201_v38 = vsub.f32 %v1185_v15, %v1193_v37 }
 0x3e7   : > { %v1206_v39 = vmul.f32 1.442695, %v1201_v38 }
 0x3e8   : > { %v1196_v40 = vpop.xlane.xlu1 %1195 }
 0x3e9   : > { %2038 = vpow2.f32 %v1206_v39  ;;  %v1202_v41 = vsub.f32 %v1186_v20, %v1196_v40  ;;  %v1831_v40 = vld [vmem:[%s2429_s13] ss:$0 sm:$0xff] }
 0x3eb   : > { %v1208_v42 = vmul.f32 1.442695, %v1202_v41 }
 0x3ec   : > { %v1199_v48 = vpop.xlane.xlu1 %1198 }
 0x3ed   : > { %2040 = vpow2.f32 %v1208_v42  ;;  %v1203_v49 = vsub.f32 %v1187_v26, %v1199_v48 }
 0x3ef   : > { %v1210_v50 = vmul.f32 1.442695, %v1203_v49 }
 0x3f6   : > { %v2039_v43 = vpop.eup %2038 }
 0x3f7   : > { %v1215_v44 = vsel %vm999_vm3, %v2039_v43, 0.0 }
 0x3f8   : > { %1216 = vadd.xlane.f32.xlu1 %v1215_v44 }
 0x3fa   : > { %v2041_v45 = vpop.eup %2040 }
 0x3fb   : > { %v1218_v46 = vsel %vm999_vm3, %v2041_v45, 0.0 }
 0x3fc   : > { %1219 = vadd.xlane.f32.xlu0 %v1218_v46 }
 0x409   : > { %985 = vrot.lane.b32.xlu1 %v2280_v58, %s2067_s24 }
 0x40e   : > { %v1214_v47 = vpop.xlane.xlu0 %1213 }
 0x40f   : > { %2042 = vrcp.f32 %v1214_v47 }
 0x410   : > { %2044 = vpow2.f32 %v1210_v50 }
 0x412   : > { %982 = vrot.lane.b32.xlu0 %v2280_v58, %s2066_s22  ;;  %s2071_s22 = smov 24  }
 0x41c   : > { %v2043_v51 = vpop.eup %2042 }
 0x41d   : > { %v1228_v52 = vmul.f32 %v2043_v51, %v2037_v35  ;;  %v2045_v54 = vpop.eup %2044 }
 0x41e   : > { %v1221_v55 = vsel %vm999_vm3, %v2045_v54, 0.0 }
 0x41f   : > { %v1232_v53 = vpack.c.bf16 %v1228_v52, %v1228_v52 }
 0x421   : > { %1943 = vmatmul.mubr.msk.bf16.vlgmr.msra.gmra.mxu1 %vm999_vm3, %v1232_v53  ;;  %v2024_v53 = vld [vmem:[%s2432_s16 + $0x8] sm:$0xff]  }
 0x422   : > { %1954 = vmatprep.mubr.msk.bf16.mxu1 %vm2065_vm2, %v2064_v11 }
 0x42d   : > { %1222 = vadd.xlane.f32.xlu1 %v1221_v55 }
 0x43e   : > { %988 = vrot.lane.b32.xlu1 %v2280_v58, %s2068_s25 }
 0x481   : > { %v1217_v56 = vpop.xlane.xlu1 %1216 }
 0x482   : > { %2046 = vrcp.f32 %v1217_v56 }
 0x485   : > { %v1220_v57 = vpop.xlane.xlu0 %1219  ;;  %v986_v59 = vpop.permute.xlu1 %985 }
 0x486   : > { %2048 = vrcp.f32 %v1220_v57  ;;  %v1238_v60 = vpack.c.bf16 %v986_v59, %v986_v59  ;;  %v1835_v59 = vld [vmem:[%s2430_s14] ss:$0 sm:$0xff] }
 0x488   : > { %v1336_v61 = vsel %vm686_vm0, %v1238_v60, 0 }
 0x489   : > { %v983_v62 = vpop.permute.xlu0 %982  ;;  %1953 = vmatpush3.bf16.msra.mxu1 %v1336_v61  ;;  %v1836_v61 = vld [vmem:[%s2431_s15] ss:$0 sm:$0xff] }
 0x48a   : > { %v1237_v63 = vpack.c.bf16 %v983_v62, %v983_v62  ;;  %1964 = vmatprep.subr.bf16.mxu1 %v2064_v11 }
 0x48c   : > { %v1290_v0 = vsel %vm686_vm0, %v1237_v63, 0 }
 0x48d   : > { %1947 = vmatpush3.bf16.msra.mxu0 %v1290_v0 }
 0x48e   : > { %1958 = vmatprep.subr.bf16.mxu0 %v2064_v11 }
 0x48f   : > { %v2047_v1 = vpop.eup %2046 }
 0x490   : > { %v1229_v58 = vmul.f32 %v2047_v1, %v2039_v43  ;;  %v2026_v1 = vld [vmem:[%s2434_s18 + $0x38] sm:$0xff]  }
 0x492   : > { %v1233_v2 = vpack.c.bf16 %v1229_v58, %v1229_v58  ;;  %v2027_v58 = vld [vmem:[%s2434_s18 + $0x30] sm:$0xff]  }
 0x493   : > { %v2049_v4 = vpop.eup %2048 }
 0x494   : > { %1949 = vmatmul.mubr.msk.bf16.vlgmr.msra.gmra.mxu0 %vm999_vm3, %v1233_v2  ;;  %v1230_v5 = vmul.f32 %v2049_v4, %v2041_v45  ;;  %v2028_v2 = vld [vmem:[%s2434_s18 + $0x28] sm:$0xff]   ;;  %v2029_v4 = vld [vmem:[%s2434_s18 + $0x20] sm:$0xff]  }
 0x495   : > { %1960 = vmatprep.mubr.msk.bf16.mxu0 %vm2065_vm2, %v2064_v11 }
 0x496   : > { %v1234_v6 = vpack.c.bf16 %v1230_v5, %v1230_v5  ;;  %v2030_v5 = vld [vmem:[%s2434_s18 + $0x18] sm:$0xff]  }
 0x498   : > { %1955 = vmatmul.mubr.msk.bf16.vlgmr.msra.gmra.mxu1 %vm999_vm3, %v1234_v6  ;;  %v2031_v6 = vld [vmem:[%s2434_s18 + $0x10] sm:$0xff]  }
 0x499   : > { %1968 = vmatprep.mubr.msk.bf16.mxu1 %vm2065_vm2, %v2064_v11  ;;  %1965 = vmatpush3.bf16.msra.mxu1 %v2022_v19 }
 0x49a   : > { %1966 = vmatprep.subr.bf16.mxu1 %v2064_v11 }
 0x49d   : > { %1967 = vmatpush3.bf16.msra.mxu1 %v2023_v28 }
 0x49e   : > { %1980 = vmatprep.subr.bf16.mxu1 %v2064_v11 }
 0x4b6   : > { %v1223_v7 = vpop.xlane.xlu1 %1222 }
 0x4b7   : > { %2050 = vrcp.f32 %v1223_v7  ;;  %v2032_v7 = vld [vmem:[%s2434_s18 + $0x8] sm:$0xff]  }
 0x4ba   : > { %v989_v8 = vpop.permute.xlu1 %988 }
 0x4bb   : > { %v1239_v9 = vpack.c.bf16 %v989_v8, %v989_v8  ;;  %v2033_v8 = vld [vmem:[%s2434_s18] sm:$0xff]  }
 0x4bd   : > { %v1382_v10 = vsel %vm686_vm0, %v1239_v9, 0  ;;  %v1837_v9 = vld [vmem:[%s2433_s17] ss:$0 sm:$0xff] }
 0x4be   : > { %1959 = vmatpush3.bf16.msra.mxu0 %v1382_v10 }
 0x4bf   : > { %1972 = vmatprep.subr.bf16.mxu0 %v2064_v11 }
 0x4c4   : > { %v2051_v12 = vpop.eup %2050 }
 0x4c5   : > { %v1231_v13 = vmul.f32 %v2051_v12, %v2045_v54 }
 0x4c7   : > { %v1235_v14 = vpack.c.bf16 %v1231_v13, %v1231_v13 }
 0x4c9   : > { %1961 = vmatmul.mubr.msk.bf16.vlgmr.msra.gmra.mxu0 %vm999_vm3, %v1235_v14 }
 0x4ca   : > { %1976 = vmatprep.mubr.msk.bf16.mxu0 %vm2065_vm2, %v2064_v11  ;;  %1973 = vmatpush3.bf16.msra.mxu0 %v2024_v53 }
 0x4cb   : > { %1974 = vmatprep.subr.bf16.mxu0 %v2064_v11 }
 0x4e1   : > { %v1280_v15 = vpop.f32.mrf.mxu1 }
 0x4e3   : > { %v1944_v16 = vpop.f32.mrf.mxu1 }
 0x4e5   : > { %v1283_v17 = vpop.f32.mrf.mxu1 }
 0x4e7   : > { %v1945_v18 = vpop.f32.mrf.mxu1 }
 0x554   : > { %v1326_v20 = vpop.f32.mrf.mxu0 }
 0x555   : > { %1425 = vrot.lane.b32.xlu0 %v1326_v20, %s2069_s0 }
 0x556   : > { %v1950_v21 = vpop.f32.mrf.mxu0 }
 0x558   : > { %v1329_v22 = vpop.f32.mrf.mxu0  ;;  %v1372_v23 = vpop.f32.mrf.mxu1 }
 0x559   : > { %1429 = vrot.lane.b32.xlu1 %v1372_v23, %s2070_s4  ;;  %s679_s4 = scalar_lea.vmem %s2437_s21, %s2190_s26 }
 0x55a   : > { %v1951_v24 = vpop.f32.mrf.mxu0  ;;  %v1956_v25 = vpop.f32.mrf.mxu1 }
 0x55b   : > { %v1841_v25 = vld [vmem:[%s2435_s19] ss:$0 sm:$0xff] }
 0x55c   : > { %v1375_v26 = vpop.f32.mrf.mxu1 }
 0x55e   : > { %v1957_v27 = vpop.f32.mrf.mxu1 }
 0x589   : > { %v1418_v29 = vpop.f32.mrf.mxu0 }
 0x58a   : > { %1433 = vrot.lane.b32.xlu0 %v1418_v29, %s2071_s22 }
 0x58b   : > { %v1962_v30 = vpop.f32.mrf.mxu0 }
 0x58d   : > { %v1421_v31 = vpop.f32.mrf.mxu0 }
 0x58f   : > { %v1963_v32 = vpop.f32.mrf.mxu0 }
 0x5c7   : > { %v1426_v33 = vpop.permute.xlu0 %1425 }
 0x5c8   : > { %v1436_v35 = vsel %vm999_vm3, %v1280_v15, %v1426_v33 }
 0x5cb   : > { %v1430_v34 = vpop.permute.xlu1 %1429 }
 0x5cc   : > { %v1438_v36 = vsel %vm1437_vm4, %v1436_v35, %v1430_v34 }
 0x5fc   : > { %v1434_v37 = vpop.permute.xlu0 %1433 }
 0x5fd   : > { %v1440_v38 = vsel %vm1439_vm5, %v1438_v36, %v1434_v37 }
 0x5fe   : > { %v1441_v39 = vpack.c.bf16 %v1440_v38, %v1440_v38 }
 0x600   : > { %1969 = vmatmul.mubr.msk.bf16.vlgmr.msra.gmra.mxu1 %vm736_vm1, %v1441_v39 }
 0x601   : > { %1996 = vmatprep.mubr.msk.bf16.mxu1 %vm2065_vm2, %v2064_v11  ;;  %1981 = vmatpush3.bf16.msra.mxu1 %v2026_v1 }
 0x602   : > { %1982 = vmatprep.subr.bf16.mxu1 %v2064_v11 }
 0x605   : > { %1983 = vmatpush3.bf16.msra.mxu1 %v2027_v58 }
 0x606   : > { %1984 = vmatprep.subr.bf16.mxu1 %v2064_v11 }
 0x609   : > { %1985 = vmatpush3.bf16.msra.mxu1 %v2028_v2 }
 0x60a   : > { %1986 = vmatprep.subr.bf16.mxu1 %v2064_v11 }
 0x60d   : > { %1987 = vmatpush3.bf16.msra.mxu1 %v2029_v4 }
 0x60e   : > { %1988 = vmatprep.subr.bf16.mxu1 %v2064_v11 }
 0x611   : > { %1989 = vmatpush3.bf16.msra.mxu1 %v2030_v5 }
 0x612   : > { %1990 = vmatprep.subr.bf16.mxu1 %v2064_v11 }
 0x615   : > { %1991 = vmatpush3.bf16.msra.mxu1 %v2031_v6 }
 0x616   : > { %1992 = vmatprep.subr.bf16.mxu1 %v2064_v11 }
 0x619   : > { %1993 = vmatpush3.bf16.msra.mxu1 %v2032_v7 }
 0x61a   : > { %1994 = vmatprep.subr.bf16.mxu1 %v2064_v11 }
 0x61d   : > { %1995 = vmatpush3.bf16.msra.mxu1 %v2033_v8 }
 0x6c0   : > { %v1497_v41 = vpop.f32.mrf.mxu1 }
 0x6c1   : > { %v1498_v42 = vadd.f32 %v1831_v40, %v1497_v41 }
 0x6c2   : > { %v1970_v43 = vpop.f32.mrf.mxu1 }
 0x6c3   : > { %v2347_v44 = vadd.f32 %v1498_v42, %v2201_v3  ;;  %v2025_v3 = vld [vmem:[%s2432_s16] sm:$0xff]  }
 0x6c4   : > { %v1500_v45 = vpop.f32.mrf.mxu1  ;;  %1975 = vmatpush3.bf16.msra.mxu0 %v2025_v3 }
 0x6c5   : > { %v1504_v46 = vsel %vm736_vm1, %v2347_v44, 0.0 }
 0x6c6   : > { %1505 = vadd.xlane.f32.xlu1 %v1504_v46  ;;  %v1971_v47 = vpop.f32.mrf.mxu1 }
 0x74f   : > { %v1506_v48 = vpop.xlane.xlu1 %1505 }
 0x750   : > { %v1507_v49 = vmul.f32 0.03125, %v1506_v48 }
 0x752   : > { %v1508_v50 = vsub.f32 %v2347_v44, %v1507_v49 }
 0x754   : > { %v1509_v51 = vmul.f32 %v1508_v50, %v1508_v50 }
 0x756   : > { %v1510_v52 = vsel %vm736_vm1, %v1509_v51, 0.0 }
 0x757   : > { %1511 = vadd.xlane.f32.xlu0 %v1510_v52 }
 0x7e0   : > { %v1512_v54 = vpop.xlane.xlu0 %1511 }
 0x7e1   : > { %v1513_v55 = vmul.f32 0.03125, %v1512_v54 }
 0x7e3   : > { %v1514_v56 = vadd.f32 1e-05, %v1513_v55 }
 0x7e5   : > { %2052 = vrsqrt.f32 %v1514_v56 }
 0x7f2   : > { %v2053_v57 = vpop.eup %2052 }
 0x7f3   : > { %v1516_v60 = vmul.f32 %v2053_v57, %v1508_v50 }
 0x7f5   : > { %v1523_v62 = vmul.f32 %v1835_v59, %v1516_v60 }
 0x7f7   : > { %v1530_v63 = vadd.f32 %v1836_v61, %v1523_v62 }
 0x7f9   : > { %v1531_v0 = vpack.c.bf16 %v1530_v63, %v1530_v63 }
 0x7fb   : > { %1977 = vmatmul.mubr.msk.bf16.vlgmr.msra.gmra.mxu0 %vm736_vm1, %v1531_v0 }
 0x8bb   : > { %v1587_v10 = vpop.f32.mrf.mxu0 }
 0x8bc   : > { %v1588_v12 = vadd.f32 %v1837_v9, %v1587_v10 }
 0x8bd   : > { %v1978_v13 = vpop.f32.mrf.mxu0 }
 0x8be   : > { %v1593_v14 = vmul.f32 %v1588_v12, %v1588_v12 }
 0x8bf   : > { %v1590_v15 = vpop.f32.mrf.mxu0 }
 0x8c0   : > { %v1594_v16 = vmul.f32 %v1593_v14, %v1588_v12 }
 0x8c1   : > { %v1979_v17 = vpop.f32.mrf.mxu0 }
 0x8c2   : > { %v1595_v18 = vmul.f32 0.044715, %v1594_v16 }
 0x8c4   : > { %v1596_v19 = vadd.f32 %v1595_v18, %v1588_v12 }
 0x8c6   : > { %v1597_v20 = vmul.f32 0.7978846, %v1596_v19 }
 0x8c8   : > { %2054 = vtanh.f32 %v1597_v20 }
 0x8d5   : > { %v2055_v21 = vpop.eup %2054 }
 0x8d6   : > { %v1599_v11 = vadd.f32 1.0, %v2055_v21 }
 0x8d8   : > { %v1600_v22 = vmul.f32 0.5, %v1599_v11 }
 0x8da   : > { %v1601_v23 = vmul.f32 %v1600_v22, %v1588_v12 }
 0x8dc   : > { %v1602_v24 = vpack.c.bf16 %v1601_v23, %v1601_v23 }
 0x8de   : > { %1997 = vmatmul.mubr.bf16.vlgmr.msra.gmra.mxu1 %v1602_v24 }
 0x99e   : > { %v1691_v26 = vpop.f32.mrf.mxu1 }
 0x99f   : > { %v1692_v27 = vadd.f32 %v1841_v25, %v1691_v26 }
 0x9a0   : > { %v1998_v28 = vpop.f32.mrf.mxu1 }
 0x9a1   : > { %v1697_v29 = vadd.f32 %v1692_v27, %v2347_v44 }
 0x9a2   : > { %v1694_v30 = vpop.f32.mrf.mxu1 }
 0x9a3   : > { %1699 = vst.msk [vmem:[%s675_s28] sm:$0xf] %vm1698_vm6, %v1697_v29 }
 0x9a4   : > { %1701 = vst.msk [vmem:[%s679_s4 - $0x4] sm:$0xf0] %vm1700_vm7, %v1697_v29  ;;  %v1999_v31 = vpop.f32.mrf.mxu1 }
 0x9a5 PF: > { %s32_s2 = sadd.s32 1, %s2062_s2  }
 0x9a6   : > { %p29_p4 = scmp.ge.s32.totalorder %s32_s2, 10  }
 0x9a8   :  { %31 = sbr.rel (!%p29_p4) target bundleno = 7 (0x7), region = 145 }

// kernel: alpha_tensor_train_forward.40
= control target key start
LH: loop header
LB: loop body
LE: loop exit
PB: predicated region body
PF: predicated region fallthrough
CT: control target
= control target key end

     0   :  { %s3534_s0 = inlined_call_operand.vmem [shape: f32[2,4,32], index: 0, kind: input, shape index: {}]   ;;  %s3535_s1 = inlined_call_operand.vmem [shape: f32[2,48,32], index: 1, kind: input, shape index: {}]   ;;  %s3536_s2 = inlined_call_operand.vmem [shape: f32[1,32], index: 2, kind: input, shape index: {}]   ;;  %s3537_s3 = inlined_call_operand.vmem [shape: f32[1,32], index: 3, kind: input, shape index: {}]   ;;  %s3538_s4 = inlined_call_operand.vmem [shape: f32[1,32], index: 4, kind: input, shape index: {}]   ;;  %s3539_s5 = inlined_call_operand.vmem [shape: f32[1,32], index: 5, kind: input, shape index: {}]   ;;  %s3540_s6 = inlined_call_operand.vmem [shape: bf16[32,32], index: 6, kind: input, shape index: {}]   ;;  %s3541_s7 = inlined_call_operand.hbm [shape: f32[1,32], index: 7, kind: input, shape index: {}]   ;;  %s3542_s8 = inlined_call_operand.vmem [shape: bf16[32,32], index: 8, kind: input, shape index: {}]   ;;  %s3543_s9 = inlined_call_operand.hbm [shape: f32[1,32], index: 9, kind: input, shape index: {}]   ;;  %s3544_s10 = inlined_call_operand.vmem [shape: bf16[32,32], index: 10, kind: input, shape index: {}]   ;;  %s3545_s11 = inlined_call_operand.hbm [shape: f32[1,32], index: 11, kind: input, shape index: {}]   ;;  %s3546_s12 = inlined_call_operand.vmem [shape: bf16[32,32], index: 12, kind: input, shape index: {}]   ;;  %s3547_s13 = inlined_call_operand.hbm [shape: f32[1,32], index: 13, kind: input, shape index: {}]   ;;  %s3548_s14 = inlined_call_operand.hbm [shape: f32[1,32], index: 14, kind: input, shape index: {}]   ;;  %s3549_s15 = inlined_call_operand.hbm [shape: f32[1,32], index: 15, kind: input, shape index: {}]   ;;  %s3550_s16 = inlined_call_operand.vmem [shape: bf16[32,128], index: 16, kind: input, shape index: {}]   ;;  %s3551_s17 = inlined_call_operand.hbm [shape: f32[1,128], index: 17, kind: input, shape index: {}]   ;;  %s3552_s18 = inlined_call_operand.vmem [shape: bf16[128,32], index: 18, kind: input, shape index: {}]   ;;  %s3553_s19 = inlined_call_operand.hbm [shape: f32[1,32], index: 19, kind: input, shape index: {}]   ;;  %s3554_s20 = inlined_call_operand.vmem [shape: f32[2,4,32], index: 20, kind: output, shape index: {}]  }
   0x1   :  { %3556 = sst [smem:[#allocation20_spill]] %s3534_s0 }
   0x2   :  { %3557 = sst [smem:[#allocation21_spill]] %s3535_s1 }
   0x3   :  { %3558 = sst [smem:[#allocation22_spill]] %s3536_s2 }
   0x4   :  { %3559 = sst [smem:[#allocation23_spill]] %s3537_s3 }
   0x5   :  { %3560 = sst [smem:[#allocation24_spill]] %s3538_s4 }
   0x6   :  { %25 = vsyncpa [#allocation3], 0 }
   0x7   :  { %26 = vsyncpa [#allocation5], 0 }
   0x8   :  { %27 = vsyncpa [#allocation8], 0 }
   0x9   :  { %28 = vsyncpa [#allocation11], 0 }
   0xa   :  { %29 = vsyncpa [#allocation14], 0  ;;  %s3057_s1 = smov 0  }
   0xb LB: > { %s2936_s22 = smov [#allocation4]   ;;  %s3063_s24 = sadd.s32 4294967295, %s2934_s1   ;;  %s2934_s1 = sphi %s3057_s1, %s35_s1  }
   0xc   : > { %s538_s23 = sshll.u32 %s2936_s22, 4  ;;  %p2172_p0 = scmp.ge.s32.totalorder %s2934_s1, 1  ;;  %s539_s23 = int_to_ptr.vmem [resolvable:$true] %s538_s23 }
   0xd   : > { %p496_p1 = scmp.lt.s32.totalorder %s2934_s1, 3  ;;  %p3555_p2 = scmp.eq.s32.totalorder %s3063_s24, 0 }
   0xe   : > { %s2937_s25 = smov [#allocation7]   ;;  %s2938_s26 = smov [#allocation10]  }
   0xf   : > { %p3068_p3 = pnand %p2172_p0, %p496_p1  ;;  %s566_s3 = sshll.u32 %s2937_s25, 4  ;;  %s3074_s3 = int_to_ptr.vmem [resolvable:$true] %s566_s3 }
  0x10   : > { %s588_s27 = sshll.u32 %s2938_s26, 4  ;;  %s2939_s4 = smov [#allocation2]   ;;  %s3082_s27 = int_to_ptr.vmem [resolvable:$true] %s588_s27 }
  0x11   : > { %p2492_p4 = pneg %p3068_p3  ;;  %s524_s29 = sshll.u32 %s2939_s4, 4  ;;  %s3084_s29 = int_to_ptr.vmem [resolvable:$true] %s524_s29 }
  0x12   : > { %s2711_s0 = scalar_lea.vmem %s539_s23, 16  ;;  %s2718_s21 = scalar_lea.vmem %s539_s23, 32 }
  0x13   : > { %p3078_p5 = pnand %p3555_p2, %p2492_p4  ;;  %p2712_p7 = scmp.ne.s32.totalorder %s539_s23, %s2711_s0 }
  0x14   : > { %p2719_p10 = scmp.lt.s32.totalorder %s539_s23, %s539_s23  ;;  %p2720_p11 = scmp.lt.s32.totalorder %s2718_s21, %s2711_s0 }
  0x15   : > { %p3088_p6 = pneg %p3078_p5 }
  0x16   : > { %p2721_p12 = por %p2720_p11, %p2719_p10 }
  0x17   : > { %p2714_p8 = pnand %p2712_p7, %p3088_p6 }
  0x19   : > { %p2715_p9 = pneg %p2714_p8 }
  0x1b   : > { %p2722_p13 = pnand %p2721_p12, %p2715_p9 }
  0x1d   : > { %2725 = shalt.err (!%p2722_p13)
}
  0x1e   : > { %2498 = dma.hbm_to_vmem [thread:$0]  (!%p3078_p5), %s3543_s9, 16, %s539_s23, [#allocation5]  }
  0x1f   : > { %s2737_s26 = scalar_lea.vmem %s3074_s3, 16  ;;  %s2744_s4 = scalar_lea.vmem %s3074_s3, 32 }
  0x20   : > { %p2738_p0 = scmp.ne.s32.totalorder %s3074_s3, %s2737_s26  ;;  %p2745_p7 = scmp.lt.s32.totalorder %s3074_s3, %s3074_s3 }
  0x21   : > { %p2746_p8 = scmp.lt.s32.totalorder %s2744_s4, %s2737_s26 }
  0x22   : > { %p2740_p1 = pnand %p2738_p0, %p3088_p6 }
  0x23   : > { %p2747_p9 = por %p2746_p8, %p2745_p7 }
  0x24   : > { %p2741_p4 = pneg %p2740_p1 }
  0x26   : > { %p2748_p10 = pnand %p2747_p9, %p2741_p4 }
  0x28   : > { %2751 = shalt.err (!%p2748_p10)
}
  0x29   : > { %2504 = dma.hbm_to_vmem [thread:$0]  (!%p3078_p5), %s3547_s13, 16, %s3074_s3, [#allocation8]  }
  0x2a   : > { %s2763_s23 = scalar_lea.vmem %s3082_s27, 16  ;;  %s2770_s22 = scalar_lea.vmem %s3082_s27, 32 }
  0x2b   : > { %p2764_p11 = scmp.ne.s32.totalorder %s3082_s27, %s2763_s23  ;;  %p2771_p0 = scmp.lt.s32.totalorder %s3082_s27, %s3082_s27 }
  0x2c   : > { %p2772_p1 = scmp.lt.s32.totalorder %s2770_s22, %s2763_s23 }
  0x2d   : > { %p2766_p12 = pnand %p2764_p11, %p3088_p6 }
  0x2e   : > { %p2773_p4 = por %p2772_p1, %p2771_p0 }
  0x2f   : > { %p2767_p13 = pneg %p2766_p12 }
  0x31   : > { %p2774_p7 = pnand %p2773_p4, %p2767_p13 }
  0x33   : > { %2777 = shalt.err (!%p2774_p7)
}
  0x34   : > { %2510 = dma.hbm_to_vmem [thread:$0]  (!%p3078_p5), %s3549_s15, 16, %s3082_s27, [#allocation11]  }
  0x35   : > { %s2789_s3 = scalar_lea.vmem %s3084_s29, 16  ;;  %s2796_s4 = scalar_lea.vmem %s3084_s29, 32 }
  0x36   : > { %p2790_p8 = scmp.ne.s32.totalorder %s3084_s29, %s2789_s3  ;;  %p2797_p11 = scmp.lt.s32.totalorder %s3084_s29, %s3084_s29 }
  0x37   : > { %p2798_p12 = scmp.lt.s32.totalorder %s2796_s4, %s2789_s3 }
  0x38   : > { %p2792_p9 = pnand %p2790_p8, %p3088_p6 }
  0x39   : > { %p2799_p13 = por %p2798_p12, %p2797_p11 }
  0x3a   : > { %p2793_p10 = pneg %p2792_p9 }
  0x3c   : > { %p2800_p0 = pnand %p2799_p13, %p2793_p10 }
  0x3e   : > { %2803 = shalt.err (!%p2800_p0)
}
  0x3f   : > { %2495 = dma.hbm_to_vmem [thread:$0]  (!%p3078_p5), %s3541_s7, 16, %s3084_s29, [#allocation3]  }
  0x40   : > { %s2940_s27 = smov [#allocation6]   ;;  %s2941_s22 = smov [#allocation9]  }
  0x41   : > { %s552_s23 = sshll.u32 %s2940_s27, 4  ;;  %s577_s25 = sshll.u32 %s2941_s22, 4  ;;  %s553_s23 = int_to_ptr.vmem [resolvable:$true] %s552_s23  ;;  %s578_s25 = int_to_ptr.vmem [resolvable:$true] %s577_s25 }
  0x42   : > { %s2815_s26 = scalar_lea.vmem %s553_s23, 16  ;;  %s2822_s3 = scalar_lea.vmem %s553_s23, 32 }
  0x43   : > { %p2816_p1 = scmp.ne.s32.totalorder %s553_s23, %s2815_s26  ;;  %p2823_p8 = scmp.lt.s32.totalorder %s553_s23, %s553_s23 }
  0x44   : > { %p2824_p9 = scmp.lt.s32.totalorder %s2822_s3, %s2815_s26 }
  0x45   : > { %p2818_p4 = pnand %p2816_p1, %p3088_p6 }
  0x46   : > { %p2825_p10 = por %p2824_p9, %p2823_p8 }
  0x47   : > { %p2819_p7 = pneg %p2818_p4 }
  0x49   : > { %p2826_p11 = pnand %p2825_p10, %p2819_p7 }
  0x4b   : > { %2829 = shalt.err (!%p2826_p11)
}
  0x4c   : > { %2501 = dma.hbm_to_vmem [thread:$0]  (!%p3078_p5), %s3545_s11, 16, %s553_s23, [#allocation5]  }
  0x4d   : > { %s2841_s0 = scalar_lea.vmem %s578_s25, 16  ;;  %s2848_s21 = scalar_lea.vmem %s578_s25, 32 }
  0x4e   : > { %p2842_p12 = scmp.ne.s32.totalorder %s578_s25, %s2841_s0  ;;  %p2849_p1 = scmp.lt.s32.totalorder %s578_s25, %s578_s25 }
  0x4f   : > { %p2850_p4 = scmp.lt.s32.totalorder %s2848_s21, %s2841_s0 }
  0x50   : > { %p2844_p13 = pnand %p2842_p12, %p3088_p6 }
  0x51   : > { %p2851_p2 = por %p2850_p4, %p2849_p1 }
  0x52   : > { %p2845_p0 = pneg %p2844_p13 }
  0x54   : > { %p2852_p8 = pnand %p2851_p2, %p2845_p0 }
  0x56   : > { %2855 = shalt.err (!%p2852_p8)
}
  0x57   : > { %2507 = dma.hbm_to_vmem [thread:$0]  (!%p3078_p5), %s3548_s14, 16, %s578_s25, [#allocation8]  }
  0x58   : > { %s2942_s23 = smov [#allocation12]   ;;  %s2943_s3 = smov [#allocation13]  }
  0x59   : > { %s602_s26 = sshll.u32 %s2942_s23, 4  ;;  %s616_s4 = sshll.u32 %s2943_s3, 4  ;;  %s603_s26 = int_to_ptr.vmem [resolvable:$true] %s602_s26  ;;  %s617_s4 = int_to_ptr.vmem [resolvable:$true] %s616_s4 }
  0x5a   : > { %s2867_s29 = scalar_lea.vmem %s603_s26, 16  ;;  %s2874_s0 = scalar_lea.vmem %s603_s26, 32 }
  0x5b   : > { %p2868_p7 = scmp.ne.s32.totalorder %s603_s26, %s2867_s29  ;;  %p2875_p2 = scmp.lt.s32.totalorder %s603_s26, %s603_s26 }
  0x5c   : > { %p2876_p11 = scmp.lt.s32.totalorder %s2874_s0, %s2867_s29 }
  0x5d   : > { %p2870_p9 = pnand %p2868_p7, %p3088_p6 }
  0x5e   : > { %p2877_p12 = por %p2876_p11, %p2875_p2 }
  0x5f   : > { %p2871_p10 = pneg %p2870_p9 }
  0x61   : > { %p2878_p13 = pnand %p2877_p12, %p2871_p10 }
  0x63   : > { %2881 = shalt.err (!%p2878_p13)
}
  0x64   : > { %2513 = dma.hbm_to_vmem [thread:$0]  (!%p3078_p5), %s3551_s17, 16, %s603_s26, [#allocation11]  }
  0x65   : > { %s2893_s27 = scalar_lea.vmem %s617_s4, 16  ;;  %s2900_s22 = scalar_lea.vmem %s617_s4, 32 }
  0x66   : > { %p2894_p0 = scmp.ne.s32.totalorder %s617_s4, %s2893_s27  ;;  %p2901_p8 = scmp.lt.s32.totalorder %s617_s4, %s617_s4 }
  0x67   : > { %p2902_p7 = scmp.lt.s32.totalorder %s2900_s22, %s2893_s27 }
  0x68   : > { %p2896_p1 = pnand %p2894_p0, %p3088_p6 }
  0x69   : > { %p2903_p9 = por %p2902_p7, %p2901_p8 }
  0x6a   : > { %p2897_p4 = pneg %p2896_p1 }
  0x6c   : > { %p2904_p2 = pnand %p2903_p9, %p2897_p4 }
  0x6e   : > { %2907 = shalt.err (!%p2904_p2)
}
  0x6f   : > { %2516 = dma.hbm_to_vmem [thread:$0]  (!%p3078_p5), %s3553_s19, 16, %s617_s4, [#allocation14]  }
  0x70   : > { %644 = sbr.rel (%p3068_p3) target bundleno = 2591 (0xa1f), region = 100  ;;  %p3564_p10 = scmp.eq.s32.totalorder (!%p3068_p3), %s3063_s24, 0 }
  0x75   : > { %2913 = dma.done.wait (%p3564_p10), [#allocation3], 16   ;;  %p3565_p6 = pmov %p3564_p10 }
  0x77   : > { %2915 = vsyncadd (%p3565_p6), [#allocation3], 4294967280  ;;  %p3566_p11 = pmov %p3565_p6 }
  0x78   : > { %p3567_p12 = pmov %p3565_p6 }
  0x79   : > { %2917 = dma.done.wait (%p3566_p11), [#allocation5], 32  }
  0x7a   : > { %2919 = vsyncadd (%p3567_p12), [#allocation5], 4294967264  ;;  %p3568_p13 = pmov %p3565_p6 }
  0x7b   : > { %p3569_p5 = pmov %p3565_p6 }
  0x7c   : > { %2921 = dma.done.wait (%p3568_p13), [#allocation8], 32  }
  0x7d   : > { %2923 = vsyncadd (%p3569_p5), [#allocation8], 4294967264  ;;  %p3570_p3 = pmov %p3569_p5 }
  0x7f   : > { %2925 = dma.done.wait (%p3570_p3), [#allocation11], 32   ;;  %p3571_p0 = pmov %p3570_p3 }
  0x81   : > { %2927 = vsyncadd (%p3571_p0), [#allocation11], 4294967264  ;;  %p3572_p1 = pmov %p3571_p0 }
  0x82   : > { %p3573_p4 = pmov %p3571_p0 }
  0x83   : > { %2929 = dma.done.wait (%p3572_p1), [#allocation14], 16  }
  0x84   : > { %2931 = vsyncadd (%p3573_p4), [#allocation14], 4294967280  ;;  %p733_p8 = scmp.lt.s32.totalorder %s3063_s24, 1  ;;  %vm831_vm0 = vcmask 261120   ;;  %s3574_s4 = sld [smem:[#allocation21_spill]]  ;;  %vm802_vm1 = vcmask 257024  }
  0x85   : > { %s3575_s25 = sld [smem:[#allocation20_spill]]  ;;  %v2647_v49 = vld [vmem:[%s3542_s8 + $0x8] sm:$0xff]   ;;  %v2944_v50 = vmov 0.0   ;;  %vm2945_vm2 = vmmov 0   ;;  %v2648_v51 = vld [vmem:[%s3542_s8] sm:$0xff]   ;;  %s2946_s23 = smov 120  }
  0x86   : > { %s3580_s24 = smov (!%p733_p8, %s3063_s24), 1  ;;  %2311 = vmatprep.subr.bf16.mxu1 %v2944_v50  ;;  %2315 = vmatprep.mubr.msk.bf16.mxu1 %vm2945_vm2, %v2944_v50  ;;  %v2649_v52 = vld [vmem:[%s3540_s6 + $0x8] sm:$0xff]   ;;  %v2650_v53 = vld [vmem:[%s3540_s6] sm:$0xff]   ;;  %s3577_s30 = sld [smem:[#allocation22_spill]]  ;;  %vm1304_vm3 = vcmask 64512   ;;  %vm1517_vm4 = vcmask 388096  }
  0x87   : > { %s2459_s2 = smul.u32 48, %s3580_s24  ;;  %s2191_s28 = sshll.u32 %s3580_s24, 2  ;;  %2312 = vmatpush3.bf16.msra.mxu1 %v2647_v49  ;;  %2303 = vmatprep.subr.bf16.mxu0 %v2944_v50  ;;  %vm1578_vm5 = vcmask 392192   ;;  %vm1764_vm6 = vcmask 130048   ;;  %vm1766_vm7 = vcmask 195584  }
  0x88   : > { %2313 = vmatprep.subr.bf16.mxu1 %v2944_v50  ;;  %2307 = vmatprep.mubr.msk.bf16.mxu0 %vm2945_vm2, %v2944_v50  ;;  %s2947_s3 = smov 112   ;;  %s2950_s21 = smov 16  }
  0x89   : > { %2304 = vmatpush3.bf16.msra.mxu0 %v2649_v52 }
  0x8a   : > { %s741_s29 = scalar_lea.vmem %s3574_s4, %s2459_s2  ;;  %2305 = vmatprep.subr.bf16.mxu0 %v2944_v50  ;;  %s2948_s2 = smov 104  }
  0x8b   : > { %s3202_s27 = scalar_lea.vmem %s3575_s25, %s2191_s28  ;;  %v748_v0 = vld [vmem:[%s741_s29] sm:$0xff]  ;;  %v750_v1 = vld [vmem:[%s741_s29 + $0x10] sm:$0xff]  ;;  %v749_v2 = vld [vmem:[%s741_s29 + $0x8] sm:$0xff]  ;;  %2314 = vmatpush3.bf16.msra.mxu1 %v2648_v51  ;;  %s3576_s25 = sld [smem:[#allocation24_spill]] }
  0x8c   : > { %v832_v3 = vsel %vm831_vm0, %v748_v0, 0.0  ;;  %v838_v4 = vsel %vm831_vm0, %v750_v1, 0.0  ;;  %v751_v5 = vld [vmem:[%s741_s29 + $0x18] sm:$0xff]  ;;  %v752_v6 = vld [vmem:[%s741_s29 + $0x20] sm:$0xff]  ;;  %v753_v7 = vld [vmem:[%s741_s29 + $0x28] sm:$0xff]  ;;  %v835_v8 = vsel %vm831_vm0, %v749_v2, 0.0  ;;  %2343 = vmatprep.subr.bf16.mxu1 %v2944_v50 }
  0x8d   : > { %833 = vadd.xlane.f32.xlu0 %v832_v3  ;;  %839 = vadd.xlane.f32.xlu1 %v838_v4  ;;  %v841_v9 = vsel %vm831_vm0, %v751_v5, 0.0  ;;  %v844_v10 = vsel %vm831_vm0, %v752_v6, 0.0  ;;  %v747_v11 = vld [vmem:[%s3202_s27] sm:$0xf]  ;;  %v847_v12 = vsel %vm831_vm0, %v753_v7, 0.0  ;;  %s3578_s29 = sld [smem:[#allocation23_spill]] }
  0x8e   : > { %v803_v13 = vsel %vm802_vm1, %v747_v11, 0.0  ;;  %2306 = vmatpush3.bf16.msra.mxu0 %v2650_v53 }
  0x8f   : > { %2327 = vmatprep.subr.bf16.mxu0 %v2944_v50 }
  0x91   : > { %836 = vadd.xlane.f32.xlu0 %v835_v8  ;;  %842 = vadd.xlane.f32.xlu1 %v841_v9 }
  0x95   : > { %845 = vadd.xlane.f32.xlu0 %v844_v10  ;;  %848 = vadd.xlane.f32.xlu1 %v847_v12 }
  0x99   : > { %804 = vadd.xlane.f32.xlu0 %v803_v13  ;;  %v2196_v13 = vld [vmem:[%s3576_s25] ss:$0 sm:$0xff]  ;;  %s2951_s25 = smov 24  }
 0x116   : > { %v834_v14 = vpop.xlane.xlu0 %833  ;;  %v840_v15 = vpop.xlane.xlu1 %839 }
 0x117   : > { %v850_v16 = vmul.f32 0.03125, %v834_v14  ;;  %v852_v17 = vmul.f32 0.03125, %v840_v15 }
 0x119   : > { %v3212_v18 = vsub.f32 %v748_v0, %v850_v16  ;;  %v3214_v19 = vsub.f32 %v750_v1, %v852_v17 }
 0x11a   : > { %v837_v20 = vpop.xlane.xlu0 %836  ;;  %v843_v21 = vpop.xlane.xlu1 %842 }
 0x11b   : > { %v851_v22 = vmul.f32 0.03125, %v837_v20  ;;  %v853_v23 = vmul.f32 0.03125, %v843_v21  ;;  %v862_v24 = vmul.f32 %v3212_v18, %v3212_v18  ;;  %v864_v25 = vmul.f32 %v3214_v19, %v3214_v19  ;;  %v2197_v20 = vld [vmem:[%s3539_s5] ss:$0 sm:$0xff] }
 0x11d   : > { %v3220_v26 = vsub.f32 %v749_v2, %v851_v22  ;;  %v3222_v27 = vsub.f32 %v751_v5, %v853_v23  ;;  %v868_v28 = vsel %vm831_vm0, %v862_v24, 0.0  ;;  %v874_v31 = vsel %vm831_vm0, %v864_v25, 0.0 }
 0x11e   : > { %869 = vadd.xlane.f32.xlu1 %v868_v28  ;;  %v846_v29 = vpop.xlane.xlu0 %845  ;;  %v849_v30 = vpop.xlane.xlu1 %848 }
 0x11f   : > { %v854_v32 = vmul.f32 0.03125, %v846_v29  ;;  %v855_v33 = vmul.f32 0.03125, %v849_v30  ;;  %v863_v34 = vmul.f32 %v3220_v26, %v3220_v26  ;;  %v865_v35 = vmul.f32 %v3222_v27, %v3222_v27 }
 0x121   : > { %v3230_v36 = vsub.f32 %v752_v6, %v854_v32  ;;  %v3232_v37 = vsub.f32 %v753_v7, %v855_v33  ;;  %v871_v38 = vsel %vm831_vm0, %v863_v34, 0.0  ;;  %v877_v42 = vsel %vm831_vm0, %v865_v35, 0.0  ;;  %v2195_v33 = vld [vmem:[%s3578_s29] ss:$0 sm:$0xff] }
 0x122   : > { %875 = vadd.xlane.f32.xlu1 %v874_v31  ;;  %872 = vadd.xlane.f32.xlu0 %v871_v38  ;;  %v805_v39 = vpop.xlane.xlu0 %804 }
 0x123   : > { %v807_v40 = vmul.f32 0.03125, %v805_v39  ;;  %v866_v41 = vmul.f32 %v3230_v36, %v3230_v36  ;;  %v867_v43 = vmul.f32 %v3232_v37, %v3232_v37 }
 0x125   : > { %v3240_v44 = vsub.f32 %v747_v11, %v807_v40  ;;  %v880_v45 = vsel %vm831_vm0, %v866_v41, 0.0  ;;  %v883_v46 = vsel %vm831_vm0, %v867_v43, 0.0  ;;  %v2651_v41 = vld [vmem:[%s3544_s10 + $0x8] sm:$0xff]  }
 0x126   : > { %881 = vadd.xlane.f32.xlu1 %v880_v45  ;;  %878 = vadd.xlane.f32.xlu0 %v877_v42 }
 0x127   : > { %v809_v47 = vmul.f32 %v3240_v44, %v3240_v44 }
 0x129   : > { %v810_v48 = vsel %vm802_vm1, %v809_v47, 0.0 }
 0x12a   : > { %884 = vadd.xlane.f32.xlu0 %v883_v46  ;;  %811 = vadd.xlane.f32.xlu1 %v810_v48 }
 0x1a7   : > { %v870_v54 = vpop.xlane.xlu1 %869 }
 0x1a8   : > { %v886_v55 = vmul.f32 0.03125, %v870_v54 }
 0x1aa   : > { %v892_v56 = vadd.f32 1e-05, %v886_v55 }
 0x1ab   : > { %v876_v57 = vpop.xlane.xlu1 %875  ;;  %v873_v58 = vpop.xlane.xlu0 %872 }
 0x1ac   : > { %2665 = vrsqrt.f32 %v892_v56  ;;  %v888_v59 = vmul.f32 0.03125, %v876_v57  ;;  %v887_v60 = vmul.f32 0.03125, %v873_v58 }
 0x1ae   : > { %v893_v61 = vadd.f32 1e-05, %v887_v60  ;;  %v894_v62 = vadd.f32 1e-05, %v888_v59  ;;  %v2202_v59 = vld [vmem:[#allocation4] ss:$0 sm:$0xff] }
 0x1af   : > { %v882_v63 = vpop.xlane.xlu1 %881  ;;  %v879_v0 = vpop.xlane.xlu0 %878 }
 0x1b0   : > { %v889_v1 = vmul.f32 0.03125, %v879_v0  ;;  %2667 = vrsqrt.f32 %v893_v61  ;;  %v890_v3 = vmul.f32 0.03125, %v882_v63 }
 0x1b1   : > { %2669 = vrsqrt.f32 %v894_v62 }
 0x1b2   : > { %v895_v2 = vadd.f32 1e-05, %v889_v1  ;;  %v896_v10 = vadd.f32 1e-05, %v890_v3 }
 0x1b3   : > { %v812_v4 = vpop.xlane.xlu1 %811  ;;  %v885_v5 = vpop.xlane.xlu0 %884 }
 0x1b4   : > { %v813_v6 = vmul.f32 0.03125, %v812_v4  ;;  %v891_v7 = vmul.f32 0.03125, %v885_v5  ;;  %2671 = vrsqrt.f32 %v895_v2 }
 0x1b6   : > { %v814_v8 = vadd.f32 1e-05, %v813_v6  ;;  %v897_v9 = vadd.f32 1e-05, %v891_v7  ;;  %v2208_v6 = vld [vmem:[#allocation6] ss:$0 sm:$0xff] }
 0x1b8   : > { %2673 = vrsqrt.f32 %v814_v8 }
 0x1b9   : > { %v2666_v11 = vpop.eup %2665  ;;  %2675 = vrsqrt.f32 %v897_v9 }
 0x1ba   : > { %2677 = vrsqrt.f32 %v896_v10  ;;  %v904_v12 = vmul.f32 %v2666_v11, %v3212_v18 }
 0x1bc   : > { %v916_v16 = vmul.f32 %v2196_v13, %v904_v12 }
 0x1bd   : > { %v2668_v14 = vpop.eup %2667 }
 0x1be   : > { %v905_v15 = vmul.f32 %v2668_v14, %v3220_v26  ;;  %v2670_v17 = vpop.eup %2669  ;;  %v928_v23 = vadd.f32 %v2197_v20, %v916_v16  ;;  %v2194_v26 = vld [vmem:[%s3577_s30] ss:$0 sm:$0xff]  ;;  %s2949_s30 = smov 8  }
 0x1bf   : > { %v906_v25 = vmul.f32 %v2670_v17, %v3214_v19 }
 0x1c0   : > { %v917_v21 = vmul.f32 %v2196_v13, %v905_v15 }
 0x1c1   : > { %v2672_v22 = vpop.eup %2671  ;;  %v918_v34 = vmul.f32 %v2196_v13, %v906_v25  ;;  %v2198_v25 = vld [vmem:[#allocation2] ss:$0 sm:$0xff] }
 0x1c2   : > { %v929_v24 = vadd.f32 %v2197_v20, %v917_v21  ;;  %v907_v18 = vmul.f32 %v2672_v22, %v3222_v27 }
 0x1c3   : > { %v930_v40 = vadd.f32 %v2197_v20, %v918_v34 }
 0x1c4   : > { %v996_v29 = vpack.c.bf16 %v929_v24, %v928_v23  ;;  %v919_v30 = vmul.f32 %v2196_v13, %v907_v18 }
 0x1c5   : > { %v2674_v28 = vpop.eup %2673 }
 0x1c6   : > { %v2676_v31 = vpop.eup %2675  ;;  %v816_v32 = vmul.f32 %v2674_v28, %v3240_v44  ;;  %2316 = vmatmul.mubr.msk.bf16.vlgmr.msra.gmra.mxu1 %vm831_vm0, %v996_v29  ;;  %v931_v35 = vadd.f32 %v2197_v20, %v919_v30 }
 0x1c7   : > { %v2678_v19 = vpop.eup %2677  ;;  %2319 = vmatprep.mubr.msk.bf16.mxu1 %vm2945_vm2, %v2944_v50  ;;  %v909_v38 = vmul.f32 %v2676_v31, %v3232_v37  ;;  %v2652_v37 = vld [vmem:[%s3544_s10] sm:$0xff]  }
 0x1c8   : > { %v823_v27 = vmul.f32 %v2194_v26, %v816_v32  ;;  %v908_v42 = vmul.f32 %v2678_v19, %v3230_v36  ;;  %v997_v44 = vpack.c.bf16 %v931_v35, %v930_v40 }
 0x1c9   : > { %v921_v45 = vmul.f32 %v2196_v13, %v909_v38 }
 0x1ca   : > { %v830_v39 = vadd.f32 %v2195_v33, %v823_v27  ;;  %v920_v46 = vmul.f32 %v2196_v13, %v908_v42 }
 0x1cb   : > { %v933_v36 = vadd.f32 %v2197_v20, %v921_v45 }
 0x1cc   : > { %v934_v43 = vpack.c.bf16 %v830_v39, %v830_v39  ;;  %v932_v47 = vadd.f32 %v2197_v20, %v920_v46 }
 0x1ce   : > { %2308 = vmatmul.mubr.msk.bf16.vlgmr.msra.gmra.mxu0 %vm831_vm0, %v934_v43  ;;  %2320 = vmatmul.mubr.msk.bf16.gmra.mxu1 %vm831_vm0, %v997_v44  ;;  %v998_v48 = vpack.c.bf16 %v933_v36, %v932_v47 }
 0x1cf   : > { %2328 = vmatpush3.bf16.msra.mxu0 %v2651_v41  ;;  %2323 = vmatprep.mubr.msk.bf16.mxu1 %vm2945_vm2, %v2944_v50 }
 0x1d0   : > { %2329 = vmatprep.subr.bf16.mxu0 %v2944_v50  ;;  %2331 = vmatprep.mubr.msk.bf16.mxu0 %vm2945_vm2, %v2944_v50 }
 0x1d3   : > { %2330 = vmatpush3.bf16.msra.mxu0 %v2652_v37 }
 0x1d4   : > { %2353 = vmatprep.subr.bf16.mxu0 %v2944_v50 }
 0x1d6   : > { %2332 = vmatmul.mubr.msk.bf16.vlgmr.msra.gmra.mxu0 %vm831_vm0, %v996_v29  ;;  %2324 = vmatmul.mubr.msk.bf16.gmra.mxu1 %vm831_vm0, %v998_v48 }
 0x1d7   : > { %2335 = vmatprep.mubr.msk.bf16.mxu0 %vm2945_vm2, %v2944_v50  ;;  %2349 = vmatprep.mubr.msk.bf16.mxu1 %vm2945_vm2, %v2944_v50 }
 0x1de   : > { %2336 = vmatmul.mubr.msk.bf16.gmra.mxu0 %vm831_vm0, %v997_v44 }
 0x1df   : > { %2339 = vmatprep.mubr.msk.bf16.mxu0 %vm2945_vm2, %v2944_v50 }
 0x1e6   : > { %2340 = vmatmul.mubr.msk.bf16.gmra.mxu0 %vm831_vm0, %v998_v48 }
 0x1e7   : > { %2359 = vmatprep.mubr.msk.bf16.mxu0 %vm2945_vm2, %v2944_v50 }
 0x286   : > { %v1060_v49 = vpop.f32.mrf.mxu1 }
 0x287   : > { %v1061_v5 = vadd.f32 %v2202_v59, %v1060_v49 }
 0x288   : > { %v2317_v51 = vpop.f32.mrf.mxu1 }
 0x28a   : > { %v1063_v52 = vpop.f32.mrf.mxu1 }
 0x28b   : > { %v3317_v1 = vadd.f32 %v2202_v59, %v1063_v52 }
 0x28c   : > { %v2318_v53 = vpop.f32.mrf.mxu1 }
 0x28d   : > { %v2567_v10 = vpack.i.bf16 %v3317_v1, %v1061_v5  ;;  %v1292_v43 = vpack.c.bf16 %v3317_v1, %v1061_v5 }
 0x28e   : > { %v990_v54 = vpop.f32.mrf.mxu0  ;;  %v1068_v55 = vpop.f32.mrf.mxu1 }
 0x28f   : > { %v1069_v61 = vadd.f32 %v2202_v59, %v1068_v55  ;;  %v991_v29 = vadd.f32 %v2198_v25, %v990_v54  ;;  %v1309_v37 = vsel %vm1304_vm3, %v1292_v43, 0 }
 0x290   : > { %v2309_v56 = vpop.f32.mrf.mxu0  ;;  %v2321_v57 = vpop.f32.mrf.mxu1 }
 0x291   : > { %v1288_v46 = vpack.c.bf16 %v991_v29, %v991_v29 }
 0x292   : > { %v993_v58 = vpop.f32.mrf.mxu0  ;;  %v1071_v60 = vpop.f32.mrf.mxu1 }
 0x293   : > { %v1072_v62 = vadd.f32 %v2202_v59, %v1071_v60 }
 0x294   : > { %v2310_v63 = vpop.f32.mrf.mxu0  ;;  %v2322_v0 = vpop.f32.mrf.mxu1 }
 0x295   : > { %v2562_v3 = vpack.i.bf16 %v1072_v62, %v1069_v61  ;;  %v1293_v33 = vpack.c.bf16 %v1072_v62, %v1069_v61 }
 0x296   : > { %v1135_v2 = vpop.f32.mrf.mxu0  ;;  %v1076_v4 = vpop.f32.mrf.mxu1 }
 0x297   : > { %2563 = vrot.lane.b32.xlu1 %v2562_v3, %s2946_s23  ;;  %v3321_v11 = vadd.f32 %v2208_v6, %v1135_v2  ;;  %v1077_v14 = vadd.f32 %v2202_v59, %v1076_v4  ;;  %v1312_v38 = vsel %vm1304_vm3, %v1293_v33, 0 }
 0x298   : > { %v2333_v7 = vpop.f32.mrf.mxu0  ;;  %v2325_v8 = vpop.f32.mrf.mxu1 }
 0x29a   : > { %v1138_v9 = vpop.f32.mrf.mxu0  ;;  %v1079_v12 = vpop.f32.mrf.mxu1 }
 0x29b   : > { %v3323_v13 = vadd.f32 %v2208_v6, %v1138_v9  ;;  %v1080_v15 = vadd.f32 %v2202_v59, %v1079_v12  ;;  %2568 = vrot.lane.b32.xlu1 %v2567_v10, %s2946_s23 }
 0x29c   : > { %v2334_v16 = vpop.f32.mrf.mxu0  ;;  %v2326_v17 = vpop.f32.mrf.mxu1 }
 0x29d   : > { %v1566_v20 = vpack.c.bf16 %v3323_v13, %v3321_v11  ;;  %v3330_v21 = vpack.i.bf16 %v3323_v13, %v3321_v11  ;;  %v2572_v23 = vpack.i.bf16 %v1080_v15, %v1077_v14  ;;  %v1294_v24 = vpack.c.bf16 %v1080_v15, %v1077_v14 }
 0x29e   : > { %v1143_v22 = vpop.f32.mrf.mxu0 }
 0x29f   : > { %2573 = vrot.lane.b32.xlu1 %v2572_v23, %s2947_s3  ;;  %2558 = vrot.lane.b32.xlu0 %v2572_v23, %s2946_s23  ;;  %v1315_v28 = vsel %vm1304_vm3, %v1294_v24, 0  ;;  %v3336_v30 = vadd.f32 %v2208_v6, %v1143_v22 }
 0x2a0   : > { %v2337_v18 = vpop.f32.mrf.mxu0  ;;  %2344 = vmatpush3.bf16.xpose.msra.mxu1 %v1315_v28 }
 0x2a1   : > { %2345 = vmatprep.subr.bf16.mxu1 %v2944_v50 }
 0x2a2   : > { %v1146_v26 = vpop.f32.mrf.mxu0 }
 0x2a3   : > { %v3338_v31 = vadd.f32 %v2208_v6, %v1146_v26  ;;  %1159 = vrot.lane.b32.xlu1 %v991_v29, %s2946_s23  ;;  %2578 = vrot.lane.b32.xlu0 %v2572_v23, %s2948_s2 }
 0x2a4   : > { %v2338_v32 = vpop.f32.mrf.mxu0 }
 0x2a5   : > { %v1567_v34 = vpack.c.bf16 %v3338_v31, %v3336_v30  ;;  %v3346_v19 = vpack.i.bf16 %v3338_v31, %v3336_v30 }
 0x2a6   : > { %v1151_v27 = vpop.f32.mrf.mxu0 }
 0x2a7   : > { %2588 = vrot.lane.b32.xlu1 %v2562_v3, %s2948_s2  ;;  %2583 = vrot.lane.b32.xlu0 %v2562_v3, %s2947_s3  ;;  %v3352_v40 = vadd.f32 %v2208_v6, %v1151_v27 }
 0x2a8   : > { %v2341_v35 = vpop.f32.mrf.mxu0  ;;  %2346 = vmatpush3.bf16.xpose.msra.mxu1 %v1312_v38 }
 0x2a9   : > { %2347 = vmatprep.subr.bf16.mxu1 %v2944_v50 }
 0x2aa   : > { %v1154_v39 = vpop.f32.mrf.mxu0 }
 0x2ab   : > { %v3354_v41 = vadd.f32 %v2208_v6, %v1154_v39  ;;  %2598 = vrot.lane.b32.xlu1 %v2567_v10, %s2948_s2  ;;  %2593 = vrot.lane.b32.xlu0 %v2567_v10, %s2947_s3 }
 0x2ac   : > { %v2342_v42 = vpop.f32.mrf.mxu0 }
 0x2ad   : > { %v1568_v44 = vpack.c.bf16 %v3354_v41, %v3352_v40  ;;  %v3363_v45 = vpack.i.bf16 %v3354_v41, %v3352_v40 }
 0x2af   : > { %1165 = vrot.lane.b32.xlu1 %v991_v29, %s2948_s2  ;;  %1162 = vrot.lane.b32.xlu0 %v991_v29, %s2947_s3 }
 0x2b0   : > { %2348 = vmatpush3.bf16.xpose.msra.mxu1 %v1309_v37 }
 0x2b1   : > { %2363 = vmatprep.subr.bf16.mxu1 %v2944_v50 }
 0x2b7   : > { %2350 = vmatmul.mubr.msk.bf16.vlgmr.msra.gmra.mxu1 %vm1304_vm3, %v1288_v46 }
 0x2b8   : > { %2369 = vmatprep.mubr.msk.bf16.mxu1 %vm2945_vm2, %v2944_v50 }
 0x309   : > { %v2564_v36 = vpop.permute.xlu1 %2563 }
 0x30a   : > { %v2566_v58 = vunpack.i.h.bf16 %v2564_v36  ;;  %v2565_v59 = vunpack.i.l.bf16 %v2564_v36 }
 0x30c   : > { %v1296_v63 = vpack.c.bf16 %v2566_v58, %v2565_v59 }
 0x30d   : > { %v2569_v47 = vpop.permute.xlu1 %2568 }
 0x30e   : > { %v2571_v4 = vunpack.i.h.bf16 %v2569_v47  ;;  %v2570_v5 = vunpack.i.l.bf16 %v2569_v47  ;;  %v1364_v6 = vsel %vm1304_vm3, %v1296_v63, 0 }
 0x310   : > { %v1295_v10 = vpack.c.bf16 %v2571_v4, %v2570_v5 }
 0x311   : > { %v2574_v48 = vpop.permute.xlu1 %2573  ;;  %v2559_v49 = vpop.permute.xlu0 %2558 }
 0x312   : > { %v2576_v51 = vunpack.i.h.bf16 %v2574_v48  ;;  %v2575_v52 = vunpack.i.l.bf16 %v2574_v48  ;;  %v2561_v53 = vunpack.i.h.bf16 %v2559_v49  ;;  %v2560_v54 = vunpack.i.l.bf16 %v2559_v49 }
 0x313   : > { %v1361_v17 = vsel %vm1304_vm3, %v1295_v10, 0 }
 0x314   : > { %v1300_v55 = vpack.c.bf16 %v2576_v51, %v2575_v52  ;;  %v1297_v56 = vpack.c.bf16 %v2561_v53, %v2560_v54 }
 0x315   : > { %v2579_v57 = vpop.permute.xlu0 %2578  ;;  %v1160_v14 = vpop.permute.xlu1 %1159 }
 0x316   : > { %v1367_v60 = vsel %vm1304_vm3, %v1297_v56, 0  ;;  %v1419_v61 = vsel %vm1304_vm3, %v1300_v55, 0  ;;  %v2581_v15 = vunpack.i.h.bf16 %v2579_v57  ;;  %v2580_v16 = vunpack.i.l.bf16 %v2579_v57 }
 0x317   : > { %2354 = vmatpush3.bf16.xpose.msra.mxu0 %v1367_v60  ;;  %2364 = vmatpush3.bf16.xpose.msra.mxu1 %v1419_v61  ;;  %v1289_v18 = vpack.c.bf16 %v1160_v14, %v1160_v14 }
 0x318   : > { %2355 = vmatprep.subr.bf16.mxu0 %v2944_v50  ;;  %2365 = vmatprep.subr.bf16.mxu1 %v2944_v50  ;;  %v1303_v23 = vpack.c.bf16 %v2581_v15, %v2580_v16 }
 0x319   : > { %v2584_v62 = vpop.permute.xlu0 %2583  ;;  %v2589_v25 = vpop.permute.xlu1 %2588 }
 0x31a   : > { %v2586_v0 = vunpack.i.h.bf16 %v2584_v62  ;;  %v2585_v1 = vunpack.i.l.bf16 %v2584_v62  ;;  %v2591_v29 = vunpack.i.h.bf16 %v2589_v25  ;;  %v2590_v26 = vunpack.i.l.bf16 %v2589_v25 }
 0x31b   : > { %v1471_v32 = vsel %vm1304_vm3, %v1303_v23, 0 }
 0x31c   : > { %v1299_v2 = vpack.c.bf16 %v2586_v0, %v2585_v1  ;;  %v1302_v33 = vpack.c.bf16 %v2591_v29, %v2590_v26 }
 0x31d   : > { %v2594_v3 = vpop.permute.xlu0 %2593  ;;  %v2599_v27 = vpop.permute.xlu1 %2598 }
 0x31e   : > { %v2596_v7 = vunpack.i.h.bf16 %v2594_v3  ;;  %v2595_v8 = vunpack.i.l.bf16 %v2594_v3  ;;  %v1416_v9 = vsel %vm1304_vm3, %v1299_v2, 0  ;;  %v2601_v35 = vunpack.i.h.bf16 %v2599_v27 }
 0x31f   : > { %2356 = vmatpush3.bf16.xpose.msra.mxu0 %v1364_v6  ;;  %2366 = vmatpush3.bf16.xpose.msra.mxu1 %v1416_v9  ;;  %v2600_v38 = vunpack.i.l.bf16 %v2599_v27  ;;  %v1468_v39 = vsel %vm1304_vm3, %v1302_v33, 0 }
 0x320   : > { %2357 = vmatprep.subr.bf16.mxu0 %v2944_v50  ;;  %2367 = vmatprep.subr.bf16.mxu1 %v2944_v50  ;;  %v1298_v12 = vpack.c.bf16 %v2596_v7, %v2595_v8 }
 0x321   : > { %v1163_v24 = vpop.permute.xlu0 %1162  ;;  %v1301_v42 = vpack.c.bf16 %v2601_v35, %v2600_v38  ;;  %v1166_v37 = vpop.permute.xlu1 %1165 }
 0x322   : > { %v1413_v22 = vsel %vm1304_vm3, %v1298_v12, 0  ;;  %v1290_v28 = vpack.c.bf16 %v1163_v24, %v1163_v24  ;;  %v1291_v46 = vpack.c.bf16 %v1166_v37, %v1166_v37 }
 0x323   : > { %v1465_v43 = vsel %vm1304_vm3, %v1301_v42, 0 }
 0x327   : > { %2358 = vmatpush3.bf16.xpose.msra.mxu0 %v1361_v17  ;;  %2368 = vmatpush3.bf16.xpose.msra.mxu1 %v1413_v22 }
 0x328   : > { %2373 = vmatprep.subr.bf16.mxu0 %v2944_v50  ;;  %2403 = vmatprep.subr.bf16.mxu1 %v2944_v50 }
 0x32e   : > { %2360 = vmatmul.mubr.msk.bf16.vlgmr.msra.gmra.mxu0 %vm1304_vm3, %v1289_v18  ;;  %2370 = vmatmul.mubr.msk.bf16.vlgmr.msra.gmra.mxu1 %vm1304_vm3, %v1290_v28 }
 0x32f   : > { %2374 = vmatpush3.bf16.xpose.msra.mxu0 %v1471_v32  ;;  %2379 = vmatprep.mubr.msk.bf16.mxu0 %vm2945_vm2, %v2944_v50 }
 0x330   : > { %2375 = vmatprep.subr.bf16.mxu0 %v2944_v50  ;;  %2409 = vmatprep.mubr.msk.bf16.mxu1 %vm2945_vm2, %v2944_v50 }
 0x337   : > { %2376 = vmatpush3.bf16.xpose.msra.mxu0 %v1468_v39 }
 0x338   : > { %2377 = vmatprep.subr.bf16.mxu0 %v2944_v50 }
 0x33f   : > { %2378 = vmatpush3.bf16.xpose.msra.mxu0 %v1465_v43 }
 0x340   : > { %2383 = vmatprep.subr.bf16.mxu0 %v2944_v50 }
 0x346   : > { %2380 = vmatmul.mubr.msk.bf16.vlgmr.msra.gmra.mxu0 %vm1304_vm3, %v1291_v46 }
 0x347   : > { %2384 = vmatpush3.bf16.msra.mxu0 %v1568_v44  ;;  %2389 = vmatprep.mubr.msk.bf16.mxu0 %vm2945_vm2, %v2944_v50 }
 0x348   : > { %2385 = vmatprep.subr.bf16.mxu0 %v2944_v50 }
 0x34b   : > { %2386 = vmatpush3.bf16.msra.mxu0 %v1567_v34 }
 0x34c   : > { %2387 = vmatprep.subr.bf16.mxu0 %v2944_v50 }
 0x34f   : > { %2388 = vmatpush3.bf16.msra.mxu0 %v1566_v20 }
 0x350   : > { %2393 = vmatprep.subr.bf16.mxu0 %v2944_v50 }
 0x377   : > { %v1351_v36 = vpop.f32.mrf.mxu1 }
 0x378   : > { %v1513_v40 = vmul.f32 0.35355338, %v1351_v36 }
 0x379   : > { %v2351_v41 = vpop.f32.mrf.mxu1 }
 0x37a   : > { %v1518_v44 = vsel %vm1517_vm4, %v1513_v40, -inf }
 0x37b   : > { %1519 = vmax.xlane.f32.xlu0 %v1518_v44  ;;  %v1354_v47 = vpop.f32.mrf.mxu1 }
 0x37d   : > { %v2352_v48 = vpop.f32.mrf.mxu1 }
 0x391   : > { %2603 = vrot.lane.b32.xlu0 %v3363_v45, %s2946_s23 }
 0x3ee   : > { %v1403_v30 = vpop.f32.mrf.mxu0  ;;  %v1455_v34 = vpop.f32.mrf.mxu1 }
 0x3ef   : > { %v1514_v31 = vmul.f32 0.35355338, %v1403_v30  ;;  %v1515_v49 = vmul.f32 0.35355338, %v1455_v34 }
 0x3f0   : > { %v2361_v11 = vpop.f32.mrf.mxu0  ;;  %v2371_v13 = vpop.f32.mrf.mxu1 }
 0x3f1   : > { %v1521_v20 = vsel %vm1517_vm4, %v1514_v31, -inf  ;;  %v1524_v52 = vsel %vm1517_vm4, %v1515_v49, -inf }
 0x3f2   : > { %1522 = vmax.xlane.f32.xlu1 %v1521_v20  ;;  %v1406_v51 = vpop.f32.mrf.mxu0  ;;  %1525 = vmax.xlane.f32.xlu0 %v1524_v52  ;;  %v1458_v53 = vpop.f32.mrf.mxu1 }
 0x3f4   : > { %v2362_v54 = vpop.f32.mrf.mxu0  ;;  %v2372_v55 = vpop.f32.mrf.mxu1 }
 0x403   : > { %2608 = vrot.lane.b32.xlu1 %v3346_v19, %s2946_s23 }
 0x404   : > { %v1520_v62 = vpop.xlane.xlu0 %1519 }
 0x405   : > { %v1530_v63 = vsub.f32 %v1513_v40, %v1520_v62 }
 0x406   : > { %v1507_v56 = vpop.f32.mrf.mxu0 }
 0x407   : > { %v1516_v57 = vmul.f32 0.35355338, %v1507_v56  ;;  %2613 = vrot.lane.b32.xlu1 %v3330_v21, %s2946_s23  ;;  %v1534_v0 = vmul.f32 1.442695, %v1530_v63 }
 0x408   : > { %v2381_v58 = vpop.f32.mrf.mxu0  ;;  %v2604_v3 = vpop.permute.xlu0 %2603 }
 0x409   : > { %v1527_v59 = vsel %vm1517_vm4, %v1516_v57, -inf  ;;  %2679 = vpow2.f32 %v1534_v0  ;;  %v2606_v42 = vunpack.i.h.bf16 %v2604_v3  ;;  %v2605_v43 = vunpack.i.l.bf16 %v2604_v3 }
 0x40a   : > { %v1510_v60 = vpop.f32.mrf.mxu0  ;;  %1528 = vmax.xlane.f32.xlu0 %v1527_v59 }
 0x40b   : > { %2618 = vrot.lane.b32.xlu1 %v3363_v45, %s2947_s3  ;;  %v1571_v36 = vpack.c.bf16 %v2606_v42, %v2605_v43  ;;  %v2222_v42 = vld [vmem:[#allocation7] ss:$0 sm:$0xff] }
 0x40c   : > { %v2382_v61 = vpop.f32.mrf.mxu0 }
 0x40f   : > { %2628 = vrot.lane.b32.xlu1 %v3346_v19, %s2947_s3 }
 0x416   : > { %v2680_v1 = vpop.eup %2679 }
 0x417   : > { %v1542_v2 = vsel %vm1517_vm4, %v2680_v1, 0.0 }
 0x420   : > { %2623 = vrot.lane.b32.xlu0 %v3363_v45, %s2948_s2 }
 0x43f   : > { %1543 = vadd.xlane.f32.xlu0 %v1542_v2 }
 0x455   : > { %2633 = vrot.lane.b32.xlu0 %v3346_v19, %s2948_s2 }
 0x47b   : > { %v1523_v4 = vpop.xlane.xlu1 %1522  ;;  %v1526_v6 = vpop.xlane.xlu0 %1525 }
 0x47c   : > { %v1531_v5 = vsub.f32 %v1514_v31, %v1523_v4  ;;  %v1532_v7 = vsub.f32 %v1515_v49, %v1526_v6 }
 0x47e   : > { %v1536_v8 = vmul.f32 1.442695, %v1531_v5  ;;  %v1538_v9 = vmul.f32 1.442695, %v1532_v7 }
 0x47f   : > { %v2609_v10 = vpop.permute.xlu1 %2608 }
 0x480   : > { %2681 = vpow2.f32 %v1536_v8  ;;  %v2611_v40 = vunpack.i.h.bf16 %v2609_v10  ;;  %v2610_v41 = vunpack.i.l.bf16 %v2609_v10 }
 0x481   : > { %2683 = vpow2.f32 %v1538_v9 }
 0x483   : > { %v2614_v45 = vpop.permute.xlu1 %2613 }
 0x484   : > { %v2616_v44 = vunpack.i.h.bf16 %v2614_v45  ;;  %v2615_v47 = vunpack.i.l.bf16 %v2614_v45 }
 0x486   : > { %v1569_v48 = vpack.c.bf16 %v2616_v44, %v2615_v47 }
 0x487   : > { %v2619_v12 = vpop.permute.xlu1 %2618 }
 0x488   : > { %v2621_v14 = vunpack.i.h.bf16 %v2619_v12  ;;  %v2620_v15 = vunpack.i.l.bf16 %v2619_v12 }
 0x48a   : > { %v1574_v16 = vpack.c.bf16 %v2621_v14, %v2620_v15  ;;  %v2653_v15 = vld [vmem:[%s3546_s12 + $0x8] sm:$0xff]  }
 0x48b   : > { %v2629_v17 = vpop.permute.xlu1 %2628 }
 0x48c   : > { %v2631_v22 = vunpack.i.h.bf16 %v2629_v17  ;;  %v2630_v23 = vunpack.i.l.bf16 %v2629_v17  ;;  %2404 = vmatpush3.bf16.msra.mxu1 %v1574_v16  ;;  %v2654_v17 = vld [vmem:[%s3546_s12] sm:$0xff]  }
 0x48d   : > { %v2682_v19 = vpop.eup %2681  ;;  %2405 = vmatprep.subr.bf16.mxu1 %v2944_v50 }
 0x48e   : > { %v3431_v24 = vpop.eup %2683  ;;  %v1573_v25 = vpack.c.bf16 %v2631_v22, %v2630_v23  ;;  %v1545_v18 = vsel %vm1517_vm4, %v2682_v19, 0.0 }
 0x48f   : > { %1546 = vadd.xlane.f32.xlu1 %v1545_v18  ;;  %v1548_v28 = vsel %vm1517_vm4, %v3431_v24, 0.0 }
 0x490   : > { %1549 = vadd.xlane.f32.xlu0 %v1548_v28  ;;  %2406 = vmatpush3.bf16.msra.mxu1 %v1573_v25 }
 0x491   : > { %2407 = vmatprep.subr.bf16.mxu1 %v2944_v50 }
 0x493   : > { %v1529_v29 = vpop.xlane.xlu0 %1528 }
 0x494   : > { %v1533_v26 = vsub.f32 %v1516_v57, %v1529_v29 }
 0x496   : > { %v1540_v32 = vmul.f32 1.442695, %v1533_v26 }
 0x497   : > { %v2624_v35 = vpop.permute.xlu0 %2623 }
 0x498   : > { %2685 = vpow2.f32 %v1540_v32  ;;  %v2626_v11 = vunpack.i.h.bf16 %v2624_v35  ;;  %v2625_v13 = vunpack.i.l.bf16 %v2624_v35 }
 0x49a   : > { %v1577_v52 = vpack.c.bf16 %v2626_v11, %v2625_v13  ;;  %v2656_v11 = vld [vmem:[%s3550_s16] sm:$0xff]  }
 0x4a5   : > { %v3437_v33 = vpop.eup %2685 }
 0x4a6   : > { %2643 = vrot.lane.b32.xlu0 %v3330_v21, %s2948_s2  ;;  %v1551_v27 = vsel %vm1517_vm4, %v3437_v33, 0.0 }
 0x4a7   : > { %1552 = vadd.xlane.f32.xlu1 %v1551_v27 }
 0x4b8   : > { %2638 = vrot.lane.b32.xlu1 %v3330_v21, %s2947_s3  ;;  %v1570_v21 = vpack.c.bf16 %v2611_v40, %v2610_v41 }
 0x4c8   : > { %v1544_v38 = vpop.xlane.xlu0 %1543 }
 0x4c9   : > { %2687 = vrcp.f32 %v1544_v38 }
 0x4cc   : > { %v2634_v31 = vpop.permute.xlu0 %2633 }
 0x4cd   : > { %v2636_v53 = vunpack.i.h.bf16 %v2634_v31  ;;  %v2635_v54 = vunpack.i.l.bf16 %v2634_v31 }
 0x4cf   : > { %v1576_v56 = vpack.c.bf16 %v2636_v53, %v2635_v54  ;;  %v2226_v53 = vld [vmem:[#allocation9] ss:$0 sm:$0xff] }
 0x4d6   : > { %v2688_v39 = vpop.eup %2687 }
 0x4d7   : > { %v1558_v37 = vmul.f32 %v2688_v39, %v2680_v1 }
 0x4d9   : > { %v1562_v46 = vpack.c.bf16 %v1558_v37, %v1558_v37 }
 0x4db   : > { %2390 = vmatmul.mubr.msk.bf16.vlgmr.msra.gmra.mxu0 %vm1578_vm5, %v1562_v46 }
 0x4dc   : > { %2394 = vmatpush3.bf16.msra.mxu0 %v1571_v36  ;;  %2399 = vmatprep.mubr.msk.bf16.mxu0 %vm2945_vm2, %v2944_v50  ;;  %v2699_v36 = vld [vmem:[%s3202_s27] sm:$0xf] }
 0x4dd   : > { %2395 = vmatprep.subr.bf16.mxu0 %v2944_v50 }
 0x4e0   : > { %2396 = vmatpush3.bf16.msra.mxu0 %v1570_v21 }
 0x4e1   : > { %2397 = vmatprep.subr.bf16.mxu0 %v2944_v50 }
 0x4e4   : > { %2398 = vmatpush3.bf16.msra.mxu0 %v1569_v48 }
 0x4e5   : > { %2413 = vmatprep.subr.bf16.mxu0 %v2944_v50 }
 0x518   : > { %v1547_v30 = vpop.xlane.xlu1 %1546 }
 0x519   : > { %2689 = vrcp.f32 %v1547_v30  ;;  %v1550_v34 = vpop.xlane.xlu0 %1549 }
 0x51a   : > { %2691 = vrcp.f32 %v1550_v34 }
 0x51d   : > { %v2644_v55 = vpop.permute.xlu0 %2643 }
 0x51e   : > { %v2646_v57 = vunpack.i.h.bf16 %v2644_v55  ;;  %v2645_v58 = vunpack.i.l.bf16 %v2644_v55  ;;  %v2227_v55 = vld [vmem:[#allocation10] ss:$0 sm:$0xff] }
 0x520   : > { %v1575_v60 = vpack.c.bf16 %v2646_v57, %v2645_v58 }
 0x526   : > { %v2690_v49 = vpop.eup %2689 }
 0x527   : > { %v1559_v20 = vmul.f32 %v2690_v49, %v2682_v19  ;;  %v2692_v61 = vpop.eup %2691  ;;  %v2655_v49 = vld [vmem:[%s3550_s16 + $0x8] sm:$0xff]  }
 0x528   : > { %v1560_v1 = vmul.f32 %v2692_v61, %v3431_v24  ;;  %v2659_v61 = vld [vmem:[%s3552_s18 + $0x28] sm:$0xff]  }
 0x529   : > { %v1563_v51 = vpack.c.bf16 %v1559_v20, %v1559_v20 }
 0x52a   : > { %v1564_v3 = vpack.c.bf16 %v1560_v1, %v1560_v1  ;;  %v2663_v1 = vld [vmem:[%s3552_s18 + $0x8] sm:$0xff]  }
 0x52b   : > { %2400 = vmatmul.mubr.msk.bf16.vlgmr.msra.gmra.mxu0 %vm1578_vm5, %v1563_v51 }
 0x52c   : > { %2414 = vmatpush3.bf16.msra.mxu0 %v1577_v52  ;;  %2419 = vmatprep.mubr.msk.bf16.mxu0 %vm2945_vm2, %v2944_v50 }
 0x52d   : > { %2415 = vmatprep.subr.bf16.mxu0 %v2944_v50 }
 0x530   : > { %2416 = vmatpush3.bf16.msra.mxu0 %v1576_v56  ;;  %v1553_v59 = vpop.xlane.xlu1 %1552 }
 0x531   : > { %2693 = vrcp.f32 %v1553_v59  ;;  %2417 = vmatprep.subr.bf16.mxu0 %v2944_v50  ;;  %v2657_v59 = vld [vmem:[%s3552_s18 + $0x38] sm:$0xff]  }
 0x534   : > { %2418 = vmatpush3.bf16.msra.mxu0 %v1575_v60  ;;  %v2639_v62 = vpop.permute.xlu1 %2638  ;;  %v2658_v60 = vld [vmem:[%s3552_s18 + $0x30] sm:$0xff]  }
 0x535   : > { %v2641_v63 = vunpack.i.h.bf16 %v2639_v62  ;;  %v2640_v0 = vunpack.i.l.bf16 %v2639_v62  ;;  %2431 = vmatprep.subr.bf16.mxu0 %v2944_v50  ;;  %v2660_v62 = vld [vmem:[%s3552_s18 + $0x20] sm:$0xff]  }
 0x537   : > { %v1572_v2 = vpack.c.bf16 %v2641_v63, %v2640_v0  ;;  %v2661_v63 = vld [vmem:[%s3552_s18 + $0x18] sm:$0xff]   ;;  %v2662_v0 = vld [vmem:[%s3552_s18 + $0x10] sm:$0xff]  }
 0x539   : > { %2408 = vmatpush3.bf16.msra.mxu1 %v1572_v2  ;;  %v2664_v2 = vld [vmem:[%s3552_s18] sm:$0xff]  }
 0x53a   : > { %2423 = vmatprep.subr.bf16.mxu1 %v2944_v50 }
 0x53c   : > { %2410 = vmatmul.mubr.msk.bf16.vlgmr.msra.gmra.mxu1 %vm1578_vm5, %v1564_v3  ;;  %v2228_v3 = vld [vmem:[#allocation12] ss:$0 sm:$0xff] }
 0x53d   : > { %2427 = vmatprep.mubr.msk.bf16.mxu1 %vm2945_vm2, %v2944_v50  ;;  %2424 = vmatpush3.bf16.msra.mxu1 %v2653_v15 }
 0x53e   : > { %v2694_v4 = vpop.eup %2693  ;;  %2425 = vmatprep.subr.bf16.mxu1 %v2944_v50 }
 0x53f   : > { %v1561_v5 = vmul.f32 %v2694_v4, %v3437_v33 }
 0x541   : > { %v1565_v6 = vpack.c.bf16 %v1561_v5, %v1561_v5  ;;  %2426 = vmatpush3.bf16.msra.mxu1 %v2654_v17 }
 0x542   : > { %2439 = vmatprep.subr.bf16.mxu1 %v2944_v50 }
 0x543   : > { %2420 = vmatmul.mubr.msk.bf16.vlgmr.msra.gmra.mxu0 %vm1578_vm5, %v1565_v6 }
 0x544   : > { %2435 = vmatprep.mubr.msk.bf16.mxu0 %vm2945_vm2, %v2944_v50  ;;  %2432 = vmatpush3.bf16.msra.mxu0 %v2655_v49 }
 0x545   : > { %2433 = vmatprep.subr.bf16.mxu0 %v2944_v50 }
 0x548   : > { %2434 = vmatpush3.bf16.msra.mxu0 %v2656_v11 }
 0x59b   : > { %v1616_v7 = vpop.f32.mrf.mxu0 }
 0x59d   : > { %v2391_v8 = vpop.f32.mrf.mxu0 }
 0x59f   : > { %v1619_v9 = vpop.f32.mrf.mxu0 }
 0x5a1   : > { %v2392_v10 = vpop.f32.mrf.mxu0 }
 0x5eb   : > { %v1659_v45 = vpop.f32.mrf.mxu0 }
 0x5ec   : > { %1752 = vrot.lane.b32.xlu1 %v1659_v45, %s2949_s30 }
 0x5ed   : > { %v2401_v12 = vpop.f32.mrf.mxu0 }
 0x5ef   : > { %v1662_v14 = vpop.f32.mrf.mxu0 }
 0x5f1   : > { %v2402_v16 = vpop.f32.mrf.mxu0 }
 0x5fc   : > { %v1702_v22 = vpop.f32.mrf.mxu1 }
 0x5fd   : > { %1756 = vrot.lane.b32.xlu0 %v1702_v22, %s2950_s21  ;;  %s745_s21 = scalar_lea.vmem %s3554_s20, %s2191_s28 }
 0x5fe   : > { %v2411_v23 = vpop.f32.mrf.mxu1 }
 0x600   : > { %v1705_v19 = vpop.f32.mrf.mxu1 }
 0x602   : > { %v2412_v24 = vpop.f32.mrf.mxu1 }
 0x603   : > { %v1745_v25 = vpop.f32.mrf.mxu0 }
 0x604   : > { %1760 = vrot.lane.b32.xlu1 %v1745_v25, %s2951_s25 }
 0x605   : > { %v2421_v18 = vpop.f32.mrf.mxu0 }
 0x607   : > { %v1748_v28 = vpop.f32.mrf.mxu0 }
 0x609   : > { %v2422_v29 = vpop.f32.mrf.mxu0 }
 0x65e   : > { %v1753_v26 = vpop.permute.xlu1 %1752 }
 0x65f   : > { %v1763_v33 = vsel %vm1304_vm3, %v1616_v7, %v1753_v26 }
 0x66f   : > { %v1757_v32 = vpop.permute.xlu0 %1756 }
 0x670   : > { %v1765_v27 = vsel %vm1764_vm6, %v1763_v33, %v1757_v32 }
 0x676   : > { %v1761_v35 = vpop.permute.xlu1 %1760 }
 0x677   : > { %v1767_v38 = vsel %vm1766_vm7, %v1765_v27, %v1761_v35 }
 0x678   : > { %v1768_v39 = vpack.c.bf16 %v1767_v38, %v1767_v38 }
 0x67a   : > { %2428 = vmatmul.mubr.msk.bf16.vlgmr.msra.gmra.mxu1 %vm831_vm0, %v1768_v39 }
 0x67b   : > { %2455 = vmatprep.mubr.msk.bf16.mxu1 %vm2945_vm2, %v2944_v50  ;;  %2440 = vmatpush3.bf16.msra.mxu1 %v2657_v59 }
 0x67c   : > { %2441 = vmatprep.subr.bf16.mxu1 %v2944_v50 }
 0x67f   : > { %2442 = vmatpush3.bf16.msra.mxu1 %v2658_v60 }
 0x680   : > { %2443 = vmatprep.subr.bf16.mxu1 %v2944_v50 }
 0x683   : > { %2444 = vmatpush3.bf16.msra.mxu1 %v2659_v61 }
 0x684   : > { %2445 = vmatprep.subr.bf16.mxu1 %v2944_v50 }
 0x687   : > { %2446 = vmatpush3.bf16.msra.mxu1 %v2660_v62 }
 0x688   : > { %2447 = vmatprep.subr.bf16.mxu1 %v2944_v50 }
 0x68b   : > { %2448 = vmatpush3.bf16.msra.mxu1 %v2661_v63 }
 0x68c   : > { %2449 = vmatprep.subr.bf16.mxu1 %v2944_v50 }
 0x68f   : > { %2450 = vmatpush3.bf16.msra.mxu1 %v2662_v0 }
 0x690   : > { %2451 = vmatprep.subr.bf16.mxu1 %v2944_v50 }
 0x693   : > { %2452 = vmatpush3.bf16.msra.mxu1 %v2663_v1 }
 0x694   : > { %2453 = vmatprep.subr.bf16.mxu1 %v2944_v50  ;;  %v2232_v50 = vld [vmem:[#allocation13] ss:$0 sm:$0xff] }
 0x697   : > { %2454 = vmatpush3.bf16.msra.mxu1 %v2664_v2 }
 0x73a   : > { %v1824_v43 = vpop.f32.mrf.mxu1 }
 0x73b   : > { %v1825_v37 = vadd.f32 %v2222_v42, %v1824_v43 }
 0x73c   : > { %v2429_v46 = vpop.f32.mrf.mxu1 }
 0x73d   : > { %v3479_v40 = vadd.f32 %v2699_v36, %v1825_v37 }
 0x73e   : > { %v1827_v41 = vpop.f32.mrf.mxu1 }
 0x73f   : > { %v1831_v21 = vsel %vm802_vm1, %v3479_v40, 0.0 }
 0x740   : > { %1832 = vadd.xlane.f32.xlu0 %v1831_v21  ;;  %v2430_v44 = vpop.f32.mrf.mxu1 }
 0x7c9   : > { %v1833_v47 = vpop.xlane.xlu0 %1832 }
 0x7ca   : > { %v1834_v48 = vmul.f32 0.03125, %v1833_v47 }
 0x7cc   : > { %v1835_v30 = vsub.f32 %v3479_v40, %v1834_v48 }
 0x7ce   : > { %v1836_v31 = vmul.f32 %v1835_v30, %v1835_v30 }
 0x7d0   : > { %v1837_v34 = vsel %vm802_vm1, %v1836_v31, 0.0 }
 0x7d1   : > { %1838 = vadd.xlane.f32.xlu1 %v1837_v34 }
 0x85a   : > { %v1839_v13 = vpop.xlane.xlu1 %1838 }
 0x85b   : > { %v1840_v20 = vmul.f32 0.03125, %v1839_v13 }
 0x85d   : > { %v1841_v51 = vadd.f32 1e-05, %v1840_v20 }
 0x85f   : > { %2695 = vrsqrt.f32 %v1841_v51 }
 0x86c   : > { %v2696_v52 = vpop.eup %2695 }
 0x86d   : > { %v1843_v54 = vmul.f32 %v2696_v52, %v1835_v30 }
 0x86f   : > { %v1850_v56 = vmul.f32 %v2226_v53, %v1843_v54 }
 0x871   : > { %v1857_v57 = vadd.f32 %v2227_v55, %v1850_v56 }
 0x873   : > { %v1858_v58 = vpack.c.bf16 %v1857_v57, %v1857_v57 }
 0x875   : > { %2436 = vmatmul.mubr.msk.bf16.vlgmr.msra.gmra.mxu0 %vm831_vm0, %v1858_v58 }
 0x935   : > { %v1914_v4 = vpop.f32.mrf.mxu0 }
 0x936   : > { %v1915_v5 = vadd.f32 %v2228_v3, %v1914_v4 }
 0x937   : > { %v2437_v6 = vpop.f32.mrf.mxu0 }
 0x938   : > { %v1920_v7 = vmul.f32 %v1915_v5, %v1915_v5 }
 0x939   : > { %v1917_v8 = vpop.f32.mrf.mxu0 }
 0x93a   : > { %v1921_v9 = vmul.f32 %v1920_v7, %v1915_v5 }
 0x93b   : > { %v2438_v10 = vpop.f32.mrf.mxu0 }
 0x93c   : > { %v1922_v45 = vmul.f32 0.044715, %v1921_v9 }
 0x93e   : > { %v1923_v12 = vadd.f32 %v1922_v45, %v1915_v5 }
 0x940   : > { %v1924_v14 = vmul.f32 0.7978846, %v1923_v12 }
 0x942   : > { %2697 = vtanh.f32 %v1924_v14 }
 0x94f   : > { %v2698_v15 = vpop.eup %2697 }
 0x950   : > { %v1926_v16 = vadd.f32 1.0, %v2698_v15 }
 0x952   : > { %v1927_v17 = vmul.f32 0.5, %v1926_v16 }
 0x954   : > { %v1928_v22 = vmul.f32 %v1927_v17, %v1915_v5 }
 0x956   : > { %v1929_v23 = vpack.c.bf16 %v1928_v22, %v1928_v22 }
 0x958   : > { %2456 = vmatmul.mubr.bf16.vlgmr.msra.gmra.mxu1 %v1929_v23 }
 0xa18   : > { %v2018_v19 = vpop.f32.mrf.mxu1 }
 0xa19   : > { %v2019_v24 = vadd.f32 %v2232_v50, %v2018_v19 }
 0xa1a   : > { %v2457_v25 = vpop.f32.mrf.mxu1 }
 0xa1b   : > { %v2024_v18 = vadd.f32 %v2019_v24, %v3479_v40 }
 0xa1c   : > { %v2021_v28 = vpop.f32.mrf.mxu1 }
 0xa1d   : > { %2025 = vst.msk [vmem:[%s745_s21] sm:$0xf] %vm802_vm1, %v2024_v18 }
 0xa1e   : > { %v2458_v29 = vpop.f32.mrf.mxu1 }
 0xa1f PF: > { %s35_s1 = sadd.s32 1, %s2934_s1  }
 0xa20   : > { %p32_p7 = scmp.ge.s32.totalorder %s35_s1, 4  }
 0xa22   :  { %34 = sbr.rel (!%p32_p7) target bundleno = 11 (0xb), region = 166 }
 0xa27   :  { %2045 = vsyncpa [#allocation3], 1 }
 0xa28   :  { %2047 = vsyncpa [#allocation3 + $0x1], 1 }
 0xa29   :  { %2048 = vsyncpa [#allocation5], 1 }
 0xa2a   :  { %2049 = vsyncpa [#allocation8], 1 }
 0xa2b   :  { %2050 = vsyncpa [#allocation11], 1 }
 0xa2c   :  { %2051 = vsyncpa [#allocation14], 1 }

// kernel: alpha_tensor_train_forward.39
= control target key start
LH: loop header
LB: loop body
LE: loop exit
PB: predicated region body
PF: predicated region fallthrough
CT: control target
= control target key end

     0   :  { %s2365_s0 = inlined_call_operand.vmem [shape: f32[2,4,32], index: 0, kind: input, shape index: {}, may-alias: {0,1}]   ;;  %s2366_s1 = inlined_call_operand.vmem [shape: f32[2,4,32], index: 1, kind: input, shape index: {}, may-alias: {0,1}]   ;;  %s2367_s2 = inlined_call_operand.vmem [shape: f32[1,32], index: 2, kind: input, shape index: {}]   ;;  %s2368_s3 = inlined_call_operand.vmem [shape: f32[1,32], index: 3, kind: input, shape index: {}]   ;;  %s2369_s4 = inlined_call_operand.vmem [shape: f32[1,32], index: 4, kind: input, shape index: {}]   ;;  %s2370_s5 = inlined_call_operand.vmem [shape: f32[1,32], index: 5, kind: input, shape index: {}]   ;;  %s2371_s6 = inlined_call_operand.vmem [shape: bf16[32,32], index: 6, kind: input, shape index: {}]   ;;  %s2372_s7 = inlined_call_operand.vmem [shape: f32[1,32], index: 7, kind: input, shape index: {}]   ;;  %s2373_s8 = inlined_call_operand.vmem [shape: bf16[32,32], index: 8, kind: input, shape index: {}]   ;;  %s2374_s9 = inlined_call_operand.vmem [shape: f32[1,32], index: 9, kind: input, shape index: {}]   ;;  %s2375_s10 = inlined_call_operand.vmem [shape: bf16[32,32], index: 10, kind: input, shape index: {}]   ;;  %s2376_s11 = inlined_call_operand.vmem [shape: f32[1,32], index: 11, kind: input, shape index: {}]   ;;  %s2377_s12 = inlined_call_operand.vmem [shape: bf16[32,32], index: 12, kind: input, shape index: {}]   ;;  %s2378_s13 = inlined_call_operand.vmem [shape: f32[1,32], index: 13, kind: input, shape index: {}]   ;;  %s2379_s14 = inlined_call_operand.vmem [shape: f32[1,32], index: 14, kind: input, shape index: {}]   ;;  %s2380_s15 = inlined_call_operand.vmem [shape: f32[1,32], index: 15, kind: input, shape index: {}]   ;;  %s2381_s16 = inlined_call_operand.vmem [shape: bf16[32,128], index: 16, kind: input, shape index: {}]   ;;  %s2382_s17 = inlined_call_operand.vmem [shape: f32[1,128], index: 17, kind: input, shape index: {}]   ;;  %s2383_s18 = inlined_call_operand.vmem [shape: bf16[128,32], index: 18, kind: input, shape index: {}]   ;;  %s2384_s19 = inlined_call_operand.vmem [shape: f32[1,32], index: 19, kind: input, shape index: {}]   ;;  %s2385_s20 = inlined_call_operand.vmem [shape: f32[2,4,32], index: 20, kind: output, shape index: {}]  }
   0x1   :  { %2386 = sst [smem:[#allocation2_spill]] %s2365_s0 }
   0x2   :  { %2387 = sst [smem:[#allocation3_spill]] %s2366_s1  ;;  %s2129_s1 = smov 0  }
   0x3   :  { %2388 = sst [smem:[#allocation4_spill]] %s2367_s2 }
   0x4   :  { %2389 = sst [smem:[#allocation5_spill]] %s2368_s3 }
   0x5   :  { %2390 = sst [smem:[#allocation6_spill]] %s2369_s4 }
   0x6 LB: > { %s1749_s22 = sadd.s32 4294967295, %s2014_s1   ;;  %p1753_p0 = scmp.ge.s32.totalorder %s2014_s1, 1  ;;  %s2014_s1 = sphi %s2129_s1, %s30_s1  }
   0x7   : > { %p570_p1 = scmp.lt.s32.totalorder %s2014_s1, 3 }
   0x9   : > { %p571_p2 = pnand %p1753_p0, %p570_p1 }
   0xa   : > { %p630_p3 = scmp.lt.s32.totalorder (!%p571_p2), %s1749_s22, 1  ;;  %s2391_s25 = sld [smem:[#allocation2_spill]] (!%p571_p2) }
   0xb   : > { %574 = sbr.rel (%p571_p2) target bundleno = 2466 (0x9a2), region = 100  ;;  %s2392_s28 = sld [smem:[#allocation3_spill]] (!%p571_p2) }
   0xc   : > { %s2393_s2 = sld [smem:[#allocation4_spill]] (!%p571_p2)  ;;  %s2019_s0 = smov (!%p571_p2), 112  }
   0xd   : > { %s2394_s26 = sld [smem:[#allocation5_spill]] (!%p571_p2)  ;;  %s2020_s21 = smov (!%p571_p2), 104  }
  0x10   : > { %s2397_s22 = smov (!%p630_p3, %s1749_s22), 1  ;;  %vm693_vm0 = vcmask 257024   ;;  %v1966_v14 = vld [vmem:[%s2371_s6 + $0x8] sm:$0xff]   ;;  %v2016_v15 = vmov 0.0   ;;  %v1967_v16 = vld [vmem:[%s2371_s6] sm:$0xff]   ;;  %vm2017_vm1 = vmmov 0  }
  0x11   : > { %s2137_s23 = sshll.u32 %s2397_s22, 2  ;;  %1842 = vmatprep.subr.bf16.mxu0 %v2016_v15  ;;  %1866 = vmatprep.subr.bf16.mxu1 %v2016_v15  ;;  %vm768_vm2 = vcmask 261120   ;;  %v1968_v32 = vld [vmem:[%s2373_s8 + $0x8] sm:$0xff]   ;;  %v1760_v35 = vld [vmem:[%s2370_s5] ss:$0 sm:$0xff]  ;;  %vm970_vm3 = vcmask 64512  }
  0x12   : > { %s633_s3 = scalar_lea.vmem %s2391_s25, %s2137_s23  ;;  %s637_s4 = scalar_lea.vmem %s2392_s28, %s2137_s23  ;;  %1843 = vmatpush3.bf16.msra.mxu0 %v1966_v14  ;;  %1846 = vmatprep.mubr.msk.bf16.mxu0 %vm2017_vm1, %v2016_v15  ;;  %v1757_v24 = vld [vmem:[%s2393_s2] ss:$0 sm:$0xff]  ;;  %v1970_v38 = vld [vmem:[%s2375_s10 + $0x8] sm:$0xff]   ;;  %vm1227_vm4 = vcmask 1041408   ;;  %vm1170_vm6 = vcmask 27648   ;;  %vm1223_vm7 = vcmask 31744  }
  0x13   : > { %v2143_v0 = vld [vmem:[%s633_s3] sm:$0xf]  ;;  %1844 = vmatprep.subr.bf16.mxu0 %v2016_v15  ;;  %1868 = vmatprep.mubr.msk.bf16.mxu1 %vm2017_vm1, %v2016_v15  ;;  %s2021_s3 = smov 16   ;;  %vm1422_vm8 = vcmask 130048   ;;  %vm1424_vm9 = vcmask 195584   ;;  %s641_s2 = scalar_lea.vmem %s2385_s20, %s2137_s23 }
  0x14   : > { %v694_v1 = vsel %vm693_vm0, %v2143_v0, 0.0  ;;  %v644_v2 = vld [vmem:[%s637_s4] sm:$0xf]  ;;  %s2395_s4 = sld [smem:[#allocation6_spill]] }
  0x15   : > { %695 = vadd.xlane.f32.xlu0 %v694_v1  ;;  %v722_v3 = vsel %vm693_vm0, %v644_v2, 0.0  ;;  %v1758_v26 = vld [vmem:[%s2394_s26] ss:$0 sm:$0xff]  ;;  %s2022_s26 = smov 8  }
  0x16   : > { %1845 = vmatpush3.bf16.msra.mxu0 %v1967_v16  ;;  %v1969_v36 = vld [vmem:[%s2373_s8] sm:$0xff]  }
  0x17   : > { %1850 = vmatprep.subr.bf16.mxu0 %v2016_v15  ;;  %v1971_v40 = vld [vmem:[%s2375_s10] sm:$0xff]  }
  0x18   : > { %v1761_v41 = vld [vmem:[%s2372_s7] ss:$0 sm:$0xff] }
  0x19   : > { %723 = vadd.xlane.f32.xlu0 %v722_v3  ;;  %v1765_v47 = vld [vmem:[%s2374_s9] ss:$0 sm:$0xff] }
  0x1a   : > { %v1759_v29 = vld [vmem:[%s2395_s4] ss:$0 sm:$0xff]  ;;  %s2018_s4 = smov 120  }
  0x1b   : > { %v1769_v61 = vld [vmem:[%s2376_s11] ss:$0 sm:$0xff] }
  0x9e   : > { %v696_v4 = vpop.xlane.xlu0 %695 }
  0x9f   : > { %v698_v5 = vmul.f32 0.03125, %v696_v4 }
  0xa1   : > { %v699_v6 = vsub.f32 %v2143_v0, %v698_v5 }
  0xa2   : > { %v724_v7 = vpop.xlane.xlu0 %723 }
  0xa3   : > { %v725_v8 = vmul.f32 0.03125, %v724_v7  ;;  %v700_v9 = vmul.f32 %v699_v6, %v699_v6 }
  0xa5   : > { %v726_v10 = vsub.f32 %v644_v2, %v725_v8  ;;  %v701_v11 = vsel %vm693_vm0, %v700_v9, 0.0 }
  0xa6   : > { %702 = vadd.xlane.f32.xlu1 %v701_v11 }
  0xa7   : > { %v727_v12 = vmul.f32 %v726_v10, %v726_v10 }
  0xa9   : > { %v728_v13 = vsel %vm693_vm0, %v727_v12, 0.0 }
  0xaa   : > { %729 = vadd.xlane.f32.xlu1 %v728_v13 }
 0x12f   : > { %v703_v17 = vpop.xlane.xlu1 %702 }
 0x130   : > { %v704_v18 = vmul.f32 0.03125, %v703_v17  ;;  %v1159_v17 = vlaneseq }
 0x132   : > { %v705_v19 = vadd.f32 1e-05, %v704_v18  ;;  %v1160_v18 = vshrl.u32 %v1159_v17, 7 }
 0x133   : > { %v730_v20 = vpop.xlane.xlu1 %729 }
 0x134   : > { %1984 = vrsqrt.f32 %v705_v19  ;;  %v731_v21 = vmul.f32 0.03125, %v730_v20  ;;  %v1162_v19 = vand.u32 127, %v1159_v17 }
 0x136   : > { %v732_v22 = vadd.f32 1e-05, %v731_v21  ;;  %vm1163_vm5 = vcmp.le.s32.totalorder %v1162_v19, %v1160_v18 }
 0x138   : > { %1986 = vrsqrt.f32 %v732_v22 }
 0x141   : > { %v1985_v23 = vpop.eup %1984 }
 0x142   : > { %v707_v25 = vmul.f32 %v1985_v23, %v699_v6 }
 0x144   : > { %v714_v27 = vmul.f32 %v1757_v24, %v707_v25 }
 0x145   : > { %v1987_v28 = vpop.eup %1986 }
 0x146   : > { %v734_v30 = vmul.f32 %v1987_v28, %v726_v10  ;;  %v721_v31 = vadd.f32 %v1758_v26, %v714_v27 }
 0x148   : > { %v749_v33 = vpack.c.bf16 %v721_v31, %v721_v31  ;;  %v741_v34 = vmul.f32 %v1759_v29, %v734_v30 }
 0x14a   : > { %1847 = vmatmul.mubr.msk.bf16.vlgmr.msra.gmra.mxu0 %vm768_vm2, %v749_v33  ;;  %v748_v37 = vadd.f32 %v1760_v35, %v741_v34 }
 0x14b   : > { %1851 = vmatpush3.bf16.msra.mxu0 %v1968_v32  ;;  %1854 = vmatprep.mubr.msk.bf16.mxu0 %vm2017_vm1, %v2016_v15 }
 0x14c   : > { %1852 = vmatprep.subr.bf16.mxu0 %v2016_v15  ;;  %v812_v39 = vpack.c.bf16 %v748_v37, %v748_v37 }
 0x14f   : > { %1853 = vmatpush3.bf16.msra.mxu0 %v1969_v36 }
 0x150   : > { %1858 = vmatprep.subr.bf16.mxu0 %v2016_v15 }
 0x152   : > { %1855 = vmatmul.mubr.msk.bf16.vlgmr.msra.gmra.mxu0 %vm768_vm2, %v812_v39 }
 0x153   : > { %1859 = vmatpush3.bf16.msra.mxu0 %v1970_v38  ;;  %1862 = vmatprep.mubr.msk.bf16.mxu0 %vm2017_vm1, %v2016_v15 }
 0x154   : > { %1860 = vmatprep.subr.bf16.mxu0 %v2016_v15 }
 0x157   : > { %1861 = vmatpush3.bf16.msra.mxu0 %v1971_v40 }
 0x158   : > { %1872 = vmatprep.subr.bf16.mxu0 %v2016_v15 }
 0x15a   : > { %1863 = vmatmul.mubr.msk.bf16.vlgmr.msra.gmra.mxu0 %vm768_vm2, %v812_v39 }
 0x15b   : > { %1874 = vmatprep.mubr.msk.bf16.mxu0 %vm2017_vm1, %v2016_v15 }
 0x20a   : > { %v806_v42 = vpop.f32.mrf.mxu0 }
 0x20b   : > { %v807_v43 = vadd.f32 %v1761_v41, %v806_v42 }
 0x20c   : > { %v1848_v44 = vpop.f32.mrf.mxu0 }
 0x20d   : > { %933 = vrot.lane.b32.xlu1 %v807_v43, %s2018_s4  ;;  %v962_v57 = vpack.c.bf16 %v807_v43, %v807_v43 }
 0x20e   : > { %v809_v45 = vpop.f32.mrf.mxu0 }
 0x210   : > { %v1849_v46 = vpop.f32.mrf.mxu0 }
 0x212   : > { %v868_v48 = vpop.f32.mrf.mxu0 }
 0x213   : > { %v869_v49 = vadd.f32 %v1765_v47, %v868_v48 }
 0x214   : > { %v1856_v50 = vpop.f32.mrf.mxu0 }
 0x215   : > { %946 = vrot.lane.b32.xlu1 %v869_v49, %s2019_s0  ;;  %943 = vrot.lane.b32.xlu0 %v869_v49, %s2018_s4  ;;  %v966_v51 = vpack.c.bf16 %v869_v49, %v869_v49 }
 0x216   : > { %v871_v52 = vpop.f32.mrf.mxu0 }
 0x217   : > { %v975_v53 = vsel %vm970_vm3, %v966_v51, 0 }
 0x218   : > { %v1857_v54 = vpop.f32.mrf.mxu0  ;;  %1867 = vmatpush3.bf16.xpose.msra.mxu1 %v975_v53 }
 0x219   : > { %949 = vrot.lane.b32.xlu1 %v869_v49, %s2020_s21  ;;  %936 = vrot.lane.b32.xlu0 %v807_v43, %s2019_s0 }
 0x21a   : > { %v926_v55 = vpop.f32.mrf.mxu0  ;;  %1878 = vmatprep.subr.bf16.mxu1 %v2016_v15 }
 0x21b   : > { %v2226_v3 = vadd.f32 %v1769_v61, %v926_v55 }
 0x21c   : > { %v1864_v56 = vpop.f32.mrf.mxu0 }
 0x21d   : > { %939 = vrot.lane.b32.xlu1 %v807_v43, %s2020_s21  ;;  %v1219_v9 = vpack.c.bf16 %v2226_v3, %v2226_v3 }
 0x21e   : > { %v929_v58 = vpop.f32.mrf.mxu0 }
 0x21f   : > { %1869 = vmatmul.mubr.msk.bf16.vlgmr.msra.gmra.mxu1 %vm970_vm3, %v962_v57  ;;  %v1229_v13 = vsel %vm1227_vm4, %v1219_v9, 0 }
 0x220   : > { %v1865_v59 = vpop.f32.mrf.mxu0  ;;  %1880 = vmatprep.mubr.msk.bf16.mxu1 %vm2017_vm1, %v2016_v15 }
 0x27f   : > { %v934_v60 = vpop.permute.xlu1 %933 }
 0x280   : > { %v963_v10 = vpack.c.bf16 %v934_v60, %v934_v60 }
 0x287   : > { %v944_v62 = vpop.permute.xlu0 %943  ;;  %v947_v63 = vpop.permute.xlu1 %946 }
 0x288   : > { %v967_v1 = vpack.c.bf16 %v944_v62, %v944_v62  ;;  %v968_v2 = vpack.c.bf16 %v947_v63, %v947_v63 }
 0x28a   : > { %v1021_v4 = vsel %vm970_vm3, %v967_v1, 0  ;;  %v1067_v5 = vsel %vm970_vm3, %v968_v2, 0 }
 0x28b   : > { %1873 = vmatpush3.bf16.xpose.msra.mxu0 %v1021_v4  ;;  %1879 = vmatpush3.bf16.xpose.msra.mxu1 %v1067_v5  ;;  %v950_v6 = vpop.permute.xlu1 %949  ;;  %v937_v7 = vpop.permute.xlu0 %936 }
 0x28c   : > { %1884 = vmatprep.subr.bf16.mxu0 %v2016_v15  ;;  %1890 = vmatprep.subr.bf16.mxu1 %v2016_v15  ;;  %v969_v8 = vpack.c.bf16 %v950_v6, %v950_v6  ;;  %v964_v11 = vpack.c.bf16 %v937_v7, %v937_v7 }
 0x28e   : > { %v1113_v12 = vsel %vm970_vm3, %v969_v8, 0 }
 0x28f   : > { %v940_v14 = vpop.permute.xlu1 %939 }
 0x290   : > { %v965_v16 = vpack.c.bf16 %v940_v14, %v940_v14 }
 0x292   : > { %1875 = vmatmul.mubr.msk.bf16.vlgmr.msra.gmra.mxu0 %vm970_vm3, %v963_v10  ;;  %1881 = vmatmul.mubr.msk.bf16.vlgmr.msra.gmra.mxu1 %vm970_vm3, %v964_v11 }
 0x293   : > { %1885 = vmatpush3.bf16.xpose.msra.mxu0 %v1113_v12  ;;  %1891 = vmatpush3.bf16.msra.mxu1 %v1229_v13 }
 0x294   : > { %1886 = vmatprep.mubr.msk.bf16.mxu0 %vm2017_vm1, %v2016_v15  ;;  %1892 = vmatprep.mubr.msk.bf16.mxu1 %vm2017_vm1, %v2016_v15 }
 0x295   : > { %1896 = vmatprep.subr.bf16.mxu0 %v2016_v15  ;;  %1902 = vmatprep.subr.bf16.mxu1 %v2016_v15 }
 0x29a   : > { %1887 = vmatmul.mubr.msk.bf16.vlgmr.msra.gmra.mxu0 %vm970_vm3, %v965_v16 }
 0x29b   : > { %1898 = vmatprep.mubr.msk.bf16.mxu0 %vm2017_vm1, %v2016_v15 }
 0x2df   : > { %v1011_v20 = vpop.f32.mrf.mxu1 }
 0x2e0   : > { %v1155_v21 = vmul.f32 0.35355338, %v1011_v20 }
 0x2e1   : > { %v1870_v22 = vpop.f32.mrf.mxu1 }
 0x2e2   : > { %v1166_v23 = vsel %vm1163_vm5, %v1155_v21, -1e+30 }
 0x2e3   : > { %v1014_v24 = vpop.f32.mrf.mxu1  ;;  %v1171_v25 = vsel %vm1170_vm6, %v1166_v23, -inf }
 0x2e4   : > { %1172 = vmax.xlane.f32.xlu0 %v1171_v25 }
 0x2e5   : > { %v1871_v26 = vpop.f32.mrf.mxu1 }
 0x352   : > { %v1057_v27 = vpop.f32.mrf.mxu0  ;;  %v1103_v28 = vpop.f32.mrf.mxu1 }
 0x353   : > { %v1156_v29 = vmul.f32 0.35355338, %v1057_v27  ;;  %v1157_v30 = vmul.f32 0.35355338, %v1103_v28 }
 0x354   : > { %v1876_v31 = vpop.f32.mrf.mxu0  ;;  %v1882_v32 = vpop.f32.mrf.mxu1 }
 0x355   : > { %v1167_v33 = vsel %vm1163_vm5, %v1156_v29, -1e+30  ;;  %v1168_v34 = vsel %vm1163_vm5, %v1157_v30, -1e+30 }
 0x356   : > { %v1060_v35 = vpop.f32.mrf.mxu0  ;;  %v1106_v36 = vpop.f32.mrf.mxu1  ;;  %v1174_v37 = vsel %vm1170_vm6, %v1167_v33, -inf  ;;  %v1177_v38 = vsel %vm1170_vm6, %v1168_v34, -inf }
 0x357   : > { %1175 = vmax.xlane.f32.xlu1 %v1174_v37  ;;  %1178 = vmax.xlane.f32.xlu0 %v1177_v38  ;;  %v1972_v35 = vld [vmem:[%s2377_s12 + $0x8] sm:$0xff]  }
 0x358   : > { %v1877_v39 = vpop.f32.mrf.mxu0  ;;  %v1883_v40 = vpop.f32.mrf.mxu1 }
 0x35a   : > { %v1149_v41 = vpop.f32.mrf.mxu0 }
 0x35b   : > { %v1158_v42 = vmul.f32 0.35355338, %v1149_v41 }
 0x35c   : > { %v1888_v43 = vpop.f32.mrf.mxu0 }
 0x35d   : > { %v1169_v44 = vsel %vm1163_vm5, %v1158_v42, -1e+30 }
 0x35e   : > { %v1152_v45 = vpop.f32.mrf.mxu0  ;;  %v1180_v46 = vsel %vm1170_vm6, %v1169_v44, -inf }
 0x35f   : > { %1181 = vmax.xlane.f32.xlu0 %v1180_v46 }
 0x360   : > { %v1889_v47 = vpop.f32.mrf.mxu0 }
 0x36d   : > { %v1173_v48 = vpop.xlane.xlu0 %1172 }
 0x36e   : > { %v1183_v49 = vsub.f32 %v1166_v23, %v1173_v48 }
 0x370   : > { %v1187_v50 = vmul.f32 1.442695, %v1183_v49 }
 0x372   : > { %1988 = vpow2.f32 %v1187_v50 }
 0x37f   : > { %v1989_v51 = vpop.eup %1988 }
 0x380   : > { %v1195_v52 = vsel %vm1170_vm6, %v1989_v51, 0.0 }
 0x381   : > { %1196 = vadd.xlane.f32.xlu0 %v1195_v52 }
 0x3e0   : > { %v1179_v53 = vpop.xlane.xlu0 %1178  ;;  %v1176_v54 = vpop.xlane.xlu1 %1175 }
 0x3e1   : > { %v1185_v55 = vsub.f32 %v1168_v34, %v1179_v53  ;;  %v1184_v56 = vsub.f32 %v1167_v33, %v1176_v54 }
 0x3e3   : > { %v1191_v57 = vmul.f32 1.442695, %v1185_v55  ;;  %v1189_v58 = vmul.f32 1.442695, %v1184_v56  ;;  %v1781_v56 = vld [vmem:[%s2378_s13] ss:$0 sm:$0xff] }
 0x3e5   : > { %1990 = vpow2.f32 %v1191_v57 }
 0x3e6   : > { %1992 = vpow2.f32 %v1189_v58 }
 0x3e8   : > { %v1182_v63 = vpop.xlane.xlu0 %1181 }
 0x3e9   : > { %v1186_v2 = vsub.f32 %v1169_v44, %v1182_v63  ;;  %v1973_v44 = vld [vmem:[%s2377_s12] sm:$0xff]  }
 0x3eb   : > { %v1193_v4 = vmul.f32 1.442695, %v1186_v2 }
 0x3f2   : > { %v1991_v59 = vpop.eup %1990 }
 0x3f3   : > { %v1993_v60 = vpop.eup %1992  ;;  %v1201_v61 = vsel %vm1170_vm6, %v1991_v59, 0.0 }
 0x3f4   : > { %1202 = vadd.xlane.f32.xlu0 %v1201_v61  ;;  %v1198_v62 = vsel %vm1170_vm6, %v1993_v60, 0.0 }
 0x3f5   : > { %1199 = vadd.xlane.f32.xlu1 %v1198_v62 }
 0x406   : > { %956 = vrot.lane.b32.xlu1 %v2226_v3, %s2019_s0 }
 0x40a   : > { %953 = vrot.lane.b32.xlu0 %v2226_v3, %s2018_s4  ;;  %v1197_v1 = vpop.xlane.xlu0 %1196  ;;  %s2023_s4 = smov 24  }
 0x40b   : > { %1994 = vrcp.f32 %v1197_v1 }
 0x40c   : > { %1996 = vpow2.f32 %v1193_v4 }
 0x418   : > { %v1995_v5 = vpop.eup %1994 }
 0x419   : > { %v1211_v6 = vmul.f32 %v1995_v5, %v1989_v51  ;;  %v1997_v8 = vpop.eup %1996 }
 0x41a   : > { %v1204_v9 = vsel %vm1170_vm6, %v1997_v8, 0.0 }
 0x41b   : > { %v1215_v7 = vpack.c.bf16 %v1211_v6, %v1211_v6 }
 0x41d   : > { %1893 = vmatmul.mubr.msk.bf16.vlgmr.msra.gmra.mxu1 %vm1223_vm7, %v1215_v7  ;;  %v1974_v7 = vld [vmem:[%s2381_s16 + $0x8] sm:$0xff]  }
 0x41e   : > { %1904 = vmatprep.mubr.msk.bf16.mxu1 %vm2017_vm1, %v2016_v15 }
 0x42a   : > { %1205 = vadd.xlane.f32.xlu1 %v1204_v9 }
 0x43b   : > { %959 = vrot.lane.b32.xlu1 %v2226_v3, %s2020_s21 }
 0x47d   : > { %v1203_v10 = vpop.xlane.xlu0 %1202 }
 0x47e   : > { %1998 = vrcp.f32 %v1203_v10  ;;  %v1200_v11 = vpop.xlane.xlu1 %1199 }
 0x47f   : > { %2000 = vrcp.f32 %v1200_v11 }
 0x481   : > { %v954_v12 = vpop.permute.xlu0 %953 }
 0x482   : > { %v1220_v13 = vpack.c.bf16 %v954_v12, %v954_v12  ;;  %v957_v14 = vpop.permute.xlu1 %956  ;;  %v1785_v12 = vld [vmem:[%s2379_s14] ss:$0 sm:$0xff] }
 0x483   : > { %v1221_v16 = vpack.c.bf16 %v957_v14, %v957_v14  ;;  %v1786_v14 = vld [vmem:[%s2380_s15] ss:$0 sm:$0xff] }
 0x484   : > { %v1275_v17 = vsel %vm1227_vm4, %v1220_v13, 0 }
 0x485   : > { %v1321_v18 = vsel %vm1227_vm4, %v1221_v16, 0  ;;  %1897 = vmatpush3.bf16.msra.mxu0 %v1275_v17 }
 0x486   : > { %1903 = vmatpush3.bf16.msra.mxu1 %v1321_v18  ;;  %1908 = vmatprep.subr.bf16.mxu0 %v2016_v15 }
 0x487   : > { %1914 = vmatprep.subr.bf16.mxu1 %v2016_v15 }
 0x48b   : > { %v1999_v19 = vpop.eup %1998 }
 0x48c   : > { %v2001_v3 = vpop.eup %2000  ;;  %v1213_v20 = vmul.f32 %v1999_v19, %v1991_v59  ;;  %v1976_v19 = vld [vmem:[%s2383_s18 + $0x38] sm:$0xff]  }
 0x48d   : > { %v1212_v21 = vmul.f32 %v2001_v3, %v1993_v60  ;;  %v1977_v3 = vld [vmem:[%s2383_s18 + $0x30] sm:$0xff]  }
 0x48e   : > { %v1217_v22 = vpack.c.bf16 %v1213_v20, %v1213_v20  ;;  %v1978_v20 = vld [vmem:[%s2383_s18 + $0x28] sm:$0xff]  }
 0x48f   : > { %v1216_v23 = vpack.c.bf16 %v1212_v21, %v1212_v21  ;;  %v1979_v21 = vld [vmem:[%s2383_s18 + $0x20] sm:$0xff]  }
 0x490   : > { %1905 = vmatmul.mubr.msk.bf16.vlgmr.msra.gmra.mxu1 %vm1223_vm7, %v1217_v22  ;;  %v1980_v22 = vld [vmem:[%s2383_s18 + $0x18] sm:$0xff]  }
 0x491   : > { %1899 = vmatmul.mubr.msk.bf16.vlgmr.msra.gmra.mxu0 %vm1223_vm7, %v1216_v23  ;;  %1918 = vmatprep.mubr.msk.bf16.mxu1 %vm2017_vm1, %v2016_v15  ;;  %v1981_v23 = vld [vmem:[%s2383_s18 + $0x10] sm:$0xff]  }
 0x492   : > { %1910 = vmatprep.mubr.msk.bf16.mxu0 %vm2017_vm1, %v2016_v15  ;;  %1915 = vmatpush3.bf16.msra.mxu1 %v1972_v35 }
 0x493   : > { %1916 = vmatprep.subr.bf16.mxu1 %v2016_v15 }
 0x496   : > { %1917 = vmatpush3.bf16.msra.mxu1 %v1973_v44 }
 0x497   : > { %1930 = vmatprep.subr.bf16.mxu1 %v2016_v15 }
 0x4b3   : > { %v1206_v24 = vpop.xlane.xlu1 %1205 }
 0x4b4   : > { %2002 = vrcp.f32 %v1206_v24  ;;  %v1982_v24 = vld [vmem:[%s2383_s18 + $0x8] sm:$0xff]  }
 0x4b7   : > { %v960_v25 = vpop.permute.xlu1 %959 }
 0x4b8   : > { %v1222_v26 = vpack.c.bf16 %v960_v25, %v960_v25  ;;  %v1983_v25 = vld [vmem:[%s2383_s18] sm:$0xff]  }
 0x4ba   : > { %v1367_v27 = vsel %vm1227_vm4, %v1222_v26, 0  ;;  %v1787_v26 = vld [vmem:[%s2382_s17] ss:$0 sm:$0xff] }
 0x4bb   : > { %1909 = vmatpush3.bf16.msra.mxu0 %v1367_v27 }
 0x4bc   : > { %1922 = vmatprep.subr.bf16.mxu0 %v2016_v15 }
 0x4c1   : > { %v2003_v28 = vpop.eup %2002 }
 0x4c2   : > { %v1214_v29 = vmul.f32 %v2003_v28, %v1997_v8 }
 0x4c4   : > { %v1218_v30 = vpack.c.bf16 %v1214_v29, %v1214_v29 }
 0x4c6   : > { %1911 = vmatmul.mubr.msk.bf16.vlgmr.msra.gmra.mxu0 %vm1223_vm7, %v1218_v30 }
 0x4c7   : > { %1926 = vmatprep.mubr.msk.bf16.mxu0 %vm2017_vm1, %v2016_v15  ;;  %1923 = vmatpush3.bf16.msra.mxu0 %v1974_v7 }
 0x4c8   : > { %1924 = vmatprep.subr.bf16.mxu0 %v2016_v15 }
 0x4dd   : > { %v1265_v31 = vpop.f32.mrf.mxu1 }
 0x4df   : > { %v1894_v32 = vpop.f32.mrf.mxu1 }
 0x4e1   : > { %v1268_v33 = vpop.f32.mrf.mxu1 }
 0x4e3   : > { %v1895_v34 = vpop.f32.mrf.mxu1 }
 0x550   : > { %v1357_v36 = vpop.f32.mrf.mxu1 }
 0x551   : > { %v1311_v37 = vpop.f32.mrf.mxu0  ;;  %1414 = vrot.lane.b32.xlu0 %v1357_v36, %s2021_s3 }
 0x552   : > { %1410 = vrot.lane.b32.xlu1 %v1311_v37, %s2022_s26  ;;  %v1906_v38 = vpop.f32.mrf.mxu1 }
 0x553   : > { %v1900_v39 = vpop.f32.mrf.mxu0 }
 0x554   : > { %v1360_v40 = vpop.f32.mrf.mxu1 }
 0x555   : > { %v1314_v41 = vpop.f32.mrf.mxu0 }
 0x556   : > { %v1907_v42 = vpop.f32.mrf.mxu1  ;;  %v1791_v41 = vld [vmem:[%s2384_s19] ss:$0 sm:$0xff] }
 0x557   : > { %v1901_v43 = vpop.f32.mrf.mxu0 }
 0x586   : > { %v1403_v45 = vpop.f32.mrf.mxu0 }
 0x587   : > { %1418 = vrot.lane.b32.xlu1 %v1403_v45, %s2023_s4 }
 0x588   : > { %v1912_v46 = vpop.f32.mrf.mxu0 }
 0x58a   : > { %v1406_v47 = vpop.f32.mrf.mxu0 }
 0x58c   : > { %v1913_v48 = vpop.f32.mrf.mxu0 }
 0x5c3   : > { %v1415_v50 = vpop.permute.xlu0 %1414 }
 0x5c4   : > { %v1411_v49 = vpop.permute.xlu1 %1410 }
 0x5c5   : > { %v1421_v51 = vsel %vm970_vm3, %v1265_v31, %v1411_v49 }
 0x5c6   : > { %v1423_v52 = vsel %vm1422_vm8, %v1421_v51, %v1415_v50 }
 0x5f9   : > { %v1419_v53 = vpop.permute.xlu1 %1418 }
 0x5fa   : > { %v1425_v54 = vsel %vm1424_vm9, %v1423_v52, %v1419_v53 }
 0x5fb   : > { %v1426_v55 = vpack.c.bf16 %v1425_v54, %v1425_v54 }
 0x5fd   : > { %1919 = vmatmul.mubr.msk.bf16.vlgmr.msra.gmra.mxu1 %vm768_vm2, %v1426_v55 }
 0x5fe   : > { %1946 = vmatprep.mubr.msk.bf16.mxu1 %vm2017_vm1, %v2016_v15  ;;  %1931 = vmatpush3.bf16.msra.mxu1 %v1976_v19 }
 0x5ff   : > { %1932 = vmatprep.subr.bf16.mxu1 %v2016_v15 }
 0x602   : > { %1933 = vmatpush3.bf16.msra.mxu1 %v1977_v3 }
 0x603   : > { %1934 = vmatprep.subr.bf16.mxu1 %v2016_v15 }
 0x606   : > { %1935 = vmatpush3.bf16.msra.mxu1 %v1978_v20 }
 0x607   : > { %1936 = vmatprep.subr.bf16.mxu1 %v2016_v15 }
 0x60a   : > { %1937 = vmatpush3.bf16.msra.mxu1 %v1979_v21 }
 0x60b   : > { %1938 = vmatprep.subr.bf16.mxu1 %v2016_v15 }
 0x60e   : > { %1939 = vmatpush3.bf16.msra.mxu1 %v1980_v22 }
 0x60f   : > { %1940 = vmatprep.subr.bf16.mxu1 %v2016_v15 }
 0x612   : > { %1941 = vmatpush3.bf16.msra.mxu1 %v1981_v23 }
 0x613   : > { %1942 = vmatprep.subr.bf16.mxu1 %v2016_v15 }
 0x616   : > { %1943 = vmatpush3.bf16.msra.mxu1 %v1982_v24 }
 0x617   : > { %1944 = vmatprep.subr.bf16.mxu1 %v2016_v15 }
 0x61a   : > { %1945 = vmatpush3.bf16.msra.mxu1 %v1983_v25 }
 0x6bd   : > { %v1482_v57 = vpop.f32.mrf.mxu1 }
 0x6be   : > { %v1483_v58 = vadd.f32 %v1781_v56, %v1482_v57 }
 0x6bf   : > { %v1920_v59 = vpop.f32.mrf.mxu1 }
 0x6c0   : > { %v2299_v60 = vadd.f32 %v1483_v58, %v2143_v0  ;;  %v1975_v0 = vld [vmem:[%s2381_s16] sm:$0xff]  }
 0x6c1   : > { %v1485_v61 = vpop.f32.mrf.mxu1  ;;  %1925 = vmatpush3.bf16.msra.mxu0 %v1975_v0 }
 0x6c2   : > { %v1489_v62 = vsel %vm693_vm0, %v2299_v60, 0.0 }
 0x6c3   : > { %1490 = vadd.xlane.f32.xlu0 %v1489_v62  ;;  %v1921_v63 = vpop.f32.mrf.mxu1 }
 0x74c   : > { %v1491_v1 = vpop.xlane.xlu0 %1490 }
 0x74d   : > { %v1492_v2 = vmul.f32 0.03125, %v1491_v1 }
 0x74f   : > { %v1493_v4 = vsub.f32 %v2299_v60, %v1492_v2 }
 0x751   : > { %v1494_v5 = vmul.f32 %v1493_v4, %v1493_v4 }
 0x753   : > { %v1495_v6 = vsel %vm693_vm0, %v1494_v5, 0.0 }
 0x754   : > { %1496 = vadd.xlane.f32.xlu1 %v1495_v6 }
 0x7dd   : > { %v1497_v8 = vpop.xlane.xlu1 %1496 }
 0x7de   : > { %v1498_v9 = vmul.f32 0.03125, %v1497_v8 }
 0x7e0   : > { %v1499_v10 = vadd.f32 1e-05, %v1498_v9 }
 0x7e2   : > { %2004 = vrsqrt.f32 %v1499_v10 }
 0x7ef   : > { %v2005_v11 = vpop.eup %2004 }
 0x7f0   : > { %v1501_v13 = vmul.f32 %v2005_v11, %v1493_v4 }
 0x7f2   : > { %v1508_v16 = vmul.f32 %v1785_v12, %v1501_v13 }
 0x7f4   : > { %v1515_v17 = vadd.f32 %v1786_v14, %v1508_v16 }
 0x7f6   : > { %v1516_v18 = vpack.c.bf16 %v1515_v17, %v1515_v17 }
 0x7f8   : > { %1927 = vmatmul.mubr.msk.bf16.vlgmr.msra.gmra.mxu0 %vm768_vm2, %v1516_v18 }
 0x8b8   : > { %v1572_v27 = vpop.f32.mrf.mxu0 }
 0x8b9   : > { %v1573_v28 = vadd.f32 %v1787_v26, %v1572_v27 }
 0x8ba   : > { %v1928_v29 = vpop.f32.mrf.mxu0 }
 0x8bb   : > { %v1578_v30 = vmul.f32 %v1573_v28, %v1573_v28 }
 0x8bc   : > { %v1575_v31 = vpop.f32.mrf.mxu0 }
 0x8bd   : > { %v1579_v32 = vmul.f32 %v1578_v30, %v1573_v28 }
 0x8be   : > { %v1929_v33 = vpop.f32.mrf.mxu0 }
 0x8bf   : > { %v1580_v34 = vmul.f32 0.044715, %v1579_v32 }
 0x8c1   : > { %v1581_v35 = vadd.f32 %v1580_v34, %v1573_v28 }
 0x8c3   : > { %v1582_v36 = vmul.f32 0.7978846, %v1581_v35 }
 0x8c5   : > { %2006 = vtanh.f32 %v1582_v36 }
 0x8d2   : > { %v2007_v37 = vpop.eup %2006 }
 0x8d3   : > { %v1584_v38 = vadd.f32 1.0, %v2007_v37 }
 0x8d5   : > { %v1585_v15 = vmul.f32 0.5, %v1584_v38 }
 0x8d7   : > { %v1586_v39 = vmul.f32 %v1585_v15, %v1573_v28 }
 0x8d9   : > { %v1587_v40 = vpack.c.bf16 %v1586_v39, %v1586_v39 }
 0x8db   : > { %1947 = vmatmul.mubr.bf16.vlgmr.msra.gmra.mxu1 %v1587_v40 }
 0x99b   : > { %v1676_v42 = vpop.f32.mrf.mxu1 }
 0x99c   : > { %v1677_v43 = vadd.f32 %v1791_v41, %v1676_v42 }
 0x99d   : > { %v1948_v44 = vpop.f32.mrf.mxu1 }
 0x99e   : > { %v1682_v45 = vadd.f32 %v1677_v43, %v2299_v60 }
 0x99f   : > { %v1679_v46 = vpop.f32.mrf.mxu1 }
 0x9a0   : > { %1683 = vst.msk [vmem:[%s641_s2] sm:$0xf] %vm693_vm0, %v1682_v45 }
 0x9a1   : > { %v1949_v47 = vpop.f32.mrf.mxu1 }
 0x9a2 PF: > { %s30_s1 = sadd.s32 1, %s2014_s1  }
 0x9a3   : > { %p27_p4 = scmp.ge.s32.totalorder %s30_s1, 4  }
 0x9a5   :  { %29 = sbr.rel (!%p27_p4) target bundleno = 6 (0x6), region = 133 }

// kernel: alpha_tensor_train_forward.43
= control target key start
LH: loop header
LB: loop body
LE: loop exit
PB: predicated region body
PF: predicated region fallthrough
CT: control target
= control target key end

     0   :  { %vm19_vm0 = vcmask 64512   ;;  %v124_v0 = vmov 0.0   ;;  %vm125_vm1 = vmmov 0   ;;  %vm41_vm2 = vcmask 261120   ;;  %s164_s1 = inlined_call_operand.vmem [shape: bf16[32,8], index: 1, kind: input, shape index: {}]   ;;  %s165_s0 = inlined_call_operand.vmem [shape: f32[8,32], index: 0, kind: input, shape index: {}]   ;;  %s166_s2 = inlined_call_operand.vmem [shape: f32[1,8], index: 2, kind: input, shape index: {}]   ;;  %s167_s3 = inlined_call_operand.vmem [shape: f32[8,8], index: 3, kind: output, shape index: {}]  }
   0x1   :  { %20 = vst.msk [vmem:[#allocation2] sm:$0xff] %vm19_vm0, %v124_v0  ;;  %112 = vmatprep.subr.bf16.mxu0 %v124_v0  ;;  %v122_v1 = vld [vmem:[%s164_s1 + $0x8] sm:$0xff]   ;;  %116 = vmatprep.mubr.msk.bf16.mxu0 %vm125_vm1, %v124_v0  ;;  %v123_v2 = vld [vmem:[%s164_s1] sm:$0xff]  }
   0x2   :  { %113 = vmatpush3.bf16.msra.mxu0 %v122_v1  ;;  %v21_v3 = vld [vmem:[%s165_s0] sm:$0xff] }
   0x3   :  { %114 = vmatprep.subr.bf16.mxu0 %v124_v0  ;;  %v22_v4 = vmax.f32 %v21_v3, 0.0  ;;  %v108_v12 = vld [vmem:[%s166_s2] ss:$0 sm:$0xff] }
   0x5   :  { %v24_v5 = vpack.c.bf16 %v22_v4, %v22_v4 }
   0x6   :  { %115 = vmatpush3.bf16.msra.mxu0 %v123_v2 }
   0x8   :  { %v23_v6 = vld [vmem:[#allocation2] sm:$0xff] }
   0x9   :  { %117 = vmatmul.mubr.msk.bf16.vlgmr.msra.gmra.mxu0 %vm41_vm2, %v24_v5 }
  0xc9   :  { %v79_v7 = vpop.f32.mrf.mxu0 }
  0xca   :  { %v85_v8 = vadd.f32 %v79_v7, %v23_v6 }
  0xcb   :  { %v118_v9 = vpop.f32.mrf.mxu0 }
  0xcc   :  { %87 = vst.msk [vmem:[#allocation2] sm:$0xff] %vm19_vm0, %v85_v8 }
  0xcd   :  { %v82_v10 = vpop.f32.mrf.mxu0 }
  0xcf   :  { %v119_v11 = vpop.f32.mrf.mxu0 }
  0xd3   :  { %v91_v13 = vld [vmem:[#allocation2] sm:$0xff] }
  0xd4   :  { %v99_v14 = vadd.f32 %v108_v12, %v91_v13 }
  0xd6   :  { %100 = vst.msk [vmem:[%s167_s3] sm:$0xff] %vm19_vm0, %v99_v14 }

// kernel: alpha_tensor_train_forward.45
= control target key start
LH: loop header
LB: loop body
LE: loop exit
PB: predicated region body
PF: predicated region fallthrough
CT: control target
= control target key end

     0   :  { %v541_v1 = vmov 0.0   ;;  %vm542_vm0 = vmmov 0   ;;  %vm62_vm1 = vcmask 261120   ;;  %s689_s0 = inlined_call_operand.vmem [shape: f32[2,32], index: 0, kind: input, shape index: {}]   ;;  %s690_s1 = inlined_call_operand.vmem [shape: f32[2,1], index: 1, kind: input, shape index: {}]   ;;  %s691_s2 = inlined_call_operand.vmem [shape: bf16[32,64], index: 2, kind: input, shape index: {}]   ;;  %s692_s3 = inlined_call_operand.vmem [shape: f32[1,64], index: 3, kind: input, shape index: {}]   ;;  %s693_s4 = inlined_call_operand.vmem [shape: bf16[64,64], index: 4, kind: input, shape index: {}]   ;;  %s694_s5 = inlined_call_operand.vmem [shape: f32[1,64], index: 5, kind: input, shape index: {}]   ;;  %s695_s6 = inlined_call_operand.vmem [shape: bf16[64,64], index: 6, kind: input, shape index: {}]   ;;  %s696_s7 = inlined_call_operand.vmem [shape: f32[1,64], index: 7, kind: input, shape index: {}]   ;;  %s697_s8 = inlined_call_operand.vmem [shape: bf16[64,8], index: 8, kind: input, shape index: {}]   ;;  %s698_s9 = inlined_call_operand.vmem [shape: f32[1,8], index: 9, kind: input, shape index: {}]   ;;  %s699_s10 = inlined_call_operand.hbm [shape: f32[1,1], index: 10, kind: output, shape index: {}]  }
   0x1   :  { %v505_v0 = vld [vmem:[%s691_s2 + $0x8] sm:$0xff]   ;;  %456 = vmatprep.subr.bf16.mxu0 %v541_v1  ;;  %v506_v2 = vld [vmem:[%s691_s2] sm:$0xff]   ;;  %464 = vmatprep.subr.bf16.mxu1 %v541_v1  ;;  %v507_v4 = vld [vmem:[%s693_s4 + $0x18] sm:$0xff]  }
   0x2   :  { %457 = vmatpush3.bf16.msra.mxu0 %v505_v0  ;;  %460 = vmatprep.mubr.msk.bf16.mxu0 %vm542_vm0, %v541_v1  ;;  %v37_v3 = vld [vmem:[%s689_s0] sm:$0x3]  ;;  %v508_v5 = vld [vmem:[%s693_s4 + $0x10] sm:$0xff]  }
   0x3   :  { %458 = vmatprep.subr.bf16.mxu0 %v541_v1  ;;  %472 = vmatprep.mubr.msk.bf16.mxu1 %vm542_vm0, %v541_v1  ;;  %v38_v6 = vpack.c.bf16 %v37_v3, %v37_v3 }
   0x4   :  { %465 = vmatpush3.bf16.msra.mxu1 %v507_v4 }
   0x5   :  { %466 = vmatprep.subr.bf16.mxu1 %v541_v1 }
   0x6   :  { %459 = vmatpush3.bf16.msra.mxu0 %v506_v2 }
   0x7   :  { %476 = vmatprep.subr.bf16.mxu0 %v541_v1 }
   0x8   :  { %467 = vmatpush3.bf16.msra.mxu1 %v508_v5 }
   0x9   :  { %461 = vmatmul.mubr.msk.bf16.vlgmr.msra.gmra.mxu0 %vm62_vm1, %v38_v6  ;;  %468 = vmatprep.subr.bf16.mxu1 %v541_v1 }
   0xa   :  { %484 = vmatprep.mubr.msk.bf16.mxu0 %vm542_vm0, %v541_v1 }
   0xb   :  { %15 = vsyncpa [#allocation3], 0  ;;  %v509_v7 = vld [vmem:[%s693_s4 + $0x8] sm:$0xff]   ;;  %v510_v8 = vld [vmem:[%s693_s4] sm:$0xff]   ;;  %vm147_vm2 = vcmask 523264   ;;  %v543_v34 = vmov 0   ;;  %v360_v43 = vlaneseq }
   0xc   :  { %469 = vmatpush3.bf16.msra.mxu1 %v509_v7  ;;  %v511_v9 = vld [vmem:[%s695_s6 + $0x18] sm:$0xff]   ;;  %v512_v10 = vld [vmem:[%s695_s6 + $0x10] sm:$0xff]   ;;  %v414_v11 = vld [vmem:[%s692_s3] ss:$0 sm:$0xff]  ;;  %504 = vset.pattern.permute.xlu0 %v543_v34  ;;  %vm384_vm5 = vcmask 58368   ;;  %vm388_vm6 = vcmask 1041408  }
   0xd   :  { %470 = vmatprep.subr.bf16.mxu1 %v541_v1  ;;  %477 = vmatpush3.bf16.msra.mxu0 %v511_v9  ;;  %v513_v19 = vld [vmem:[%s695_s6 + $0x8] sm:$0xff]   ;;  %v514_v20 = vld [vmem:[%s695_s6] sm:$0xff]   ;;  %v515_v21 = vld [vmem:[%s697_s8 + $0x18] sm:$0xff]   ;;  %v361_v44 = vand.u32 127, %v360_v43  ;;  %vm398_vm7 = vcmask 0  }
   0xe   :  { %478 = vmatprep.subr.bf16.mxu0 %v541_v1  ;;  %v516_v22 = vld [vmem:[%s697_s8 + $0x10] sm:$0xff]   ;;  %v418_v23 = vld [vmem:[%s694_s5] ss:$0 sm:$0xff]  ;;  %v517_v31 = vld [vmem:[%s697_s8 + $0x8] sm:$0xff]  }
   0xf   :  { %v518_v32 = vld [vmem:[%s697_s8] sm:$0xff]   ;;  %v362_v45 = vcvt.s32.f32 %v361_v44 }
  0x10   :  { %471 = vmatpush3.bf16.msra.mxu1 %v510_v8  ;;  %v359_v33 = vld [vmem:[%s690_s1] sm:$0x3] }
  0x11   :  { %488 = vmatprep.subr.bf16.mxu1 %v541_v1  ;;  %479 = vmatpush3.bf16.msra.mxu0 %v512_v10  ;;  %v424_v35 = vld [vmem:[%s696_s7] ss:$0 sm:$0xff]  ;;  %v363_v47 = vadd.f32 0.5, %v362_v45  ;;  %s544_s7 = smov [#allocation2]  }
  0x12   :  { %480 = vmatprep.subr.bf16.mxu0 %v541_v1  ;;  %368 = vperm.xlu0 %504, %v359_v33   ;;  %v430_v46 = vld [vmem:[%s698_s9] ss:$0 sm:$0xff]  ;;  %s406_s9 = sshll.u32 %s544_s7, 4  ;;  %s407_s9 = int_to_ptr.vmem [resolvable:$true] %s406_s9 }
  0x13   :  { %v365_v53 = vmul.f32 0.125, %v363_v47  ;;  %s519_s23 = scalar_lea.vmem %s407_s9, 16  ;;  %s523_s24 = scalar_lea.vmem %s407_s9, 32 }
  0x14   :  { %p520_p0 = scmp.ne.s32.totalorder %s407_s9, %s519_s23  ;;  %p524_p1 = scmp.lt.s32.totalorder %s407_s9, %s407_s9 }
  0x15   :  { %481 = vmatpush3.bf16.msra.mxu0 %v513_v19  ;;  %p525_p2 = scmp.lt.s32.totalorder %s523_s24, %s519_s23 }
  0x16   :  { %482 = vmatprep.subr.bf16.mxu0 %v541_v1 }
  0x17   :  { %p526_p3 = por %p525_p2, %p524_p1 }
  0x19   :  { %483 = vmatpush3.bf16.msra.mxu0 %v514_v20  ;;  %p527_p4 = pnand %p526_p3, %p520_p0 }
  0x8d   :  { %v369_v49 = vpop.permute.xlu0 %368 }
  0xc9   :  { %v100_v12 = vpop.f32.mrf.mxu0 }
  0xca   :  { %v101_v13 = vadd.f32 %v414_v11, %v100_v12 }
  0xcb   :  { %v462_v14 = vpop.f32.mrf.mxu0 }
  0xcc   :  { %v106_v15 = vmax.f32 %v101_v13, 0.0 }
  0xcd   :  { %v103_v16 = vpop.f32.mrf.mxu0 }
  0xce   :  { %v107_v17 = vpack.c.bf16 %v106_v15, %v106_v15 }
  0xcf   :  { %v463_v18 = vpop.f32.mrf.mxu0 }
  0xd0   :  { %473 = vmatmul.mubr.msk.bf16.vlgmr.msra.gmra.mxu1 %vm147_vm2, %v107_v17 }
  0xd1   :  { %496 = vmatprep.mubr.msk.bf16.mxu1 %vm542_vm0, %v541_v1  ;;  %489 = vmatpush3.bf16.msra.mxu1 %v515_v21 }
  0xd2   :  { %490 = vmatprep.subr.bf16.mxu1 %v541_v1 }
  0xd5   :  { %491 = vmatpush3.bf16.msra.mxu1 %v516_v22 }
  0xd6   :  { %492 = vmatprep.subr.bf16.mxu1 %v541_v1 }
  0xd9   :  { %493 = vmatpush3.bf16.msra.mxu1 %v517_v31 }
  0xda   :  { %494 = vmatprep.subr.bf16.mxu1 %v541_v1 }
  0xdd   :  { %495 = vmatpush3.bf16.msra.mxu1 %v518_v32 }
 0x190   :  { %v185_v24 = vpop.f32.mrf.mxu1 }
 0x191   :  { %v186_v25 = vadd.f32 %v418_v23, %v185_v24 }
 0x192   :  { %v474_v26 = vpop.f32.mrf.mxu1 }
 0x193   :  { %v191_v27 = vmax.f32 %v186_v25, 0.0 }
 0x194   :  { %v188_v28 = vpop.f32.mrf.mxu1 }
 0x195   :  { %v192_v29 = vpack.c.bf16 %v191_v27, %v191_v27 }
 0x196   :  { %v475_v30 = vpop.f32.mrf.mxu1 }
 0x197   :  { %485 = vmatmul.mubr.msk.bf16.vlgmr.msra.gmra.mxu0 %vm147_vm2, %v192_v29 }
 0x257   :  { %v269_v36 = vpop.f32.mrf.mxu0 }
 0x258   :  { %v270_v37 = vadd.f32 %v424_v35, %v269_v36 }
 0x259   :  { %v486_v38 = vpop.f32.mrf.mxu0 }
 0x25a   :  { %v275_v39 = vmax.f32 %v270_v37, 0.0 }
 0x25b   :  { %v272_v40 = vpop.f32.mrf.mxu0 }
 0x25c   :  { %v276_v41 = vpack.c.bf16 %v275_v39, %v275_v39 }
 0x25d   :  { %v487_v42 = vpop.f32.mrf.mxu0 }
 0x25e   :  { %497 = vmatmul.mubr.msk.bf16.vlgmr.msra.gmra.mxu1 %vm147_vm2, %v276_v41 }
 0x31e   :  { %v353_v48 = vpop.f32.mrf.mxu1 }
 0x31f   :  { %v354_v50 = vadd.f32 %v430_v46, %v353_v48 }
 0x320   :  { %v498_v51 = vpop.f32.mrf.mxu1 }
 0x321   :  { %v371_v52 = vsub.f32 %v369_v49, %v354_v50 }
 0x322   :  { %v356_v54 = vpop.f32.mrf.mxu1 }
 0x323   :  { %v374_v55 = vmul.f32 0.5, %v371_v52  ;;  %v372_v56 = vand.u32 2147483647, %v371_v52  ;;  %vm378_vm3 = vcmp.lt.f32.partialorder %v371_v52, 0.0 }
 0x324   :  { %v499_v57 = vpop.f32.mrf.mxu1  ;;  %v437_v58 = vsel %vm378_vm3, 1.0, %v541_v1 }
 0x325   :  { %vm373_vm4 = vcmp.le.f32.partialorder %v372_v56, 1.0  ;;  %v375_v59 = vmul.f32 %v374_v55, %v371_v52  ;;  %v436_v60 = vadd.f32 -0.5, %v372_v56  ;;  %v381_v61 = vsub.f32 %v365_v53, %v437_v58 }
 0x327   :  { %v377_v62 = vsel %vm373_vm4, %v375_v59, %v436_v60  ;;  %v382_v63 = vand.u32 2147483647, %v381_v61 }
 0x329   :  { %v383_v0 = vmul.f32 %v382_v63, %v377_v62 }
 0x32b   :  { %v385_v2 = vsel %vm384_vm5, %v383_v0, 0.0 }
 0x32c   :  { %386 = vadd.xlane.f32.xlu0 %v385_v2 }
 0x3b5   :  { %v387_v3 = vpop.xlane.xlu0 %386 }
 0x3b6   :  { %v389_v4 = vsel %vm388_vm6, %v387_v3, 0.0 }
 0x3b7   :  { %v390_v5 = vrot.slane %v389_v4, 4 }
 0x3b9   :  { %v391_v6 = vadd.f32 %v390_v5, %v389_v4 }
 0x3bb   :  { %v392_v7 = vrot.slane %v391_v6, 2 }
 0x3bd   :  { %v393_v8 = vadd.f32 %v392_v7, %v391_v6 }
 0x3bf   :  { %v394_v9 = vrot.slane %v393_v8, 1 }
 0x3c1   :  { %v395_v1 = vadd.f32 %v394_v9, %v393_v8 }
 0x3c3   :  { %v397_v10 = vmul.f32 0.0625, %v395_v1 }
 0x3c5   :  { %399 = vst.msk [vmem:[#allocation2] sm:$0x1] %vm398_vm7, %v397_v10 }
 0x3c6   :  { %530 = shalt.err (!%p527_p4)
}
 0x3c7   :  { %409 = dma.vmem_to_hbm [thread:$0]  %s407_s9, 16, %s699_s10, [#allocation3]  }
 0x3c8   :  { %539 = dma.done.wait [#allocation3], 16  }
 0x3c9   :  { %540 = vsyncadd [#allocation3], 4294967280 }
 0x3ca   :  { %413 = vsyncpa [#allocation3], 1 }

// kernel: alpha_tensor_train_forward.44
= control target key start
LH: loop header
LB: loop body
LE: loop exit
PB: predicated region body
PF: predicated region fallthrough
CT: control target
= control target key end

     0   :  { %vm14_vm0 = vcmask 64512   ;;  %s118_s0 = inlined_call_operand.vmem [shape: f32[8,8], index: 0, kind: input, shape index: {}]   ;;  %s119_s1 = inlined_call_operand.vmem [shape: s32[8,1], index: 1, kind: input, shape index: {}]   ;;  %s120_s2 = inlined_call_operand.hbm [shape: f32[1,1], index: 2, kind: output, shape index: {}]  }
   0x1   :  { %v12_v0 = vld [vmem:[%s118_s0] sm:$0xff] }
   0x2   :  { %7 = vsyncpa [#allocation3], 0  ;;  %v15_v1 = vsel %vm14_vm0, %v12_v0, -inf  ;;  %v89_v2 = vmov 0   ;;  %v13_v3 = vld [vmem:[%s119_s1] sm:$0xff]  ;;  %v27_v7 = vlaneseq  ;;  %s90_s0 = smov [#allocation2]  }
   0x3   :  { %62 = vset.pattern.permute.xlu0 %v89_v2  ;;  %s52_s1 = sshll.u32 %s90_s0, 4  ;;  %vm44_vm2 = vcmask 0   ;;  %s53_s1 = int_to_ptr.vmem [resolvable:$true] %s52_s1 }
   0x4   :  { %16 = vmax.xlane.f32.xlu0 %v15_v1  ;;  %v28_v8 = vand.u32 127, %v27_v7  ;;  %s67_s13 = scalar_lea.vmem %s53_s1, 16  ;;  %s71_s14 = scalar_lea.vmem %s53_s1, 32 }
   0x5   :  { %p68_p0 = scmp.ne.s32.totalorder %s53_s1, %s67_s13  ;;  %p72_p1 = scmp.lt.s32.totalorder %s53_s1, %s53_s1 }
   0x6   :  { %p73_p2 = scmp.lt.s32.totalorder %s71_s14, %s67_s13 }
   0x8   :  { %p74_p3 = por %p73_p2, %p72_p1 }
   0xa   :  { %p75_p4 = pnand %p74_p3, %p68_p0 }
  0x1a   :  { %30 = vperm.xlu0 %62, %v13_v3  }
  0x8d   :  { %v17_v4 = vpop.xlane.xlu0 %16 }
  0x8e   :  { %v18_v5 = vsub.f32 %v12_v0, %v17_v4 }
  0x90   :  { %v19_v6 = vmul.f32 1.442695, %v18_v5 }
  0x92   :  { %63 = vpow2.f32 %v19_v6 }
  0x95   :  { %v31_v9 = vpop.permute.xlu0 %30 }
  0x96   :  { %vm32_vm1 = vcmp.eq.s32.totalorder %v28_v8, %v31_v9 }
  0x97   :  { %v33_v11 = vsel %vm32_vm1, %v12_v0, 0.0 }
  0x98   :  { %v34_v13 = vsel %vm14_vm0, %v33_v11, 0.0 }
  0x9f   :  { %v64_v10 = vpop.eup %63 }
  0xa0   :  { %v21_v12 = vsel %vm14_vm0, %v64_v10, 0.0 }
  0xa1   :  { %22 = vadd.xlane.f32.xlu1 %v21_v12 }
  0xa5   :  { %35 = vadd.xlane.f32.xlu1 %v34_v13 }
 0x12a   :  { %v23_v14 = vpop.xlane.xlu1 %22 }
 0x12b   :  { %65 = vlog2.f32 %v23_v14 }
 0x12e   :  { %v36_v17 = vpop.xlane.xlu1 %35 }
 0x138   :  { %v66_v15 = vpop.eup %65 }
 0x139   :  { %v25_v16 = vmul.f32 0.6931472, %v66_v15 }
 0x13b   :  { %v26_v18 = vadd.f32 %v25_v16, %v17_v4 }
 0x13d   :  { %v37_v19 = vsub.f32 %v26_v18, %v36_v17 }
 0x13f   :  { %v38_v20 = vrot.slane %v37_v19, 4 }
 0x141   :  { %v39_v21 = vadd.f32 %v38_v20, %v37_v19 }
 0x143   :  { %v40_v22 = vrot.slane %v39_v21, 2 }
 0x145   :  { %v41_v23 = vadd.f32 %v40_v22, %v39_v21 }
 0x147   :  { %v42_v24 = vrot.slane %v41_v23, 1 }
 0x149   :  { %v43_v25 = vadd.f32 %v42_v24, %v41_v23 }
 0x14b   :  { %45 = vst.msk [vmem:[#allocation2] sm:$0x1] %vm44_vm2, %v43_v25 }
 0x14c   :  { %78 = shalt.err (!%p75_p4)
}
 0x14d   :  { %55 = dma.vmem_to_hbm [thread:$0]  %s53_s1, 16, %s120_s2, [#allocation3]  }
 0x14e   :  { %87 = dma.done.wait [#allocation3], 16  }
 0x14f   :  { %88 = vsyncadd [#allocation3], 4294967280 }
 0x150   :  { %59 = vsyncpa [#allocation3], 1 }

// kernel: alpha_tensor_train_forward.42
= control target key start
LH: loop header
LB: loop body
LE: loop exit
PB: predicated region body
PF: predicated region fallthrough
CT: control target
= control target key end

     0   :  { %s2920_s0 = inlined_call_operand.vmem [shape: f32[2,4,32], index: 0, kind: input, shape index: {}]   ;;  %s2921_s1 = inlined_call_operand.vmem [shape: f32[2,48,32], index: 1, kind: input, shape index: {}]   ;;  %s2922_s2 = inlined_call_operand.vmem [shape: f32[1,32], index: 2, kind: input, shape index: {}]   ;;  %s2923_s3 = inlined_call_operand.vmem [shape: f32[1,32], index: 3, kind: input, shape index: {}]   ;;  %s2924_s4 = inlined_call_operand.vmem [shape: f32[1,32], index: 4, kind: input, shape index: {}]   ;;  %s2925_s5 = inlined_call_operand.vmem [shape: f32[1,32], index: 5, kind: input, shape index: {}]   ;;  %s2926_s6 = inlined_call_operand.vmem [shape: bf16[32,32], index: 6, kind: input, shape index: {}]   ;;  %s2927_s7 = inlined_call_operand.vmem [shape: f32[1,32], index: 7, kind: input, shape index: {}]   ;;  %s2928_s8 = inlined_call_operand.vmem [shape: bf16[32,32], index: 8, kind: input, shape index: {}]   ;;  %s2929_s9 = inlined_call_operand.vmem [shape: f32[1,32], index: 9, kind: input, shape index: {}]   ;;  %s2930_s10 = inlined_call_operand.vmem [shape: bf16[32,32], index: 10, kind: input, shape index: {}]   ;;  %s2931_s11 = inlined_call_operand.vmem [shape: f32[1,32], index: 11, kind: input, shape index: {}]   ;;  %s2932_s12 = inlined_call_operand.vmem [shape: bf16[32,32], index: 12, kind: input, shape index: {}]   ;;  %s2933_s13 = inlined_call_operand.vmem [shape: f32[1,32], index: 13, kind: input, shape index: {}]   ;;  %s2934_s14 = inlined_call_operand.vmem [shape: f32[1,32], index: 14, kind: input, shape index: {}]   ;;  %s2935_s15 = inlined_call_operand.vmem [shape: f32[1,32], index: 15, kind: input, shape index: {}]   ;;  %s2936_s16 = inlined_call_operand.vmem [shape: bf16[32,128], index: 16, kind: input, shape index: {}]   ;;  %s2937_s17 = inlined_call_operand.vmem [shape: f32[1,128], index: 17, kind: input, shape index: {}]   ;;  %s2938_s18 = inlined_call_operand.vmem [shape: bf16[128,32], index: 18, kind: input, shape index: {}]   ;;  %s2939_s19 = inlined_call_operand.vmem [shape: f32[1,32], index: 19, kind: input, shape index: {}]   ;;  %s2940_s20 = inlined_call_operand.vmem [shape: f32[2,4,32], index: 20, kind: output, shape index: {}]  }
   0x1   :  { %2941 = sst [smem:[#allocation2_spill]] %s2920_s0 }
   0x2   :  { %2942 = sst [smem:[#allocation3_spill]] %s2921_s1  ;;  %s2544_s1 = smov 0  }
   0x3   :  { %2943 = sst [smem:[#allocation4_spill]] %s2922_s2 }
   0x4   :  { %2944 = sst [smem:[#allocation5_spill]] %s2923_s3 }
   0x5   :  { %2945 = sst [smem:[#allocation6_spill]] %s2924_s4 }
   0x6 LB: > { %s1990_s22 = sadd.s32 4294967295, %s2429_s1   ;;  %p1994_p0 = scmp.ge.s32.totalorder %s2429_s1, 1  ;;  %s2429_s1 = sphi %s2544_s1, %s30_s1  }
   0x7   : > { %p571_p1 = scmp.lt.s32.totalorder %s2429_s1, 3 }
   0x9   : > { %p572_p2 = pnand %p1994_p0, %p571_p1 }
   0xa   : > { %p632_p3 = scmp.lt.s32.totalorder (!%p572_p2), %s1990_s22, 1  ;;  %s2946_s25 = sld [smem:[#allocation3_spill]] (!%p572_p2) }
   0xb   : > { %575 = sbr.rel (%p572_p2) target bundleno = 2472 (0x9a8), region = 100  ;;  %s2947_s4 = sld [smem:[#allocation2_spill]] (!%p572_p2) }
   0xc   : > { %s2949_s24 = sld [smem:[#allocation4_spill]] (!%p572_p2)  ;;  %s2433_s2 = smov (!%p572_p2), 120  }
   0xd   : > { %s2434_s27 = smov (!%p572_p2), 112   ;;  %s2435_s28 = smov (!%p572_p2), 104  }
  0x10   : > { %s2952_s22 = smov (!%p632_p3, %s1990_s22), 1  ;;  %vm730_vm0 = vcmask 261120   ;;  %vm701_vm1 = vcmask 257024   ;;  %v2370_v49 = vld [vmem:[%s2928_s8 + $0x8] sm:$0xff]   ;;  %v2431_v50 = vmov 0.0   ;;  %vm2432_vm2 = vmmov 0  }
  0x11   : > { %s2263_s23 = smul.u32 48, %s2952_s22  ;;  %s1995_s26 = sshll.u32 %s2952_s22, 2  ;;  %2115 = vmatprep.subr.bf16.mxu1 %v2431_v50  ;;  %2119 = vmatprep.mubr.msk.bf16.mxu1 %vm2432_vm2, %v2431_v50  ;;  %v2371_v51 = vld [vmem:[%s2928_s8] sm:$0xff]   ;;  %v2372_v52 = vld [vmem:[%s2926_s6 + $0x8] sm:$0xff]   ;;  %vm1203_vm3 = vcmask 64512   ;;  %vm1416_vm4 = vcmask 388096  }
  0x12   : > { %s2570_s29 = scalar_lea.vmem %s2947_s4, %s1995_s26  ;;  %2116 = vmatpush3.bf16.msra.mxu1 %v2370_v49  ;;  %2107 = vmatprep.subr.bf16.mxu0 %v2431_v50  ;;  %v2373_v53 = vld [vmem:[%s2926_s6] sm:$0xff]   ;;  %s2948_s4 = sld [smem:[#allocation6_spill]]  ;;  %vm1477_vm5 = vcmask 392192   ;;  %vm1663_vm6 = vcmask 130048   ;;  %vm1665_vm7 = vcmask 195584  }
  0x13   : > { %s640_s3 = scalar_lea.vmem %s2946_s25, %s2263_s23  ;;  %v646_v12 = vld [vmem:[%s2570_s29] sm:$0xf]  ;;  %2117 = vmatprep.subr.bf16.mxu1 %v2431_v50  ;;  %2111 = vmatprep.mubr.msk.bf16.mxu0 %vm2432_vm2, %v2431_v50  ;;  %s644_s21 = scalar_lea.vmem %s2940_s20, %s1995_s26 }
  0x14   : > { %v647_v0 = vld [vmem:[%s640_s3] sm:$0xff]  ;;  %v649_v1 = vld [vmem:[%s640_s3 + $0x10] sm:$0xff]  ;;  %v648_v2 = vld [vmem:[%s640_s3 + $0x8] sm:$0xff]  ;;  %v702_v13 = vsel %vm701_vm1, %v646_v12, 0.0  ;;  %2108 = vmatpush3.bf16.msra.mxu0 %v2372_v52 }
  0x15   : > { %v731_v3 = vsel %vm730_vm0, %v647_v0, 0.0  ;;  %v737_v4 = vsel %vm730_vm0, %v649_v1, 0.0  ;;  %v650_v5 = vld [vmem:[%s640_s3 + $0x18] sm:$0xff]  ;;  %v651_v6 = vld [vmem:[%s640_s3 + $0x20] sm:$0xff]  ;;  %v652_v7 = vld [vmem:[%s640_s3 + $0x28] sm:$0xff]  ;;  %v734_v8 = vsel %vm730_vm0, %v648_v2, 0.0  ;;  %2109 = vmatprep.subr.bf16.mxu0 %v2431_v50 }
  0x16   : > { %732 = vadd.xlane.f32.xlu0 %v731_v3  ;;  %738 = vadd.xlane.f32.xlu1 %v737_v4  ;;  %v740_v9 = vsel %vm730_vm0, %v650_v5, 0.0  ;;  %v743_v10 = vsel %vm730_vm0, %v651_v6, 0.0  ;;  %v746_v11 = vsel %vm730_vm0, %v652_v7, 0.0  ;;  %s2950_s3 = sld [smem:[#allocation5_spill]] }
  0x17   : > { %2118 = vmatpush3.bf16.msra.mxu1 %v2371_v51 }
  0x18   : > { %2147 = vmatprep.subr.bf16.mxu1 %v2431_v50  ;;  %2110 = vmatpush3.bf16.msra.mxu0 %v2373_v53 }
  0x19   : > { %2131 = vmatprep.subr.bf16.mxu0 %v2431_v50 }
  0x1a   : > { %735 = vadd.xlane.f32.xlu0 %v734_v8  ;;  %741 = vadd.xlane.f32.xlu1 %v740_v9 }
  0x1e   : > { %744 = vadd.xlane.f32.xlu0 %v743_v10  ;;  %747 = vadd.xlane.f32.xlu1 %v746_v11 }
  0x22   : > { %703 = vadd.xlane.f32.xlu0 %v702_v13  ;;  %v2000_v13 = vld [vmem:[%s2948_s4] ss:$0 sm:$0xff]  ;;  %s2436_s4 = smov 8  }
  0x9f   : > { %v733_v14 = vpop.xlane.xlu0 %732  ;;  %v739_v15 = vpop.xlane.xlu1 %738 }
  0xa0   : > { %v749_v16 = vmul.f32 0.03125, %v733_v14  ;;  %v751_v17 = vmul.f32 0.03125, %v739_v15 }
  0xa2   : > { %v2574_v18 = vsub.f32 %v647_v0, %v749_v16  ;;  %v2576_v19 = vsub.f32 %v649_v1, %v751_v17 }
  0xa3   : > { %v736_v20 = vpop.xlane.xlu0 %735  ;;  %v742_v21 = vpop.xlane.xlu1 %741 }
  0xa4   : > { %v750_v22 = vmul.f32 0.03125, %v736_v20  ;;  %v752_v23 = vmul.f32 0.03125, %v742_v21  ;;  %v761_v24 = vmul.f32 %v2574_v18, %v2574_v18  ;;  %v763_v25 = vmul.f32 %v2576_v19, %v2576_v19  ;;  %v2001_v20 = vld [vmem:[%s2925_s5] ss:$0 sm:$0xff] }
  0xa6   : > { %v2582_v26 = vsub.f32 %v648_v2, %v750_v22  ;;  %v2584_v27 = vsub.f32 %v650_v5, %v752_v23  ;;  %v767_v28 = vsel %vm730_vm0, %v761_v24, 0.0  ;;  %v773_v31 = vsel %vm730_vm0, %v763_v25, 0.0 }
  0xa7   : > { %768 = vadd.xlane.f32.xlu1 %v767_v28  ;;  %v745_v29 = vpop.xlane.xlu0 %744  ;;  %v748_v30 = vpop.xlane.xlu1 %747 }
  0xa8   : > { %v753_v32 = vmul.f32 0.03125, %v745_v29  ;;  %v754_v33 = vmul.f32 0.03125, %v748_v30  ;;  %v762_v34 = vmul.f32 %v2582_v26, %v2582_v26  ;;  %v764_v35 = vmul.f32 %v2584_v27, %v2584_v27 }
  0xaa   : > { %v2592_v36 = vsub.f32 %v651_v6, %v753_v32  ;;  %v2594_v37 = vsub.f32 %v652_v7, %v754_v33  ;;  %v770_v38 = vsel %vm730_vm0, %v762_v34, 0.0  ;;  %v776_v42 = vsel %vm730_vm0, %v764_v35, 0.0  ;;  %v1999_v33 = vld [vmem:[%s2950_s3] ss:$0 sm:$0xff] }
  0xab   : > { %774 = vadd.xlane.f32.xlu1 %v773_v31  ;;  %771 = vadd.xlane.f32.xlu0 %v770_v38  ;;  %v704_v39 = vpop.xlane.xlu0 %703 }
  0xac   : > { %v706_v40 = vmul.f32 0.03125, %v704_v39  ;;  %v765_v41 = vmul.f32 %v2592_v36, %v2592_v36  ;;  %v766_v43 = vmul.f32 %v2594_v37, %v2594_v37 }
  0xae   : > { %v2602_v44 = vsub.f32 %v646_v12, %v706_v40  ;;  %v779_v45 = vsel %vm730_vm0, %v765_v41, 0.0  ;;  %v782_v46 = vsel %vm730_vm0, %v766_v43, 0.0  ;;  %v2374_v41 = vld [vmem:[%s2930_s10 + $0x8] sm:$0xff]  }
  0xaf   : > { %780 = vadd.xlane.f32.xlu1 %v779_v45  ;;  %777 = vadd.xlane.f32.xlu0 %v776_v42 }
  0xb0   : > { %v708_v47 = vmul.f32 %v2602_v44, %v2602_v44 }
  0xb2   : > { %v709_v48 = vsel %vm701_vm1, %v708_v47, 0.0 }
  0xb3   : > { %783 = vadd.xlane.f32.xlu0 %v782_v46  ;;  %710 = vadd.xlane.f32.xlu1 %v709_v48 }
 0x130   : > { %v769_v54 = vpop.xlane.xlu1 %768 }
 0x131   : > { %v785_v55 = vmul.f32 0.03125, %v769_v54 }
 0x133   : > { %v791_v56 = vadd.f32 1e-05, %v785_v55 }
 0x134   : > { %v775_v57 = vpop.xlane.xlu1 %774  ;;  %v772_v58 = vpop.xlane.xlu0 %771 }
 0x135   : > { %2388 = vrsqrt.f32 %v791_v56  ;;  %v787_v59 = vmul.f32 0.03125, %v775_v57  ;;  %v786_v60 = vmul.f32 0.03125, %v772_v58 }
 0x137   : > { %v792_v61 = vadd.f32 1e-05, %v786_v60  ;;  %v793_v62 = vadd.f32 1e-05, %v787_v59  ;;  %v2006_v59 = vld [vmem:[%s2929_s9] ss:$0 sm:$0xff] }
 0x138   : > { %v781_v63 = vpop.xlane.xlu1 %780  ;;  %v778_v0 = vpop.xlane.xlu0 %777 }
 0x139   : > { %v788_v1 = vmul.f32 0.03125, %v778_v0  ;;  %2390 = vrsqrt.f32 %v792_v61  ;;  %v789_v3 = vmul.f32 0.03125, %v781_v63 }
 0x13a   : > { %2392 = vrsqrt.f32 %v793_v62 }
 0x13b   : > { %v794_v2 = vadd.f32 1e-05, %v788_v1  ;;  %v795_v10 = vadd.f32 1e-05, %v789_v3 }
 0x13c   : > { %v711_v4 = vpop.xlane.xlu1 %710  ;;  %v784_v5 = vpop.xlane.xlu0 %783 }
 0x13d   : > { %v712_v6 = vmul.f32 0.03125, %v711_v4  ;;  %v790_v7 = vmul.f32 0.03125, %v784_v5  ;;  %2394 = vrsqrt.f32 %v794_v2 }
 0x13f   : > { %v713_v8 = vadd.f32 1e-05, %v712_v6  ;;  %v796_v9 = vadd.f32 1e-05, %v790_v7  ;;  %v2012_v6 = vld [vmem:[%s2931_s11] ss:$0 sm:$0xff] }
 0x141   : > { %2396 = vrsqrt.f32 %v713_v8 }
 0x142   : > { %v2389_v11 = vpop.eup %2388  ;;  %2398 = vrsqrt.f32 %v796_v9 }
 0x143   : > { %2400 = vrsqrt.f32 %v795_v10  ;;  %v803_v12 = vmul.f32 %v2389_v11, %v2574_v18 }
 0x145   : > { %v815_v16 = vmul.f32 %v2000_v13, %v803_v12 }
 0x146   : > { %v2391_v14 = vpop.eup %2390 }
 0x147   : > { %v804_v15 = vmul.f32 %v2391_v14, %v2582_v26  ;;  %v2393_v17 = vpop.eup %2392  ;;  %v827_v23 = vadd.f32 %v2001_v20, %v815_v16  ;;  %v1998_v26 = vld [vmem:[%s2949_s24] ss:$0 sm:$0xff]  ;;  %s2437_s24 = smov 16  }
 0x148   : > { %v805_v25 = vmul.f32 %v2393_v17, %v2576_v19 }
 0x149   : > { %v816_v21 = vmul.f32 %v2000_v13, %v804_v15 }
 0x14a   : > { %v2395_v22 = vpop.eup %2394  ;;  %v817_v34 = vmul.f32 %v2000_v13, %v805_v25  ;;  %v2002_v25 = vld [vmem:[%s2927_s7] ss:$0 sm:$0xff] }
 0x14b   : > { %v828_v24 = vadd.f32 %v2001_v20, %v816_v21  ;;  %v806_v18 = vmul.f32 %v2395_v22, %v2584_v27 }
 0x14c   : > { %v829_v40 = vadd.f32 %v2001_v20, %v817_v34 }
 0x14d   : > { %v895_v29 = vpack.c.bf16 %v828_v24, %v827_v23  ;;  %v818_v30 = vmul.f32 %v2000_v13, %v806_v18 }
 0x14e   : > { %v2397_v28 = vpop.eup %2396 }
 0x14f   : > { %v2399_v31 = vpop.eup %2398  ;;  %v715_v32 = vmul.f32 %v2397_v28, %v2602_v44  ;;  %2120 = vmatmul.mubr.msk.bf16.vlgmr.msra.gmra.mxu1 %vm730_vm0, %v895_v29  ;;  %v830_v35 = vadd.f32 %v2001_v20, %v818_v30 }
 0x150   : > { %v2401_v19 = vpop.eup %2400  ;;  %2123 = vmatprep.mubr.msk.bf16.mxu1 %vm2432_vm2, %v2431_v50  ;;  %v808_v38 = vmul.f32 %v2399_v31, %v2594_v37  ;;  %v2375_v37 = vld [vmem:[%s2930_s10] sm:$0xff]  }
 0x151   : > { %v722_v27 = vmul.f32 %v1998_v26, %v715_v32  ;;  %v807_v42 = vmul.f32 %v2401_v19, %v2592_v36  ;;  %v896_v44 = vpack.c.bf16 %v830_v35, %v829_v40 }
 0x152   : > { %v820_v45 = vmul.f32 %v2000_v13, %v808_v38 }
 0x153   : > { %v729_v39 = vadd.f32 %v1999_v33, %v722_v27  ;;  %v819_v46 = vmul.f32 %v2000_v13, %v807_v42 }
 0x154   : > { %v832_v36 = vadd.f32 %v2001_v20, %v820_v45 }
 0x155   : > { %v833_v43 = vpack.c.bf16 %v729_v39, %v729_v39  ;;  %v831_v47 = vadd.f32 %v2001_v20, %v819_v46 }
 0x157   : > { %2112 = vmatmul.mubr.msk.bf16.vlgmr.msra.gmra.mxu0 %vm730_vm0, %v833_v43  ;;  %2124 = vmatmul.mubr.msk.bf16.gmra.mxu1 %vm730_vm0, %v896_v44  ;;  %v897_v48 = vpack.c.bf16 %v832_v36, %v831_v47 }
 0x158   : > { %2132 = vmatpush3.bf16.msra.mxu0 %v2374_v41  ;;  %2127 = vmatprep.mubr.msk.bf16.mxu1 %vm2432_vm2, %v2431_v50 }
 0x159   : > { %2133 = vmatprep.subr.bf16.mxu0 %v2431_v50  ;;  %2135 = vmatprep.mubr.msk.bf16.mxu0 %vm2432_vm2, %v2431_v50 }
 0x15c   : > { %2134 = vmatpush3.bf16.msra.mxu0 %v2375_v37 }
 0x15d   : > { %2157 = vmatprep.subr.bf16.mxu0 %v2431_v50 }
 0x15f   : > { %2136 = vmatmul.mubr.msk.bf16.vlgmr.msra.gmra.mxu0 %vm730_vm0, %v895_v29  ;;  %2128 = vmatmul.mubr.msk.bf16.gmra.mxu1 %vm730_vm0, %v897_v48 }
 0x160   : > { %2139 = vmatprep.mubr.msk.bf16.mxu0 %vm2432_vm2, %v2431_v50  ;;  %2153 = vmatprep.mubr.msk.bf16.mxu1 %vm2432_vm2, %v2431_v50 }
 0x167   : > { %2140 = vmatmul.mubr.msk.bf16.gmra.mxu0 %vm730_vm0, %v896_v44 }
 0x168   : > { %2143 = vmatprep.mubr.msk.bf16.mxu0 %vm2432_vm2, %v2431_v50 }
 0x16f   : > { %2144 = vmatmul.mubr.msk.bf16.gmra.mxu0 %vm730_vm0, %v897_v48 }
 0x170   : > { %2163 = vmatprep.mubr.msk.bf16.mxu0 %vm2432_vm2, %v2431_v50 }
 0x20f   : > { %v959_v49 = vpop.f32.mrf.mxu1 }
 0x210   : > { %v960_v5 = vadd.f32 %v2006_v59, %v959_v49 }
 0x211   : > { %v2121_v51 = vpop.f32.mrf.mxu1 }
 0x213   : > { %v962_v52 = vpop.f32.mrf.mxu1 }
 0x214   : > { %v2682_v1 = vadd.f32 %v2006_v59, %v962_v52 }
 0x215   : > { %v2122_v53 = vpop.f32.mrf.mxu1 }
 0x216   : > { %v2290_v10 = vpack.i.bf16 %v2682_v1, %v960_v5  ;;  %v1191_v43 = vpack.c.bf16 %v2682_v1, %v960_v5 }
 0x217   : > { %v889_v54 = vpop.f32.mrf.mxu0  ;;  %v967_v55 = vpop.f32.mrf.mxu1 }
 0x218   : > { %v968_v61 = vadd.f32 %v2006_v59, %v967_v55  ;;  %v890_v29 = vadd.f32 %v2002_v25, %v889_v54  ;;  %v1208_v37 = vsel %vm1203_vm3, %v1191_v43, 0 }
 0x219   : > { %v2113_v56 = vpop.f32.mrf.mxu0  ;;  %v2125_v57 = vpop.f32.mrf.mxu1 }
 0x21a   : > { %v1187_v46 = vpack.c.bf16 %v890_v29, %v890_v29 }
 0x21b   : > { %v892_v58 = vpop.f32.mrf.mxu0  ;;  %v970_v60 = vpop.f32.mrf.mxu1 }
 0x21c   : > { %v971_v62 = vadd.f32 %v2006_v59, %v970_v60 }
 0x21d   : > { %v2114_v63 = vpop.f32.mrf.mxu0  ;;  %v2126_v0 = vpop.f32.mrf.mxu1 }
 0x21e   : > { %v2285_v3 = vpack.i.bf16 %v971_v62, %v968_v61  ;;  %v1192_v33 = vpack.c.bf16 %v971_v62, %v968_v61 }
 0x21f   : > { %v1034_v2 = vpop.f32.mrf.mxu0  ;;  %v975_v4 = vpop.f32.mrf.mxu1 }
 0x220   : > { %2286 = vrot.lane.b32.xlu1 %v2285_v3, %s2433_s2  ;;  %v2689_v11 = vadd.f32 %v2012_v6, %v1034_v2  ;;  %v976_v14 = vadd.f32 %v2006_v59, %v975_v4  ;;  %v1211_v38 = vsel %vm1203_vm3, %v1192_v33, 0 }
 0x221   : > { %v2137_v7 = vpop.f32.mrf.mxu0  ;;  %v2129_v8 = vpop.f32.mrf.mxu1 }
 0x223   : > { %v1037_v9 = vpop.f32.mrf.mxu0  ;;  %v978_v12 = vpop.f32.mrf.mxu1 }
 0x224   : > { %v2691_v13 = vadd.f32 %v2012_v6, %v1037_v9  ;;  %v979_v15 = vadd.f32 %v2006_v59, %v978_v12  ;;  %2291 = vrot.lane.b32.xlu1 %v2290_v10, %s2433_s2 }
 0x225   : > { %v2138_v16 = vpop.f32.mrf.mxu0  ;;  %v2130_v17 = vpop.f32.mrf.mxu1 }
 0x226   : > { %v1465_v20 = vpack.c.bf16 %v2691_v13, %v2689_v11  ;;  %v2698_v21 = vpack.i.bf16 %v2691_v13, %v2689_v11  ;;  %v2295_v23 = vpack.i.bf16 %v979_v15, %v976_v14  ;;  %v1193_v24 = vpack.c.bf16 %v979_v15, %v976_v14 }
 0x227   : > { %v1042_v22 = vpop.f32.mrf.mxu0 }
 0x228   : > { %2296 = vrot.lane.b32.xlu1 %v2295_v23, %s2434_s27  ;;  %2281 = vrot.lane.b32.xlu0 %v2295_v23, %s2433_s2  ;;  %v1214_v28 = vsel %vm1203_vm3, %v1193_v24, 0  ;;  %v2707_v30 = vadd.f32 %v2012_v6, %v1042_v22 }
 0x229   : > { %v2141_v18 = vpop.f32.mrf.mxu0  ;;  %2148 = vmatpush3.bf16.xpose.msra.mxu1 %v1214_v28 }
 0x22a   : > { %2149 = vmatprep.subr.bf16.mxu1 %v2431_v50 }
 0x22b   : > { %v1045_v26 = vpop.f32.mrf.mxu0 }
 0x22c   : > { %v2709_v31 = vadd.f32 %v2012_v6, %v1045_v26  ;;  %1058 = vrot.lane.b32.xlu1 %v890_v29, %s2433_s2  ;;  %2301 = vrot.lane.b32.xlu0 %v2295_v23, %s2435_s28 }
 0x22d   : > { %v2142_v32 = vpop.f32.mrf.mxu0 }
 0x22e   : > { %v1466_v34 = vpack.c.bf16 %v2709_v31, %v2707_v30  ;;  %v2717_v19 = vpack.i.bf16 %v2709_v31, %v2707_v30 }
 0x22f   : > { %v1050_v27 = vpop.f32.mrf.mxu0 }
 0x230   : > { %2311 = vrot.lane.b32.xlu1 %v2285_v3, %s2435_s28  ;;  %2306 = vrot.lane.b32.xlu0 %v2285_v3, %s2434_s27  ;;  %v2723_v40 = vadd.f32 %v2012_v6, %v1050_v27 }
 0x231   : > { %v2145_v35 = vpop.f32.mrf.mxu0  ;;  %2150 = vmatpush3.bf16.xpose.msra.mxu1 %v1211_v38 }
 0x232   : > { %2151 = vmatprep.subr.bf16.mxu1 %v2431_v50 }
 0x233   : > { %v1053_v39 = vpop.f32.mrf.mxu0 }
 0x234   : > { %v2725_v41 = vadd.f32 %v2012_v6, %v1053_v39  ;;  %2321 = vrot.lane.b32.xlu1 %v2290_v10, %s2435_s28  ;;  %2316 = vrot.lane.b32.xlu0 %v2290_v10, %s2434_s27 }
 0x235   : > { %v2146_v42 = vpop.f32.mrf.mxu0 }
 0x236   : > { %v1467_v44 = vpack.c.bf16 %v2725_v41, %v2723_v40  ;;  %v2734_v45 = vpack.i.bf16 %v2725_v41, %v2723_v40 }
 0x238   : > { %1064 = vrot.lane.b32.xlu1 %v890_v29, %s2435_s28  ;;  %1061 = vrot.lane.b32.xlu0 %v890_v29, %s2434_s27 }
 0x239   : > { %2152 = vmatpush3.bf16.xpose.msra.mxu1 %v1208_v37 }
 0x23a   : > { %2167 = vmatprep.subr.bf16.mxu1 %v2431_v50 }
 0x240   : > { %2154 = vmatmul.mubr.msk.bf16.vlgmr.msra.gmra.mxu1 %vm1203_vm3, %v1187_v46 }
 0x241   : > { %2173 = vmatprep.mubr.msk.bf16.mxu1 %vm2432_vm2, %v2431_v50 }
 0x292   : > { %v2287_v36 = vpop.permute.xlu1 %2286 }
 0x293   : > { %v2289_v58 = vunpack.i.h.bf16 %v2287_v36  ;;  %v2288_v59 = vunpack.i.l.bf16 %v2287_v36 }
 0x295   : > { %v1195_v63 = vpack.c.bf16 %v2289_v58, %v2288_v59 }
 0x296   : > { %v2292_v47 = vpop.permute.xlu1 %2291 }
 0x297   : > { %v2294_v4 = vunpack.i.h.bf16 %v2292_v47  ;;  %v2293_v5 = vunpack.i.l.bf16 %v2292_v47  ;;  %v1263_v6 = vsel %vm1203_vm3, %v1195_v63, 0 }
 0x299   : > { %v1194_v10 = vpack.c.bf16 %v2294_v4, %v2293_v5 }
 0x29a   : > { %v2297_v48 = vpop.permute.xlu1 %2296  ;;  %v2282_v49 = vpop.permute.xlu0 %2281 }
 0x29b   : > { %v2299_v51 = vunpack.i.h.bf16 %v2297_v48  ;;  %v2298_v52 = vunpack.i.l.bf16 %v2297_v48  ;;  %v2284_v53 = vunpack.i.h.bf16 %v2282_v49  ;;  %v2283_v54 = vunpack.i.l.bf16 %v2282_v49 }
 0x29c   : > { %v1260_v17 = vsel %vm1203_vm3, %v1194_v10, 0 }
 0x29d   : > { %v1199_v55 = vpack.c.bf16 %v2299_v51, %v2298_v52  ;;  %v1196_v56 = vpack.c.bf16 %v2284_v53, %v2283_v54 }
 0x29e   : > { %v2302_v57 = vpop.permute.xlu0 %2301  ;;  %v1059_v14 = vpop.permute.xlu1 %1058 }
 0x29f   : > { %v1266_v60 = vsel %vm1203_vm3, %v1196_v56, 0  ;;  %v1318_v61 = vsel %vm1203_vm3, %v1199_v55, 0  ;;  %v2304_v15 = vunpack.i.h.bf16 %v2302_v57  ;;  %v2303_v16 = vunpack.i.l.bf16 %v2302_v57 }
 0x2a0   : > { %2158 = vmatpush3.bf16.xpose.msra.mxu0 %v1266_v60  ;;  %2168 = vmatpush3.bf16.xpose.msra.mxu1 %v1318_v61  ;;  %v1188_v18 = vpack.c.bf16 %v1059_v14, %v1059_v14 }
 0x2a1   : > { %2159 = vmatprep.subr.bf16.mxu0 %v2431_v50  ;;  %2169 = vmatprep.subr.bf16.mxu1 %v2431_v50  ;;  %v1202_v23 = vpack.c.bf16 %v2304_v15, %v2303_v16 }
 0x2a2   : > { %v2307_v62 = vpop.permute.xlu0 %2306  ;;  %v2312_v25 = vpop.permute.xlu1 %2311 }
 0x2a3   : > { %v2309_v0 = vunpack.i.h.bf16 %v2307_v62  ;;  %v2308_v1 = vunpack.i.l.bf16 %v2307_v62  ;;  %v2314_v29 = vunpack.i.h.bf16 %v2312_v25  ;;  %v2313_v26 = vunpack.i.l.bf16 %v2312_v25 }
 0x2a4   : > { %v1370_v32 = vsel %vm1203_vm3, %v1202_v23, 0 }
 0x2a5   : > { %v1198_v2 = vpack.c.bf16 %v2309_v0, %v2308_v1  ;;  %v1201_v33 = vpack.c.bf16 %v2314_v29, %v2313_v26 }
 0x2a6   : > { %v2317_v3 = vpop.permute.xlu0 %2316  ;;  %v2322_v27 = vpop.permute.xlu1 %2321 }
 0x2a7   : > { %v2319_v7 = vunpack.i.h.bf16 %v2317_v3  ;;  %v2318_v8 = vunpack.i.l.bf16 %v2317_v3  ;;  %v1315_v9 = vsel %vm1203_vm3, %v1198_v2, 0  ;;  %v2324_v35 = vunpack.i.h.bf16 %v2322_v27 }
 0x2a8   : > { %2160 = vmatpush3.bf16.xpose.msra.mxu0 %v1263_v6  ;;  %2170 = vmatpush3.bf16.xpose.msra.mxu1 %v1315_v9  ;;  %v2323_v38 = vunpack.i.l.bf16 %v2322_v27  ;;  %v1367_v39 = vsel %vm1203_vm3, %v1201_v33, 0 }
 0x2a9   : > { %2161 = vmatprep.subr.bf16.mxu0 %v2431_v50  ;;  %2171 = vmatprep.subr.bf16.mxu1 %v2431_v50  ;;  %v1197_v12 = vpack.c.bf16 %v2319_v7, %v2318_v8 }
 0x2aa   : > { %v1062_v24 = vpop.permute.xlu0 %1061  ;;  %v1200_v42 = vpack.c.bf16 %v2324_v35, %v2323_v38  ;;  %v1065_v37 = vpop.permute.xlu1 %1064 }
 0x2ab   : > { %v1312_v22 = vsel %vm1203_vm3, %v1197_v12, 0  ;;  %v1189_v28 = vpack.c.bf16 %v1062_v24, %v1062_v24  ;;  %v1190_v46 = vpack.c.bf16 %v1065_v37, %v1065_v37 }
 0x2ac   : > { %v1364_v43 = vsel %vm1203_vm3, %v1200_v42, 0 }
 0x2b0   : > { %2162 = vmatpush3.bf16.xpose.msra.mxu0 %v1260_v17  ;;  %2172 = vmatpush3.bf16.xpose.msra.mxu1 %v1312_v22 }
 0x2b1   : > { %2177 = vmatprep.subr.bf16.mxu0 %v2431_v50  ;;  %2207 = vmatprep.subr.bf16.mxu1 %v2431_v50 }
 0x2b7   : > { %2164 = vmatmul.mubr.msk.bf16.vlgmr.msra.gmra.mxu0 %vm1203_vm3, %v1188_v18  ;;  %2174 = vmatmul.mubr.msk.bf16.vlgmr.msra.gmra.mxu1 %vm1203_vm3, %v1189_v28 }
 0x2b8   : > { %2178 = vmatpush3.bf16.xpose.msra.mxu0 %v1370_v32  ;;  %2183 = vmatprep.mubr.msk.bf16.mxu0 %vm2432_vm2, %v2431_v50 }
 0x2b9   : > { %2179 = vmatprep.subr.bf16.mxu0 %v2431_v50  ;;  %2213 = vmatprep.mubr.msk.bf16.mxu1 %vm2432_vm2, %v2431_v50 }
 0x2c0   : > { %2180 = vmatpush3.bf16.xpose.msra.mxu0 %v1367_v39 }
 0x2c1   : > { %2181 = vmatprep.subr.bf16.mxu0 %v2431_v50 }
 0x2c8   : > { %2182 = vmatpush3.bf16.xpose.msra.mxu0 %v1364_v43 }
 0x2c9   : > { %2187 = vmatprep.subr.bf16.mxu0 %v2431_v50 }
 0x2cf   : > { %2184 = vmatmul.mubr.msk.bf16.vlgmr.msra.gmra.mxu0 %vm1203_vm3, %v1190_v46 }
 0x2d0   : > { %2188 = vmatpush3.bf16.msra.mxu0 %v1467_v44  ;;  %2193 = vmatprep.mubr.msk.bf16.mxu0 %vm2432_vm2, %v2431_v50 }
 0x2d1   : > { %2189 = vmatprep.subr.bf16.mxu0 %v2431_v50 }
 0x2d4   : > { %2190 = vmatpush3.bf16.msra.mxu0 %v1466_v34 }
 0x2d5   : > { %2191 = vmatprep.subr.bf16.mxu0 %v2431_v50 }
 0x2d8   : > { %2192 = vmatpush3.bf16.msra.mxu0 %v1465_v20 }
 0x2d9   : > { %2197 = vmatprep.subr.bf16.mxu0 %v2431_v50 }
 0x300   : > { %v1250_v36 = vpop.f32.mrf.mxu1 }
 0x301   : > { %v1412_v40 = vmul.f32 0.35355338, %v1250_v36 }
 0x302   : > { %v2155_v41 = vpop.f32.mrf.mxu1 }
 0x303   : > { %v1417_v44 = vsel %vm1416_vm4, %v1412_v40, -inf }
 0x304   : > { %1418 = vmax.xlane.f32.xlu0 %v1417_v44  ;;  %v1253_v47 = vpop.f32.mrf.mxu1 }
 0x306   : > { %v2156_v48 = vpop.f32.mrf.mxu1 }
 0x31a   : > { %2326 = vrot.lane.b32.xlu0 %v2734_v45, %s2433_s2 }
 0x377   : > { %v1302_v30 = vpop.f32.mrf.mxu0  ;;  %v1354_v34 = vpop.f32.mrf.mxu1 }
 0x378   : > { %v1413_v31 = vmul.f32 0.35355338, %v1302_v30  ;;  %v1414_v49 = vmul.f32 0.35355338, %v1354_v34 }
 0x379   : > { %v2165_v11 = vpop.f32.mrf.mxu0  ;;  %v2175_v13 = vpop.f32.mrf.mxu1 }
 0x37a   : > { %v1420_v20 = vsel %vm1416_vm4, %v1413_v31, -inf  ;;  %v1423_v52 = vsel %vm1416_vm4, %v1414_v49, -inf }
 0x37b   : > { %1421 = vmax.xlane.f32.xlu1 %v1420_v20  ;;  %v1305_v51 = vpop.f32.mrf.mxu0  ;;  %1424 = vmax.xlane.f32.xlu0 %v1423_v52  ;;  %v1357_v53 = vpop.f32.mrf.mxu1 }
 0x37d   : > { %v2166_v54 = vpop.f32.mrf.mxu0  ;;  %v2176_v55 = vpop.f32.mrf.mxu1 }
 0x38c   : > { %2331 = vrot.lane.b32.xlu1 %v2717_v19, %s2433_s2 }
 0x38d   : > { %v1419_v62 = vpop.xlane.xlu0 %1418 }
 0x38e   : > { %v1429_v63 = vsub.f32 %v1412_v40, %v1419_v62 }
 0x38f   : > { %v1406_v56 = vpop.f32.mrf.mxu0 }
 0x390   : > { %v1415_v57 = vmul.f32 0.35355338, %v1406_v56  ;;  %2336 = vrot.lane.b32.xlu1 %v2698_v21, %s2433_s2  ;;  %v1433_v0 = vmul.f32 1.442695, %v1429_v63  ;;  %s2438_s2 = smov 24  }
 0x391   : > { %v2185_v58 = vpop.f32.mrf.mxu0  ;;  %v2327_v3 = vpop.permute.xlu0 %2326 }
 0x392   : > { %v1426_v59 = vsel %vm1416_vm4, %v1415_v57, -inf  ;;  %2402 = vpow2.f32 %v1433_v0  ;;  %v2329_v42 = vunpack.i.h.bf16 %v2327_v3  ;;  %v2328_v43 = vunpack.i.l.bf16 %v2327_v3 }
 0x393   : > { %v1409_v60 = vpop.f32.mrf.mxu0  ;;  %1427 = vmax.xlane.f32.xlu0 %v1426_v59 }
 0x394   : > { %2341 = vrot.lane.b32.xlu1 %v2734_v45, %s2434_s27  ;;  %v1470_v36 = vpack.c.bf16 %v2329_v42, %v2328_v43  ;;  %v2026_v42 = vld [vmem:[%s2933_s13] ss:$0 sm:$0xff] }
 0x395   : > { %v2186_v61 = vpop.f32.mrf.mxu0 }
 0x398   : > { %2351 = vrot.lane.b32.xlu1 %v2717_v19, %s2434_s27 }
 0x39f   : > { %v2403_v1 = vpop.eup %2402 }
 0x3a0   : > { %v1441_v2 = vsel %vm1416_vm4, %v2403_v1, 0.0 }
 0x3a9   : > { %2346 = vrot.lane.b32.xlu0 %v2734_v45, %s2435_s28 }
 0x3c8   : > { %1442 = vadd.xlane.f32.xlu0 %v1441_v2 }
 0x3de   : > { %2356 = vrot.lane.b32.xlu0 %v2717_v19, %s2435_s28 }
 0x404   : > { %v1422_v4 = vpop.xlane.xlu1 %1421  ;;  %v1425_v6 = vpop.xlane.xlu0 %1424 }
 0x405   : > { %v1430_v5 = vsub.f32 %v1413_v31, %v1422_v4  ;;  %v1431_v7 = vsub.f32 %v1414_v49, %v1425_v6 }
 0x407   : > { %v1435_v8 = vmul.f32 1.442695, %v1430_v5  ;;  %v1437_v9 = vmul.f32 1.442695, %v1431_v7 }
 0x408   : > { %v2332_v10 = vpop.permute.xlu1 %2331 }
 0x409   : > { %2404 = vpow2.f32 %v1435_v8  ;;  %v2334_v40 = vunpack.i.h.bf16 %v2332_v10  ;;  %v2333_v41 = vunpack.i.l.bf16 %v2332_v10 }
 0x40a   : > { %2406 = vpow2.f32 %v1437_v9 }
 0x40c   : > { %v2337_v45 = vpop.permute.xlu1 %2336 }
 0x40d   : > { %v2339_v44 = vunpack.i.h.bf16 %v2337_v45  ;;  %v2338_v47 = vunpack.i.l.bf16 %v2337_v45 }
 0x40f   : > { %v1468_v48 = vpack.c.bf16 %v2339_v44, %v2338_v47 }
 0x410   : > { %v2342_v12 = vpop.permute.xlu1 %2341 }
 0x411   : > { %v2344_v14 = vunpack.i.h.bf16 %v2342_v12  ;;  %v2343_v15 = vunpack.i.l.bf16 %v2342_v12 }
 0x413   : > { %v1473_v16 = vpack.c.bf16 %v2344_v14, %v2343_v15  ;;  %v2376_v15 = vld [vmem:[%s2932_s12 + $0x8] sm:$0xff]  }
 0x414   : > { %v2352_v17 = vpop.permute.xlu1 %2351 }
 0x415   : > { %v2354_v22 = vunpack.i.h.bf16 %v2352_v17  ;;  %v2353_v23 = vunpack.i.l.bf16 %v2352_v17  ;;  %2208 = vmatpush3.bf16.msra.mxu1 %v1473_v16  ;;  %v2377_v17 = vld [vmem:[%s2932_s12] sm:$0xff]  }
 0x416   : > { %v2405_v19 = vpop.eup %2404  ;;  %2209 = vmatprep.subr.bf16.mxu1 %v2431_v50 }
 0x417   : > { %v2802_v24 = vpop.eup %2406  ;;  %v1472_v25 = vpack.c.bf16 %v2354_v22, %v2353_v23  ;;  %v1444_v18 = vsel %vm1416_vm4, %v2405_v19, 0.0 }
 0x418   : > { %1445 = vadd.xlane.f32.xlu1 %v1444_v18  ;;  %v1447_v28 = vsel %vm1416_vm4, %v2802_v24, 0.0 }
 0x419   : > { %1448 = vadd.xlane.f32.xlu0 %v1447_v28  ;;  %2210 = vmatpush3.bf16.msra.mxu1 %v1472_v25 }
 0x41a   : > { %2211 = vmatprep.subr.bf16.mxu1 %v2431_v50 }
 0x41c   : > { %v1428_v29 = vpop.xlane.xlu0 %1427 }
 0x41d   : > { %v1432_v26 = vsub.f32 %v1415_v57, %v1428_v29 }
 0x41f   : > { %v1439_v32 = vmul.f32 1.442695, %v1432_v26 }
 0x420   : > { %v2347_v35 = vpop.permute.xlu0 %2346 }
 0x421   : > { %2408 = vpow2.f32 %v1439_v32  ;;  %v2349_v11 = vunpack.i.h.bf16 %v2347_v35  ;;  %v2348_v13 = vunpack.i.l.bf16 %v2347_v35 }
 0x423   : > { %v1476_v52 = vpack.c.bf16 %v2349_v11, %v2348_v13  ;;  %v2379_v11 = vld [vmem:[%s2936_s16] sm:$0xff]  }
 0x42e   : > { %v2808_v33 = vpop.eup %2408 }
 0x42f   : > { %2366 = vrot.lane.b32.xlu0 %v2698_v21, %s2435_s28  ;;  %v1450_v27 = vsel %vm1416_vm4, %v2808_v33, 0.0 }
 0x430   : > { %1451 = vadd.xlane.f32.xlu1 %v1450_v27 }
 0x441   : > { %2361 = vrot.lane.b32.xlu1 %v2698_v21, %s2434_s27  ;;  %v1469_v21 = vpack.c.bf16 %v2334_v40, %v2333_v41 }
 0x451   : > { %v1443_v38 = vpop.xlane.xlu0 %1442 }
 0x452   : > { %2410 = vrcp.f32 %v1443_v38 }
 0x455   : > { %v2357_v31 = vpop.permute.xlu0 %2356 }
 0x456   : > { %v2359_v53 = vunpack.i.h.bf16 %v2357_v31  ;;  %v2358_v54 = vunpack.i.l.bf16 %v2357_v31 }
 0x458   : > { %v1475_v56 = vpack.c.bf16 %v2359_v53, %v2358_v54  ;;  %v2030_v53 = vld [vmem:[%s2934_s14] ss:$0 sm:$0xff] }
 0x45f   : > { %v2411_v39 = vpop.eup %2410 }
 0x460   : > { %v1457_v37 = vmul.f32 %v2411_v39, %v2403_v1 }
 0x462   : > { %v1461_v46 = vpack.c.bf16 %v1457_v37, %v1457_v37 }
 0x464   : > { %2194 = vmatmul.mubr.msk.bf16.vlgmr.msra.gmra.mxu0 %vm1477_vm5, %v1461_v46 }
 0x465   : > { %2198 = vmatpush3.bf16.msra.mxu0 %v1470_v36  ;;  %2203 = vmatprep.mubr.msk.bf16.mxu0 %vm2432_vm2, %v2431_v50  ;;  %v2422_v36 = vld [vmem:[%s2570_s29] sm:$0xf] }
 0x466   : > { %2199 = vmatprep.subr.bf16.mxu0 %v2431_v50 }
 0x469   : > { %2200 = vmatpush3.bf16.msra.mxu0 %v1469_v21 }
 0x46a   : > { %2201 = vmatprep.subr.bf16.mxu0 %v2431_v50 }
 0x46d   : > { %2202 = vmatpush3.bf16.msra.mxu0 %v1468_v48 }
 0x46e   : > { %2217 = vmatprep.subr.bf16.mxu0 %v2431_v50 }
 0x4a1   : > { %v1446_v30 = vpop.xlane.xlu1 %1445 }
 0x4a2   : > { %2412 = vrcp.f32 %v1446_v30  ;;  %v1449_v34 = vpop.xlane.xlu0 %1448 }
 0x4a3   : > { %2414 = vrcp.f32 %v1449_v34 }
 0x4a6   : > { %v2367_v55 = vpop.permute.xlu0 %2366 }
 0x4a7   : > { %v2369_v57 = vunpack.i.h.bf16 %v2367_v55  ;;  %v2368_v58 = vunpack.i.l.bf16 %v2367_v55  ;;  %v2031_v55 = vld [vmem:[%s2935_s15] ss:$0 sm:$0xff] }
 0x4a9   : > { %v1474_v60 = vpack.c.bf16 %v2369_v57, %v2368_v58 }
 0x4af   : > { %v2413_v49 = vpop.eup %2412 }
 0x4b0   : > { %v1458_v20 = vmul.f32 %v2413_v49, %v2405_v19  ;;  %v2415_v61 = vpop.eup %2414  ;;  %v2378_v49 = vld [vmem:[%s2936_s16 + $0x8] sm:$0xff]  }
 0x4b1   : > { %v1459_v1 = vmul.f32 %v2415_v61, %v2802_v24  ;;  %v2382_v61 = vld [vmem:[%s2938_s18 + $0x28] sm:$0xff]  }
 0x4b2   : > { %v1462_v51 = vpack.c.bf16 %v1458_v20, %v1458_v20 }
 0x4b3   : > { %v1463_v3 = vpack.c.bf16 %v1459_v1, %v1459_v1  ;;  %v2386_v1 = vld [vmem:[%s2938_s18 + $0x8] sm:$0xff]  }
 0x4b4   : > { %2204 = vmatmul.mubr.msk.bf16.vlgmr.msra.gmra.mxu0 %vm1477_vm5, %v1462_v51 }
 0x4b5   : > { %2218 = vmatpush3.bf16.msra.mxu0 %v1476_v52  ;;  %2223 = vmatprep.mubr.msk.bf16.mxu0 %vm2432_vm2, %v2431_v50 }
 0x4b6   : > { %2219 = vmatprep.subr.bf16.mxu0 %v2431_v50 }
 0x4b9   : > { %2220 = vmatpush3.bf16.msra.mxu0 %v1475_v56  ;;  %v1452_v59 = vpop.xlane.xlu1 %1451 }
 0x4ba   : > { %2416 = vrcp.f32 %v1452_v59  ;;  %2221 = vmatprep.subr.bf16.mxu0 %v2431_v50  ;;  %v2380_v59 = vld [vmem:[%s2938_s18 + $0x38] sm:$0xff]  }
 0x4bd   : > { %2222 = vmatpush3.bf16.msra.mxu0 %v1474_v60  ;;  %v2362_v62 = vpop.permute.xlu1 %2361  ;;  %v2381_v60 = vld [vmem:[%s2938_s18 + $0x30] sm:$0xff]  }
 0x4be   : > { %v2364_v63 = vunpack.i.h.bf16 %v2362_v62  ;;  %v2363_v0 = vunpack.i.l.bf16 %v2362_v62  ;;  %2235 = vmatprep.subr.bf16.mxu0 %v2431_v50  ;;  %v2383_v62 = vld [vmem:[%s2938_s18 + $0x20] sm:$0xff]  }
 0x4c0   : > { %v1471_v2 = vpack.c.bf16 %v2364_v63, %v2363_v0  ;;  %v2384_v63 = vld [vmem:[%s2938_s18 + $0x18] sm:$0xff]   ;;  %v2385_v0 = vld [vmem:[%s2938_s18 + $0x10] sm:$0xff]  }
 0x4c2   : > { %2212 = vmatpush3.bf16.msra.mxu1 %v1471_v2  ;;  %v2387_v2 = vld [vmem:[%s2938_s18] sm:$0xff]  }
 0x4c3   : > { %2227 = vmatprep.subr.bf16.mxu1 %v2431_v50 }
 0x4c5   : > { %2214 = vmatmul.mubr.msk.bf16.vlgmr.msra.gmra.mxu1 %vm1477_vm5, %v1463_v3  ;;  %v2032_v3 = vld [vmem:[%s2937_s17] ss:$0 sm:$0xff] }
 0x4c6   : > { %2231 = vmatprep.mubr.msk.bf16.mxu1 %vm2432_vm2, %v2431_v50  ;;  %2228 = vmatpush3.bf16.msra.mxu1 %v2376_v15 }
 0x4c7   : > { %v2417_v4 = vpop.eup %2416  ;;  %2229 = vmatprep.subr.bf16.mxu1 %v2431_v50 }
 0x4c8   : > { %v1460_v5 = vmul.f32 %v2417_v4, %v2808_v33 }
 0x4ca   : > { %v1464_v6 = vpack.c.bf16 %v1460_v5, %v1460_v5  ;;  %2230 = vmatpush3.bf16.msra.mxu1 %v2377_v17 }
 0x4cb   : > { %2243 = vmatprep.subr.bf16.mxu1 %v2431_v50 }
 0x4cc   : > { %2224 = vmatmul.mubr.msk.bf16.vlgmr.msra.gmra.mxu0 %vm1477_vm5, %v1464_v6 }
 0x4cd   : > { %2239 = vmatprep.mubr.msk.bf16.mxu0 %vm2432_vm2, %v2431_v50  ;;  %2236 = vmatpush3.bf16.msra.mxu0 %v2378_v49 }
 0x4ce   : > { %2237 = vmatprep.subr.bf16.mxu0 %v2431_v50 }
 0x4d1   : > { %2238 = vmatpush3.bf16.msra.mxu0 %v2379_v11 }
 0x524   : > { %v1515_v7 = vpop.f32.mrf.mxu0 }
 0x526   : > { %v2195_v8 = vpop.f32.mrf.mxu0 }
 0x528   : > { %v1518_v9 = vpop.f32.mrf.mxu0 }
 0x52a   : > { %v2196_v10 = vpop.f32.mrf.mxu0 }
 0x574   : > { %v1558_v45 = vpop.f32.mrf.mxu0 }
 0x575   : > { %1651 = vrot.lane.b32.xlu1 %v1558_v45, %s2436_s4 }
 0x576   : > { %v2205_v12 = vpop.f32.mrf.mxu0 }
 0x578   : > { %v1561_v14 = vpop.f32.mrf.mxu0 }
 0x57a   : > { %v2206_v16 = vpop.f32.mrf.mxu0 }
 0x585   : > { %v1601_v22 = vpop.f32.mrf.mxu1 }
 0x586   : > { %1655 = vrot.lane.b32.xlu0 %v1601_v22, %s2437_s24 }
 0x587   : > { %v2215_v23 = vpop.f32.mrf.mxu1 }
 0x588   : > { %v2036_v23 = vld [vmem:[%s2939_s19] ss:$0 sm:$0xff] }
 0x589   : > { %v1604_v19 = vpop.f32.mrf.mxu1 }
 0x58b   : > { %v2216_v24 = vpop.f32.mrf.mxu1 }
 0x58c   : > { %v1644_v25 = vpop.f32.mrf.mxu0 }
 0x58d   : > { %1659 = vrot.lane.b32.xlu1 %v1644_v25, %s2438_s2 }
 0x58e   : > { %v2225_v18 = vpop.f32.mrf.mxu0 }
 0x590   : > { %v1647_v28 = vpop.f32.mrf.mxu0 }
 0x592   : > { %v2226_v29 = vpop.f32.mrf.mxu0 }
 0x5e7   : > { %v1652_v26 = vpop.permute.xlu1 %1651 }
 0x5e8   : > { %v1662_v33 = vsel %vm1203_vm3, %v1515_v7, %v1652_v26 }
 0x5f8   : > { %v1656_v32 = vpop.permute.xlu0 %1655 }
 0x5f9   : > { %v1664_v27 = vsel %vm1663_vm6, %v1662_v33, %v1656_v32 }
 0x5ff   : > { %v1660_v35 = vpop.permute.xlu1 %1659 }
 0x600   : > { %v1666_v38 = vsel %vm1665_vm7, %v1664_v27, %v1660_v35 }
 0x601   : > { %v1667_v39 = vpack.c.bf16 %v1666_v38, %v1666_v38 }
 0x603   : > { %2232 = vmatmul.mubr.msk.bf16.vlgmr.msra.gmra.mxu1 %vm730_vm0, %v1667_v39 }
 0x604   : > { %2259 = vmatprep.mubr.msk.bf16.mxu1 %vm2432_vm2, %v2431_v50  ;;  %2244 = vmatpush3.bf16.msra.mxu1 %v2380_v59 }
 0x605   : > { %2245 = vmatprep.subr.bf16.mxu1 %v2431_v50 }
 0x608   : > { %2246 = vmatpush3.bf16.msra.mxu1 %v2381_v60 }
 0x609   : > { %2247 = vmatprep.subr.bf16.mxu1 %v2431_v50 }
 0x60c   : > { %2248 = vmatpush3.bf16.msra.mxu1 %v2382_v61 }
 0x60d   : > { %2249 = vmatprep.subr.bf16.mxu1 %v2431_v50 }
 0x610   : > { %2250 = vmatpush3.bf16.msra.mxu1 %v2383_v62 }
 0x611   : > { %2251 = vmatprep.subr.bf16.mxu1 %v2431_v50 }
 0x614   : > { %2252 = vmatpush3.bf16.msra.mxu1 %v2384_v63 }
 0x615   : > { %2253 = vmatprep.subr.bf16.mxu1 %v2431_v50 }
 0x618   : > { %2254 = vmatpush3.bf16.msra.mxu1 %v2385_v0 }
 0x619   : > { %2255 = vmatprep.subr.bf16.mxu1 %v2431_v50 }
 0x61c   : > { %2256 = vmatpush3.bf16.msra.mxu1 %v2386_v1 }
 0x61d   : > { %2257 = vmatprep.subr.bf16.mxu1 %v2431_v50 }
 0x620   : > { %2258 = vmatpush3.bf16.msra.mxu1 %v2387_v2 }
 0x6c3   : > { %v1723_v43 = vpop.f32.mrf.mxu1 }
 0x6c4   : > { %v1724_v37 = vadd.f32 %v2026_v42, %v1723_v43 }
 0x6c5   : > { %v2233_v46 = vpop.f32.mrf.mxu1 }
 0x6c6   : > { %v2853_v40 = vadd.f32 %v2422_v36, %v1724_v37 }
 0x6c7   : > { %v1726_v41 = vpop.f32.mrf.mxu1 }
 0x6c8   : > { %v1730_v21 = vsel %vm701_vm1, %v2853_v40, 0.0 }
 0x6c9   : > { %1731 = vadd.xlane.f32.xlu0 %v1730_v21  ;;  %v2234_v44 = vpop.f32.mrf.mxu1 }
 0x752   : > { %v1732_v47 = vpop.xlane.xlu0 %1731 }
 0x753   : > { %v1733_v48 = vmul.f32 0.03125, %v1732_v47 }
 0x755   : > { %v1734_v30 = vsub.f32 %v2853_v40, %v1733_v48 }
 0x757   : > { %v1735_v31 = vmul.f32 %v1734_v30, %v1734_v30 }
 0x759   : > { %v1736_v34 = vsel %vm701_vm1, %v1735_v31, 0.0 }
 0x75a   : > { %1737 = vadd.xlane.f32.xlu1 %v1736_v34 }
 0x7e3   : > { %v1738_v13 = vpop.xlane.xlu1 %1737 }
 0x7e4   : > { %v1739_v20 = vmul.f32 0.03125, %v1738_v13 }
 0x7e6   : > { %v1740_v51 = vadd.f32 1e-05, %v1739_v20 }
 0x7e8   : > { %2418 = vrsqrt.f32 %v1740_v51 }
 0x7f5   : > { %v2419_v52 = vpop.eup %2418 }
 0x7f6   : > { %v1742_v54 = vmul.f32 %v2419_v52, %v1734_v30 }
 0x7f8   : > { %v1749_v56 = vmul.f32 %v2030_v53, %v1742_v54 }
 0x7fa   : > { %v1756_v57 = vadd.f32 %v2031_v55, %v1749_v56 }
 0x7fc   : > { %v1757_v58 = vpack.c.bf16 %v1756_v57, %v1756_v57 }
 0x7fe   : > { %2240 = vmatmul.mubr.msk.bf16.vlgmr.msra.gmra.mxu0 %vm730_vm0, %v1757_v58 }
 0x8be   : > { %v1813_v4 = vpop.f32.mrf.mxu0 }
 0x8bf   : > { %v1814_v5 = vadd.f32 %v2032_v3, %v1813_v4 }
 0x8c0   : > { %v2241_v6 = vpop.f32.mrf.mxu0 }
 0x8c1   : > { %v1819_v7 = vmul.f32 %v1814_v5, %v1814_v5 }
 0x8c2   : > { %v1816_v8 = vpop.f32.mrf.mxu0 }
 0x8c3   : > { %v1820_v9 = vmul.f32 %v1819_v7, %v1814_v5 }
 0x8c4   : > { %v2242_v10 = vpop.f32.mrf.mxu0 }
 0x8c5   : > { %v1821_v45 = vmul.f32 0.044715, %v1820_v9 }
 0x8c7   : > { %v1822_v12 = vadd.f32 %v1821_v45, %v1814_v5 }
 0x8c9   : > { %v1823_v14 = vmul.f32 0.7978846, %v1822_v12 }
 0x8cb   : > { %2420 = vtanh.f32 %v1823_v14 }
 0x8d8   : > { %v2421_v15 = vpop.eup %2420 }
 0x8d9   : > { %v1825_v16 = vadd.f32 1.0, %v2421_v15 }
 0x8db   : > { %v1826_v50 = vmul.f32 0.5, %v1825_v16 }
 0x8dd   : > { %v1827_v17 = vmul.f32 %v1826_v50, %v1814_v5 }
 0x8df   : > { %v1828_v22 = vpack.c.bf16 %v1827_v17, %v1827_v17 }
 0x8e1   : > { %2260 = vmatmul.mubr.bf16.vlgmr.msra.gmra.mxu1 %v1828_v22 }
 0x9a1   : > { %v1917_v19 = vpop.f32.mrf.mxu1 }
 0x9a2   : > { %v1918_v24 = vadd.f32 %v2036_v23, %v1917_v19 }
 0x9a3   : > { %v2261_v25 = vpop.f32.mrf.mxu1 }
 0x9a4   : > { %v1923_v18 = vadd.f32 %v1918_v24, %v2853_v40 }
 0x9a5   : > { %v1920_v28 = vpop.f32.mrf.mxu1 }
 0x9a6   : > { %1924 = vst.msk [vmem:[%s644_s21] sm:$0xf] %vm701_vm1, %v1923_v18 }
 0x9a7   : > { %v2262_v29 = vpop.f32.mrf.mxu1 }
 0x9a8 PF: > { %s30_s1 = sadd.s32 1, %s2429_s1  }
 0x9a9   : > { %p27_p4 = scmp.ge.s32.totalorder %s30_s1, 4  }
 0x9ab   :  { %29 = sbr.rel (!%p27_p4) target bundleno = 6 (0x6), region = 133 }

</bundles_post_ra>
